<compile_context>
chip_gen: v7x
topology: tpu7x:2x2x1
jax: 0.10.0
libtpu: 0.0.40
codegen_flags: <defaults>
</compile_context>

<pallas_src>
import functools
import itertools

import jax
import jax.numpy as jnp
from jax import lax
from jax.experimental import pallas as pl
from jax.experimental.pallas import tpu as pltpu

EPS = 1e-5
LANE = 128
TAPS = tuple(itertools.product(range(3), range(3)))  # (dh, dw); t = 3*dh + dw
CENTER = 4                                            # tap (1, 1)


def _round_up(x, m):
    return (x + m - 1) // m * m


def _pick_tn(N, H, W):
    """Images per grid step.

    Keeps TM = TN*H*W <= 4096 rows (sized for v7x's 64 MiB/TC VMEM with
    double buffering) while preferring >= 2 grid steps (megacore sharding).
    """
    # TODO(synk): for feature maps with H*W > 4096 pixels, add H-row halo
    # tiling inside an image; ResNet-CIFAR maxes out at 32*32 = 1024 so whole
    # images always fit a tile here.
    tn = 1
    for cand in range(1, N + 1):
        if N % cand == 0 and cand * H * W <= 4096 and (N // cand >= 2 or N == 1):
            tn = cand
    return tn


def _compiler_params(est_bytes):
    return pltpu.CompilerParams(
        dimension_semantics=("parallel",),
        vmem_limit_bytes=int(min(112 << 20, max(est_bytes, 16 << 20))),
    )


def _conv1_kernel(xpad_ref, w1_ref, y1_ref, stats1_ref, *, TN, H, W, Cp):
    # xpad_ref : (TN, H+2, Wpad, Cp) bf16  spatially + channel padded NHWC tile
    # w1_ref   : (9, Cp, Cp) bf16          per-tap conv1 weights (VMEM-resident)
    # y1_ref   : (TM, Cp) f32              conv1 output tile (pre-BN)
    # stats1_ref: (1, 8, Cp) f32           row 0 = partial sum, row 1 = partial sum of squares
    TM = TN * H * W
    acc = None
    for t, (dh, dw) in enumerate(TAPS):
        patch = xpad_ref[:, dh:dh + H, dw:dw + W, :].reshape(TM, Cp)
        part = jnp.dot(patch, w1_ref[t], preferred_element_type=jnp.float32)
        acc = part if acc is None else acc + part
    y1_ref[...] = acc
    s = jnp.sum(acc, axis=0, keepdims=True)
    ss = jnp.sum(acc * acc, axis=0, keepdims=True)
    stats1_ref[...] = jnp.concatenate(
        [s, ss, jnp.zeros((6, Cp), jnp.float32)], axis=0)[None]


def _conv2_kernel(y1_ref, sc1_ref, bi1_ref, w2_ref, y2_ref, stats2_ref, pbuf_ref,
                  *, TN, H, W, Cp, Wpad):
    # y1_ref   : (TM, Cp) f32   conv1 output tile
    # sc1/bi1  : (1, Cp) f32    fused BN1 scale / bias (resident)
    # w2_ref   : (9, Cp, Cp) bf16 per-tap conv2 weights (resident)
    # y2_ref   : (TM, Cp) f32   conv2 output tile (pre-BN)
    # stats2_ref: (1, 8, Cp) f32 partial sum / sum-of-squares
    # pbuf_ref : (TN, H+2, Wpad, Cp) bf16 padded intermediate scratch
    TM = TN * H * W
    Hp = H + 2

    # bn1 (fused scale/bias) + relu, cast once to bf16 for the MXU.
    a1 = jnp.maximum(y1_ref[...] * sc1_ref[...] + bi1_ref[...], 0.0)
    a1b = a1.astype(jnp.bfloat16)

    # Zero only the 1-pixel border that conv2's shifted taps actually read.
    # Re-done every step: cheap, and stays correct when the "parallel" grid is
    # sharded across TensorCores (unlike a program_id==0 one-time init).
    zrow = jnp.zeros((TN, 1, Wpad, Cp), jnp.bfloat16)
    zcol = jnp.zeros((TN, H, 1, Cp), jnp.bfloat16)
    pbuf_ref[:, 0:1, :, :] = zrow
    pbuf_ref[:, Hp - 1:Hp, :, :] = zrow
    pbuf_ref[:, 1:H + 1, 0:1, :] = zcol
    pbuf_ref[:, 1:H + 1, W + 1:W + 2, :] = zcol
    pbuf_ref[:, 1:H + 1, 1:W + 1, :] = a1b.reshape(TN, H, W, Cp)

    # conv2: per-tap shifted matmul-accumulate; center tap straight from a1b
    # (saves one full read of the intermediate slab from VMEM).
    acc = jnp.dot(a1b, w2_ref[CENTER], preferred_element_type=jnp.float32)
    for t, (dh, dw) in enumerate(TAPS):
        if t == CENTER:
            continue
        patch = pbuf_ref[:, dh:dh + H, dw:dw + W, :].reshape(TM, Cp)
        acc = acc + jnp.dot(patch, w2_ref[t], preferred_element_type=jnp.float32)

    y2_ref[...] = acc
    s = jnp.sum(acc, axis=0, keepdims=True)
    ss = jnp.sum(acc * acc, axis=0, keepdims=True)
    stats2_ref[...] = jnp.concatenate(
        [s, ss, jnp.zeros((6, Cp), jnp.float32)], axis=0)[None]


def _epilogue_kernel(y2_ref, sc2_ref, bi2_ref, id_ref, out_ref):
    # bn2 (fused scale/bias) + residual add (f32 identity) + relu, one pass.
    out_ref[...] = jnp.maximum(
        y2_ref[...] * sc2_ref[...] + bi2_ref[...] + id_ref[...], 0.0)


@jax.jit
def basic_block_forward(x_nchw, w1_oihw, g1, b1, w2_oihw, g2, b2):
    """x_nchw: (N, Cin, H, W) f32. Returns (N, C, H, W) f32."""
    N, Cin, H, W = x_nchw.shape
    C = w1_oihw.shape[0]
    assert Cin == C, "stride=1 / downsample=None requires inplanes == planes"
    Cp = _round_up(max(Cin, C), LANE)
    Hp = H + 2
    Wpad = _round_up(W + 2, 16)          # bf16 sublane packing: multiples of 16
    TN = _pick_tn(N, H, W)
    nt = N // TN
    TM = TN * H * W
    M = N * H * W
    f32 = jnp.float32

    # ---- layout plumbing in XLA (outside the kernels) ----
    x_nhwc = jnp.transpose(x_nchw, (0, 2, 3, 1)).astype(f32)
    x_nhwc = jnp.pad(x_nhwc, ((0, 0), (0, 0), (0, 0), (0, Cp - Cin)))
    ident = x_nhwc.reshape(M, Cp)                                   # residual, lane-dense f32
    xpad = jnp.pad(x_nhwc, ((0, 0), (1, 1), (1, Wpad - W - 1), (0, 0))
                   ).astype(jnp.bfloat16)                           # (N, Hp, Wpad, Cp)

    def prep_w(w_oihw):
        # OIHW -> (tap, Cin, Cout), channel-padded, bf16 for the MXU.
        w = jnp.transpose(w_oihw, (2, 3, 1, 0)).astype(f32)         # (3,3,I,O)
        w = jnp.pad(w, ((0, 0), (0, 0), (0, Cp - w.shape[2]), (0, Cp - w.shape[3])))
        return w.reshape(9, Cp, Cp).astype(jnp.bfloat16)

    def prep_gb(g, b):
        gp = jnp.pad(g.astype(f32), (0, Cp - g.shape[0]), constant_values=1.0)
        bp = jnp.pad(b.astype(f32), (0, Cp - b.shape[0]))
        return gp, bp

    w1f, w2f = prep_w(w1_oihw), prep_w(w2_oihw)
    g1p, b1p = prep_gb(g1, b1)
    g2p, b2p = prep_gb(g2, b2)

    def finalize_bn(stats, gamma, beta):
        # stats: (nt, 8, Cp); row 0 = partial sums, row 1 = partial sums of squares.
        total = jnp.sum(stats[:, 0, :], axis=0)
        total_sq = jnp.sum(stats[:, 1, :], axis=0)
        mean = total / M
        var = jnp.maximum(total_sq / M - mean * mean, 0.0)
        scale = gamma * lax.rsqrt(var + EPS)
        bias = beta - mean * scale
        return scale.reshape(1, Cp), bias.reshape(1, Cp)

    def res_spec(shape):                  # VMEM-resident across grid steps
        return pl.BlockSpec(shape, lambda i: (0,) * len(shape))

    row_spec = pl.BlockSpec((TM, Cp), lambda i: (i, 0))
    stats_spec = pl.BlockSpec((1, 8, Cp), lambda i: (i, 0, 0))
    stats_shape = jax.ShapeDtypeStruct((nt, 8, Cp), f32)

    # ---- kernel 1: conv1 + BN1 partial stats ----
    est_a = (2 * (TN * Hp * Wpad * Cp * 2 + TM * Cp * 4) + 9 * Cp * Cp * 2
             + 3 * TM * Cp * 4 + (4 << 20))
    y1, stats1 = pl.pallas_call(
        functools.partial(_conv1_kernel, TN=TN, H=H, W=W, Cp=Cp),
        grid=(nt,),
        in_specs=[pl.BlockSpec((TN, Hp, Wpad, Cp), lambda i: (i, 0, 0, 0)),
                  res_spec((9, Cp, Cp))],
        out_specs=(row_spec, stats_spec),
        out_shape=(jax.ShapeDtypeStruct((M, Cp), f32), stats_shape),
        compiler_params=_compiler_params(est_a),
    )(xpad, w1f)

    sc1, bi1 = finalize_bn(stats1, g1p, b1p)

    # ---- kernel 2: bn1+relu (fused) -> conv2 + BN2 partial stats ----
    est_b = (2 * (2 * TM * Cp * 4) + 9 * Cp * Cp * 2 + TN * Hp * Wpad * Cp * 2
             + 3 * TM * Cp * 4 + (4 << 20))
    y2, stats2 = pl.pallas_call(
        functools.partial(_conv2_kernel, TN=TN, H=H, W=W, Cp=Cp, Wpad=Wpad),
        grid=(nt,),
        in_specs=[row_spec, res_spec((1, Cp)), res_spec((1, Cp)), res_spec((9, Cp, Cp))],
        out_specs=(row_spec, stats_spec),
        out_shape=(jax.ShapeDtypeStruct((M, Cp), f32), stats_shape),
        scratch_shapes=[pltpu.VMEM((TN, Hp, Wpad, Cp), jnp.bfloat16)],
        compiler_params=_compiler_params(est_b),
    )(y1, sc1, bi1, w2f)

    sc2, bi2 = finalize_bn(stats2, g2p, b2p)

    # ---- kernel 3: bn2 (fused) + residual add + relu ----
    est_c = 2 * (3 * TM * Cp * 4) + (4 << 20)
    out_flat = pl.pallas_call(
        _epilogue_kernel,
        grid=(nt,),
        in_specs=[row_spec, res_spec((1, Cp)), res_spec((1, Cp)), row_spec],
        out_specs=row_spec,
        out_shape=jax.ShapeDtypeStruct((M, Cp), f32),
        compiler_params=_compiler_params(est_c),
    )(y2, sc2, bi2, ident)

    out_nhwc = out_flat.reshape(N, H, W, Cp)[..., :C]
    return jnp.transpose(out_nhwc, (0, 3, 1, 2))


def _reference(x, w1, g1, b1, w2, g2, b2, mirror_bf16_matmul=False):
    """Pure-JAX reference mirroring the PyTorch forward (training-mode BN).

    With mirror_bf16_matmul=True the conv inputs/weights are rounded to bf16
    (then the conv runs in f32), mirroring the kernel's bf16-MXU / f32-acc path.
    """
    q = (lambda a: a.astype(jnp.bfloat16).astype(jnp.float32)) if mirror_bf16_matmul \
        else (lambda a: a)

    def conv(x_, w_):
        return lax.conv_general_dilated(
            q(x_), q(w_), window_strides=(1, 1), padding=((1, 1), (1, 1)),
            dimension_numbers=('NCHW', 'OIHW', 'NCHW'))

    def bn(x_, g_, b_):
        mean = jnp.mean(x_, axis=(0, 2, 3), keepdims=True)
        var = jnp.mean((x_ - mean) ** 2, axis=(0, 2, 3), keepdims=True)
        return (x_ - mean) * lax.rsqrt(var + EPS) * g_.reshape(1, -1, 1, 1) \
            + b_.reshape(1, -1, 1, 1)

    out = jnp.maximum(bn(conv(x, w1), g1, b1), 0.0)
    out = bn(conv(out, w2), g2, b2)
    return jnp.maximum(out + x, 0.0)


if __name__ == "__main__":
    key = jax.random.PRNGKey(0)
    k_x, k_w1, k_w2 = jax.random.split(key, 3)

    N, C, H, W = 2, 4, 16, 16  # inplanes = planes = 4, stride = 1, downsample = None
    x = jax.random.normal(k_x, (N, C, H, W), dtype=jnp.float32)

    # conv3x3 weights (OIHW, bias=False since use_bn=True)
    w1 = jax.random.normal(k_w1, (C, C, 3, 3), dtype=jnp.float32) * 0.1
    w2 = jax.random.normal(k_w2, (C, C, 3, 3), dtype=jnp.float32) * 0.1
    # BatchNorm2d default init: gamma=1, beta=0
    g1 = jnp.ones((C,), jnp.float32)
    b1 = jnp.zeros((C,), jnp.float32)
    g2 = jnp.ones((C,), jnp.float32)
    b2 = jnp.zeros((C,), jnp.float32)

    out = jax.block_until_ready(basic_block_forward(x, w1, g1, b1, w2, g2, b2))
    assert out.shape == (N, C, H, W)

    # Tight check vs. a reference whose conv inputs/weights are rounded to bf16
    # (mirrors the kernel's bf16 MXU inputs with f32 accumulation).
    ref_bf16 = _reference(x, w1, g1, b1, w2, g2, b2, mirror_bf16_matmul=True)
    err_tight = float(jnp.max(jnp.abs(out - ref_bf16)))
    assert err_tight < 3e-2, f"mismatch vs bf16-matmul reference: {err_tight}"

    # Loose sanity check vs. the full-f32 reference (difference = bf16 MXU rounding).
    ref_f32 = _reference(x, w1, g1, b1, w2, g2, b2)
    err_loose = float(jnp.max(jnp.abs(out - ref_f32)))
    assert err_loose < 1.5e-1, f"mismatch vs f32 reference: {err_loose}"

    print("KERNEL_OK")
</pallas_src>

<mosaic_0001>
module attributes {stable_mosaic.version = 11 : i64} {
  func.func @_conv1_kernel(%arg0: i32, %arg1: memref<1x18x32x128xbf16, #tpu.memory_space<vmem>>, %arg2: memref<9x128x128xbf16, #tpu.memory_space<vmem>>, %arg3: memref<256x128xf32, #tpu.memory_space<vmem>>, %arg4: memref<1x8x128xf32, #tpu.memory_space<vmem>>) attributes {dimension_semantics = [#tpu.dimension_semantics<parallel>], iteration_bounds = array<i64: 2>, scalar_prefetch = 0 : i64, scratch_operands = 0 : i64, tpu.core_type = #tpu.core_type<tc>, window_params = [{transform_indices = @transform_0, window_bounds = array<i64: 1, 18, 32, 128>}, {pipeline_mode = #tpu.pipeline_mode<synchronous>, transform_indices = @transform_1, window_bounds = array<i64: 9, 128, 128>}, {transform_indices = @transform_2, window_bounds = array<i64: 256, 128>}, {transform_indices = @transform_3, window_bounds = array<i64: 1, 8, 128>}]} {
    %c0 = arith.constant 0 : index
    %c0_0 = arith.constant 0 : index
    %c0_1 = arith.constant 0 : index
    %c0_2 = arith.constant 0 : index
    %0 = vector.load %arg1[%c0, %c0_0, %c0_1, %c0_2] : memref<1x18x32x128xbf16, #tpu.memory_space<vmem>>, vector<1x16x16x128xbf16>
    %1 = vector.shape_cast %0 : vector<1x16x16x128xbf16> to vector<256x128xbf16>
    %c0_3 = arith.constant 0 : index
    %c0_4 = arith.constant 0 : index
    %c0_5 = arith.constant 0 : index
    %2 = vector.load %arg2[%c0_3, %c0_4, %c0_5] : memref<9x128x128xbf16, #tpu.memory_space<vmem>>, vector<1x128x128xbf16>
    %3 = vector.shape_cast %2 : vector<1x128x128xbf16> to vector<128x128xbf16>
    %cst = arith.constant dense<0.000000e+00> : vector<256x128xf32>
    %4 = tpu.matmul %1, %3, %cst {dimension_numbers = #tpu.dot_dimension_numbers<[1], [0], [0], [1], [0, 0, 1, 1], [], []>} : vector<256x128xbf16>, vector<128x128xbf16>, vector<256x128xf32> -> vector<256x128xf32>
    %c0_6 = arith.constant 0 : index
    %c0_7 = arith.constant 0 : index
    %c1 = arith.constant 1 : index
    %c0_8 = arith.constant 0 : index
    %5 = vector.load %arg1[%c0_6, %c0_7, %c1, %c0_8] : memref<1x18x32x128xbf16, #tpu.memory_space<vmem>>, vector<1x16x16x128xbf16>
    %6 = vector.shape_cast %5 : vector<1x16x16x128xbf16> to vector<256x128xbf16>
    %c1_9 = arith.constant 1 : index
    %c0_10 = arith.constant 0 : index
    %c0_11 = arith.constant 0 : index
    %7 = vector.load %arg2[%c1_9, %c0_10, %c0_11] : memref<9x128x128xbf16, #tpu.memory_space<vmem>>, vector<1x128x128xbf16>
    %8 = vector.shape_cast %7 : vector<1x128x128xbf16> to vector<128x128xbf16>
    %cst_12 = arith.constant dense<0.000000e+00> : vector<256x128xf32>
    %9 = tpu.matmul %6, %8, %cst_12 {dimension_numbers = #tpu.dot_dimension_numbers<[1], [0], [0], [1], [0, 0, 1, 1], [], []>} : vector<256x128xbf16>, vector<128x128xbf16>, vector<256x128xf32> -> vector<256x128xf32>
    %10 = arith.addf %4, %9 : vector<256x128xf32>
    %c0_13 = arith.constant 0 : index
    %c0_14 = arith.constant 0 : index
    %c2 = arith.constant 2 : index
    %c0_15 = arith.constant 0 : index
    %11 = vector.load %arg1[%c0_13, %c0_14, %c2, %c0_15] : memref<1x18x32x128xbf16, #tpu.memory_space<vmem>>, vector<1x16x16x128xbf16>
    %12 = vector.shape_cast %11 : vector<1x16x16x128xbf16> to vector<256x128xbf16>
    %c2_16 = arith.constant 2 : index
    %c0_17 = arith.constant 0 : index
    %c0_18 = arith.constant 0 : index
    %13 = vector.load %arg2[%c2_16, %c0_17, %c0_18] : memref<9x128x128xbf16, #tpu.memory_space<vmem>>, vector<1x128x128xbf16>
    %14 = vector.shape_cast %13 : vector<1x128x128xbf16> to vector<128x128xbf16>
    %cst_19 = arith.constant dense<0.000000e+00> : vector<256x128xf32>
    %15 = tpu.matmul %12, %14, %cst_19 {dimension_numbers = #tpu.dot_dimension_numbers<[1], [0], [0], [1], [0, 0, 1, 1], [], []>} : vector<256x128xbf16>, vector<128x128xbf16>, vector<256x128xf32> -> vector<256x128xf32>
    %16 = arith.addf %10, %15 : vector<256x128xf32>
    %c0_20 = arith.constant 0 : index
    %c1_21 = arith.constant 1 : index
    %c0_22 = arith.constant 0 : index
    %c0_23 = arith.constant 0 : index
    %17 = vector.load %arg1[%c0_20, %c1_21, %c0_22, %c0_23] : memref<1x18x32x128xbf16, #tpu.memory_space<vmem>>, vector<1x16x16x128xbf16>
    %18 = vector.shape_cast %17 : vector<1x16x16x128xbf16> to vector<256x128xbf16>
    %c3 = arith.constant 3 : index
    %c0_24 = arith.constant 0 : index
    %c0_25 = arith.constant 0 : index
    %19 = vector.load %arg2[%c3, %c0_24, %c0_25] : memref<9x128x128xbf16, #tpu.memory_space<vmem>>, vector<1x128x128xbf16>
    %20 = vector.shape_cast %19 : vector<1x128x128xbf16> to vector<128x128xbf16>
    %cst_26 = arith.constant dense<0.000000e+00> : vector<256x128xf32>
    %21 = tpu.matmul %18, %20, %cst_26 {dimension_numbers = #tpu.dot_dimension_numbers<[1], [0], [0], [1], [0, 0, 1, 1], [], []>} : vector<256x128xbf16>, vector<128x128xbf16>, vector<256x128xf32> -> vector<256x128xf32>
    %22 = arith.addf %16, %21 : vector<256x128xf32>
    %c0_27 = arith.constant 0 : index
    %c1_28 = arith.constant 1 : index
    %c1_29 = arith.constant 1 : index
    %c0_30 = arith.constant 0 : index
    %23 = vector.load %arg1[%c0_27, %c1_28, %c1_29, %c0_30] : memref<1x18x32x128xbf16, #tpu.memory_space<vmem>>, vector<1x16x16x128xbf16>
    %24 = vector.shape_cast %23 : vector<1x16x16x128xbf16> to vector<256x128xbf16>
    %c4 = arith.constant 4 : index
    %c0_31 = arith.constant 0 : index
    %c0_32 = arith.constant 0 : index
    %25 = vector.load %arg2[%c4, %c0_31, %c0_32] : memref<9x128x128xbf16, #tpu.memory_space<vmem>>, vector<1x128x128xbf16>
    %26 = vector.shape_cast %25 : vector<1x128x128xbf16> to vector<128x128xbf16>
    %cst_33 = arith.constant dense<0.000000e+00> : vector<256x128xf32>
    %27 = tpu.matmul %24, %26, %cst_33 {dimension_numbers = #tpu.dot_dimension_numbers<[1], [0], [0], [1], [0, 0, 1, 1], [], []>} : vector<256x128xbf16>, vector<128x128xbf16>, vector<256x128xf32> -> vector<256x128xf32>
    %28 = arith.addf %22, %27 : vector<256x128xf32>
    %c0_34 = arith.constant 0 : index
    %c1_35 = arith.constant 1 : index
    %c2_36 = arith.constant 2 : index
    %c0_37 = arith.constant 0 : index
    %29 = vector.load %arg1[%c0_34, %c1_35, %c2_36, %c0_37] : memref<1x18x32x128xbf16, #tpu.memory_space<vmem>>, vector<1x16x16x128xbf16>
    %30 = vector.shape_cast %29 : vector<1x16x16x128xbf16> to vector<256x128xbf16>
    %c5 = arith.constant 5 : index
    %c0_38 = arith.constant 0 : index
    %c0_39 = arith.constant 0 : index
    %31 = vector.load %arg2[%c5, %c0_38, %c0_39] : memref<9x128x128xbf16, #tpu.memory_space<vmem>>, vector<1x128x128xbf16>
    %32 = vector.shape_cast %31 : vector<1x128x128xbf16> to vector<128x128xbf16>
    %cst_40 = arith.constant dense<0.000000e+00> : vector<256x128xf32>
    %33 = tpu.matmul %30, %32, %cst_40 {dimension_numbers = #tpu.dot_dimension_numbers<[1], [0], [0], [1], [0, 0, 1, 1], [], []>} : vector<256x128xbf16>, vector<128x128xbf16>, vector<256x128xf32> -> vector<256x128xf32>
    %34 = arith.addf %28, %33 : vector<256x128xf32>
    %c0_41 = arith.constant 0 : index
    %c2_42 = arith.constant 2 : index
    %c0_43 = arith.constant 0 : index
    %c0_44 = arith.constant 0 : index
    %35 = vector.load %arg1[%c0_41, %c2_42, %c0_43, %c0_44] : memref<1x18x32x128xbf16, #tpu.memory_space<vmem>>, vector<1x16x16x128xbf16>
    %36 = vector.shape_cast %35 : vector<1x16x16x128xbf16> to vector<256x128xbf16>
    %c6 = arith.constant 6 : index
    %c0_45 = arith.constant 0 : index
    %c0_46 = arith.constant 0 : index
    %37 = vector.load %arg2[%c6, %c0_45, %c0_46] : memref<9x128x128xbf16, #tpu.memory_space<vmem>>, vector<1x128x128xbf16>
    %38 = vector.shape_cast %37 : vector<1x128x128xbf16> to vector<128x128xbf16>
    %cst_47 = arith.constant dense<0.000000e+00> : vector<256x128xf32>
    %39 = tpu.matmul %36, %38, %cst_47 {dimension_numbers = #tpu.dot_dimension_numbers<[1], [0], [0], [1], [0, 0, 1, 1], [], []>} : vector<256x128xbf16>, vector<128x128xbf16>, vector<256x128xf32> -> vector<256x128xf32>
    %40 = arith.addf %34, %39 : vector<256x128xf32>
    %c0_48 = arith.constant 0 : index
    %c2_49 = arith.constant 2 : index
    %c1_50 = arith.constant 1 : index
    %c0_51 = arith.constant 0 : index
    %41 = vector.load %arg1[%c0_48, %c2_49, %c1_50, %c0_51] : memref<1x18x32x128xbf16, #tpu.memory_space<vmem>>, vector<1x16x16x128xbf16>
    %42 = vector.shape_cast %41 : vector<1x16x16x128xbf16> to vector<256x128xbf16>
    %c7 = arith.constant 7 : index
    %c0_52 = arith.constant 0 : index
    %c0_53 = arith.constant 0 : index
    %43 = vector.load %arg2[%c7, %c0_52, %c0_53] : memref<9x128x128xbf16, #tpu.memory_space<vmem>>, vector<1x128x128xbf16>
    %44 = vector.shape_cast %43 : vector<1x128x128xbf16> to vector<128x128xbf16>
    %cst_54 = arith.constant dense<0.000000e+00> : vector<256x128xf32>
    %45 = tpu.matmul %42, %44, %cst_54 {dimension_numbers = #tpu.dot_dimension_numbers<[1], [0], [0], [1], [0, 0, 1, 1], [], []>} : vector<256x128xbf16>, vector<128x128xbf16>, vector<256x128xf32> -> vector<256x128xf32>
    %46 = arith.addf %40, %45 : vector<256x128xf32>
    %c0_55 = arith.constant 0 : index
    %c2_56 = arith.constant 2 : index
    %c2_57 = arith.constant 2 : index
    %c0_58 = arith.constant 0 : index
    %47 = vector.load %arg1[%c0_55, %c2_56, %c2_57, %c0_58] : memref<1x18x32x128xbf16, #tpu.memory_space<vmem>>, vector<1x16x16x128xbf16>
    %48 = vector.shape_cast %47 : vector<1x16x16x128xbf16> to vector<256x128xbf16>
    %c8 = arith.constant 8 : index
    %c0_59 = arith.constant 0 : index
    %c0_60 = arith.constant 0 : index
    %49 = vector.load %arg2[%c8, %c0_59, %c0_60] : memref<9x128x128xbf16, #tpu.memory_space<vmem>>, vector<1x128x128xbf16>
    %50 = vector.shape_cast %49 : vector<1x128x128xbf16> to vector<128x128xbf16>
    %cst_61 = arith.constant dense<0.000000e+00> : vector<256x128xf32>
    %51 = tpu.matmul %48, %50, %cst_61 {dimension_numbers = #tpu.dot_dimension_numbers<[1], [0], [0], [1], [0, 0, 1, 1], [], []>} : vector<256x128xbf16>, vector<128x128xbf16>, vector<256x128xf32> -> vector<256x128xf32>
    %52 = arith.addf %46, %51 : vector<256x128xf32>
    %c0_62 = arith.constant 0 : index
    %c0_63 = arith.constant 0 : index
    %53 = vector.load %arg3[%c0_62, %c0_63] : memref<256x128xf32, #tpu.memory_space<vmem>>, vector<256x128xf32>
    tpu.vector_store %arg3[%c0_62, %c0_63], %52 {strides = array<i32>} : memref<256x128xf32, #tpu.memory_space<vmem>>, vector<256x128xf32>,
    %cst_64 = arith.constant dense<0.000000e+00> : vector<128xf32>
    %54 = vector.multi_reduction <add>, %52, %cst_64 [0] : vector<256x128xf32> to vector<128xf32>
    %55 = vector.shape_cast %54 : vector<128xf32> to vector<1x128xf32>
    %56 = arith.mulf %52, %52 : vector<256x128xf32>
    %cst_65 = arith.constant dense<0.000000e+00> : vector<128xf32>
    %57 = vector.multi_reduction <add>, %56, %cst_65 [0] : vector<256x128xf32> to vector<128xf32>
    %58 = vector.shape_cast %57 : vector<128xf32> to vector<1x128xf32>
    %cst_66 = arith.constant 0.000000e+00 : f32
    %59 = vector.broadcast %cst_66 : f32 to vector<6x128xf32>
    %60 = tpu.concatenate %55, %58, %59 in 0 : vector<1x128xf32>, vector<1x128xf32>, vector<6x128xf32> -> vector<8x128xf32>
    %61 = vector.shape_cast %60 : vector<8x128xf32> to vector<1x8x128xf32>
    %c0_67 = arith.constant 0 : index
    %c0_68 = arith.constant 0 : index
    %c0_69 = arith.constant 0 : index
    %62 = vector.load %arg4[%c0_67, %c0_68, %c0_69] : memref<1x8x128xf32, #tpu.memory_space<vmem>>, vector<1x8x128xf32>
    tpu.vector_store %arg4[%c0_67, %c0_68, %c0_69], %61 {strides = array<i32>} : memref<1x8x128xf32, #tpu.memory_space<vmem>>, vector<1x8x128xf32>,
    return
  }
  func.func @transform_0(%arg0: i32) -> (i32, i32, i32, i32) {
    %c0_i32 = arith.constant 0 : i32
    %c0_i32_0 = arith.constant 0 : i32
    %c0_i32_1 = arith.constant 0 : i32
    %c0_i32_2 = arith.constant 0 : i32
    return %arg0, %c0_i32, %c0_i32_0, %c0_i32_1 : i32, i32, i32, i32
  }
  func.func @transform_1(%arg0: i32) -> (i32, i32, i32) {
    %c0_i32 = arith.constant 0 : i32
    %c0_i32_0 = arith.constant 0 : i32
    %c0_i32_1 = arith.constant 0 : i32
    %c0_i32_2 = arith.constant 0 : i32
    return %c0_i32, %c0_i32_0, %c0_i32_1 : i32, i32, i32
  }
  func.func @transform_2(%arg0: i32) -> (i32, i32) {
    %c0_i32 = arith.constant 0 : i32
    %c0_i32_0 = arith.constant 0 : i32
    return %arg0, %c0_i32 : i32, i32
  }
  func.func @transform_3(%arg0: i32) -> (i32, i32, i32) {
    %c0_i32 = arith.constant 0 : i32
    %c0_i32_0 = arith.constant 0 : i32
    %c0_i32_1 = arith.constant 0 : i32
    return %arg0, %c0_i32, %c0_i32_0 : i32, i32, i32
  }
}

module attributes {stable_mosaic.version = 11 : i64} {
  func.func @_conv2_kernel(%arg0: i32, %arg1: memref<256x128xf32, #tpu.memory_space<vmem>>, %arg2: memref<1x128xf32, #tpu.memory_space<vmem>>, %arg3: memref<1x128xf32, #tpu.memory_space<vmem>>, %arg4: memref<9x128x128xbf16, #tpu.memory_space<vmem>>, %arg5: memref<256x128xf32, #tpu.memory_space<vmem>>, %arg6: memref<1x8x128xf32, #tpu.memory_space<vmem>>, %arg7: memref<1x18x32x128xbf16, #tpu.memory_space<vmem>>) attributes {dimension_semantics = [#tpu.dimension_semantics<parallel>], iteration_bounds = array<i64: 2>, scalar_prefetch = 0 : i64, scratch_operands = 1 : i64, tpu.core_type = #tpu.core_type<tc>, window_params = [{transform_indices = @transform_0, window_bounds = array<i64: 256, 128>}, {pipeline_mode = #tpu.pipeline_mode<synchronous>, transform_indices = @transform_1, window_bounds = array<i64: 1, 128>}, {pipeline_mode = #tpu.pipeline_mode<synchronous>, transform_indices = @transform_2, window_bounds = array<i64: 1, 128>}, {pipeline_mode = #tpu.pipeline_mode<synchronous>, transform_indices = @transform_3, window_bounds = array<i64: 9, 128, 128>}, {transform_indices = @transform_4, window_bounds = array<i64: 256, 128>}, {transform_indices = @transform_5, window_bounds = array<i64: 1, 8, 128>}]} {
    %c0 = arith.constant 0 : index
    %c0_0 = arith.constant 0 : index
    %0 = vector.load %arg1[%c0, %c0_0] : memref<256x128xf32, #tpu.memory_space<vmem>>, vector<256x128xf32>
    %c0_1 = arith.constant 0 : index
    %c0_2 = arith.constant 0 : index
    %1 = vector.load %arg2[%c0_1, %c0_2] : memref<1x128xf32, #tpu.memory_space<vmem>>, vector<1x128xf32>
    %2 = vector.broadcast %1 : vector<1x128xf32> to vector<256x128xf32>
    %3 = arith.mulf %0, %2 : vector<256x128xf32>
    %c0_3 = arith.constant 0 : index
    %c0_4 = arith.constant 0 : index
    %4 = vector.load %arg3[%c0_3, %c0_4] : memref<1x128xf32, #tpu.memory_space<vmem>>, vector<1x128xf32>
    %5 = vector.broadcast %4 : vector<1x128xf32> to vector<256x128xf32>
    %6 = arith.addf %3, %5 : vector<256x128xf32>
    %cst = arith.constant 0.000000e+00 : f32
    %7 = vector.broadcast %cst : f32 to vector<256x128xf32>
    %8 = arith.maximumf %6, %7 : vector<256x128xf32>
    %9 = arith.truncf %8 : vector<256x128xf32> to vector<256x128xbf16>
    %cst_5 = arith.constant 0.000000e+00 : bf16
    %10 = vector.broadcast %cst_5 : bf16 to vector<1x1x32x128xbf16>
    %cst_6 = arith.constant 0.000000e+00 : bf16
    %11 = vector.broadcast %cst_6 : bf16 to vector<1x16x1x128xbf16>
    %c0_7 = arith.constant 0 : index
    %c0_8 = arith.constant 0 : index
    %c0_9 = arith.constant 0 : index
    %c0_10 = arith.constant 0 : index
    %12 = vector.load %arg7[%c0_7, %c0_8, %c0_9, %c0_10] : memref<1x18x32x128xbf16, #tpu.memory_space<vmem>>, vector<1x1x32x128xbf16>
    tpu.vector_store %arg7[%c0_7, %c0_8, %c0_9, %c0_10], %10 {strides = array<i32>} : memref<1x18x32x128xbf16, #tpu.memory_space<vmem>>, vector<1x1x32x128xbf16>,
    %c0_11 = arith.constant 0 : index
    %c17 = arith.constant 17 : index
    %c0_12 = arith.constant 0 : index
    %c0_13 = arith.constant 0 : index
    %13 = vector.load %arg7[%c0_11, %c17, %c0_12, %c0_13] : memref<1x18x32x128xbf16, #tpu.memory_space<vmem>>, vector<1x1x32x128xbf16>
    tpu.vector_store %arg7[%c0_11, %c17, %c0_12, %c0_13], %10 {strides = array<i32>} : memref<1x18x32x128xbf16, #tpu.memory_space<vmem>>, vector<1x1x32x128xbf16>,
    %c0_14 = arith.constant 0 : index
    %c1 = arith.constant 1 : index
    %c0_15 = arith.constant 0 : index
    %c0_16 = arith.constant 0 : index
    %14 = vector.load %arg7[%c0_14, %c1, %c0_15, %c0_16] : memref<1x18x32x128xbf16, #tpu.memory_space<vmem>>, vector<1x16x1x128xbf16>
    tpu.vector_store %arg7[%c0_14, %c1, %c0_15, %c0_16], %11 {strides = array<i32>} : memref<1x18x32x128xbf16, #tpu.memory_space<vmem>>, vector<1x16x1x128xbf16>,
    %c0_17 = arith.constant 0 : index
    %c1_18 = arith.constant 1 : index
    %c17_19 = arith.constant 17 : index
    %c0_20 = arith.constant 0 : index
    %15 = vector.load %arg7[%c0_17, %c1_18, %c17_19, %c0_20] : memref<1x18x32x128xbf16, #tpu.memory_space<vmem>>, vector<1x16x1x128xbf16>
    tpu.vector_store %arg7[%c0_17, %c1_18, %c17_19, %c0_20], %11 {strides = array<i32>} : memref<1x18x32x128xbf16, #tpu.memory_space<vmem>>, vector<1x16x1x128xbf16>,
    %16 = vector.shape_cast %9 : vector<256x128xbf16> to vector<1x16x16x128xbf16>
    %c0_21 = arith.constant 0 : index
    %c1_22 = arith.constant 1 : index
    %c1_23 = arith.constant 1 : index
    %c0_24 = arith.constant 0 : index
    %17 = vector.load %arg7[%c0_21, %c1_22, %c1_23, %c0_24] : memref<1x18x32x128xbf16, #tpu.memory_space<vmem>>, vector<1x16x16x128xbf16>
    tpu.vector_store %arg7[%c0_21, %c1_22, %c1_23, %c0_24], %16 {strides = array<i32>} : memref<1x18x32x128xbf16, #tpu.memory_space<vmem>>, vector<1x16x16x128xbf16>,
    %c4 = arith.constant 4 : index
    %c0_25 = arith.constant 0 : index
    %c0_26 = arith.constant 0 : index
    %18 = vector.load %arg4[%c4, %c0_25, %c0_26] : memref<9x128x128xbf16, #tpu.memory_space<vmem>>, vector<1x128x128xbf16>
    %19 = vector.shape_cast %18 : vector<1x128x128xbf16> to vector<128x128xbf16>
    %cst_27 = arith.constant dense<0.000000e+00> : vector<256x128xf32>
    %20 = tpu.matmul %9, %19, %cst_27 {dimension_numbers = #tpu.dot_dimension_numbers<[1], [0], [0], [1], [0, 0, 1, 1], [], []>} : vector<256x128xbf16>, vector<128x128xbf16>, vector<256x128xf32> -> vector<256x128xf32>
    %c0_28 = arith.constant 0 : index
    %c0_29 = arith.constant 0 : index
    %c0_30 = arith.constant 0 : index
    %c0_31 = arith.constant 0 : index
    %21 = vector.load %arg7[%c0_28, %c0_29, %c0_30, %c0_31] : memref<1x18x32x128xbf16, #tpu.memory_space<vmem>>, vector<1x16x16x128xbf16>
    %22 = vector.shape_cast %21 : vector<1x16x16x128xbf16> to vector<256x128xbf16>
    %c0_32 = arith.constant 0 : index
    %c0_33 = arith.constant 0 : index
    %c0_34 = arith.constant 0 : index
    %23 = vector.load %arg4[%c0_32, %c0_33, %c0_34] : memref<9x128x128xbf16, #tpu.memory_space<vmem>>, vector<1x128x128xbf16>
    %24 = vector.shape_cast %23 : vector<1x128x128xbf16> to vector<128x128xbf16>
    %cst_35 = arith.constant dense<0.000000e+00> : vector<256x128xf32>
    %25 = tpu.matmul %22, %24, %cst_35 {dimension_numbers = #tpu.dot_dimension_numbers<[1], [0], [0], [1], [0, 0, 1, 1], [], []>} : vector<256x128xbf16>, vector<128x128xbf16>, vector<256x128xf32> -> vector<256x128xf32>
    %26 = arith.addf %20, %25 : vector<256x128xf32>
    %c0_36 = arith.constant 0 : index
    %c0_37 = arith.constant 0 : index
    %c1_38 = arith.constant 1 : index
    %c0_39 = arith.constant 0 : index
    %27 = vector.load %arg7[%c0_36, %c0_37, %c1_38, %c0_39] : memref<1x18x32x128xbf16, #tpu.memory_space<vmem>>, vector<1x16x16x128xbf16>
    %28 = vector.shape_cast %27 : vector<1x16x16x128xbf16> to vector<256x128xbf16>
    %c1_40 = arith.constant 1 : index
    %c0_41 = arith.constant 0 : index
    %c0_42 = arith.constant 0 : index
    %29 = vector.load %arg4[%c1_40, %c0_41, %c0_42] : memref<9x128x128xbf16, #tpu.memory_space<vmem>>, vector<1x128x128xbf16>
    %30 = vector.shape_cast %29 : vector<1x128x128xbf16> to vector<128x128xbf16>
    %cst_43 = arith.constant dense<0.000000e+00> : vector<256x128xf32>
    %31 = tpu.matmul %28, %30, %cst_43 {dimension_numbers = #tpu.dot_dimension_numbers<[1], [0], [0], [1], [0, 0, 1, 1], [], []>} : vector<256x128xbf16>, vector<128x128xbf16>, vector<256x128xf32> -> vector<256x128xf32>
    %32 = arith.addf %26, %31 : vector<256x128xf32>
    %c0_44 = arith.constant 0 : index
    %c0_45 = arith.constant 0 : index
    %c2 = arith.constant 2 : index
    %c0_46 = arith.constant 0 : index
    %33 = vector.load %arg7[%c0_44, %c0_45, %c2, %c0_46] : memref<1x18x32x128xbf16, #tpu.memory_space<vmem>>, vector<1x16x16x128xbf16>
    %34 = vector.shape_cast %33 : vector<1x16x16x128xbf16> to vector<256x128xbf16>
    %c2_47 = arith.constant 2 : index
    %c0_48 = arith.constant 0 : index
    %c0_49 = arith.constant 0 : index
    %35 = vector.load %arg4[%c2_47, %c0_48, %c0_49] : memref<9x128x128xbf16, #tpu.memory_space<vmem>>, vector<1x128x128xbf16>
    %36 = vector.shape_cast %35 : vector<1x128x128xbf16> to vector<128x128xbf16>
    %cst_50 = arith.constant dense<0.000000e+00> : vector<256x128xf32>
    %37 = tpu.matmul %34, %36, %cst_50 {dimension_numbers = #tpu.dot_dimension_numbers<[1], [0], [0], [1], [0, 0, 1, 1], [], []>} : vector<256x128xbf16>, vector<128x128xbf16>, vector<256x128xf32> -> vector<256x128xf32>
    %38 = arith.addf %32, %37 : vector<256x128xf32>
    %c0_51 = arith.constant 0 : index
    %c1_52 = arith.constant 1 : index
    %c0_53 = arith.constant 0 : index
    %c0_54 = arith.constant 0 : index
    %39 = vector.load %arg7[%c0_51, %c1_52, %c0_53, %c0_54] : memref<1x18x32x128xbf16, #tpu.memory_space<vmem>>, vector<1x16x16x128xbf16>
    %40 = vector.shape_cast %39 : vector<1x16x16x128xbf16> to vector<256x128xbf16>
    %c3 = arith.constant 3 : index
    %c0_55 = arith.constant 0 : index
    %c0_56 = arith.constant 0 : index
    %41 = vector.load %arg4[%c3, %c0_55, %c0_56] : memref<9x128x128xbf16, #tpu.memory_space<vmem>>, vector<1x128x128xbf16>
    %42 = vector.shape_cast %41 : vector<1x128x128xbf16> to vector<128x128xbf16>
    %cst_57 = arith.constant dense<0.000000e+00> : vector<256x128xf32>
    %43 = tpu.matmul %40, %42, %cst_57 {dimension_numbers = #tpu.dot_dimension_numbers<[1], [0], [0], [1], [0, 0, 1, 1], [], []>} : vector<256x128xbf16>, vector<128x128xbf16>, vector<256x128xf32> -> vector<256x128xf32>
    %44 = arith.addf %38, %43 : vector<256x128xf32>
    %c0_58 = arith.constant 0 : index
    %c1_59 = arith.constant 1 : index
    %c2_60 = arith.constant 2 : index
    %c0_61 = arith.constant 0 : index
    %45 = vector.load %arg7[%c0_58, %c1_59, %c2_60, %c0_61] : memref<1x18x32x128xbf16, #tpu.memory_space<vmem>>, vector<1x16x16x128xbf16>
    %46 = vector.shape_cast %45 : vector<1x16x16x128xbf16> to vector<256x128xbf16>
    %c5 = arith.constant 5 : index
    %c0_62 = arith.constant 0 : index
    %c0_63 = arith.constant 0 : index
    %47 = vector.load %arg4[%c5, %c0_62, %c0_63] : memref<9x128x128xbf16, #tpu.memory_space<vmem>>, vector<1x128x128xbf16>
    %48 = vector.shape_cast %47 : vector<1x128x128xbf16> to vector<128x128xbf16>
    %cst_64 = arith.constant dense<0.000000e+00> : vector<256x128xf32>
    %49 = tpu.matmul %46, %48, %cst_64 {dimension_numbers = #tpu.dot_dimension_numbers<[1], [0], [0], [1], [0, 0, 1, 1], [], []>} : vector<256x128xbf16>, vector<128x128xbf16>, vector<256x128xf32> -> vector<256x128xf32>
    %50 = arith.addf %44, %49 : vector<256x128xf32>
    %c0_65 = arith.constant 0 : index
    %c2_66 = arith.constant 2 : index
    %c0_67 = arith.constant 0 : index
    %c0_68 = arith.constant 0 : index
    %51 = vector.load %arg7[%c0_65, %c2_66, %c0_67, %c0_68] : memref<1x18x32x128xbf16, #tpu.memory_space<vmem>>, vector<1x16x16x128xbf16>
    %52 = vector.shape_cast %51 : vector<1x16x16x128xbf16> to vector<256x128xbf16>
    %c6 = arith.constant 6 : index
    %c0_69 = arith.constant 0 : index
    %c0_70 = arith.constant 0 : index
    %53 = vector.load %arg4[%c6, %c0_69, %c0_70] : memref<9x128x128xbf16, #tpu.memory_space<vmem>>, vector<1x128x128xbf16>
    %54 = vector.shape_cast %53 : vector<1x128x128xbf16> to vector<128x128xbf16>
    %cst_71 = arith.constant dense<0.000000e+00> : vector<256x128xf32>
    %55 = tpu.matmul %52, %54, %cst_71 {dimension_numbers = #tpu.dot_dimension_numbers<[1], [0], [0], [1], [0, 0, 1, 1], [], []>} : vector<256x128xbf16>, vector<128x128xbf16>, vector<256x128xf32> -> vector<256x128xf32>
    %56 = arith.addf %50, %55 : vector<256x128xf32>
    %c0_72 = arith.constant 0 : index
    %c2_73 = arith.constant 2 : index
    %c1_74 = arith.constant 1 : index
    %c0_75 = arith.constant 0 : index
    %57 = vector.load %arg7[%c0_72, %c2_73, %c1_74, %c0_75] : memref<1x18x32x128xbf16, #tpu.memory_space<vmem>>, vector<1x16x16x128xbf16>
    %58 = vector.shape_cast %57 : vector<1x16x16x128xbf16> to vector<256x128xbf16>
    %c7 = arith.constant 7 : index
    %c0_76 = arith.constant 0 : index
    %c0_77 = arith.constant 0 : index
    %59 = vector.load %arg4[%c7, %c0_76, %c0_77] : memref<9x128x128xbf16, #tpu.memory_space<vmem>>, vector<1x128x128xbf16>
    %60 = vector.shape_cast %59 : vector<1x128x128xbf16> to vector<128x128xbf16>
    %cst_78 = arith.constant dense<0.000000e+00> : vector<256x128xf32>
    %61 = tpu.matmul %58, %60, %cst_78 {dimension_numbers = #tpu.dot_dimension_numbers<[1], [0], [0], [1], [0, 0, 1, 1], [], []>} : vector<256x128xbf16>, vector<128x128xbf16>, vector<256x128xf32> -> vector<256x128xf32>
    %62 = arith.addf %56, %61 : vector<256x128xf32>
    %c0_79 = arith.constant 0 : index
    %c2_80 = arith.constant 2 : index
    %c2_81 = arith.constant 2 : index
    %c0_82 = arith.constant 0 : index
    %63 = vector.load %arg7[%c0_79, %c2_80, %c2_81, %c0_82] : memref<1x18x32x128xbf16, #tpu.memory_space<vmem>>, vector<1x16x16x128xbf16>
    %64 = vector.shape_cast %63 : vector<1x16x16x128xbf16> to vector<256x128xbf16>
    %c8 = arith.constant 8 : index
    %c0_83 = arith.constant 0 : index
    %c0_84 = arith.constant 0 : index
    %65 = vector.load %arg4[%c8, %c0_83, %c0_84] : memref<9x128x128xbf16, #tpu.memory_space<vmem>>, vector<1x128x128xbf16>
    %66 = vector.shape_cast %65 : vector<1x128x128xbf16> to vector<128x128xbf16>
    %cst_85 = arith.constant dense<0.000000e+00> : vector<256x128xf32>
    %67 = tpu.matmul %64, %66, %cst_85 {dimension_numbers = #tpu.dot_dimension_numbers<[1], [0], [0], [1], [0, 0, 1, 1], [], []>} : vector<256x128xbf16>, vector<128x128xbf16>, vector<256x128xf32> -> vector<256x128xf32>
    %68 = arith.addf %62, %67 : vector<256x128xf32>
    %c0_86 = arith.constant 0 : index
    %c0_87 = arith.constant 0 : index
    %69 = vector.load %arg5[%c0_86, %c0_87] : memref<256x128xf32, #tpu.memory_space<vmem>>, vector<256x128xf32>
    tpu.vector_store %arg5[%c0_86, %c0_87], %68 {strides = array<i32>} : memref<256x128xf32, #tpu.memory_space<vmem>>, vector<256x128xf32>,
    %cst_88 = arith.constant dense<0.000000e+00> : vector<128xf32>
    %70 = vector.multi_reduction <add>, %68, %cst_88 [0] : vector<256x128xf32> to vector<128xf32>
    %71 = vector.shape_cast %70 : vector<128xf32> to vector<1x128xf32>
    %72 = arith.mulf %68, %68 : vector<256x128xf32>
    %cst_89 = arith.constant dense<0.000000e+00> : vector<128xf32>
    %73 = vector.multi_reduction <add>, %72, %cst_89 [0] : vector<256x128xf32> to vector<128xf32>
    %74 = vector.shape_cast %73 : vector<128xf32> to vector<1x128xf32>
    %cst_90 = arith.constant 0.000000e+00 : f32
    %75 = vector.broadcast %cst_90 : f32 to vector<6x128xf32>
    %76 = tpu.concatenate %71, %74, %75 in 0 : vector<1x128xf32>, vector<1x128xf32>, vector<6x128xf32> -> vector<8x128xf32>
    %77 = vector.shape_cast %76 : vector<8x128xf32> to vector<1x8x128xf32>
    %c0_91 = arith.constant 0 : index
    %c0_92 = arith.constant 0 : index
    %c0_93 = arith.constant 0 : index
    %78 = vector.load %arg6[%c0_91, %c0_92, %c0_93] : memref<1x8x128xf32, #tpu.memory_space<vmem>>, vector<1x8x128xf32>
    tpu.vector_store %arg6[%c0_91, %c0_92, %c0_93], %77 {strides = array<i32>} : memref<1x8x128xf32, #tpu.memory_space<vmem>>, vector<1x8x128xf32>,
    return
  }
  func.func @transform_0(%arg0: i32) -> (i32, i32) {
    %c0_i32 = arith.constant 0 : i32
    %c0_i32_0 = arith.constant 0 : i32
    return %arg0, %c0_i32 : i32, i32
  }
  func.func @transform_1(%arg0: i32) -> (i32, i32) {
    %c0_i32 = arith.constant 0 : i32
    %c0_i32_0 = arith.constant 0 : i32
    %c0_i32_1 = arith.constant 0 : i32
    return %c0_i32, %c0_i32_0 : i32, i32
  }
  func.func @transform_2(%arg0: i32) -> (i32, i32) {
    %c0_i32 = arith.constant 0 : i32
    %c0_i32_0 = arith.constant 0 : i32
    %c0_i32_1 = arith.constant 0 : i32
    return %c0_i32, %c0_i32_0 : i32, i32
  }
  func.func @transform_3(%arg0: i32) -> (i32, i32, i32) {
    %c0_i32 = arith.constant 0 : i32
    %c0_i32_0 = arith.constant 0 : i32
    %c0_i32_1 = arith.constant 0 : i32
    %c0_i32_2 = arith.constant 0 : i32
    return %c0_i32, %c0_i32_0, %c0_i32_1 : i32, i32, i32
  }
  func.func @transform_4(%arg0: i32) -> (i32, i32) {
    %c0_i32 = arith.constant 0 : i32
    %c0_i32_0 = arith.constant 0 : i32
    return %arg0, %c0_i32 : i32, i32
  }
  func.func @transform_5(%arg0: i32) -> (i32, i32, i32) {
    %c0_i32 = arith.constant 0 : i32
    %c0_i32_0 = arith.constant 0 : i32
    %c0_i32_1 = arith.constant 0 : i32
    return %arg0, %c0_i32, %c0_i32_0 : i32, i32, i32
  }
}

module attributes {stable_mosaic.version = 11 : i64} {
  func.func @_epilogue_kernel(%arg0: i32, %arg1: memref<256x128xf32, #tpu.memory_space<vmem>>, %arg2: memref<1x128xf32, #tpu.memory_space<vmem>>, %arg3: memref<1x128xf32, #tpu.memory_space<vmem>>, %arg4: memref<256x128xf32, #tpu.memory_space<vmem>>, %arg5: memref<256x128xf32, #tpu.memory_space<vmem>>) attributes {dimension_semantics = [#tpu.dimension_semantics<parallel>], iteration_bounds = array<i64: 2>, scalar_prefetch = 0 : i64, scratch_operands = 0 : i64, tpu.core_type = #tpu.core_type<tc>, window_params = [{transform_indices = @transform_0, window_bounds = array<i64: 256, 128>}, {pipeline_mode = #tpu.pipeline_mode<synchronous>, transform_indices = @transform_1, window_bounds = array<i64: 1, 128>}, {pipeline_mode = #tpu.pipeline_mode<synchronous>, transform_indices = @transform_2, window_bounds = array<i64: 1, 128>}, {transform_indices = @transform_3, window_bounds = array<i64: 256, 128>}, {transform_indices = @transform_4, window_bounds = array<i64: 256, 128>}]} {
    %c0 = arith.constant 0 : index
    %c0_0 = arith.constant 0 : index
    %0 = vector.load %arg1[%c0, %c0_0] : memref<256x128xf32, #tpu.memory_space<vmem>>, vector<256x128xf32>
    %c0_1 = arith.constant 0 : index
    %c0_2 = arith.constant 0 : index
    %1 = vector.load %arg2[%c0_1, %c0_2] : memref<1x128xf32, #tpu.memory_space<vmem>>, vector<1x128xf32>
    %2 = vector.broadcast %1 : vector<1x128xf32> to vector<256x128xf32>
    %3 = arith.mulf %0, %2 : vector<256x128xf32>
    %c0_3 = arith.constant 0 : index
    %c0_4 = arith.constant 0 : index
    %4 = vector.load %arg3[%c0_3, %c0_4] : memref<1x128xf32, #tpu.memory_space<vmem>>, vector<1x128xf32>
    %5 = vector.broadcast %4 : vector<1x128xf32> to vector<256x128xf32>
    %6 = arith.addf %3, %5 : vector<256x128xf32>
    %c0_5 = arith.constant 0 : index
    %c0_6 = arith.constant 0 : index
    %7 = vector.load %arg4[%c0_5, %c0_6] : memref<256x128xf32, #tpu.memory_space<vmem>>, vector<256x128xf32>
    %8 = arith.addf %6, %7 : vector<256x128xf32>
    %cst = arith.constant 0.000000e+00 : f32
    %9 = vector.broadcast %cst : f32 to vector<256x128xf32>
    %10 = arith.maximumf %8, %9 : vector<256x128xf32>
    %c0_7 = arith.constant 0 : index
    %c0_8 = arith.constant 0 : index
    %11 = vector.load %arg5[%c0_7, %c0_8] : memref<256x128xf32, #tpu.memory_space<vmem>>, vector<256x128xf32>
    tpu.vector_store %arg5[%c0_7, %c0_8], %10 {strides = array<i32>} : memref<256x128xf32, #tpu.memory_space<vmem>>, vector<256x128xf32>,
    return
  }
  func.func @transform_0(%arg0: i32) -> (i32, i32) {
    %c0_i32 = arith.constant 0 : i32
    %c0_i32_0 = arith.constant 0 : i32
    return %arg0, %c0_i32 : i32, i32
  }
  func.func @transform_1(%arg0: i32) -> (i32, i32) {
    %c0_i32 = arith.constant 0 : i32
    %c0_i32_0 = arith.constant 0 : i32
    %c0_i32_1 = arith.constant 0 : i32
    return %c0_i32, %c0_i32_0 : i32, i32
  }
  func.func @transform_2(%arg0: i32) -> (i32, i32) {
    %c0_i32 = arith.constant 0 : i32
    %c0_i32_0 = arith.constant 0 : i32
    %c0_i32_1 = arith.constant 0 : i32
    return %c0_i32, %c0_i32_0 : i32, i32
  }
  func.func @transform_3(%arg0: i32) -> (i32, i32) {
    %c0_i32 = arith.constant 0 : i32
    %c0_i32_0 = arith.constant 0 : i32
    return %arg0, %c0_i32 : i32, i32
  }
  func.func @transform_4(%arg0: i32) -> (i32, i32) {
    %c0_i32 = arith.constant 0 : i32
    %c0_i32_0 = arith.constant 0 : i32
    return %arg0, %c0_i32 : i32, i32
  }
}

</mosaic_0001>

<bundles_post_ra>
// kernel: basic_block_forward.5
= control target key start
LH: loop header
LB: loop body
LE: loop exit
PB: predicated region body
PF: predicated region fallthrough
CT: control target
= control target key end

     0   :  { %s585_s15 = smov 0   ;;  %s786_s0 = inlined_call_operand.vmem [shape: f32[512,128], index: 0, kind: input, shape index: {}]   ;;  %s787_s1 = inlined_call_operand.vmem [shape: f32[1,128], index: 1, kind: input, shape index: {}]   ;;  %s788_s2 = inlined_call_operand.vmem [shape: f32[1,128], index: 2, kind: input, shape index: {}]   ;;  %s789_s3 = inlined_call_operand.vmem [shape: f32[512,128], index: 3, kind: input, shape index: {}]   ;;  %s790_s4 = inlined_call_operand.vmem [shape: f32[512,128], index: 4, kind: output, shape index: {}]  }
   0x1 LB: > { %s529_s16 = sadd.s32 4294967295, %s558_s15   ;;  %p533_p0 = scmp.ge.s32.totalorder %s558_s15, 1  ;;  %s558_s15 = sphi %s585_s15, %s14_s15  }
   0x2   : > { %p174_p1 = scmp.lt.s32.totalorder %s558_s15, 3 }
   0x4   : > { %p175_p2 = pnand %p533_p0, %p174_p1 }
   0x5   : > { %s534_s17 = sshll.u32 (!%p175_p2), %s529_s16, 5  ;;  %v598_v0 = vld [vmem:[%s787_s1] ss:$0 sm:$0xff] (!%p175_p2) }
   0x6   : > { %178 = sbr.rel (%p175_p2) target bundleno = 55 (0x37), region = 36  ;;  %p206_p3 = scmp.lt.s32.totalorder (!%p175_p2), %s534_s17, 63  ;;  %v616_v2 = vld [vmem:[%s788_s2] ss:$0 sm:$0xff] (!%p175_p2) }
   0xd   : > { %s792_s17 = smov (!%p206_p3, %s534_s17), 63 }
   0xe   : > { %s593_s18 = sshll.u32 %s792_s17, 3 }
   0xf   : > { %s604_s23 = scalar_lea.vmem %s786_s0, %s593_s18  ;;  %s610_s26 = scalar_lea.vmem %s789_s3, %s593_s18 }
  0x10   : > { %v223_v1 = vld [vmem:[%s604_s23] sm:$0xff]  ;;  %v224_v3 = vld [vmem:[%s604_s23 + $0x8] sm:$0xff]  ;;  %v225_v7 = vld [vmem:[%s604_s23 + $0x10] sm:$0xff]  ;;  %s646_s5 = scalar_lea.vmem %s790_s4, %s593_s18 }
  0x11   : > { %v262_v4 = vmul.f32 %v598_v0, %v223_v1  ;;  %v333_v5 = vld [vmem:[%s610_s26] sm:$0xff]  ;;  %v263_v6 = vmul.f32 %v598_v0, %v224_v3  ;;  %v334_v8 = vld [vmem:[%s610_s26 + $0x8] sm:$0xff]  ;;  %v264_v9 = vmul.f32 %v598_v0, %v225_v7  ;;  %v226_v10 = vld [vmem:[%s604_s23 + $0x18] sm:$0xff] }
  0x12   : > { %v227_v11 = vld [vmem:[%s604_s23 + $0x20] sm:$0xff]  ;;  %v335_v14 = vld [vmem:[%s610_s26 + $0x10] sm:$0xff]  ;;  %v265_v15 = vmul.f32 %v598_v0, %v226_v10  ;;  %v336_v16 = vld [vmem:[%s610_s26 + $0x18] sm:$0xff] }
  0x13   : > { %v301_v12 = vadd.f32 %v616_v2, %v262_v4  ;;  %v302_v13 = vadd.f32 %v616_v2, %v263_v6  ;;  %v266_v17 = vmul.f32 %v598_v0, %v227_v11  ;;  %v228_v18 = vld [vmem:[%s604_s23 + $0x28] sm:$0xff]  ;;  %v303_v19 = vadd.f32 %v616_v2, %v264_v9  ;;  %v337_v20 = vld [vmem:[%s610_s26 + $0x20] sm:$0xff]  ;;  %v229_v22 = vld [vmem:[%s604_s23 + $0x30] sm:$0xff] }
  0x14   : > { %v267_v21 = vmul.f32 %v598_v0, %v228_v18  ;;  %v230_v23 = vld [vmem:[%s604_s23 + $0x38] sm:$0xff]  ;;  %v304_v26 = vadd.f32 %v616_v2, %v265_v15  ;;  %v338_v28 = vld [vmem:[%s610_s26 + $0x28] sm:$0xff]  ;;  %v268_v31 = vmul.f32 %v598_v0, %v229_v22  ;;  %v231_v33 = vld [vmem:[%s604_s23 + $0x40] sm:$0xff] }
  0x15   : > { %v365_v24 = vadd.f32 %v333_v5, %v301_v12  ;;  %v366_v25 = vadd.f32 %v334_v8, %v302_v13  ;;  %v305_v27 = vadd.f32 %v616_v2, %v266_v17  ;;  %v367_v29 = vadd.f32 %v335_v14, %v303_v19  ;;  %v232_v34 = vld [vmem:[%s604_s23 + $0x48] sm:$0xff]  ;;  %v339_v39 = vld [vmem:[%s610_s26 + $0x30] sm:$0xff]  ;;  %v340_v40 = vld [vmem:[%s610_s26 + $0x38] sm:$0xff] }
  0x16   : > { %v306_v30 = vadd.f32 %v616_v2, %v267_v21  ;;  %v269_v32 = vmul.f32 %v598_v0, %v230_v23  ;;  %v368_v37 = vadd.f32 %v336_v16, %v304_v26  ;;  %v233_v41 = vld [vmem:[%s604_s23 + $0x50] sm:$0xff]  ;;  %v307_v44 = vadd.f32 %v616_v2, %v268_v31  ;;  %v234_v46 = vld [vmem:[%s604_s23 + $0x58] sm:$0xff]  ;;  %v235_v47 = vld [vmem:[%s604_s23 + $0x60] sm:$0xff] }
  0x17   : > { %v397_v35 = vmax.f32 %v365_v24, 0.0  ;;  %v398_v36 = vmax.f32 %v366_v25, 0.0  ;;  %v369_v38 = vadd.f32 %v337_v20, %v305_v27  ;;  %v399_v42 = vmax.f32 %v367_v29, 0.0  ;;  %v236_v52 = vld [vmem:[%s604_s23 + $0x68] sm:$0xff]  ;;  %v341_v56 = vld [vmem:[%s610_s26 + $0x40] sm:$0xff]  ;;  %v343_v61 = vld [vmem:[%s610_s26 + $0x50] sm:$0xff] }
  0x18   : > { %v370_v43 = vadd.f32 %v338_v28, %v306_v30  ;;  %v308_v45 = vadd.f32 %v616_v2, %v269_v32  ;;  %v400_v48 = vmax.f32 %v368_v37, 0.0  ;;  %v270_v50 = vmul.f32 %v598_v0, %v231_v33  ;;  %v342_v57 = vld [vmem:[%s610_s26 + $0x48] sm:$0xff]  ;;  %v237_v1 = vld [vmem:[%s604_s23 + $0x70] sm:$0xff]  ;;  %v238_v3 = vld [vmem:[%s604_s23 + $0x78] sm:$0xff] }
  0x19   : > { %429 = vst [vmem:[%s646_s5] sm:$0xff] %v397_v35  ;;  %430 = vst [vmem:[%s646_s5 + $0x8] sm:$0xff] %v398_v36  ;;  %v401_v49 = vmax.f32 %v369_v38, 0.0  ;;  %v271_v51 = vmul.f32 %v598_v0, %v232_v34  ;;  %v371_v54 = vadd.f32 %v339_v39, %v307_v44  ;;  %v272_v58 = vmul.f32 %v598_v0, %v233_v41  ;;  %v344_v7 = vld [vmem:[%s610_s26 + $0x58] sm:$0xff]  ;;  %v345_v8 = vld [vmem:[%s610_s26 + $0x60] sm:$0xff] }
  0x1a   : > { %431 = vst [vmem:[%s646_s5 + $0x10] sm:$0xff] %v399_v42  ;;  %v402_v53 = vmax.f32 %v370_v43, 0.0  ;;  %v372_v55 = vadd.f32 %v340_v40, %v308_v45  ;;  %432 = vst [vmem:[%s646_s5 + $0x18] sm:$0xff] %v400_v48  ;;  %v309_v59 = vadd.f32 %v616_v2, %v270_v50  ;;  %v273_v62 = vmul.f32 %v598_v0, %v234_v46  ;;  %v346_v14 = vld [vmem:[%s610_s26 + $0x68] sm:$0xff]  ;;  %v239_v19 = vld [vmem:[%s604_s23 + $0x80] sm:$0xff] }
  0x1b   : > { %433 = vst [vmem:[%s646_s5 + $0x20] sm:$0xff] %v401_v49  ;;  %v310_v60 = vadd.f32 %v616_v2, %v271_v51  ;;  %v274_v63 = vmul.f32 %v598_v0, %v235_v47  ;;  %v403_v4 = vmax.f32 %v371_v54, 0.0  ;;  %v311_v6 = vadd.f32 %v616_v2, %v272_v58  ;;  %v240_v20 = vld [vmem:[%s604_s23 + $0x88] sm:$0xff]  ;;  %v347_v25 = vld [vmem:[%s610_s26 + $0x70] sm:$0xff]  ;;  %v348_v26 = vld [vmem:[%s610_s26 + $0x78] sm:$0xff] }
  0x1c   : > { %434 = vst [vmem:[%s646_s5 + $0x28] sm:$0xff] %v402_v53  ;;  %v404_v5 = vmax.f32 %v372_v55, 0.0  ;;  %v275_v9 = vmul.f32 %v598_v0, %v236_v52  ;;  %v373_v10 = vadd.f32 %v341_v56, %v309_v59  ;;  %v312_v12 = vadd.f32 %v616_v2, %v273_v62  ;;  %v241_v27 = vld [vmem:[%s604_s23 + $0x90] sm:$0xff]  ;;  %v242_v32 = vld [vmem:[%s604_s23 + $0x98] sm:$0xff]  ;;  %v243_v33 = vld [vmem:[%s604_s23 + $0xa0] sm:$0xff] }
  0x1d   : > { %v374_v11 = vadd.f32 %v342_v57, %v310_v60  ;;  %v313_v13 = vadd.f32 %v616_v2, %v274_v63  ;;  %435 = vst [vmem:[%s646_s5 + $0x30] sm:$0xff] %v403_v4  ;;  %v375_v15 = vadd.f32 %v343_v61, %v311_v6  ;;  %v276_v17 = vmul.f32 %v598_v0, %v237_v1  ;;  %v244_v38 = vld [vmem:[%s604_s23 + $0xa8] sm:$0xff]  ;;  %v349_v42 = vld [vmem:[%s610_s26 + $0x80] sm:$0xff]  ;;  %v351_v47 = vld [vmem:[%s610_s26 + $0x90] sm:$0xff] }
  0x1e   : > { %436 = vst [vmem:[%s646_s5 + $0x38] sm:$0xff] %v404_v5  ;;  %v314_v16 = vadd.f32 %v616_v2, %v275_v9  ;;  %v277_v18 = vmul.f32 %v598_v0, %v238_v3  ;;  %v405_v21 = vmax.f32 %v373_v10, 0.0  ;;  %v376_v23 = vadd.f32 %v344_v7, %v312_v12  ;;  %v350_v43 = vld [vmem:[%s610_s26 + $0x88] sm:$0xff]  ;;  %v245_v50 = vld [vmem:[%s604_s23 + $0xb0] sm:$0xff]  ;;  %v246_v51 = vld [vmem:[%s604_s23 + $0xb8] sm:$0xff] }
  0x1f   : > { %v406_v22 = vmax.f32 %v374_v11, 0.0  ;;  %v377_v24 = vadd.f32 %v345_v8, %v313_v13  ;;  %v407_v28 = vmax.f32 %v375_v15, 0.0  ;;  %v315_v30 = vadd.f32 %v616_v2, %v276_v17  ;;  %v352_v55 = vld [vmem:[%s610_s26 + $0x98] sm:$0xff]  ;;  %v353_v56 = vld [vmem:[%s610_s26 + $0xa0] sm:$0xff]  ;;  %v354_v62 = vld [vmem:[%s610_s26 + $0xa8] sm:$0xff] }
  0x20   : > { %v378_v29 = vadd.f32 %v346_v14, %v314_v16  ;;  %v316_v31 = vadd.f32 %v616_v2, %v277_v18  ;;  %437 = vst [vmem:[%s646_s5 + $0x40] sm:$0xff] %v405_v21  ;;  %v408_v34 = vmax.f32 %v376_v23, 0.0  ;;  %v278_v36 = vmul.f32 %v598_v0, %v239_v19  ;;  %v247_v5 = vld [vmem:[%s604_s23 + $0xc0] sm:$0xff]  ;;  %v248_v6 = vld [vmem:[%s604_s23 + $0xc8] sm:$0xff]  ;;  %v355_v11 = vld [vmem:[%s610_s26 + $0xb0] sm:$0xff] }
  0x21   : > { %438 = vst [vmem:[%s646_s5 + $0x48] sm:$0xff] %v406_v22  ;;  %v409_v35 = vmax.f32 %v377_v24, 0.0  ;;  %v279_v37 = vmul.f32 %v598_v0, %v240_v20  ;;  %439 = vst [vmem:[%s646_s5 + $0x50] sm:$0xff] %v407_v28  ;;  %v379_v40 = vadd.f32 %v347_v25, %v315_v30  ;;  %v280_v44 = vmul.f32 %v598_v0, %v241_v27  ;;  %v356_v12 = vld [vmem:[%s610_s26 + $0xb8] sm:$0xff]  ;;  %v249_v13 = vld [vmem:[%s604_s23 + $0xd0] sm:$0xff] }
  0x22   : > { %v410_v39 = vmax.f32 %v378_v29, 0.0  ;;  %v380_v41 = vadd.f32 %v348_v26, %v316_v31  ;;  %440 = vst [vmem:[%s646_s5 + $0x58] sm:$0xff] %v408_v34  ;;  %v317_v45 = vadd.f32 %v616_v2, %v278_v36  ;;  %v281_v48 = vmul.f32 %v598_v0, %v242_v32  ;;  %v250_v18 = vld [vmem:[%s604_s23 + $0xd8] sm:$0xff]  ;;  %v251_v19 = vld [vmem:[%s604_s23 + $0xe0] sm:$0xff]  ;;  %v252_v24 = vld [vmem:[%s604_s23 + $0xe8] sm:$0xff] }
  0x23   : > { %441 = vst [vmem:[%s646_s5 + $0x60] sm:$0xff] %v409_v35  ;;  %v318_v46 = vadd.f32 %v616_v2, %v279_v37  ;;  %v282_v49 = vmul.f32 %v598_v0, %v243_v33  ;;  %v411_v52 = vmax.f32 %v379_v40, 0.0  ;;  %v319_v54 = vadd.f32 %v616_v2, %v280_v44  ;;  %v357_v28 = vld [vmem:[%s610_s26 + $0xc0] sm:$0xff]  ;;  %v358_v29 = vld [vmem:[%s610_s26 + $0xc8] sm:$0xff]  ;;  %v359_v33 = vld [vmem:[%s610_s26 + $0xd0] sm:$0xff] }
  0x24   : > { %442 = vst [vmem:[%s646_s5 + $0x68] sm:$0xff] %v410_v39  ;;  %v412_v53 = vmax.f32 %v380_v41, 0.0  ;;  %v283_v57 = vmul.f32 %v598_v0, %v244_v38  ;;  %v381_v58 = vadd.f32 %v349_v42, %v317_v45  ;;  %v320_v60 = vadd.f32 %v616_v2, %v281_v48  ;;  %v253_v36 = vld [vmem:[%s604_s23 + $0xf0] sm:$0xff]  ;;  %v254_v37 = vld [vmem:[%s604_s23 + $0xf8] sm:$0xff]  ;;  %v361_v42 = vld [vmem:[%s610_s26 + $0xe0] sm:$0xff] }
  0x25   : > { %v382_v59 = vadd.f32 %v350_v43, %v318_v46  ;;  %v321_v61 = vadd.f32 %v616_v2, %v282_v49  ;;  %443 = vst [vmem:[%s646_s5 + $0x70] sm:$0xff] %v411_v52  ;;  %v383_v63 = vadd.f32 %v351_v47, %v319_v54  ;;  %v284_v3 = vmul.f32 %v598_v0, %v245_v50  ;;  %v360_v41 = vld [vmem:[%s610_s26 + $0xd8] sm:$0xff]  ;;  %v362_v48 = vld [vmem:[%s610_s26 + $0xe8] sm:$0xff] }
  0x26   : > { %444 = vst [vmem:[%s646_s5 + $0x78] sm:$0xff] %v412_v53  ;;  %v322_v1 = vadd.f32 %v616_v2, %v283_v57  ;;  %v285_v4 = vmul.f32 %v598_v0, %v246_v51  ;;  %v413_v7 = vmax.f32 %v381_v58, 0.0  ;;  %v384_v9 = vadd.f32 %v352_v55, %v320_v60  ;;  %v363_v57 = vld [vmem:[%s610_s26 + $0xf0] sm:$0xff]  ;;  %v364_v58 = vld [vmem:[%s610_s26 + $0xf8] sm:$0xff] }
  0x27   : > { %v414_v8 = vmax.f32 %v382_v59, 0.0  ;;  %v385_v10 = vadd.f32 %v353_v56, %v321_v61  ;;  %v415_v14 = vmax.f32 %v383_v63, 0.0  ;;  %v323_v16 = vadd.f32 %v616_v2, %v284_v3 }
  0x28   : > { %v386_v15 = vadd.f32 %v354_v62, %v322_v1  ;;  %v324_v17 = vadd.f32 %v616_v2, %v285_v4  ;;  %445 = vst [vmem:[%s646_s5 + $0x80] sm:$0xff] %v413_v7  ;;  %v416_v20 = vmax.f32 %v384_v9, 0.0  ;;  %v286_v22 = vmul.f32 %v598_v0, %v247_v5 }
  0x29   : > { %446 = vst [vmem:[%s646_s5 + $0x88] sm:$0xff] %v414_v8  ;;  %v417_v21 = vmax.f32 %v385_v10, 0.0  ;;  %v287_v23 = vmul.f32 %v598_v0, %v248_v6  ;;  %447 = vst [vmem:[%s646_s5 + $0x90] sm:$0xff] %v415_v14  ;;  %v387_v26 = vadd.f32 %v355_v11, %v323_v16  ;;  %v288_v30 = vmul.f32 %v598_v0, %v249_v13 }
  0x2a   : > { %v418_v25 = vmax.f32 %v386_v15, 0.0  ;;  %v388_v27 = vadd.f32 %v356_v12, %v324_v17  ;;  %448 = vst [vmem:[%s646_s5 + $0x98] sm:$0xff] %v416_v20  ;;  %v325_v31 = vadd.f32 %v616_v2, %v286_v22  ;;  %v289_v34 = vmul.f32 %v598_v0, %v250_v18 }
  0x2b   : > { %449 = vst [vmem:[%s646_s5 + $0xa0] sm:$0xff] %v417_v21  ;;  %v326_v32 = vadd.f32 %v616_v2, %v287_v23  ;;  %v290_v35 = vmul.f32 %v598_v0, %v251_v19  ;;  %v419_v38 = vmax.f32 %v387_v26, 0.0  ;;  %v327_v40 = vadd.f32 %v616_v2, %v288_v30 }
  0x2c   : > { %450 = vst [vmem:[%s646_s5 + $0xa8] sm:$0xff] %v418_v25  ;;  %v420_v39 = vmax.f32 %v388_v27, 0.0  ;;  %v291_v43 = vmul.f32 %v598_v0, %v252_v24  ;;  %v389_v44 = vadd.f32 %v357_v28, %v325_v31  ;;  %v328_v46 = vadd.f32 %v616_v2, %v289_v34 }
  0x2d   : > { %v390_v45 = vadd.f32 %v358_v29, %v326_v32  ;;  %v329_v47 = vadd.f32 %v616_v2, %v290_v35  ;;  %451 = vst [vmem:[%s646_s5 + $0xb0] sm:$0xff] %v419_v38  ;;  %v391_v49 = vadd.f32 %v359_v33, %v327_v40  ;;  %v292_v51 = vmul.f32 %v598_v0, %v253_v36 }
  0x2e   : > { %452 = vst [vmem:[%s646_s5 + $0xb8] sm:$0xff] %v420_v39  ;;  %v330_v50 = vadd.f32 %v616_v2, %v291_v43  ;;  %v293_v52 = vmul.f32 %v598_v0, %v254_v37  ;;  %v421_v53 = vmax.f32 %v389_v44, 0.0  ;;  %v392_v55 = vadd.f32 %v360_v41, %v328_v46 }
  0x2f   : > { %v422_v54 = vmax.f32 %v390_v45, 0.0  ;;  %v393_v56 = vadd.f32 %v361_v42, %v329_v47  ;;  %v423_v59 = vmax.f32 %v391_v49, 0.0  ;;  %v331_v61 = vadd.f32 %v616_v2, %v292_v51 }
  0x30   : > { %v394_v60 = vadd.f32 %v362_v48, %v330_v50  ;;  %v332_v62 = vadd.f32 %v616_v2, %v293_v52  ;;  %453 = vst [vmem:[%s646_s5 + $0xc0] sm:$0xff] %v421_v53  ;;  %v424_v0 = vmax.f32 %v392_v55, 0.0 }
  0x31   : > { %454 = vst [vmem:[%s646_s5 + $0xc8] sm:$0xff] %v422_v54  ;;  %v425_v63 = vmax.f32 %v393_v56, 0.0  ;;  %455 = vst [vmem:[%s646_s5 + $0xd0] sm:$0xff] %v423_v59  ;;  %v395_v3 = vadd.f32 %v363_v57, %v331_v61 }
  0x32   : > { %v426_v1 = vmax.f32 %v394_v60, 0.0  ;;  %v396_v4 = vadd.f32 %v364_v58, %v332_v62  ;;  %456 = vst [vmem:[%s646_s5 + $0xd8] sm:$0xff] %v424_v0 }
  0x33   : > { %457 = vst [vmem:[%s646_s5 + $0xe0] sm:$0xff] %v425_v63  ;;  %v427_v5 = vmax.f32 %v395_v3, 0.0 }
  0x34   : > { %458 = vst [vmem:[%s646_s5 + $0xe8] sm:$0xff] %v426_v1  ;;  %v428_v6 = vmax.f32 %v396_v4, 0.0 }
  0x35   : > { %459 = vst [vmem:[%s646_s5 + $0xf0] sm:$0xff] %v427_v5 }
  0x36   : > { %460 = vst [vmem:[%s646_s5 + $0xf8] sm:$0xff] %v428_v6 }
  0x37 PF: > { %s14_s15 = sadd.s32 1, %s558_s15  }
  0x38   : > { %p11_p4 = scmp.ge.s32.totalorder %s14_s15, 4  }
  0x3a   :  { %13 = sbr.rel (!%p11_p4) target bundleno = 1 (0x1), region = 69 }

// kernel: basic_block_forward.4
= control target key start
LH: loop header
LB: loop body
LE: loop exit
PB: predicated region body
PF: predicated region fallthrough
CT: control target
= control target key end

     0   :  { %s5382_s18 = smov 0   ;;  %s6558_s0 = inlined_call_operand.vmem [shape: f32[512,128], index: 0, kind: input, shape index: {}]   ;;  %s6559_s1 = inlined_call_operand.vmem [shape: f32[1,128], index: 1, kind: input, shape index: {}]   ;;  %s6560_s2 = inlined_call_operand.vmem [shape: f32[1,128], index: 2, kind: input, shape index: {}]   ;;  %s6561_s3 = inlined_call_operand.vmem [shape: bf16[9,128,128], index: 3, kind: input, shape index: {}]   ;;  %s6562_s4 = inlined_call_operand.vmem [shape: f32[512,128], index: 4, kind: output, shape index: {0}]   ;;  %s6563_s5 = inlined_call_operand.vmem [shape: f32[2,8,128], index: 5, kind: output, shape index: {1}]  }
   0x1 LB: > { %s5388_s19 = sadd.s32 4294967295, %s5349_s18   ;;  %p4121_p0 = scmp.ge.s32.totalorder %s5349_s18, 1  ;;  %s5349_s18 = sphi %s5382_s18, %s16_s18  }
   0x2   : > { %p191_p1 = scmp.lt.s32.totalorder %s5349_s18, 3 }
   0x4   : > { %p192_p2 = pnand %p4121_p0, %p191_p1 }
   0x5   : > { %v5260_v0 = vld [vmem:[%s6561_s3] sm:$0xff] (!%p192_p2)   ;;  %v5351_v2 = vmov (!%p192_p2), 0   ;;  %s4122_s24 = sshll.u32 (!%p192_p2), %s5388_s19, 5  ;;  %v5262_v3 = vld [vmem:[%s6561_s3 + $0x8] sm:$0xff] (!%p192_p2)   ;;  %v5264_v5 = vld [vmem:[%s6561_s3 + $0x10] sm:$0xff] (!%p192_p2)   ;;  %vm404_vm0 = vcmask (!%p192_p2), 1040384  }
   0x6   : > { %195 = sbr.rel (%p192_p2) target bundleno = 561 (0x231), region = 36  ;;  %v5261_v1 = vld [vmem:[%s6561_s3 + $0xc0] sm:$0xff] (!%p192_p2)   ;;  %398 = vst [vmem:[#allocation2] sm:$0xff] (!%p192_p2), %v5351_v2  ;;  %4563 = vmatprep.mubr.bf16.mxu1 (!%p192_p2), %v5351_v2  ;;  %399 = vst [vmem:[#allocation2 + $0x8] sm:$0xff] (!%p192_p2), %v5351_v2  ;;  %4547 = vmatprep.subr.bf16.mxu1 (!%p192_p2), %v5260_v0  ;;  %p224_p3 = scmp.lt.s32.totalorder (!%p192_p2), %s4122_s24, 63  ;;  %v5263_v4 = vld [vmem:[%s6561_s3 + $0xc8] sm:$0xff] (!%p192_p2)  }
   0x7   : > { %401 = vst [vmem:[#allocation2 + $0x110] sm:$0xff] (!%p192_p2), %v5351_v2  ;;  %402 = vst [vmem:[#allocation2 + $0x118] sm:$0xff] (!%p192_p2), %v5351_v2  ;;  %4739 = vmatprep.subr.bf16.mxu0 (!%p192_p2), %v5261_v1  ;;  %4548 = vmatpush3.bf16.msra.mxu1 (!%p192_p2), %v5260_v0  ;;  %v5265_v6 = vld [vmem:[%s6561_s3 + $0xd0] sm:$0xff] (!%p192_p2)   ;;  %v5266_v7 = vld [vmem:[%s6561_s3 + $0x18] sm:$0xff] (!%p192_p2)   ;;  %vm405_vm1 = vsmask.f32 (!%p192_p2), 256 }
   0x8   : > { %4740 = vmatpush3.bf16.msra.mxu0 (!%p192_p2), %v5261_v1  ;;  %4549 = vmatprep.subr.bf16.mxu1 (!%p192_p2), %v5262_v3  ;;  %v5267_v8 = vld [vmem:[%s6561_s3 + $0xd8] sm:$0xff] (!%p192_p2)   ;;  %v5268_v9 = vld [vmem:[%s6561_s3 + $0x20] sm:$0xff] (!%p192_p2)   ;;  %v5270_v11 = vld [vmem:[%s6561_s3 + $0x28] sm:$0xff] (!%p192_p2)   ;;  %vm649_vm3 = vcmask (!%p192_p2), 1047552   ;;  %vm455_vm4 = vsmask.f32 (!%p192_p2), 7938 }
   0x9   : > { %4741 = vmatprep.subr.bf16.mxu0 (!%p192_p2), %v5263_v4  ;;  %v5269_v10 = vld [vmem:[%s6561_s3 + $0xe0] sm:$0xff] (!%p192_p2)   ;;  %v5271_v12 = vld [vmem:[%s6561_s3 + $0xe8] sm:$0xff] (!%p192_p2)   ;;  %vm5454_vm2 = vmand (!%p192_p2), %vm404_vm0, %vm405_vm1  ;;  %vm1761_vm7 = vcmask (!%p192_p2), 1046528   ;;  %vm1246_vm8 = vsmask.f32 (!%p192_p2), 7424  ;;  %p235_p4 = scmp.lt.s32.totalorder (!%p192_p2), %s5388_s19, 1 }
   0xa   : > { %v5444_v15 = vld [vmem:[%s6559_s1] ss:$0 sm:$0xff] (!%p192_p2)  ;;  %v407_v20 = vld [vmem:[#allocation2 + $0x10] sm:$0x1] (!%p192_p2)  ;;  %v5274_v34 = vld [vmem:[%s6561_s3 + $0x38] sm:$0xff] (!%p192_p2)   ;;  %vm4027_vm9 = vcmask (!%p192_p2), 1041408  }
   0xb   : > { %4550 = vmatpush3.bf16.msra.mxu1 (!%p192_p2), %v5262_v3  ;;  %v5451_v18 = vld [vmem:[%s6560_s2] ss:$0 sm:$0xff] (!%p192_p2)  ;;  %v408_v21 = vsel (!%p192_p2), %vm5454_vm2, 0, %v407_v20  ;;  %v5272_v22 = vld [vmem:[%s6561_s3 + $0x30] sm:$0xff] (!%p192_p2)   ;;  %v5275_v45 = vld [vmem:[%s6561_s3 + $0xf8] sm:$0xff] (!%p192_p2)  }
   0xc   : > { %4742 = vmatpush3.bf16.msra.mxu0 (!%p192_p2), %v5263_v4  ;;  %4551 = vmatprep.subr.bf16.mxu1 (!%p192_p2), %v5264_v5  ;;  %409 = vst [vmem:[#allocation2 + $0x10] sm:$0x1] (!%p192_p2), %v408_v21  ;;  %v410_v28 = vld [vmem:[#allocation2 + $0x20] sm:$0x1] (!%p192_p2)  ;;  %v5273_v29 = vld [vmem:[%s6561_s3 + $0xf0] sm:$0xff] (!%p192_p2)   ;;  %vm5509_vm5 = vmand (!%p192_p2), %vm649_vm3, %vm455_vm4 }
   0xd   : > { %s6571_s24 = smov (!%p224_p3, %s4122_s24), 63  ;;  %4743 = vmatprep.subr.bf16.mxu0 %v5265_v6  ;;  %v411_v33 = vsel %vm5454_vm2, 0, %v410_v28  ;;  %v413_v40 = vld [vmem:[#allocation2 + $0x30] sm:$0x1]  ;;  %v416_v55 = vld [vmem:[#allocation2 + $0x40] sm:$0x1]  ;;  %vm5589_vm6 = vmand %vm404_vm0, %vm455_vm4 }
   0xe   : > { %s4123_s12 = sshll.u32 %s6571_s24, 3  ;;  %412 = vst [vmem:[#allocation2 + $0x20] sm:$0x1] %v411_v33  ;;  %v414_v44 = vsel %vm5454_vm2, 0, %v413_v40  ;;  %v5276_v58 = vld [vmem:[%s6561_s3 + $0x100] sm:$0xff]   ;;  %v417_v60 = vsel %vm5454_vm2, 0, %v416_v55 }
   0xf   : > { %4552 = vmatpush3.bf16.msra.mxu1 %v5264_v5  ;;  %s5431_s21 = scalar_lea.vmem %s6558_s0, %s4123_s12  ;;  %415 = vst [vmem:[#allocation2 + $0x30] sm:$0x1] %v414_v44  ;;  %418 = vst [vmem:[#allocation2 + $0x40] sm:$0x1] %v417_v60  ;;  %v5277_v5 = vld [vmem:[%s6561_s3 + $0x140] sm:$0xff]   ;;  %s6510_s29 = scalar_lea.vmem %s6562_s4, %s4123_s12 }
  0x10   : > { %4744 = vmatpush3.bf16.msra.mxu0 %v5265_v6  ;;  %4553 = vmatprep.subr.bf16.mxu1 %v5266_v7  ;;  %v240_v13 = vld [vmem:[%s5431_s21] sm:$0xff]  ;;  %v241_v14 = vld [vmem:[%s5431_s21 + $0x8] sm:$0xff]  ;;  %v242_v25 = vld [vmem:[%s5431_s21 + $0x10] sm:$0xff]  ;;  %s6573_s19 = smov (!%p235_p4, %s5388_s19), 1 }
  0x11   : > { %4745 = vmatprep.subr.bf16.mxu0 %v5267_v8  ;;  %v279_v16 = vmul.f32 %v5444_v15, %v240_v13  ;;  %v280_v17 = vmul.f32 %v5444_v15, %v241_v14  ;;  %v243_v26 = vld [vmem:[%s5431_s21 + $0x18] sm:$0xff]  ;;  %v281_v27 = vmul.f32 %v5444_v15, %v242_v25  ;;  %v244_v38 = vld [vmem:[%s5431_s21 + $0x20] sm:$0xff]  ;;  %v245_v39 = vld [vmem:[%s5431_s21 + $0x28] sm:$0xff]  ;;  %s4126_s24 = sshll.u32 %s6573_s19, 3 }
  0x12   : > { %v282_v32 = vmul.f32 %v5444_v15, %v243_v26  ;;  %v283_v42 = vmul.f32 %v5444_v15, %v244_v38  ;;  %v284_v43 = vmul.f32 %v5444_v15, %v245_v39  ;;  %v246_v49 = vld [vmem:[%s5431_s21 + $0x30] sm:$0xff]  ;;  %v247_v50 = vld [vmem:[%s5431_s21 + $0x38] sm:$0xff]  ;;  %v248_v6 = vld [vmem:[%s5431_s21 + $0x40] sm:$0xff] }
  0x13   : > { %4554 = vmatpush3.bf16.msra.mxu1 %v5266_v7  ;;  %v318_v23 = vadd.f32 %v5451_v18, %v279_v16  ;;  %v319_v24 = vadd.f32 %v5451_v18, %v280_v17  ;;  %v320_v35 = vadd.f32 %v5451_v18, %v281_v27  ;;  %v285_v53 = vmul.f32 %v5444_v15, %v246_v49  ;;  %v651_v57 = vld [vmem:[#allocation2 + $0x10] sm:$0xff]  ;;  %v249_v7 = vld [vmem:[%s5431_s21 + $0x48] sm:$0xff]  ;;  %v251_v27 = vld [vmem:[%s5431_s21 + $0x58] sm:$0xff] }
  0x14   : > { %4746 = vmatpush3.bf16.msra.mxu0 %v5267_v8  ;;  %4555 = vmatprep.subr.bf16.mxu1 %v5268_v9  ;;  %v321_v37 = vadd.f32 %v5451_v18, %v282_v32  ;;  %v322_v51 = vadd.f32 %v5451_v18, %v283_v42  ;;  %v323_v52 = vadd.f32 %v5451_v18, %v284_v43  ;;  %v250_v20 = vld [vmem:[%s5431_s21 + $0x50] sm:$0xff]  ;;  %v422_v28 = vld [vmem:[#allocation2 + $0x60] sm:$0x1]  ;;  %v253_v49 = vld [vmem:[%s5431_s21 + $0x68] sm:$0xff] }
  0x15   : > { %4747 = vmatprep.subr.bf16.mxu0 %v5269_v10  ;;  %v350_v30 = vmax.f32 %v318_v23, 0.0  ;;  %v351_v31 = vmax.f32 %v319_v24, 0.0  ;;  %v352_v41 = vmax.f32 %v320_v35, 0.0  ;;  %v286_v54 = vmul.f32 %v5444_v15, %v247_v50  ;;  %v657_v21 = vld [vmem:[#allocation2 + $0x20] sm:$0xff]  ;;  %v5282_v42 = vld [vmem:[%s6561_s3 + $0x110] sm:$0xff]  }
  0x16   : > { %v353_v48 = vmax.f32 %v321_v37, 0.0  ;;  %v354_v62 = vmax.f32 %v322_v51, 0.0  ;;  %v355_v63 = vmax.f32 %v323_v52, 0.0  ;;  %v324_v0 = vadd.f32 %v5451_v18, %v285_v53  ;;  %v663_v40 = vld [vmem:[#allocation2 + $0x30] sm:$0xff]  ;;  %v669_v51 = vld [vmem:[#allocation2 + $0x40] sm:$0xff] }
  0x17   : > { %4556 = vmatpush3.bf16.msra.mxu1 %v5268_v9  ;;  %v5478_v36 = vpack.c.bf16 %v351_v31, %v350_v30  ;;  %v325_v1 = vadd.f32 %v5451_v18, %v286_v54  ;;  %v288_v16 = vmul.f32 %v5444_v15, %v249_v7  ;;  %v5279_v30 = vld [vmem:[%s6561_s3 + $0x108] sm:$0xff]   ;;  %v289_v32 = vmul.f32 %v5444_v15, %v250_v20  ;;  %v425_v50 = vld [vmem:[#allocation2 + $0x70] sm:$0x1]  ;;  %v5304_v61 = vld [vmem:[%s6561_s3 + $0x60] sm:$0xff]  }
  0x18   : > { %4748 = vmatpush3.bf16.msra.mxu0 %v5269_v10  ;;  %4557 = vmatprep.subr.bf16.mxu1 %v5270_v11  ;;  %v5503_v59 = vpack.c.bf16 %v353_v48, %v352_v41  ;;  %v5523_v8 = vpack.c.bf16 %v355_v63, %v354_v62  ;;  %v356_v9 = vmax.f32 %v324_v0, 0.0  ;;  %v423_v33 = vsel %vm5454_vm2, 0, %v422_v28  ;;  %v252_v48 = vld [vmem:[%s5431_s21 + $0x60] sm:$0xff]  ;;  %v254_v63 = vld [vmem:[%s5431_s21 + $0x70] sm:$0xff]  ;;  %v255_v0 = vld [vmem:[%s5431_s21 + $0x78] sm:$0xff] }
  0x19   : > { %4749 = vmatprep.subr.bf16.mxu0 %v5271_v12  ;;  %v506_v46 = vshrl.u32 %v5478_v36, 16  ;;  %v509_v47 = vshll.u32 %v5478_v36, 16  ;;  %v357_v10 = vmax.f32 %v325_v1, 0.0  ;;  %v327_v31 = vadd.f32 %v5451_v18, %v288_v16  ;;  %424 = vst [vmem:[#allocation2 + $0x60] sm:$0x1] %v423_v33  ;;  %v256_v33 = vld [vmem:[%s5431_s21 + $0x80] sm:$0xff] }
  0x1a   : > { %v513_v3 = vshrl.u32 %v5503_v59, 16  ;;  %v516_v4 = vshll.u32 %v5503_v59, 16  ;;  %v520_v23 = vshrl.u32 %v5523_v8, 16  ;;  %v523_v24 = vshll.u32 %v5523_v8, 16  ;;  %v428_v1 = vld [vmem:[#allocation2 + $0x80] sm:$0x1] }
  0x1b   : > { %4558 = vmatpush3.bf16.msra.mxu1 %v5270_v11  ;;  %v5498_v56 = vrot.slane %v506_v46, 7  ;;  %v287_v11 = vmul.f32 %v5444_v15, %v248_v6  ;;  %v5541_v25 = vpack.c.bf16 %v357_v10, %v356_v9  ;;  %v359_v41 = vmax.f32 %v327_v31, 0.0  ;;  %v5285_v10 = vld [vmem:[%s6561_s3 + $0x118] sm:$0xff]  }
  0x1c   : > { %4750 = vmatpush3.bf16.msra.mxu0 %v5271_v12  ;;  %4559 = vmatprep.subr.bf16.mxu1 %v5272_v22  ;;  %v419_v12 = vld [vmem:[#allocation2 + $0x50] sm:$0x1]  ;;  %v5528_v14 = vrot.slane %v513_v3, 7  ;;  %v290_v43 = vmul.f32 %v5444_v15, %v251_v27  ;;  %v328_v44 = vadd.f32 %v5451_v18, %v289_v32  ;;  %v291_v55 = vmul.f32 %v5444_v15, %v252_v48  ;;  %v457_v27 = vld [vmem:[#allocation2 + $0x18] sm:$0x1] }
  0x1d   : > { %4751 = vmatprep.subr.bf16.mxu0 %v5273_v29  ;;  %v511_v2 = vor.u32 %v509_v47, %v5498_v56  ;;  %v420_v17 = vsel %vm5454_vm2, 0, %v419_v12  ;;  %v326_v26 = vadd.f32 %v5451_v18, %v287_v11  ;;  %v527_v35 = vshrl.u32 %v5541_v25, 16  ;;  %v5570_v47 = vld [vmem:[%s6561_s3 + $0x150] sm:$0xff]  }
  0x1e   : > { %421 = vst [vmem:[#allocation2 + $0x50] sm:$0x1] %v420_v17  ;;  %v530_v37 = vshll.u32 %v5541_v25, 16  ;;  %v329_v53 = vadd.f32 %v5451_v18, %v290_v43  ;;  %v360_v54 = vmax.f32 %v328_v44, 0.0  ;;  %v292_v60 = vmul.f32 %v5444_v15, %v253_v49 }
  0x1f   : > { %4560 = vmatpush3.bf16.msra.mxu1 %v5272_v22  ;;  %v652_v13 = vsel %vm5509_vm5, %v511_v2, %v651_v57  ;;  %v5537_v22 = vld [vmem:[%s6561_s3 + $0x148] sm:$0xff]   ;;  %v358_v38 = vmax.f32 %v326_v26, 0.0  ;;  %v5565_v46 = vrot.slane %v527_v35, 7  ;;  %v426_v62 = vsel %vm5454_vm2, 0, %v425_v50 }
  0x20   : > { %4752 = vmatpush3.bf16.msra.mxu0 %v5273_v29  ;;  %4561 = vmatprep.subr.bf16.mxu1 %v5274_v34  ;;  %653 = vst [vmem:[#allocation2 + $0x10] sm:$0xff] %v652_v13  ;;  %v518_v29 = vor.u32 %v516_v4, %v5528_v14  ;;  %v330_v6 = vadd.f32 %v5451_v18, %v291_v55  ;;  %427 = vst [vmem:[#allocation2 + $0x70] sm:$0x1] %v426_v62  ;;  %v429_v20 = vsel %vm5454_vm2, 0, %v428_v1  ;;  %v257_v35 = vld [vmem:[%s5431_s21 + $0x88] sm:$0xff]  ;;  %v258_v55 = vld [vmem:[%s5431_s21 + $0x90] sm:$0xff] }
  0x21   : > { %4753 = vmatprep.subr.bf16.mxu0 %v5275_v45  ;;  %4755 = vmatprep.mubr.bf16.mxu0 %v652_v13  ;;  %v5574_v52 = vpack.c.bf16 %v359_v41, %v358_v38  ;;  %v331_v9 = vadd.f32 %v5451_v18, %v292_v60  ;;  %v293_v11 = vmul.f32 %v5444_v15, %v254_v63  ;;  %v458_v31 = vsel %vm5589_vm6, 0, %v457_v27  ;;  %v431_v41 = vld [vmem:[#allocation2 + $0x90] sm:$0x1]  ;;  %v260_v27 = vld [vmem:[%s5431_s21 + $0xa0] sm:$0xff] }
  0x22   : > { %v658_v39 = vsel %vm5509_vm5, %v518_v29, %v657_v21  ;;  %v294_v12 = vmul.f32 %v5444_v15, %v255_v0  ;;  %v362_v17 = vmax.f32 %v330_v6, 0.0  ;;  %v5281_v21 = vld [vmem:[%s6561_s3 + $0x158] sm:$0xff]   ;;  %430 = vst [vmem:[#allocation2 + $0x80] sm:$0x1] %v429_v20  ;;  %459 = vst [vmem:[#allocation2 + $0x18] sm:$0x1] %v458_v31  ;;  %v295_v48 = vmul.f32 %v5444_v15, %v256_v33 }
  0x23   : > { %4562 = vmatpush3.bf16.msra.mxu1 %v5274_v34  ;;  %v5553_v34 = vrot.slane %v520_v23, 7  ;;  %659 = vst [vmem:[#allocation2 + $0x20] sm:$0xff] %v658_v39  ;;  %v534_v3 = vshrl.u32 %v5574_v52, 16  ;;  %v537_v4 = vshll.u32 %v5574_v52, 16  ;;  %v296_v49 = vmul.f32 %v5444_v15, %v257_v35  ;;  %v259_v0 = vld [vmem:[%s5431_s21 + $0x98] sm:$0xff]  ;;  %v261_v35 = vld [vmem:[%s5431_s21 + $0xa8] sm:$0xff] }
  0x24   : > { %4754 = vmatpush3.bf16.msra.mxu0 %v5275_v45  ;;  %4595 = vmatprep.subr.bf16.mxu1 %v5276_v58  ;;  %v333_v26 = vadd.f32 %v5451_v18, %v294_v12  ;;  %v297_v12 = vmul.f32 %v5444_v15, %v258_v55 }
  0x25   : > { %4787 = vmatprep.subr.bf16.mxu0 %v5277_v5  ;;  %v525_v45 = vor.u32 %v523_v24, %v5553_v34  ;;  %v675_v23 = vld [vmem:[#allocation2 + $0x50] sm:$0xff]  ;;  %v332_v24 = vadd.f32 %v5451_v18, %v293_v11  ;;  %v335_v60 = vadd.f32 %v5451_v18, %v296_v49 }
  0x26   : > { %4564 = vmatmul.mubr.bf16.vlgmr.msra.gmra.mrb[0].mxu1 %v652_v13  ;;  %v5605_v13 = vrot.slane %v534_v3, 7  ;;  %v336_v31 = vadd.f32 %v5451_v18, %v297_v12 }
  0x27   : > { %4596 = vmatpush3.bf16.msra.mxu1 %v5276_v58  ;;  %4756 = vmatmul.mubr.bf16.vlgmr.msra.gmra.mrb[0].mxu0 %v658_v39  ;;  %v664_v57 = vsel %vm5509_vm5, %v525_v45, %v663_v40  ;;  %v532_v58 = vor.u32 %v530_v37, %v5565_v46  ;;  %v5622_v32 = vld [vmem:[#allocation2 + $0x10] sm:$0xfe]  ;;  %v5629_v37 = vld [vmem:[%s6561_s3 + $0x160] sm:$0xff]   ;;  %v365_v40 = vmax.f32 %v333_v26, 0.0  ;;  %v367_v11 = vmax.f32 %v335_v60, 0.0 }
  0x28   : > { %4567 = vmatprep.mubr.bf16.mxu1 %v658_v39  ;;  %4788 = vmatpush3.bf16.msra.mxu0 %v5277_v5  ;;  %665 = vst [vmem:[#allocation2 + $0x30] sm:$0xff] %v664_v57  ;;  %v361_v5 = vmax.f32 %v329_v53, 0.0  ;;  %v539_v28 = vor.u32 %v537_v4, %v5605_v13  ;;  %v364_v39 = vmax.f32 %v332_v24, 0.0  ;;  %v681_v45 = vld [vmem:[#allocation2 + $0x60] sm:$0xff]  ;;  %v463_v26 = vld [vmem:[#allocation2 + $0x38] sm:$0x1] }
  0x29   : > { %4597 = vmatprep.subr.bf16.mxu1 %v5279_v30  ;;  %4789 = vmatprep.subr.bf16.mxu0 %v5537_v22  ;;  %v670_v7 = vsel %vm5509_vm5, %v532_v58, %v669_v51  ;;  %v334_v58 = vadd.f32 %v5451_v18, %v295_v48  ;;  %v464_v33 = vsel %vm5589_vm6, 0, %v463_v26  ;;  %v262_v60 = vld [vmem:[%s5431_s21 + $0xb0] sm:$0xff]  ;;  %v469_v26 = vld [vmem:[#allocation2 + $0x58] sm:$0x1] }
  0x2a   : > { %4759 = vmatprep.mubr.bf16.mxu0 %v664_v57  ;;  %671 = vst [vmem:[#allocation2 + $0x40] sm:$0xff] %v670_v7  ;;  %v5607_v16 = vpack.c.bf16 %v361_v5, %v360_v54  ;;  %v676_v43 = vsel %vm5509_vm5, %v539_v28, %v675_v23  ;;  %v5645_v53 = vpack.c.bf16 %v365_v40, %v364_v39  ;;  %v460_v54 = vld [vmem:[#allocation2 + $0x28] sm:$0x1]  ;;  %v5655_v63 = vld [vmem:[#allocation2 + $0x20] sm:$0xfe]  ;;  %v2422_v5 = vrot.slane %v5622_v32, 1 }
  0x2b   : > { %4598 = vmatpush3.bf16.msra.mxu1 %v5279_v30  ;;  %677 = vst [vmem:[#allocation2 + $0x50] sm:$0xff] %v676_v43  ;;  %v461_v62 = vsel %vm5589_vm6, 0, %v460_v54  ;;  %v693_v23 = vld [vmem:[#allocation2 + $0x80] sm:$0xff]  ;;  %v654_v28 = vld [vmem:[#allocation2 + $0x18] sm:$0x1]  ;;  %v5290_v39 = vld [vmem:[%s6561_s3 + $0x128] sm:$0xff]  }
  0x2c   : > { %4599 = vmatprep.subr.bf16.mxu1 %v5282_v42  ;;  %4790 = vmatpush3.bf16.msra.mxu0 %v5537_v22  ;;  %v363_v22 = vmax.f32 %v331_v9, 0.0  ;;  %v541_v29 = vshrl.u32 %v5607_v16, 16  ;;  %v544_v30 = vshll.u32 %v5607_v16, 16  ;;  %v555_v3 = vshrl.u32 %v5645_v53, 16  ;;  %462 = vst [vmem:[#allocation2 + $0x28] sm:$0x1] %v461_v62 }
  0x2d   : > { %4791 = vmatprep.subr.bf16.mxu0 %v5570_v47  ;;  %v558_v4 = vshll.u32 %v5645_v53, 16  ;;  %v687_v9 = vld [vmem:[#allocation2 + $0x70] sm:$0xff]  ;;  %465 = vst [vmem:[#allocation2 + $0x38] sm:$0x1] %v464_v33 }
  0x2e   : > { %4568 = vmatmul.mubr.bf16.gmra.mrb[4].mxu1 %v664_v57  ;;  %v5631_v38 = vpack.c.bf16 %v363_v22, %v362_v17  ;;  %v5639_v44 = vrot.slane %v541_v29, 7  ;;  %v434_v17 = vld [vmem:[#allocation2 + $0xa0] sm:$0x1]  ;;  %v298_v22 = vmul.f32 %v5444_v15, %v259_v0 }
  0x2f   : > { %4571 = vmatprep.mubr.bf16.mxu1 %v670_v7  ;;  %4600 = vmatpush3.bf16.msra.mxu1 %v5282_v42  ;;  %v5288_v42 = vld [vmem:[%s6561_s3 + $0x120] sm:$0xff]   ;;  %v435_v24 = vsel %vm5454_vm2, 0, %v434_v17  ;;  %v5708_v55 = vld [vmem:[#allocation2 + $0x30] sm:$0xfe]  ;;  %v301_v17 = vmul.f32 %v5444_v15, %v262_v60 }
  0x30   : > { %4760 = vmatmul.mubr.bf16.gmra.mrb[4].mxu0 %v670_v7  ;;  %4601 = vmatprep.subr.bf16.mxu1 %v5285_v10  ;;  %v548_v50 = vshrl.u32 %v5631_v38, 16  ;;  %v551_v51 = vshll.u32 %v5631_v38, 16  ;;  %v546_v57 = vor.u32 %v544_v30, %v5639_v44  ;;  %v5668_v7 = vld [vmem:[%s6561_s3 + $0x168] sm:$0xff]   ;;  %v2425_v30 = vrot.slane %v5655_v63, 1  ;;  %436 = vst [vmem:[#allocation2 + $0xa0] sm:$0x1] %v435_v24 }
  0x31   : > { %4792 = vmatpush3.bf16.msra.mxu0 %v5570_v47  ;;  %4763 = vmatprep.mubr.bf16.mxu0 %v676_v43  ;;  %v432_v47 = vsel %vm5454_vm2, 0, %v431_v41  ;;  %v340_v33 = vadd.f32 %v5451_v18, %v301_v17 }
  0x32   : > { %4793 = vmatprep.subr.bf16.mxu0 %v5281_v21  ;;  %433 = vst [vmem:[#allocation2 + $0x90] sm:$0x1] %v432_v47  ;;  %v5658_v1 = vrot.slane %v548_v50, 7  ;;  %v682_v6 = vsel %vm5509_vm5, %v546_v57, %v681_v45  ;;  %v437_v45 = vld [vmem:[#allocation2 + $0xb0] sm:$0x1]  ;;  %v368_v50 = vmax.f32 %v336_v31, 0.0  ;;  %v300_v57 = vmul.f32 %v5444_v15, %v261_v35 }
  0x33   : > { %4602 = vmatpush3.bf16.msra.mxu1 %v5285_v10  ;;  %v366_v10 = vmax.f32 %v334_v58, 0.0  ;;  %683 = vst [vmem:[#allocation2 + $0x60] sm:$0xff] %v682_v6  ;;  %v466_v47 = vld [vmem:[#allocation2 + $0x48] sm:$0x1]  ;;  %v438_v58 = vsel %vm5454_vm2, 0, %v437_v45  ;;  %v264_v35 = vld [vmem:[%s5431_s21 + $0xc0] sm:$0xff] }
  0x34   : > { %4603 = vmatprep.subr.bf16.mxu1 %v5288_v42  ;;  %v553_v20 = vor.u32 %v551_v51, %v5658_v1  ;;  %v299_v51 = vmul.f32 %v5444_v15, %v260_v27  ;;  %439 = vst [vmem:[#allocation2 + $0xb0] sm:$0x1] %v438_v58  ;;  %v339_v12 = vadd.f32 %v5451_v18, %v300_v57  ;;  %v5287_v27 = vld [vmem:[%s6561_s3 + $0x178] sm:$0xff]   ;;  %v470_v45 = vsel %vm5589_vm6, 0, %v469_v26 }
  0x35   : > { %4794 = vmatpush3.bf16.msra.mxu0 %v5281_v21  ;;  %v5673_v21 = vrot.slane %v555_v3, 7  ;;  %v5679_v29 = vpack.c.bf16 %v367_v11, %v366_v10  ;;  %v660_v3 = vld [vmem:[#allocation2 + $0x28] sm:$0x1]  ;;  %471 = vst [vmem:[#allocation2 + $0x58] sm:$0x1] %v470_v45  ;;  %v266_v45 = vld [vmem:[%s5431_s21 + $0xd0] sm:$0xff] }
  0x36   : > { %4572 = vmatmul.mubr.bf16.gmra.mrb[8].mxu1 %v676_v43  ;;  %4795 = vmatprep.subr.bf16.mxu0 %v5629_v37  ;;  %v688_v40 = vsel %vm5509_vm5, %v553_v20, %v687_v9  ;;  %v337_v43 = vadd.f32 %v5451_v18, %v298_v22  ;;  %v263_v9 = vld [vmem:[%s5431_s21 + $0xb8] sm:$0xff]  ;;  %v661_v10 = vsel %vm5454_vm2, %v5528_v14, %v660_v3  ;;  %v440_v20 = vld [vmem:[#allocation2 + $0xc0] sm:$0x1]  ;;  %v371_v31 = vmax.f32 %v339_v12, 0.0  ;;  %v472_v12 = vld [vmem:[#allocation2 + $0x68] sm:$0x1] }
  0x37   : > { %4575 = vmatprep.mubr.bf16.mxu1 %v682_v6  ;;  %4604 = vmatpush3.bf16.msra.mxu1 %v5288_v42  ;;  %v560_v41 = vor.u32 %v558_v4, %v5673_v21  ;;  %v655_v42 = vsel %vm5454_vm2, %v5498_v56, %v654_v28  ;;  %689 = vst [vmem:[#allocation2 + $0x70] sm:$0xff] %v688_v40  ;;  %v562_v48 = vshrl.u32 %v5679_v29, 16  ;;  %v565_v49 = vshll.u32 %v5679_v29, 16  ;;  %v705_v58 = vld [vmem:[#allocation2 + $0xa0] sm:$0xff] }
  0x38   : > { %4764 = vmatmul.mubr.bf16.gmra.mrb[8].mxu0 %v682_v6  ;;  %656 = vst [vmem:[#allocation2 + $0x18] sm:$0x1] %v655_v42  ;;  %v369_v54 = vmax.f32 %v337_v43, 0.0  ;;  %4605 = vmatprep.subr.bf16.mxu1 %v5290_v39  ;;  %v338_v4 = vadd.f32 %v5451_v18, %v299_v51  ;;  %v467_v6 = vsel %vm5589_vm6, 0, %v466_v47  ;;  %662 = vst [vmem:[#allocation2 + $0x28] sm:$0x1] %v661_v10 }
  0x39   : > { %4796 = vmatpush3.bf16.msra.mxu0 %v5629_v37  ;;  %4767 = vmatprep.mubr.bf16.mxu0 %v688_v40  ;;  %v5703_v56 = vsel %vm5509_vm5, %v560_v41, %v693_v23  ;;  %v5286_v37 = vld [vmem:[%s6561_s3 + $0x170] sm:$0xff]   ;;  %v5715_v62 = vrot.slane %v562_v48, 7  ;;  %468 = vst [vmem:[#allocation2 + $0x48] sm:$0x1] %v467_v6  ;;  %v302_v24 = vmul.f32 %v5444_v15, %v263_v9  ;;  %v441_v14 = vsel %vm5454_vm2, 0, %v440_v20 }
  0x3a   : > { %4797 = vmatprep.subr.bf16.mxu0 %v5668_v7  ;;  %695 = vst [vmem:[#allocation2 + $0x80] sm:$0xff] %v5703_v56  ;;  %v699_v0 = vld [vmem:[#allocation2 + $0x90] sm:$0xff]  ;;  %v5724_v11 = vpack.c.bf16 %v369_v54, %v368_v50  ;;  %v370_v22 = vmax.f32 %v338_v4, 0.0  ;;  %442 = vst [vmem:[#allocation2 + $0xc0] sm:$0x1] %v441_v14  ;;  %v2428_v42 = vrot.slane %v5708_v55, 1 }
  0x3b   : > { %4606 = vmatpush3.bf16.msra.mxu1 %v5290_v39  ;;  %v567_v23 = vor.u32 %v565_v49, %v5715_v62  ;;  %v265_v39 = vld [vmem:[%s5431_s21 + $0xc8] sm:$0xff]  ;;  %v666_v41 = vld [vmem:[#allocation2 + $0x38] sm:$0x1]  ;;  %v341_v43 = vadd.f32 %v5451_v18, %v302_v24  ;;  %v443_v48 = vld [vmem:[#allocation2 + $0xd0] sm:$0x1]  ;;  %v372_v54 = vmax.f32 %v340_v33, 0.0 }
  0x3c   : > { %v569_v28 = vshrl.u32 %v5724_v11, 16  ;;  %v667_v51 = vsel %vm5454_vm2, %v5553_v34, %v666_v41  ;;  %v5757_v47 = vpack.c.bf16 %v371_v31, %v370_v22  ;;  %v304_v3 = vmul.f32 %v5444_v15, %v265_v39  ;;  %v5292_v4 = vld [vmem:[%s6561_s3 + $0x130] sm:$0xff]   ;;  %v5289_v34 = vld [vmem:[%s6561_s3 + $0x180] sm:$0xff]  }
  0x3d   : > { %4798 = vmatpush3.bf16.msra.mxu0 %v5668_v7  ;;  %v572_v7 = vshll.u32 %v5724_v11, 16  ;;  %668 = vst [vmem:[#allocation2 + $0x38] sm:$0x1] %v667_v51  ;;  %v373_v60 = vmax.f32 %v341_v43, 0.0  ;;  %v444_v10 = vsel %vm5454_vm2, 0, %v443_v48  ;;  %4607 = vmatprep.subr.bf16.mxu1 %v5292_v4  ;;  %v473_v31 = vsel %vm5589_vm6, 0, %v472_v12 }
  0x3e   : > { %4576 = vmatmul.mubr.bf16.gmra.mrb[12].mxu1 %v688_v40  ;;  %4799 = vmatprep.subr.bf16.mxu0 %v5286_v37  ;;  %v5744_v40 = vsel %vm5509_vm5, %v567_v23, %v699_v0  ;;  %v5752_v50 = vrot.slane %v569_v28, 7  ;;  %v303_v0 = vmul.f32 %v5444_v15, %v264_v35  ;;  %v579_v9 = vshll.u32 %v5757_v47, 16  ;;  %v5775_v23 = vld [vmem:[#allocation2 + $0x40] sm:$0xfe]  ;;  %445 = vst [vmem:[#allocation2 + $0xd0] sm:$0x1] %v444_v10 }
  0x3f   : > { %4579 = vmatprep.mubr.bf16.mxu1 %v5703_v56  ;;  %v2359_v49 = vld [vmem:[#allocation2 + $0x18] sm:$0x1]  ;;  %701 = vst [vmem:[#allocation2 + $0x90] sm:$0xff] %v5744_v40  ;;  %v5777_v22 = vpack.c.bf16 %v373_v60, %v372_v54  ;;  %v343_v14 = vadd.f32 %v5451_v18, %v304_v3  ;;  %v2361_v26 = vld [vmem:[#allocation2 + $0x28] sm:$0x1]  ;;  %4608 = vmatpush3.bf16.msra.mxu1 %v5292_v4  ;;  %v711_v35 = vld [vmem:[#allocation2 + $0xb0] sm:$0xff] }
  0x40   : > { %4768 = vmatmul.mubr.bf16.gmra.mrb[12].mxu0 %v5703_v56  ;;  %v2423_v57 = vrot.slane %v2359_v49, 1  ;;  %v574_v6 = vor.u32 %v572_v7, %v5752_v50  ;;  %v672_v20 = vld [vmem:[#allocation2 + $0x48] sm:$0x1]  ;;  %v342_v24 = vadd.f32 %v5451_v18, %v303_v0  ;;  %v2426_v33 = vrot.slane %v2361_v26, 1  ;;  %v5800_v41 = vld [vmem:[#allocation2 + $0x50] sm:$0xfe] }
  0x41   : > { %4800 = vmatpush3.bf16.msra.mxu0 %v5286_v37  ;;  %v576_v37 = vshrl.u32 %v5757_v47, 16  ;;  %v5793_v7 = vld [vmem:[%s6561_s3 + $0x188] sm:$0xff]   ;;  %v583_v39 = vshrl.u32 %v5777_v22, 16  ;;  %474 = vst [vmem:[#allocation2 + $0x68] sm:$0x1] %v473_v31  ;;  %v2431_v48 = vrot.slane %v5775_v23, 1 }
  0x42   : > { %4801 = vmatprep.subr.bf16.mxu0 %v5287_v27  ;;  %v2424_v17 = vsel %vm1761_vm7, %v2422_v5, %v2423_v57  ;;  %v5783_v28 = vsel %vm5509_vm5, %v574_v6, %v705_v58  ;;  %v673_v5 = vsel %vm5454_vm2, %v5565_v46, %v672_v20  ;;  %v586_v46 = vshll.u32 %v5777_v22, 16  ;;  %v717_v49 = vld [vmem:[#allocation2 + $0xc0] sm:$0xff]  ;;  %v267_v54 = vld [vmem:[%s5431_s21 + $0xd8] sm:$0xff]  ;;  %v269_v20 = vld [vmem:[%s5431_s21 + $0xe8] sm:$0xff] }
  0x43   : > { %4803 = vmatprep.mubr.bf16.mxu0 %v2424_v17  ;;  %v5785_v32 = vrot.slane %v576_v37, 7  ;;  %707 = vst [vmem:[#allocation2 + $0xa0] sm:$0xff] %v5783_v28  ;;  %674 = vst [vmem:[#allocation2 + $0x48] sm:$0x1] %v673_v5  ;;  %v374_v43 = vmax.f32 %v342_v24, 0.0  ;;  %v375_v51 = vmax.f32 %v343_v14, 0.0  ;;  %v305_v57 = vmul.f32 %v5444_v15, %v266_v45 }
  0x44   : > { %v446_v58 = vld [vmem:[#allocation2 + $0xe0] sm:$0x1]  ;;  %v2427_v60 = vsel %vm1761_vm7, %v2425_v30, %v2426_v33  ;;  %v5812_v0 = vrot.slane %v583_v39, 7  ;;  %v678_v3 = vld [vmem:[#allocation2 + $0x58] sm:$0x1]  ;;  %v306_v4 = vmul.f32 %v5444_v15, %v267_v54  ;;  %v2434_v31 = vrot.slane %v5800_v41, 1 }
  0x45   : > { %4802 = vmatpush3.bf16.msra.mxu0 %v5287_v27  ;;  %v581_v27 = vor.u32 %v579_v9, %v5785_v32  ;;  %v447_v6 = vsel %vm5454_vm2, 0, %v446_v58  ;;  %v475_v37 = vld [vmem:[#allocation2 + $0x78] sm:$0x1]  ;;  %v679_v63 = vsel %vm5454_vm2, %v5605_v13, %v678_v3  ;;  %v5824_v30 = vpack.c.bf16 %v375_v51, %v374_v43  ;;  %v268_v17 = vld [vmem:[%s5431_s21 + $0xe0] sm:$0xff]  ;;  %v449_v13 = vld [vmem:[#allocation2 + $0xf0] sm:$0x1] }
  0x46   : > { %4580 = vmatmul.mubr.bf16.gmra.mrb[16].mxu1 %v5744_v40  ;;  %4835 = vmatprep.subr.bf16.mxu0 %v5289_v34  ;;  %v2363_v9 = vld [vmem:[#allocation2 + $0x38] sm:$0x1]  ;;  %v344_v12 = vadd.f32 %v5451_v18, %v305_v57  ;;  %448 = vst [vmem:[#allocation2 + $0xe0] sm:$0x1] %v447_v6  ;;  %v588_v14 = vor.u32 %v586_v46, %v5812_v0  ;;  %680 = vst [vmem:[#allocation2 + $0x58] sm:$0x1] %v679_v63 }
  0x47   : > { %4583 = vmatprep.mubr.bf16.mxu1 %v5783_v28  ;;  %v5819_v10 = vsel %vm5509_vm5, %v581_v27, %v711_v35  ;;  %v2429_v24 = vrot.slane %v2363_v9, 1  ;;  %v345_v26 = vadd.f32 %v5451_v18, %v306_v4  ;;  %v476_v5 = vsel %vm5589_vm6, 0, %v475_v37  ;;  %v5293_v35 = vld [vmem:[%s6561_s3 + $0x190] sm:$0xff]   ;;  %v5294_v46 = vld [vmem:[%s6561_s3 + $0x138] sm:$0xff]   ;;  %v478_v54 = vld [vmem:[#allocation2 + $0x88] sm:$0x1] }
  0x48   : > { %4804 = vmatmul.mubr.bf16.vlgmr.msra.gmra.mrb[0].mxu0 %v2427_v60  ;;  %713 = vst [vmem:[#allocation2 + $0xb0] sm:$0xff] %v5819_v10  ;;  %v590_v33 = vshrl.u32 %v5824_v30, 16  ;;  %v376_v39 = vmax.f32 %v344_v12, 0.0  ;;  %477 = vst [vmem:[#allocation2 + $0x78] sm:$0x1] %v476_v5  ;;  %v5849_v45 = vsel %vm5509_vm5, %v588_v14, %v717_v49  ;;  %v307_v51 = vmul.f32 %v5444_v15, %v268_v17  ;;  %v723_v49 = vld [vmem:[#allocation2 + $0xd0] sm:$0xff] }
  0x49   : > { %4836 = vmatpush3.bf16.msra.mxu0 %v5289_v34  ;;  %v593_v34 = vshll.u32 %v5824_v30, 16  ;;  %v2430_v43 = vsel %vm1761_vm7, %v2428_v42, %v2429_v24  ;;  %v377_v27 = vmax.f32 %v345_v26, 0.0  ;;  %719 = vst [vmem:[#allocation2 + $0xc0] sm:$0xff] %v5849_v45  ;;  %v684_v60 = vld [vmem:[#allocation2 + $0x68] sm:$0x1]  ;;  %v308_v3 = vmul.f32 %v5444_v15, %v269_v20  ;;  %4609 = vmatprep.subr.bf16.mxu1 %v5294_v46  ;;  %v5868_v15 = vld [vmem:[%s6561_s3 + $0x40] sm:$0xff]  }
  0x4a   : > { %4837 = vmatprep.subr.bf16.mxu0 %v5793_v7  ;;  %4807 = vmatprep.mubr.bf16.mxu0 %v2430_v43  ;;  %v2365_v57 = vld [vmem:[#allocation2 + $0x48] sm:$0x1]  ;;  %v5853_v58 = vrot.slane %v590_v33, 7  ;;  %v450_v55 = vsel %vm5454_vm2, 0, %v449_v13  ;;  %v685_v4 = vsel %vm5454_vm2, %v5639_v44, %v684_v60  ;;  %v346_v37 = vadd.f32 %v5451_v18, %v307_v51  ;;  %v5295_v63 = vld [vmem:[%s6561_s3 + $0x198] sm:$0xff]   ;;  %v5297_v51 = vld [vmem:[%s6561_s3 + $0x1a0] sm:$0xff]  }
  0x4b   : > { %v2432_v42 = vrot.slane %v2365_v57, 1  ;;  %v5862_v6 = vpack.c.bf16 %v377_v27, %v376_v39  ;;  %451 = vst [vmem:[#allocation2 + $0xf0] sm:$0x1] %v450_v55  ;;  %4610 = vmatpush3.bf16.msra.mxu1 %v5294_v46  ;;  %686 = vst [vmem:[#allocation2 + $0x68] sm:$0x1] %v685_v4  ;;  %v347_v9 = vadd.f32 %v5451_v18, %v308_v3  ;;  %v479_v44 = vsel %vm5589_vm6, 0, %v478_v54 }
  0x4c   : > { %v481_v12 = vld [vmem:[#allocation2 + $0x98] sm:$0x1]  ;;  %v2368_v20 = vld [vmem:[#allocation2 + $0x60] sm:$0xfe]  ;;  %v378_v18 = vmax.f32 %v346_v37, 0.0  ;;  %4643 = vmatprep.subr.bf16.mxu1 %v5868_v15 }
  0x4d   : > { %4838 = vmatpush3.bf16.msra.mxu0 %v5793_v7  ;;  %v595_v7 = vor.u32 %v593_v34, %v5853_v58  ;;  %v2433_v17 = vsel %vm1761_vm7, %v2431_v48, %v2432_v42  ;;  %v597_v24 = vshrl.u32 %v5862_v6, 16  ;;  %v600_v14 = vshll.u32 %v5862_v6, 16  ;;  %480 = vst [vmem:[#allocation2 + $0x88] sm:$0x1] %v479_v44  ;;  %v2367_v26 = vld [vmem:[#allocation2 + $0x58] sm:$0x1] }
  0x4e   : > { %4584 = vmatmul.mubr.bf16.gmra.mrb[20].mxu1 %v5819_v10  ;;  %4839 = vmatprep.subr.bf16.mxu0 %v5293_v35  ;;  %v729_v23 = vld [vmem:[#allocation2 + $0xe0] sm:$0xff]  ;;  %v379_v13 = vmax.f32 %v347_v9, 0.0  ;;  %v482_v48 = vsel %vm5589_vm6, 0, %v481_v12  ;;  %v2435_v33 = vrot.slane %v2367_v26, 1  ;;  %v484_v27 = vld [vmem:[#allocation2 + $0xa8] sm:$0x1] }
  0x4f   : > { %4587 = vmatprep.mubr.bf16.mxu1 %v5849_v45  ;;  %v5887_v5 = vsel %vm5509_vm5, %v595_v7, %v723_v49  ;;  %v5892_v34 = vrot.slane %v597_v24, 7  ;;  %v690_v39 = vld [vmem:[#allocation2 + $0x78] sm:$0x1]  ;;  %483 = vst [vmem:[#allocation2 + $0x98] sm:$0x1] %v482_v48  ;;  %v485_v57 = vsel %vm5589_vm6, 0, %v484_v27 }
  0x50   : > { %4808 = vmatmul.mubr.bf16.gmra.mrb[4].mxu0 %v2433_v17  ;;  %725 = vst [vmem:[#allocation2 + $0xd0] sm:$0xff] %v5887_v5  ;;  %v691_v46 = vsel %vm5454_vm2, %v5658_v1, %v690_v39  ;;  %v5897_v43 = vpack.c.bf16 %v379_v13, %v378_v18  ;;  %v2437_v1 = vrot.slane %v2368_v20, 1  ;;  %486 = vst [vmem:[#allocation2 + $0xa8] sm:$0x1] %v485_v57  ;;  %v487_v55 = vld [vmem:[#allocation2 + $0xb8] sm:$0x1] }
  0x51   : > { %4840 = vmatpush3.bf16.msra.mxu0 %v5293_v35  ;;  %v2436_v35 = vsel %vm1761_vm7, %v2434_v31, %v2435_v33  ;;  %v602_v54 = vor.u32 %v600_v14, %v5892_v34  ;;  %692 = vst [vmem:[#allocation2 + $0x78] sm:$0x1] %v691_v46  ;;  %v2370_v31 = vld [vmem:[#allocation2 + $0x70] sm:$0xfe]  ;;  %v488_v49 = vsel %vm5589_vm6, 0, %v487_v55  ;;  %v5299_v44 = vld [vmem:[%s6561_s3 + $0x1a8] sm:$0xff]  }
  0x52   : > { %4841 = vmatprep.subr.bf16.mxu0 %v5295_v63  ;;  %4811 = vmatprep.mubr.bf16.mxu0 %v2436_v35  ;;  %v604_v60 = vshrl.u32 %v5897_v43, 16  ;;  %v607_v3 = vshll.u32 %v5897_v43, 16  ;;  %v2369_v42 = vld [vmem:[#allocation2 + $0x68] sm:$0x1]  ;;  %v735_v7 = vld [vmem:[#allocation2 + $0xf0] sm:$0xff]  ;;  %v2440_v20 = vrot.slane %v2370_v31, 1 }
  0x53   : > { %v5912_v41 = vsel %vm5509_vm5, %v602_v54, %v729_v23  ;;  %v2438_v4 = vrot.slane %v2369_v42, 1  ;;  %489 = vst [vmem:[#allocation2 + $0xb8] sm:$0x1] %v488_v49  ;;  %v490_v12 = vld [vmem:[#allocation2 + $0xc8] sm:$0x1]  ;;  %v270_v35 = vld [vmem:[%s5431_s21 + $0xf0] sm:$0xff] }
  0x54   : > { %731 = vst [vmem:[#allocation2 + $0xe0] sm:$0xff] %v5912_v41  ;;  %v5918_v37 = vrot.slane %v604_v60, 7  ;;  %v696_v9 = vld [vmem:[#allocation2 + $0x88] sm:$0x1]  ;;  %v491_v18 = vsel %vm5589_vm6, 0, %v490_v12  ;;  %v271_v49 = vld [vmem:[%s5431_s21 + $0xf8] sm:$0xff]  ;;  %s238_s21 = scalar_lea.vmem %s6563_s5, %s4126_s24 }
  0x55   : > { %4842 = vmatpush3.bf16.msra.mxu0 %v5295_v63  ;;  %v697_v63 = vsel %vm5454_vm2, %v5673_v21, %v696_v9  ;;  %v2439_v17 = vsel %vm1761_vm7, %v2437_v1, %v2438_v4  ;;  %v2372_v26 = vld [vmem:[#allocation2 + $0x80] sm:$0xfe]  ;;  %492 = vst [vmem:[#allocation2 + $0xc8] sm:$0x1] %v491_v18  ;;  %v2374_v48 = vld [vmem:[#allocation2 + $0x90] sm:$0xfe] }
  0x56   : > { %4588 = vmatmul.mubr.bf16.gmra.mrb[24].mxu1 %v5887_v5  ;;  %4843 = vmatprep.subr.bf16.mxu0 %v5297_v51  ;;  %v609_v24 = vor.u32 %v607_v3, %v5918_v37  ;;  %698 = vst [vmem:[#allocation2 + $0x88] sm:$0x1] %v697_v63  ;;  %v702_v14 = vld [vmem:[#allocation2 + $0x98] sm:$0x1]  ;;  %v5332_v57 = vld [vmem:[%s6559_s1] ss:$0 sm:$0xff] }
  0x57   : > { %4591 = vmatprep.mubr.bf16.mxu1 %v5912_v41  ;;  %v703_v23 = vsel %vm5454_vm2, %v5715_v62, %v702_v14  ;;  %v493_v33 = vld [vmem:[#allocation2 + $0xd8] sm:$0x1]  ;;  %v708_v46 = vld [vmem:[#allocation2 + $0xa8] sm:$0x1]  ;;  %v5301_v62 = vld [vmem:[%s6561_s3 + $0x1b0] sm:$0xff]   ;;  %v309_v1 = vmul.f32 %v5332_v57, %v270_v35  ;;  %v2443_v3 = vrot.slane %v2372_v26, 1  ;;  %v310_v9 = vmul.f32 %v5332_v57, %v271_v49 }
  0x58   : > { %4812 = vmatmul.mubr.bf16.gmra.mrb[8].mxu0 %v2439_v17  ;;  %v2371_v21 = vld [vmem:[#allocation2 + $0x78] sm:$0x1]  ;;  %v5936_v13 = vsel %vm5509_vm5, %v609_v24, %v735_v7  ;;  %704 = vst [vmem:[#allocation2 + $0x98] sm:$0x1] %v703_v23  ;;  %v494_v27 = vsel %vm5589_vm6, 0, %v493_v33  ;;  %v709_v54 = vsel %vm5454_vm2, %v5752_v50, %v708_v46  ;;  %v2446_v55 = vrot.slane %v2374_v48, 1 }
  0x59   : > { %4844 = vmatpush3.bf16.msra.mxu0 %v5297_v51  ;;  %v2441_v39 = vrot.slane %v2371_v21, 1  ;;  %737 = vst [vmem:[#allocation2 + $0xf0] sm:$0xff] %v5936_v13  ;;  %495 = vst [vmem:[#allocation2 + $0xd8] sm:$0x1] %v494_v27  ;;  %v496_v51 = vld [vmem:[#allocation2 + $0xe8] sm:$0x1] }
  0x5a   : > { %4845 = vmatprep.subr.bf16.mxu0 %v5299_v44  ;;  %710 = vst [vmem:[#allocation2 + $0xa8] sm:$0x1] %v709_v54  ;;  %v714_v42 = vld [vmem:[#allocation2 + $0xb8] sm:$0x1]  ;;  %v497_v31 = vsel %vm5589_vm6, 0, %v496_v51 }
  0x5b   : > { %v2442_v60 = vsel %vm1761_vm7, %v2440_v20, %v2441_v39  ;;  %v2376_v50 = vld [vmem:[#allocation2 + $0xa0] sm:$0xfe]  ;;  %v715_v4 = vsel %vm5454_vm2, %v5785_v32, %v714_v42  ;;  %v5959_v7 = vld [vmem:[#allocation2 + $0xb0] sm:$0xfe]  ;;  %498 = vst [vmem:[#allocation2 + $0xe8] sm:$0x1] %v497_v31 }
  0x5c   : > { %4815 = vmatprep.mubr.bf16.mxu0 %v2442_v60  ;;  %v5333_v63 = vld [vmem:[%s6560_s2] ss:$0 sm:$0xff]  ;;  %716 = vst [vmem:[#allocation2 + $0xb8] sm:$0x1] %v715_v4  ;;  %v499_v20 = vld [vmem:[#allocation2 + $0xf8] sm:$0x1] }
  0x5d   : > { %v348_v12 = vadd.f32 %v5333_v63, %v309_v1  ;;  %v2373_v17 = vld [vmem:[#allocation2 + $0x88] sm:$0x1]  ;;  %4846 = vmatpush3.bf16.msra.mxu0 %v5299_v44  ;;  %v500_v32 = vsel %vm5589_vm6, 0, %v499_v20  ;;  %v349_v18 = vadd.f32 %v5333_v63, %v310_v9  ;;  %v452_v48 = vld [vmem:[#allocation2 + $0x100] sm:$0x1]  ;;  %v2449_v27 = vrot.slane %v2376_v50, 1 }
  0x5e   : > { %4592 = vmatmul.mubr.bf16.gmra.mrb[28].mxu1 %v5936_v13  ;;  %v2444_v24 = vrot.slane %v2373_v17, 1  ;;  %v720_v14 = vld [vmem:[#allocation2 + $0xc8] sm:$0x1]  ;;  %4847 = vmatprep.subr.bf16.mxu0 %v5301_v62  ;;  %501 = vst [vmem:[#allocation2 + $0xf8] sm:$0x1] %v500_v32  ;;  %v453_v46 = vsel %vm5454_vm2, 0, %v452_v48 }
  0x5f   : > { %4611 = vmatprep.mubr.bf16.mxu1 %v5478_v36  ;;  %v2375_v26 = vld [vmem:[#allocation2 + $0x98] sm:$0x1]  ;;  %v721_v23 = vsel %vm5454_vm2, %v5812_v0, %v720_v14  ;;  %v380_v21 = vmax.f32 %v348_v12, 0.0  ;;  %v381_v39 = vmax.f32 %v349_v18, 0.0  ;;  %v2452_v35 = vrot.slane %v5959_v7, 1  ;;  %v5298_v1 = vld [vmem:[%s6561_s3 + $0x48] sm:$0xff]  }
  0x60   : > { %v5303_v36 = vld [vmem:[%s6561_s3 + $0x1b8] sm:$0xff]   ;;  %v2445_v44 = vsel %vm1761_vm7, %v2443_v3, %v2444_v24  ;;  %v2447_v33 = vrot.slane %v2375_v26, 1  ;;  %722 = vst [vmem:[#allocation2 + $0xc8] sm:$0x1] %v721_v23  ;;  %454 = vst [vmem:[#allocation2 + $0x100] sm:$0x1] %v453_v46 }
  0x61   : > { %4816 = vmatmul.mubr.bf16.gmra.mrb[12].mxu0 %v2445_v44  ;;  %v726_v0 = vld [vmem:[#allocation2 + $0xd8] sm:$0x1]  ;;  %v502_v54 = vld [vmem:[#allocation2 + $0x108] sm:$0x1]  ;;  %v5984_v3 = vpack.c.bf16 %v381_v39, %v380_v21  ;;  %v5300_v63 = vld [vmem:[%s6561_s3 + $0x50] sm:$0xff]  }
  0x62   : > { %v2448_v51 = vsel %vm1761_vm7, %v2446_v55, %v2447_v33  ;;  %v2377_v57 = vld [vmem:[#allocation2 + $0xa8] sm:$0x1]  ;;  %v727_v60 = vsel %vm5454_vm2, %v5853_v58, %v726_v0  ;;  %4848 = vmatpush3.bf16.msra.mxu0 %v5301_v62  ;;  %v503_v42 = vsel %vm5589_vm6, 0, %v502_v54  ;;  %v5991_v55 = vld [vmem:[%s6561_s3 + $0x1c0] sm:$0xff]   ;;  %v5302_v18 = vld [vmem:[%s6561_s3 + $0x58] sm:$0xff]  }
  0x63   : > { %4819 = vmatprep.mubr.bf16.mxu0 %v2448_v51  ;;  %v2450_v31 = vrot.slane %v2377_v57, 1  ;;  %728 = vst [vmem:[#allocation2 + $0xd8] sm:$0x1] %v727_v60  ;;  %v732_v49 = vld [vmem:[#allocation2 + $0xe8] sm:$0x1]  ;;  %4849 = vmatprep.subr.bf16.mxu0 %v5303_v36  ;;  %v611_v50 = vshrl.u32 %v5984_v3, 16 }
  0x64   : > { %504 = vst [vmem:[#allocation2 + $0x108] sm:$0x1] %v503_v42  ;;  %v2379_v58 = vld [vmem:[#allocation2 + $0xb8] sm:$0x1]  ;;  %v2380_v62 = vld [vmem:[#allocation2 + $0xc0] sm:$0xfe]  ;;  %v733_v2 = vsel %vm5454_vm2, %v5892_v34, %v732_v49 }
  0x65   : > { %v614_v4 = vshll.u32 %v5984_v3, 16  ;;  %v2453_v7 = vrot.slane %v2379_v58, 1  ;;  %734 = vst [vmem:[#allocation2 + $0xe8] sm:$0x1] %v733_v2  ;;  %v2451_v9 = vsel %vm1761_vm7, %v2449_v27, %v2450_v31  ;;  %v738_v12 = vld [vmem:[#allocation2 + $0xf8] sm:$0x1] }
  0x66   : > { %4612 = vmatmul.mubr.bf16.vlgmr.msra.gmra.mrb[0].mxu1 %v5503_v59  ;;  %v2382_v59 = vld [vmem:[#allocation2 + $0xd0] sm:$0xfe]  ;;  %v613_v34 = vrot.slane %v611_v50, 7  ;;  %4850 = vmatpush3.bf16.msra.mxu0 %v5303_v36  ;;  %v2455_v14 = vrot.slane %v2380_v62, 1  ;;  %v2384_v39 = vld [vmem:[#allocation2 + $0xe0] sm:$0xfe] }
  0x67   : > { %4644 = vmatpush3.bf16.msra.mxu1 %v5868_v15  ;;  %4615 = vmatprep.mubr.bf16.mxu1 %v5523_v8  ;;  %v2454_v17 = vsel %vm1761_vm7, %v2452_v35, %v2453_v7  ;;  %v2381_v20 = vld [vmem:[#allocation2 + $0xc8] sm:$0x1]  ;;  %v739_v8 = vsel %vm5454_vm2, %v5918_v37, %v738_v12  ;;  %v741_v24 = vld [vmem:[#allocation2 + $0x100] sm:$0xff]  ;;  %v2458_v21 = vrot.slane %v2382_v59, 1  ;;  %v2386_v27 = vld [vmem:[#allocation2 + $0xf0] sm:$0xfe] }
  0x68   : > { %4645 = vmatprep.subr.bf16.mxu1 %v5298_v1  ;;  %4883 = vmatprep.subr.bf16.mxu0 %v5991_v55  ;;  %740 = vst [vmem:[#allocation2 + $0xf8] sm:$0x1] %v739_v8  ;;  %v616_v15 = vor.u32 %v614_v4, %v613_v34  ;;  %v2456_v32 = vrot.slane %v2381_v20, 1  ;;  %v2464_v0 = vrot.slane %v2386_v27, 1  ;;  %v5308_v57 = vld [vmem:[%s6561_s3 + $0x70] sm:$0xff]   ;;  %v6046_v58 = vld [vmem:[%s6561_s3 + $0x80] sm:$0xff]  }
  0x69   : > { %4820 = vmatmul.mubr.bf16.gmra.mrb[16].mxu0 %v2451_v9  ;;  %v6048_v62 = vld [vmem:[#allocation2 + $0x20] sm:$0xff]  ;;  %v5307_v2 = vld [vmem:[%s6561_s3 + $0x1c8] sm:$0xff]   ;;  %v5311_v7 = vld [vmem:[%s6561_s3 + $0x1d8] sm:$0xff]  }
  0x6a   : > { %4823 = vmatprep.mubr.bf16.mxu0 %v2454_v17  ;;  %v2383_v26 = vld [vmem:[#allocation2 + $0xd8] sm:$0x1]  ;;  %v6015_v23 = vsel %vm5509_vm5, %v616_v15, %v741_v24  ;;  %v2457_v44 = vsel %vm1761_vm7, %v2455_v14, %v2456_v32  ;;  %v6071_v50 = vld [vmem:[#allocation2 + $0x60] sm:$0xff]  ;;  %v6079_v9 = vld [vmem:[#allocation2 + $0x8] sm:$0x1]  ;;  %v1274_v24 = vshll.u32 %v6048_v62, 16 }
  0x6b   : > { %4646 = vmatpush3.bf16.msra.mxu1 %v5298_v1  ;;  %v744_v37 = vld [vmem:[#allocation2 + $0x108] sm:$0x1]  ;;  %v2459_v48 = vrot.slane %v2383_v26, 1  ;;  %743 = vst [vmem:[#allocation2 + $0x100] sm:$0xff] %v6015_v23  ;;  %v6073_v4 = vld [vmem:[#allocation2] sm:$0xff]  ;;  %v1255_v59 = vshll.u32 %v6079_v9, 16 }
  0x6c   : > { %4647 = vmatprep.subr.bf16.mxu1 %v5300_v63  ;;  %v745_v36 = vsel %vm5454_vm2, %v613_v34, %v744_v37  ;;  %v2385_v46 = vld [vmem:[#allocation2 + $0xe8] sm:$0x1]  ;;  %v5313_v12 = vld [vmem:[%s6561_s3 + $0x1e0] sm:$0xff]   ;;  %v6089_v34 = vld [vmem:[#allocation2 + $0x70] sm:$0xff]  ;;  %v1272_v37 = vshrl.u32 %v6048_v62, 16 }
  0x6d   : > { %746 = vst [vmem:[#allocation2 + $0x108] sm:$0x1] %v745_v36  ;;  %v2460_v33 = vsel %vm1761_vm7, %v2458_v21, %v2459_v48  ;;  %v2462_v35 = vrot.slane %v2385_v46, 1  ;;  %v1257_v8 = vrot.slane %v1255_v59, 1  ;;  %v6094_v15 = vld [vmem:[#allocation2 + $0x18] sm:$0x1] }
  0x6e   : > { %4616 = vmatmul.mubr.bf16.gmra.mrb[4].mxu1 %v5541_v25  ;;  %v2461_v25 = vrot.slane %v2384_v39, 1  ;;  %v6097_v14 = vld [vmem:[#allocation2 + $0x28] sm:$0x1]  ;;  %v1276_v21 = vrot.slane %v1274_v24, 1  ;;  %v5317_v36 = vld [vmem:[%s6561_s3 + $0x1f0] sm:$0xff]  }
  0x6f   : > { %4619 = vmatprep.mubr.bf16.mxu1 %v5574_v52  ;;  %4648 = vmatpush3.bf16.msra.mxu1 %v5300_v63  ;;  %v2387_v19 = vld [vmem:[#allocation2 + $0xf8] sm:$0x1]  ;;  %v5306_v52 = vld [vmem:[%s6561_s3 + $0x68] sm:$0xff]   ;;  %v1216_v63 = vld [vmem:[#allocation2 + $0x10] sm:$0xff]  ;;  %v1279_v48 = vshll.u32 %v6097_v14, 16 }
  0x70   : > { %4649 = vmatprep.subr.bf16.mxu1 %v5302_v18  ;;  %v2465_v54 = vrot.slane %v2387_v19, 1  ;;  %v2463_v51 = vsel %vm1761_vm7, %v2461_v25, %v2462_v35  ;;  %v1262_v17 = vshll.u32 %v1216_v63, 16  ;;  %v1260_v32 = vshrl.u32 %v1216_v63, 16  ;;  %v6116_v46 = vld [vmem:[#allocation2 + $0x38] sm:$0x1] }
  0x71   : > { %4824 = vmatmul.mubr.bf16.gmra.mrb[20].mxu0 %v2457_v44  ;;  %v1281_v39 = vrot.slane %v1279_v48, 1  ;;  %v6119_v19 = vld [vmem:[#allocation2 + $0x48] sm:$0x1] }
  0x72   : > { %4827 = vmatprep.mubr.bf16.mxu0 %v2460_v33  ;;  %v2466_v1 = vsel %vm1761_vm7, %v2464_v0, %v2465_v54  ;;  %v2388_v60 = vld [vmem:[#allocation2 + $0x100] sm:$0xfe]  ;;  %v6114_v33 = vor.u32 %v1276_v21, %v1272_v37  ;;  %v1291_v0 = vshll.u32 %v6116_v46, 16  ;;  %v1332_v21 = vshrl.u32 %v6089_v34, 16 }
  0x73   : > { %4650 = vmatpush3.bf16.msra.mxu1 %v5302_v18  ;;  %v2467_v31 = vrot.slane %v2388_v60, 1  ;;  %v1267_v18 = vshll.u32 %v6094_v15, 16  ;;  %v6139_v60 = vld [vmem:[%s6561_s3 + $0x200] sm:$0xff]  }
  0x74   : > { %4651 = vmatprep.subr.bf16.mxu1 %v5304_v61  ;;  %v2389_v42 = vld [vmem:[#allocation2 + $0x108] sm:$0x1]  ;;  %v1282_v54 = vsel %vm1246_vm8, %v6114_v33, %v1281_v39 }
  0x75   : > { %v2468_v49 = vrot.slane %v2389_v42, 1 }
  0x76   : > { %4620 = vmatmul.mubr.bf16.gmra.mrb[8].mxu1 %v5607_v16  ;;  %v5310_v16 = vld [vmem:[%s6561_s3 + $0x78] sm:$0xff]  }
  0x77   : > { %4623 = vmatprep.mubr.bf16.mxu1 %v5631_v38  ;;  %4652 = vmatpush3.bf16.msra.mxu1 %v5304_v61  ;;  %v2469_v38 = vsel %vm1761_vm7, %v2467_v31, %v2468_v49  ;;  %v1269_v61 = vrot.slane %v1267_v18, 1  ;;  %v1293_v49 = vrot.slane %v1291_v0, 1  ;;  %v5320_v18 = vld [vmem:[%s6561_s3 + $0xa0] sm:$0xff]  }
  0x78   : > { %4653 = vmatprep.subr.bf16.mxu1 %v5306_v52 }
  0x79   : > { %4828 = vmatmul.mubr.bf16.gmra.mrb[24].mxu0 %v2463_v51  ;;  %v5314_v51 = vld [vmem:[%s6561_s3 + $0x88] sm:$0xff]  }
  0x7a   : > { %4831 = vmatprep.mubr.bf16.mxu0 %v2466_v1 }
  0x7b   : > { %4654 = vmatpush3.bf16.msra.mxu1 %v5306_v52 }
  0x7c   : > { %4655 = vmatprep.subr.bf16.mxu1 %v5308_v57 }
  0x7e   : > { %4624 = vmatmul.mubr.bf16.gmra.mrb[12].mxu1 %v5645_v53  ;;  %v6054_v53 = vld [vmem:[#allocation2 + $0x30] sm:$0xff] }
  0x7f   : > { %4627 = vmatprep.mubr.bf16.mxu1 %v5679_v29  ;;  %4656 = vmatpush3.bf16.msra.mxu1 %v5308_v57  ;;  %v6056_v29 = vld [vmem:[#allocation2 + $0x40] sm:$0xff]  ;;  %v1284_v35 = vshrl.u32 %v6054_v53, 16 }
  0x80   : > { %4657 = vmatprep.subr.bf16.mxu1 %v5310_v16  ;;  %v1298_v27 = vshll.u32 %v6056_v29, 16  ;;  %v1296_v57 = vshrl.u32 %v6056_v29, 16 }
  0x81   : > { %4832 = vmatmul.mubr.bf16.gmra.mrb[28].mxu0 %v2469_v38 }
  0x82   : > { %4851 = vmatprep.mubr.bf16.mxu0 %v6048_v62  ;;  %v1300_v1 = vrot.slane %v1298_v27, 1  ;;  %v6197_v27 = vld [vmem:[#allocation2 + $0x90] sm:$0xff] }
  0x83   : > { %4658 = vmatpush3.bf16.msra.mxu1 %v5310_v16 }
  0x84   : > { %4691 = vmatprep.subr.bf16.mxu1 %v6046_v58  ;;  %v6148_v38 = vor.u32 %v1300_v1, %v1296_v57  ;;  %v5324_v57 = vld [vmem:[%s6561_s3 + $0xb0] sm:$0xff]  }
  0x86   : > { %4628 = vmatmul.mubr.bf16.gmra.mrb[16].mxu1 %v5724_v11  ;;  %v5309_v11 = vld [vmem:[%s6561_s3 + $0x1d0] sm:$0xff]  }
  0x87   : > { %4631 = vmatprep.mubr.bf16.mxu1 %v5757_v47  ;;  %v6068_v47 = vld [vmem:[#allocation2 + $0x50] sm:$0xff] }
  0x88   : > { %v1310_v16 = vshll.u32 %v6068_v47, 16 }
  0x89   : > { %4852 = vmatmul.mubr.bf16.vlgmr.msra.gmra.mrb[0].mxu0 %v6054_v53 }
  0x8a   : > { %4884 = vmatpush3.bf16.msra.mxu0 %v5991_v55  ;;  %4855 = vmatprep.mubr.bf16.mxu0 %v6056_v29  ;;  %v1250_v55 = vshll.u32 %v6073_v4, 16  ;;  %v5316_v29 = vld [vmem:[%s6561_s3 + $0x90] sm:$0xff]  }
  0x8b   : > { %4885 = vmatprep.subr.bf16.mxu0 %v5307_v2 }
  0x8e   : > { %4632 = vmatmul.mubr.bf16.gmra.mrb[20].mxu1 %v5777_v22  ;;  %4886 = vmatpush3.bf16.msra.mxu0 %v5307_v2  ;;  %v1248_v22 = vshrl.u32 %v6073_v4, 16  ;;  %v1322_v2 = vshll.u32 %v6071_v50, 16 }
  0x8f   : > { %4635 = vmatprep.mubr.bf16.mxu1 %v5824_v30  ;;  %4887 = vmatprep.subr.bf16.mxu0 %v5309_v11  ;;  %v1252_v30 = vrot.slane %v1250_v55, 1 }
  0x91   : > { %4856 = vmatmul.mubr.bf16.gmra.mrb[4].mxu0 %v6068_v47  ;;  %v6092_v20 = vor.u32 %v1252_v30, %v1248_v22  ;;  %v1308_v22 = vshrl.u32 %v6068_v47, 16  ;;  %v1312_v30 = vrot.slane %v1310_v16, 1 }
  0x92   : > { %4859 = vmatprep.mubr.bf16.mxu0 %v6071_v50  ;;  %4888 = vmatpush3.bf16.msra.mxu0 %v5309_v11  ;;  %v6156_v11 = vld [vmem:[#allocation2 + $0x68] sm:$0x1] }
  0x93   : > { %4889 = vmatprep.subr.bf16.mxu0 %v5311_v7  ;;  %v1258_v26 = vsel %vm1246_vm8, %v6092_v20, %v1257_v8  ;;  %v1230_v8 = vld [vmem:[#allocation2 + $0x80] sm:$0xff]  ;;  %v6176_v47 = vor.u32 %v1312_v30, %v1308_v22  ;;  %v6232_v22 = vld [vmem:[#allocation2 + $0xb0] sm:$0xff]  ;;  %v5326_v30 = vld [vmem:[%s6561_s3 + $0xb8] sm:$0xff]  }
  0x96   : > { %4636 = vmatmul.mubr.bf16.gmra.mrb[24].mxu1 %v5862_v6  ;;  %4890 = vmatpush3.bf16.msra.mxu0 %v5311_v7  ;;  %v5315_v6 = vld [vmem:[%s6561_s3 + $0x1e8] sm:$0xff]  }
  0x97   : > { %4639 = vmatprep.mubr.bf16.mxu1 %v5897_v43  ;;  %4891 = vmatprep.subr.bf16.mxu0 %v5313_v12  ;;  %v1264_v43 = vrot.slane %v1262_v17, 1  ;;  %v1324_v17 = vrot.slane %v1322_v2, 1 }
  0x99   : > { %4860 = vmatmul.mubr.bf16.gmra.mrb[8].mxu0 %v6089_v34  ;;  %v1265_v44 = vor.u32 %v1264_v43, %v1260_v32  ;;  %v1346_v43 = vshll.u32 %v1230_v8, 16 }
  0x9a   : > { %4863 = vmatprep.mubr.bf16.mxu0 %v5703_v56  ;;  %4892 = vmatpush3.bf16.msra.mxu0 %v5313_v12  ;;  %v1286_v56 = vshll.u32 %v6054_v53, 16  ;;  %v6150_v53 = vld [vmem:[#allocation2 + $0x58] sm:$0x1]  ;;  %v1320_v12 = vshrl.u32 %v6071_v50, 16 }
  0x9b   : > { %4893 = vmatprep.subr.bf16.mxu0 %v5315_v6  ;;  %v1270_v25 = vsel %vm1246_vm8, %v1265_v44, %v1269_v61  ;;  %v1315_v59 = vshll.u32 %v6150_v53, 16  ;;  %v6181_v50 = vld [vmem:[#allocation2 + $0x78] sm:$0x1]  ;;  %v1344_v61 = vshrl.u32 %v1230_v8, 16 }
  0x9c   : > { %v1288_v52 = vrot.slane %v1286_v56, 1  ;;  %v1348_v56 = vrot.slane %v1346_v43, 1 }
  0x9d   : > { %v1317_v24 = vrot.slane %v1315_v59, 1 }
  0x9e   : > { %4640 = vmatmul.mubr.bf16.gmra.mrb[28].mxu1 %v5984_v3  ;;  %4894 = vmatpush3.bf16.msra.mxu0 %v5315_v6  ;;  %v5319_v3 = vld [vmem:[%s6561_s3 + $0x1f8] sm:$0xff]   ;;  %v6145_v31 = vor.u32 %v1288_v52, %v1284_v35  ;;  %v6179_v6 = vor.u32 %v1324_v17, %v1320_v12  ;;  %v1358_v35 = vshll.u32 %v6197_v27, 16  ;;  %v6209_v52 = vor.u32 %v1348_v56, %v1344_v61  ;;  %v6240_v12 = vld [vmem:[#allocation2 + $0x48] sm:$0x1] }
  0x9f   : > { %4659 = vmatprep.mubr.bf16.mxu1 %v1258_v26  ;;  %4895 = vmatprep.subr.bf16.mxu0 %v5317_v36  ;;  %v6186_v26 = vld [vmem:[#allocation2 + $0x88] sm:$0x1]  ;;  %v1318_v37 = vsel %vm1246_vm8, %v6176_v47, %v1317_v24  ;;  %v6260_v56 = vld [vmem:[#allocation2 + $0x58] sm:$0x1] }
  0xa0   : > { %v1294_v7 = vsel %vm1246_vm8, %v6145_v31, %v1293_v49  ;;  %v1351_v39 = vshll.u32 %v6186_v26, 16  ;;  %v1356_v49 = vshrl.u32 %v6197_v27, 16  ;;  %v1360_v16 = vrot.slane %v1358_v35, 1  ;;  %v6271_v35 = vld [vmem:[%s6561_s3 + $0xc0] sm:$0xff]  }
  0xa1   : > { %4864 = vmatmul.mubr.bf16.gmra.mrb[12].mxu0 %v5744_v40  ;;  %v1303_v40 = vshll.u32 %v6119_v19, 16 }
  0xa2   : > { %4867 = vmatprep.mubr.bf16.mxu0 %v5783_v28  ;;  %4896 = vmatpush3.bf16.msra.mxu0 %v5317_v36  ;;  %v6141_v28 = vld [vmem:[#allocation2 + $0x118] sm:$0x1]  ;;  %v1339_v36 = vshll.u32 %v6181_v50, 16  ;;  %v1353_v0 = vrot.slane %v1351_v39, 1  ;;  %v6242_v17 = vor.u32 %v1360_v16, %v1356_v49 }
  0xa3   : > { %4897 = vmatprep.subr.bf16.mxu0 %v5319_v3  ;;  %v3239_v42 = vshll.u32 %v6141_v28, 16  ;;  %v1305_v62 = vrot.slane %v1303_v40, 1  ;;  %v6218_v40 = vld [vmem:[#allocation2 + $0xa8] sm:$0x1] }
  0xa4   : > { %v1354_v2 = vsel %vm1246_vm8, %v6209_v52, %v1353_v0 }
  0xa5   : > { %v1306_v63 = vsel %vm1246_vm8, %v6148_v38, %v1305_v62 }
  0xa6   : > { %4660 = vmatmul.mubr.bf16.vlgmr.msra.gmra.mrb[0].mxu1 %v1270_v25  ;;  %4898 = vmatpush3.bf16.msra.mxu0 %v5319_v3  ;;  %v6204_v3 = vld [vmem:[#allocation2 + $0x28] sm:$0x1]  ;;  %v1341_v25 = vrot.slane %v1339_v36, 1  ;;  %v1380_v36 = vshrl.u32 %v6232_v22, 16 }
  0xa7   : > { %4692 = vmatpush3.bf16.msra.mxu1 %v6046_v58  ;;  %4663 = vmatprep.mubr.bf16.mxu1 %v1282_v54  ;;  %v3241_v58 = vrot.slane %v3239_v42, 1  ;;  %v6211_v54 = vld [vmem:[#allocation2 + $0x98] sm:$0x1]  ;;  %v3059_v1 = vshll.u32 %v6204_v3, 16 }
  0xa8   : > { %4693 = vmatprep.subr.bf16.mxu1 %v5314_v51  ;;  %4931 = vmatprep.subr.bf16.mxu0 %v6139_v60  ;;  %v1363_v62 = vshll.u32 %v6211_v54, 16 }
  0xa9   : > { %v6161_v55 = vsel %vm1246_vm8, %v6092_v20, %v3241_v58  ;;  %4868 = vmatmul.mubr.bf16.gmra.mrb[16].mxu0 %v5819_v10  ;;  %v1327_v10 = vshll.u32 %v6156_v11, 16  ;;  %v5318_v20 = vld [vmem:[%s6561_s3 + $0x98] sm:$0xff]   ;;  %v3061_v59 = vrot.slane %v3059_v1, 1  ;;  %v6277_v1 = vld [vmem:[#allocation2 + $0x68] sm:$0x1] }
  0xaa   : > { %4871 = vmatprep.mubr.bf16.mxu0 %v5849_v45  ;;  %v1334_v45 = vshll.u32 %v6089_v34, 16  ;;  %v6202_v34 = vld [vmem:[#allocation2 + $0xa0] sm:$0xff] }
  0xab   : > { %4694 = vmatpush3.bf16.msra.mxu1 %v5314_v51  ;;  %v1329_v32 = vrot.slane %v1327_v10, 1  ;;  %v1370_v51 = vshll.u32 %v6202_v34, 16  ;;  %v1368_v58 = vshrl.u32 %v6202_v34, 16  ;;  %v1365_v10 = vrot.slane %v1363_v62, 1 }
  0xac   : > { %4695 = vmatprep.subr.bf16.mxu1 %v5316_v29  ;;  %v1336_v48 = vrot.slane %v1334_v45, 1  ;;  %v6247_v45 = vld [vmem:[#allocation2 + $0xb8] sm:$0x1]  ;;  %v3062_v43 = vsel %vm1246_vm8, %v6114_v33, %v3061_v59  ;;  %v5323_v59 = vld [vmem:[%s6561_s3 + $0x208] sm:$0xff]  }
  0xad   : > { %v1330_v44 = vsel %vm1246_vm8, %v6179_v6, %v1329_v32  ;;  %v1387_v61 = vshll.u32 %v6247_v45, 16 }
  0xae   : > { %4664 = vmatmul.mubr.bf16.gmra.mrb[4].mxu1 %v1294_v7  ;;  %v1372_v7 = vrot.slane %v1370_v51, 1  ;;  %v6274_v51 = vld [vmem:[#allocation2 + $0xe0] sm:$0xff] }
  0xaf   : > { %4667 = vmatprep.mubr.bf16.mxu1 %v1306_v63  ;;  %4696 = vmatpush3.bf16.msra.mxu1 %v5316_v29  ;;  %v6225_v29 = vld [vmem:[#allocation2 + $0x38] sm:$0x1]  ;;  %v6237_v63 = vld [vmem:[#allocation2 + $0xc0] sm:$0xff]  ;;  %v1389_v49 = vrot.slane %v1387_v61, 1 }
  0xb0   : > { %4697 = vmatprep.subr.bf16.mxu1 %v5318_v20  ;;  %v6245_v8 = vor.u32 %v1372_v7, %v1368_v58  ;;  %v1394_v32 = vshll.u32 %v6237_v63, 16  ;;  %v1392_v39 = vshrl.u32 %v6237_v63, 16  ;;  %v6286_v7 = vld [vmem:[#allocation2 + $0xd8] sm:$0x1] }
  0xb1   : > { %4872 = vmatmul.mubr.bf16.gmra.mrb[20].mxu0 %v5887_v5  ;;  %v5322_v5 = vld [vmem:[%s6561_s3 + $0xa8] sm:$0xff]   ;;  %v6308_v61 = vld [vmem:[#allocation2 + $0x78] sm:$0x1] }
  0xb2   : > { %4875 = vmatprep.mubr.bf16.mxu0 %v5912_v41  ;;  %v6206_v41 = vor.u32 %v1336_v48, %v1332_v21  ;;  %v1366_v48 = vsel %vm1246_vm8, %v6242_v17, %v1365_v10  ;;  %v6295_v10 = vld [vmem:[#allocation2 + $0xe8] sm:$0x1] }
  0xb3   : > { %4698 = vmatpush3.bf16.msra.mxu1 %v5318_v20  ;;  %v1382_v20 = vshll.u32 %v6232_v22, 16 }
  0xb4   : > { %4699 = vmatprep.subr.bf16.mxu1 %v5320_v18  ;;  %v1342_v42 = vsel %vm1246_vm8, %v6206_v41, %v1341_v25  ;;  %v6266_v25 = vld [vmem:[#allocation2 + $0xd0] sm:$0xff] }
  0xb5   : > { %v1406_v16 = vshll.u32 %v6266_v25, 16 }
  0xb6   : > { %4668 = vmatmul.mubr.bf16.gmra.mrb[8].mxu1 %v1318_v37  ;;  %v6253_v37 = vld [vmem:[#allocation2 + $0xc8] sm:$0x1] }
  0xb7   : > { %4671 = vmatprep.mubr.bf16.mxu1 %v1330_v44  ;;  %4700 = vmatpush3.bf16.msra.mxu1 %v5320_v18  ;;  %v3083_v18 = vshll.u32 %v6240_v12, 16  ;;  %v1384_v44 = vrot.slane %v1382_v20, 1 }
  0xb8   : > { %4701 = vmatprep.subr.bf16.mxu1 %v5322_v5 }
  0xb9   : > { %4876 = vmatmul.mubr.bf16.gmra.mrb[24].mxu0 %v5936_v13  ;;  %v1375_v13 = vshll.u32 %v6218_v40, 16  ;;  %v3085_v0 = vrot.slane %v3083_v18, 1  ;;  %v1416_v18 = vshrl.u32 %v6274_v51, 16 }
  0xba   : > { %4879 = vmatprep.mubr.bf16.mxu0 %v6015_v23  ;;  %v3071_v23 = vshll.u32 %v6225_v29, 16 }
  0xbb   : > { %4702 = vmatpush3.bf16.msra.mxu1 %v5322_v5  ;;  %v1377_v24 = vrot.slane %v1375_v13, 1  ;;  %v1396_v5 = vrot.slane %v1394_v32, 1  ;;  %v1418_v13 = vshll.u32 %v6274_v51, 16  ;;  %v1408_v32 = vrot.slane %v1406_v16, 1 }
  0xbc   : > { %4703 = vmatprep.subr.bf16.mxu1 %v5324_v57  ;;  %v3073_v21 = vrot.slane %v3071_v23, 1  ;;  %v3107_v23 = vshll.u32 %v6277_v1, 16 }
  0xbd   : > { %v1378_v33 = vsel %vm1246_vm8, %v6245_v8, %v1377_v24  ;;  %v1404_v24 = vshrl.u32 %v6266_v25, 16 }
  0xbe   : > { %4672 = vmatmul.mubr.bf16.gmra.mrb[12].mxu1 %v1342_v42  ;;  %v6279_v42 = vor.u32 %v1384_v44, %v1380_v36  ;;  %v3074_v62 = vsel %vm1246_vm8, %v6145_v31, %v3073_v21  ;;  %v1420_v21 = vrot.slane %v1418_v13, 1  ;;  %v6306_v36 = vld [vmem:[#allocation2 + $0xf0] sm:$0xff]  ;;  %v3109_v44 = vrot.slane %v3107_v23, 1 }
  0xbf   : > { %4675 = vmatprep.mubr.bf16.mxu1 %v1354_v2  ;;  %4704 = vmatpush3.bf16.msra.mxu1 %v5324_v57  ;;  %v3095_v57 = vshll.u32 %v6260_v56, 16  ;;  %v6284_v2 = vor.u32 %v1396_v5, %v1392_v39  ;;  %v6315_v39 = vor.u32 %v1408_v32, %v1404_v24  ;;  %v6337_v32 = vld [vmem:[#allocation2 + $0x98] sm:$0x1] }
  0xc0   : > { %4705 = vmatprep.subr.bf16.mxu1 %v5326_v30  ;;  %v1390_v31 = vsel %vm1246_vm8, %v6279_v42, %v1389_v49  ;;  %v6321_v49 = vor.u32 %v1420_v21, %v1416_v18  ;;  %v6342_v18 = vld [vmem:[#allocation2 + $0xa8] sm:$0x1] }
  0xc1   : > { %4880 = vmatmul.mubr.bf16.gmra.mrb[28].mxu0 %v6073_v4  ;;  %v1399_v4 = vshll.u32 %v6253_v37, 16  ;;  %v3097_v20 = vrot.slane %v3095_v57, 1  ;;  %v3119_v57 = vshll.u32 %v6308_v61, 16 }
  0xc2   : > { %4899 = vmatprep.mubr.bf16.mxu0 %v3062_v43  ;;  %v1411_v43 = vshll.u32 %v6286_v7, 16 }
  0xc3   : > { %4706 = vmatpush3.bf16.msra.mxu1 %v5326_v30  ;;  %v1401_v58 = vrot.slane %v1399_v4, 1  ;;  %v3086_v30 = vsel %vm1246_vm8, %v6148_v38, %v3085_v0  ;;  %v1430_v4 = vshll.u32 %v6306_v36, 16  ;;  %v3098_v0 = vsel %vm1246_vm8, %v6176_v47, %v3097_v20 }
  0xc4   : > { %4979 = vmatprep.subr.bf16.mxu1 %v6271_v35  ;;  %v1413_v5 = vrot.slane %v1411_v43, 1  ;;  %v1713_v43 = vld [vmem:[#allocation2] sm:$0xfe] }
  0xc5   : > { %v1402_v38 = vsel %vm1246_vm8, %v6284_v2, %v1401_v58  ;;  %v3110_v58 = vsel %vm1246_vm8, %v6179_v6, %v3109_v44  ;;  %v1432_v23 = vrot.slane %v1430_v4, 1  ;;  %v1763_v4 = vrot.slane %v6079_v9, 1 }
  0xc6   : > { %4676 = vmatmul.mubr.bf16.gmra.mrb[16].mxu1 %v1366_v48  ;;  %v1423_v48 = vshll.u32 %v6295_v10, 16  ;;  %v1414_v47 = vsel %vm1246_vm8, %v6315_v39, %v1413_v5  ;;  %v1762_v5 = vrot.slane %v1713_v43, 1 }
  0xc7   : > { %4679 = vmatprep.mubr.bf16.mxu1 %v1378_v33  ;;  %v5325_v33 = vld [vmem:[%s6561_s3 + $0x210] sm:$0xff]  }
  0xc8   : > { %v1425_v16 = vrot.slane %v1423_v48, 1 }
  0xc9   : > { %4900 = vmatmul.mubr.bf16.vlgmr.msra.gmra.mrb[0].mxu0 %v3074_v62  ;;  %v6323_v62 = vld [vmem:[#allocation2 + $0xf8] sm:$0x1] }
  0xca   : > { %4932 = vmatpush3.bf16.msra.mxu0 %v6139_v60  ;;  %4903 = vmatprep.mubr.bf16.mxu0 %v3086_v30  ;;  %v6313_v60 = vld [vmem:[#allocation2 + $0x88] sm:$0x1]  ;;  %v5327_v30 = vld [vmem:[%s6561_s3 + $0x218] sm:$0xff]   ;;  %v1435_v20 = vshll.u32 %v6323_v62, 16  ;;  %v1426_v6 = vsel %vm1246_vm8, %v6321_v49, %v1425_v16 }
  0xcb   : > { %4933 = vmatprep.subr.bf16.mxu0 %v5323_v59  ;;  %v3131_v13 = vshll.u32 %v6313_v60, 16  ;;  %v5329_v16 = vld [vmem:[%s6561_s3 + $0x228] sm:$0xff]  }
  0xcc   : > { %v1437_v48 = vrot.slane %v1435_v20, 1 }
  0xcd   : > { %v3133_v24 = vrot.slane %v3131_v13, 1  ;;  %v1764_v13 = vsel %vm1761_vm7, %v1762_v5, %v1763_v4  ;;  %v1716_v4 = vld [vmem:[#allocation2 + $0x30] sm:$0xfe] }
  0xce   : > { %4680 = vmatmul.mubr.bf16.gmra.mrb[20].mxu1 %v1390_v31  ;;  %4934 = vmatpush3.bf16.msra.mxu0 %v5323_v59  ;;  %v1428_v59 = vshrl.u32 %v6306_v36, 16  ;;  %v3121_v31 = vrot.slane %v3119_v57, 1  ;;  %v3155_v57 = vshll.u32 %v6342_v18, 16 }
  0xcf   : > { %4683 = vmatprep.mubr.bf16.mxu1 %v1402_v38  ;;  %4935 = vmatprep.subr.bf16.mxu0 %v5325_v33  ;;  %v5328_v38 = vld [vmem:[%s6561_s3 + $0x220] sm:$0xff]  }
  0xd0   : > { %v6344_v21 = vor.u32 %v1432_v23, %v1428_v59  ;;  %v3122_v44 = vsel %vm1246_vm8, %v6206_v41, %v3121_v31  ;;  %v3157_v9 = vrot.slane %v3155_v57, 1  ;;  %v5330_v59 = vld [vmem:[%s6561_s3 + $0x230] sm:$0xff]   ;;  %v6364_v23 = vld [vmem:[#allocation2 + $0xc8] sm:$0x1]  ;;  %v1766_v31 = vrot.slane %v6094_v15, 1 }
  0xd1   : > { %4904 = vmatmul.mubr.bf16.gmra.mrb[4].mxu0 %v3098_v0  ;;  %v3134_v0 = vsel %vm1246_vm8, %v6209_v52, %v3133_v24  ;;  %v1715_v52 = vld [vmem:[#allocation2 + $0x20] sm:$0xfe]  ;;  %v6381_v57 = vld [vmem:[#allocation2 + $0xe8] sm:$0x1] }
  0xd2   : > { %4907 = vmatprep.mubr.bf16.mxu0 %v3110_v58  ;;  %4936 = vmatpush3.bf16.msra.mxu0 %v5325_v33  ;;  %v3143_v33 = vshll.u32 %v6337_v32, 16  ;;  %v1438_v41 = vsel %vm1246_vm8, %v6344_v21, %v1437_v48  ;;  %v1768_v43 = vrot.slane %v1715_v52, 1  ;;  %v3158_v48 = vsel %vm1246_vm8, %v6245_v8, %v3157_v9  ;;  %v1717_v8 = vld [vmem:[#allocation2 + $0x40] sm:$0xfe] }
  0xd3   : > { %4937 = vmatprep.subr.bf16.mxu0 %v5327_v30  ;;  %v1774_v9 = vrot.slane %v1717_v8, 1  ;;  %v1775_v52 = vrot.slane %v6119_v19, 1  ;;  %v5337_v19 = vld [vmem:[%s6561_s3 + $0xd0] sm:$0xff]  }
  0xd4   : > { %v3145_v58 = vrot.slane %v3143_v33, 1  ;;  %v5331_v33 = vld [vmem:[%s6561_s3 + $0x238] sm:$0xff]  }
  0xd6   : > { %4684 = vmatmul.mubr.bf16.gmra.mrb[24].mxu1 %v1414_v47  ;;  %4938 = vmatpush3.bf16.msra.mxu0 %v5327_v30  ;;  %v1714_v30 = vld [vmem:[#allocation2 + $0x10] sm:$0xfe]  ;;  %v6359_v47 = vld [vmem:[#allocation2 + $0xb8] sm:$0x1] }
  0xd7   : > { %4687 = vmatprep.mubr.bf16.mxu1 %v1426_v6  ;;  %4939 = vmatprep.subr.bf16.mxu0 %v5328_v38  ;;  %v1765_v20 = vrot.slane %v1714_v30, 1  ;;  %v3146_v6 = vsel %vm1246_vm8, %v6242_v17, %v3145_v58  ;;  %v3167_v24 = vshll.u32 %v6359_v47, 16 }
  0xd9   : > { %4908 = vmatmul.mubr.bf16.gmra.mrb[8].mxu0 %v3122_v44  ;;  %v3179_v44 = vshll.u32 %v6364_v23, 16  ;;  %v1767_v15 = vsel %vm1761_vm7, %v1765_v20, %v1766_v31  ;;  %v3169_v17 = vrot.slane %v3167_v24, 1  ;;  %v1776_v31 = vsel %vm1761_vm7, %v1774_v9, %v1775_v52  ;;  %v1721_v52 = vld [vmem:[#allocation2 + $0x80] sm:$0xfe] }
  0xda   : > { %4911 = vmatprep.mubr.bf16.mxu0 %v3134_v0  ;;  %4940 = vmatpush3.bf16.msra.mxu0 %v5328_v38  ;;  %v1769_v38 = vrot.slane %v6097_v14, 1  ;;  %v6379_v0 = vld [vmem:[#allocation2 + $0xd8] sm:$0x1] }
  0xdb   : > { %4941 = vmatprep.subr.bf16.mxu0 %v5329_v16  ;;  %v3181_v14 = vrot.slane %v3179_v44, 1  ;;  %v3170_v58 = vsel %vm1246_vm8, %v6279_v42, %v3169_v17  ;;  %v3191_v30 = vshll.u32 %v6379_v0, 16 }
  0xdc   : > { %v1770_v5 = vsel %vm1761_vm7, %v1768_v43, %v1769_v38  ;;  %v1719_v43 = vld [vmem:[#allocation2 + $0x60] sm:$0xfe] }
  0xdd   : > { %v3193_v20 = vrot.slane %v3191_v30, 1  ;;  %v5339_v30 = vld [vmem:[%s6561_s3 + $0xe0] sm:$0xff]  }
  0xde   : > { %4688 = vmatmul.mubr.bf16.gmra.mrb[28].mxu1 %v1438_v41  ;;  %4942 = vmatpush3.bf16.msra.mxu0 %v5329_v16  ;;  %v1771_v16 = vrot.slane %v1716_v4, 1  ;;  %v1772_v41 = vrot.slane %v6116_v46, 1  ;;  %v6395_v46 = vld [vmem:[#allocation2 + $0x100] sm:$0xff]  ;;  %v1781_v4 = vrot.slane %v6156_v11, 1 }
  0xdf   : > { %4707 = vmatprep.mubr.bf16.mxu1 %v1764_v13  ;;  %4943 = vmatprep.subr.bf16.mxu0 %v5330_v59  ;;  %v5336_v13 = vld [vmem:[%s6561_s3 + $0xc8] sm:$0xff]   ;;  %v3222_v38 = vshll.u32 %v6395_v46, 16 }
  0xe0   : > { %v1773_v42 = vsel %vm1761_vm7, %v1771_v16, %v1772_v41  ;;  %v3220_v16 = vshrl.u32 %v6395_v46, 16 }
  0xe1   : > { %4912 = vmatmul.mubr.bf16.gmra.mrb[12].mxu0 %v3146_v6  ;;  %v1718_v6 = vld [vmem:[#allocation2 + $0x50] sm:$0xfe] }
  0xe2   : > { %4915 = vmatprep.mubr.bf16.mxu0 %v3158_v48  ;;  %4944 = vmatpush3.bf16.msra.mxu0 %v5330_v59  ;;  %v3203_v59 = vshll.u32 %v6381_v57, 16  ;;  %v6405_v48 = vld [vmem:[#allocation2 + $0x108] sm:$0x1]  ;;  %v1777_v44 = vrot.slane %v1718_v6, 1 }
  0xe3   : > { %4945 = vmatprep.subr.bf16.mxu0 %v5331_v33  ;;  %v3227_v41 = vshll.u32 %v6405_v48, 16  ;;  %v5340_v6 = vld [vmem:[%s6561_s3 + $0xe8] sm:$0xff]  }
  0xe4   : > { %v3205_v24 = vrot.slane %v3203_v59, 1  ;;  %v1784_v59 = vrot.slane %v6181_v50, 1 }
  0xe5   : > { %v3229_v9 = vrot.slane %v3227_v41, 1  ;;  %v3569_v41 = vrot.slane %v6225_v29, 1  ;;  %v3520_v29 = vld [vmem:[#allocation2 + $0x50] sm:$0xfe] }
  0xe6   : > { %4708 = vmatmul.mubr.bf16.vlgmr.msra.gmra.mrb[0].mxu1 %v1767_v15  ;;  %4946 = vmatpush3.bf16.msra.mxu0 %v5331_v33  ;;  %v1778_v33 = vrot.slane %v6150_v53, 1  ;;  %v3194_v15 = vsel %vm1246_vm8, %v6315_v39, %v3193_v20  ;;  %v3206_v8 = vsel %vm1246_vm8, %v6321_v49, %v3205_v24  ;;  %v3224_v53 = vrot.slane %v3222_v38, 1  ;;  %v3517_v24 = vld [vmem:[#allocation2 + $0x20] sm:$0xfe]  ;;  %v1722_v38 = vld [vmem:[#allocation2 + $0x90] sm:$0xfe] }
  0xe7   : > { %4987 = vmatpush3.bf16.msra.mxu1 %v6271_v35  ;;  %4711 = vmatprep.mubr.bf16.mxu1 %v1770_v5  ;;  %v3182_v35 = vsel %vm1246_vm8, %v6284_v2, %v3181_v14  ;;  %v6402_v2 = vld [vmem:[#allocation2 + $0xf8] sm:$0x1]  ;;  %v1780_v5 = vrot.slane %v1719_v43, 1  ;;  %v1786_v20 = vrot.slane %v1721_v52, 1  ;;  %v1799_v52 = vrot.slane %v6253_v37, 1 }
  0xe8   : > { %4980 = vmatprep.subr.bf16.mxu1 %v5336_v13  ;;  %v3215_v17 = vshll.u32 %v6402_v2, 16  ;;  %v5338_v14 = vld [vmem:[%s6561_s3 + $0xd8] sm:$0xff]   ;;  %v1779_v39 = vsel %vm1761_vm7, %v1777_v44, %v1778_v33  ;;  %v3225_v49 = vor.u32 %v3224_v53, %v3220_v16  ;;  %v3566_v44 = vrot.slane %v6204_v3, 1  ;;  %v1723_v33 = vld [vmem:[#allocation2 + $0xa0] sm:$0xfe] }
  0xe9   : > { %4916 = vmatmul.mubr.bf16.gmra.mrb[16].mxu0 %v3170_v58  ;;  %v1782_v11 = vsel %vm1761_vm7, %v1780_v5, %v1781_v4  ;;  %v1792_v5 = vrot.slane %v1723_v33, 1  ;;  %v1793_v4 = vrot.slane %v6218_v40, 1  ;;  %v3518_v16 = vld [vmem:[#allocation2 + $0x30] sm:$0xfe]  ;;  %v3519_v53 = vld [vmem:[#allocation2 + $0x40] sm:$0xfe] }
  0xea   : > { %4919 = vmatprep.mubr.bf16.mxu0 %v3182_v35  ;;  %v3217_v58 = vrot.slane %v3215_v17, 1  ;;  %v1790_v17 = vrot.slane %v6211_v54, 1  ;;  %v3568_v54 = vrot.slane %v3518_v16, 1 }
  0xeb   : > { %4988 = vmatpush3.bf16.msra.mxu1 %v5336_v13  ;;  %v1720_v13 = vld [vmem:[#allocation2 + $0x70] sm:$0xfe]  ;;  %v1794_v40 = vsel %vm1761_vm7, %v1792_v5, %v1793_v4  ;;  %v3584_v4 = vrot.slane %v6313_v60, 1  ;;  %v3590_v60 = vrot.slane %v6342_v18, 1 }
  0xec   : > { %4981 = vmatprep.subr.bf16.mxu1 %v5337_v19  ;;  %v1783_v35 = vrot.slane %v1720_v13, 1  ;;  %v1725_v13 = vld [vmem:[#allocation2 + $0xc0] sm:$0xfe]  ;;  %v1728_v5 = vld [vmem:[#allocation2 + $0xf0] sm:$0xfe] }
  0xee   : > { %4712 = vmatmul.mubr.bf16.gmra.mrb[4].mxu1 %v1773_v42  ;;  %v3218_v42 = vsel %vm1246_vm8, %v6344_v21, %v3217_v58  ;;  %v1785_v43 = vsel %vm1761_vm7, %v1783_v35, %v1784_v59  ;;  %v3565_v21 = vrot.slane %v3517_v24, 1  ;;  %v3571_v58 = vrot.slane %v3519_v53, 1  ;;  %v3521_v59 = vld [vmem:[#allocation2 + $0x60] sm:$0xfe]  ;;  %v3524_v53 = vld [vmem:[#allocation2 + $0x90] sm:$0xfe] }
  0xef   : > { %4715 = vmatprep.mubr.bf16.mxu1 %v1776_v31  ;;  %4989 = vmatpush3.bf16.msra.mxu1 %v5337_v19  ;;  %v1787_v31 = vrot.slane %v6186_v26, 1  ;;  %v3230_v19 = vsel %vm1246_vm8, %v3225_v49, %v3229_v9  ;;  %v5341_v26 = vld [vmem:[%s6561_s3 + $0xf0] sm:$0xff]   ;;  %v1796_v49 = vrot.slane %v6247_v45, 1  ;;  %v1798_v9 = vrot.slane %v1725_v13, 1  ;;  %v1727_v24 = vld [vmem:[#allocation2 + $0xe0] sm:$0xfe] }
  0xf0   : > { %4982 = vmatprep.subr.bf16.mxu1 %v5338_v14  ;;  %v3577_v45 = vrot.slane %v3521_v59, 1  ;;  %v3531_v59 = vld [vmem:[#allocation2 + $0x100] sm:$0xfe] }
  0xf1   : > { %4920 = vmatmul.mubr.bf16.gmra.mrb[20].mxu0 %v3194_v15  ;;  %v1788_v50 = vsel %vm1761_vm7, %v1786_v20, %v1787_v31  ;;  %v1789_v15 = vrot.slane %v1722_v38, 1  ;;  %v3575_v20 = vrot.slane %v6260_v56, 1  ;;  %v1800_v31 = vsel %vm1761_vm7, %v1798_v9, %v1799_v52  ;;  %v3522_v56 = vld [vmem:[#allocation2 + $0x70] sm:$0xfe]  ;;  %v3529_v9 = vld [vmem:[#allocation2 + $0xe0] sm:$0xfe] }
  0xf2   : > { %4923 = vmatprep.mubr.bf16.mxu0 %v3206_v8  ;;  %v3567_v8 = vsel %vm1761_vm7, %v3565_v21, %v3566_v44  ;;  %v1804_v38 = vrot.slane %v1727_v24, 1  ;;  %v3523_v44 = vld [vmem:[#allocation2 + $0x80] sm:$0xfe] }
  0xf3   : > { %4990 = vmatpush3.bf16.msra.mxu1 %v5338_v14  ;;  %v5342_v14 = vld [vmem:[%s6561_s3 + $0xf8] sm:$0xff]   ;;  %v1791_v3 = vsel %vm1761_vm7, %v1789_v15, %v1790_v17  ;;  %v3581_v15 = vrot.slane %v6308_v61, 1 }
  0xf4   : > { %4983 = vmatprep.subr.bf16.mxu1 %v5339_v30 }
  0xf6   : > { %4716 = vmatmul.mubr.bf16.gmra.mrb[8].mxu1 %v1779_v39  ;;  %v1724_v39 = vld [vmem:[#allocation2 + $0xb0] sm:$0xfe] }
  0xf7   : > { %4719 = vmatprep.mubr.bf16.mxu1 %v1782_v11  ;;  %4991 = vmatpush3.bf16.msra.mxu1 %v5339_v30  ;;  %v3572_v11 = vrot.slane %v6240_v12, 1  ;;  %v1795_v30 = vrot.slane %v1724_v39, 1  ;;  %v3574_v12 = vrot.slane %v3520_v29, 1  ;;  %v3601_v29 = vrot.slane %v3529_v9, 1 }
  0xf8   : > { %4984 = vmatprep.subr.bf16.mxu1 %v5340_v6 }
  0xf9   : > { %4924 = vmatmul.mubr.bf16.gmra.mrb[24].mxu0 %v3218_v42  ;;  %v3573_v35 = vsel %vm1761_vm7, %v3571_v58, %v3572_v11  ;;  %v1797_v42 = vsel %vm1761_vm7, %v1795_v30, %v1796_v49  ;;  %v3526_v58 = vld [vmem:[#allocation2 + $0xb0] sm:$0xfe]  ;;  %v3527_v11 = vld [vmem:[#allocation2 + $0xc0] sm:$0xfe]  ;;  %v3593_v30 = vrot.slane %v6359_v47, 1  ;;  %v3602_v47 = vrot.slane %v6381_v57, 1 }
  0xfa   : > { %4927 = vmatprep.mubr.bf16.mxu0 %v3230_v19  ;;  %v3578_v19 = vrot.slane %v6277_v1, 1  ;;  %v3580_v1 = vrot.slane %v3522_v56, 1  ;;  %v3592_v13 = vrot.slane %v3526_v58, 1  ;;  %v3595_v49 = vrot.slane %v3527_v11, 1  ;;  %v3532_v57 = vld [vmem:[#allocation2 + $0x110] sm:$0xfe] }
  0xfb   : > { %4992 = vmatpush3.bf16.msra.mxu1 %v5340_v6  ;;  %v1726_v6 = vld [vmem:[#allocation2 + $0xd0] sm:$0xfe] }
  0xfc   : > { %4985 = vmatprep.subr.bf16.mxu1 %v5341_v26  ;;  %v1801_v37 = vrot.slane %v1726_v6, 1  ;;  %v3579_v21 = vsel %vm1761_vm7, %v3577_v45, %v3578_v19  ;;  %v3611_v6 = vrot.slane %v6141_v28, 1 }
  0xfe   : > { %4720 = vmatmul.mubr.bf16.gmra.mrb[12].mxu1 %v1785_v43  ;;  %v1802_v43 = vrot.slane %v6286_v7, 1  ;;  %v3583_v7 = vrot.slane %v3523_v44, 1 }
  0xff   : > { %4723 = vmatprep.mubr.bf16.mxu1 %v1788_v50  ;;  %4993 = vmatpush3.bf16.msra.mxu1 %v5341_v26  ;;  %v3576_v50 = vsel %vm1761_vm7, %v3574_v12, %v3575_v20  ;;  %v1805_v26 = vrot.slane %v6295_v10, 1  ;;  %v1807_v10 = vrot.slane %v1728_v5, 1  ;;  %v3605_v12 = vrot.slane %v6402_v2, 1 }
 0x100   : > { %4986 = vmatprep.subr.bf16.mxu1 %v5342_v14  ;;  %v1803_v33 = vsel %vm1761_vm7, %v1801_v37, %v1802_v43  ;;  %v3585_v16 = vsel %vm1761_vm7, %v3583_v7, %v3584_v4  ;;  %v3607_v20 = vrot.slane %v3531_v59, 1 }
 0x101   : > { %4928 = vmatmul.mubr.bf16.gmra.mrb[28].mxu0 %v6161_v55  ;;  %v3570_v55 = vsel %vm1761_vm7, %v3568_v54, %v3569_v41  ;;  %v1806_v17 = vsel %vm1761_vm7, %v1804_v38, %v1805_v26  ;;  %v3586_v54 = vrot.slane %v3524_v53, 1  ;;  %v3587_v41 = vrot.slane %v6337_v32, 1 }
 0x102   : > { %4947 = vmatprep.mubr.bf16.mxu0 %v3567_v8  ;;  %v3582_v8 = vsel %vm1761_vm7, %v3580_v1, %v3581_v15  ;;  %v3596_v32 = vrot.slane %v6364_v23, 1  ;;  %v3530_v23 = vld [vmem:[#allocation2 + $0xf0] sm:$0xfe] }
 0x103   : > { %4994 = vmatpush3.bf16.msra.mxu1 %v5342_v14  ;;  %v1808_v14 = vrot.slane %v6323_v62, 1  ;;  %v3588_v62 = vsel %vm1761_vm7, %v3586_v54, %v3587_v41 }
 0x104   : > { %v3597_v18 = vsel %vm1761_vm7, %v3595_v49, %v3596_v32 }
 0x105   : > { %v1809_v61 = vsel %vm1761_vm7, %v1807_v10, %v1808_v14 }
 0x106   : > { %4724 = vmatmul.mubr.bf16.gmra.mrb[16].mxu1 %v1791_v3  ;;  %v3525_v3 = vld [vmem:[#allocation2 + $0xa0] sm:$0xfe] }
 0x107   : > { %4727 = vmatprep.mubr.bf16.mxu1 %v1794_v40  ;;  %v3589_v40 = vrot.slane %v3525_v3, 1 }
 0x109   : > { %4948 = vmatmul.mubr.bf16.vlgmr.msra.gmra.mrb[0].mxu0 %v3570_v55  ;;  %v3591_v39 = vsel %vm1761_vm7, %v3589_v40, %v3590_v60  ;;  %v3528_v55 = vld [vmem:[#allocation2 + $0xd0] sm:$0xfe] }
 0x10a   : > { %4951 = vmatprep.mubr.bf16.mxu0 %v3573_v35  ;;  %v3598_v52 = vrot.slane %v3528_v55, 1  ;;  %v3599_v35 = vrot.slane %v6379_v0, 1  ;;  %v3608_v0 = vrot.slane %v6405_v48, 1 }
 0x10e   : > { %4728 = vmatmul.mubr.bf16.gmra.mrb[20].mxu1 %v1797_v42  ;;  %v3604_v42 = vrot.slane %v3530_v23, 1 }
 0x10f   : > { %4731 = vmatprep.mubr.bf16.mxu1 %v1800_v31  ;;  %v3610_v31 = vrot.slane %v3532_v57, 1 }
 0x111   : > { %4952 = vmatmul.mubr.bf16.gmra.mrb[4].mxu0 %v3576_v50  ;;  %v3612_v2 = vsel %vm1761_vm7, %v3610_v31, %v3611_v6 }
 0x112   : > { %4955 = vmatprep.mubr.bf16.mxu0 %v3579_v21 }
 0x116   : > { %4732 = vmatmul.mubr.bf16.gmra.mrb[24].mxu1 %v1803_v33 }
 0x117   : > { %4735 = vmatprep.mubr.bf16.mxu1 %v1806_v17 }
 0x119   : > { %4956 = vmatmul.mubr.bf16.gmra.mrb[8].mxu0 %v3582_v8 }
 0x11a   : > { %4959 = vmatprep.mubr.bf16.mxu0 %v3585_v16 }
 0x11e   : > { %4736 = vmatmul.mubr.bf16.gmra.mrb[28].mxu1 %v1809_v61 }
 0x11f   : > { %4771 = vmatprep.mubr.bf16.mxu1 %v6197_v27  ;;  %v3594_v27 = vsel %vm1761_vm7, %v3592_v13, %v3593_v30 }
 0x121   : > { %4960 = vmatmul.mubr.bf16.gmra.mrb[12].mxu0 %v3588_v62 }
 0x122   : > { %4963 = vmatprep.mubr.bf16.mxu0 %v3591_v39 }
 0x126   : > { %4772 = vmatmul.mubr.bf16.vlgmr.msra.gmra.mrb[16].mxu1 %v6202_v34  ;;  %v3600_v34 = vsel %vm1761_vm7, %v3598_v52, %v3599_v35 }
 0x127   : > { %4775 = vmatprep.mubr.bf16.mxu1 %v6232_v22  ;;  %v3603_v22 = vsel %vm1761_vm7, %v3601_v29, %v3602_v47 }
 0x129   : > { %4964 = vmatmul.mubr.bf16.gmra.mrb[16].mxu0 %v3594_v27 }
 0x12a   : > { %4967 = vmatprep.mubr.bf16.mxu0 %v3597_v18 }
 0x12e   : > { %4776 = vmatmul.mubr.bf16.gmra.mrb[20].mxu1 %v6237_v63  ;;  %v3606_v63 = vsel %vm1761_vm7, %v3604_v42, %v3605_v12 }
 0x12f   : > { %4779 = vmatprep.mubr.bf16.mxu1 %v6266_v25  ;;  %v3609_v25 = vsel %vm1761_vm7, %v3607_v20, %v3608_v0 }
 0x131   : > { %4968 = vmatmul.mubr.bf16.gmra.mrb[20].mxu0 %v3600_v34 }
 0x132   : > { %4971 = vmatprep.mubr.bf16.mxu0 %v3603_v22 }
 0x136   : > { %4780 = vmatmul.mubr.bf16.gmra.mrb[24].mxu1 %v6274_v51 }
 0x137   : > { %4783 = vmatprep.mubr.bf16.mxu1 %v6306_v36 }
 0x139   : > { %4972 = vmatmul.mubr.bf16.gmra.mrb[24].mxu0 %v3606_v63 }
 0x13a   : > { %4975 = vmatprep.mubr.bf16.mxu0 %v3609_v25 }
 0x13e   : > { %4784 = vmatmul.mubr.bf16.gmra.mrb[28].mxu1 %v6395_v46 }
 0x141   : > { %4976 = vmatmul.mubr.bf16.gmra.mrb[28].mxu0 %v3612_v2 }
 0x1b9   : > { %v4709_v48 = vpop.f32.mrb[0].mxu1 }
 0x1ba   : > { %v1925_v51 = vpop.f32.mrb[1].mxu1 }
 0x1bb   : > { %v4710_v45 = vpop.f32.mrb[2].mxu1 }
 0x1bc   : > { %v1928_v36 = vpop.f32.mrb[3].mxu1 }
 0x1c1   : > { %v4713_v19 = vpop.f32.mrb[4].mxu1 }
 0x1c2   : > { %v1941_v24 = vpop.f32.mrb[5].mxu1 }
 0x1c3   : > { %v4714_v37 = vpop.f32.mrb[6].mxu1 }
 0x1c4   : > { %v1944_v43 = vpop.f32.mrb[7].mxu1 }
 0x1c9   : > { %v4717_v50 = vpop.f32.mrb[8].mxu1 }
 0x1ca   : > { %v1957_v38 = vpop.f32.mrb[9].mxu1 }
 0x1cb   : > { %v4718_v26 = vpop.f32.mrb[10].mxu1 }
 0x1cc   : > { %v6495_v21 = vpop.f32.mrb[11].mxu1 }
 0x1d1   : > { %v6497_v28 = vpop.f32.mrb[12].mxu1 }
 0x1d2   : > { %v6499_v46 = vpop.f32.mrb[13].mxu1 }
 0x1d3   : > { %v6501_v56 = vpop.f32.mrb[14].mxu1 }
 0x1d4   : > { %v6503_v44 = vpop.f32.mrb[15].mxu1 }
 0x1dc   : > { %v4949_v33 = vpop.f32.mrb[0].mxu0 }
 0x1dd   : > { %v4995_v1 = vadd.f32 %v4949_v33, %v4709_v48  ;;  %v3728_v15 = vpop.f32.mrb[1].mxu0 }
 0x1de   : > { %v4996_v17 = vadd.f32 %v3728_v15, %v1925_v51  ;;  %v4950_v5 = vpop.f32.mrb[2].mxu0 }
 0x1df   : > { %3889 = vst [vmem:[%s6510_s29 + $0x10] sm:$0xff] %v4995_v1  ;;  %v4997_v7 = vadd.f32 %v4950_v5, %v4710_v45  ;;  %v3731_v4 = vpop.f32.mrb[3].mxu0  ;;  %v3958_v53 = vmul.f32 %v4995_v1, %v4995_v1 }
 0x1e0   : > { %3887 = vst [vmem:[%s6510_s29] sm:$0xff] %v4996_v17  ;;  %v4998_v10 = vadd.f32 %v3731_v4, %v1928_v36  ;;  %v3956_v14 = vmul.f32 %v4996_v17, %v4996_v17 }
 0x1e1   : > { %3890 = vst [vmem:[%s6510_s29 + $0x18] sm:$0xff] %v4997_v7  ;;  %v3959_v60 = vmul.f32 %v4997_v7, %v4997_v7 }
 0x1e2   : > { %3888 = vst [vmem:[%s6510_s29 + $0x8] sm:$0xff] %v4998_v10  ;;  %v3919_v8 = vadd.f32 %v4998_v10, %v4996_v17  ;;  %v3957_v16 = vmul.f32 %v4998_v10, %v4998_v10 }
 0x1e4   : > { %v3920_v3 = vadd.f32 %v4995_v1, %v3919_v8  ;;  %v3988_v61 = vadd.f32 %v3957_v16, %v3956_v14  ;;  %v4953_v54 = vpop.f32.mrb[4].mxu0 }
 0x1e5   : > { %v4999_v41 = vadd.f32 %v4953_v54, %v4713_v19  ;;  %v3744_v40 = vpop.f32.mrb[5].mxu0 }
 0x1e6   : > { %v3989_v62 = vadd.f32 %v3988_v61, %v3958_v53  ;;  %v5000_v39 = vadd.f32 %v3744_v40, %v1941_v24  ;;  %v3921_v58 = vadd.f32 %v4997_v7, %v3920_v3  ;;  %v4954_v11 = vpop.f32.mrb[6].mxu0 }
 0x1e7   : > { %3893 = vst [vmem:[%s6510_s29 + $0x30] sm:$0xff] %v4999_v41  ;;  %v5001_v13 = vadd.f32 %v4954_v11, %v4714_v37  ;;  %v3747_v30 = vpop.f32.mrb[7].mxu0  ;;  %v3962_v35 = vmul.f32 %v4999_v41, %v4999_v41 }
 0x1e8   : > { %3891 = vst [vmem:[%s6510_s29 + $0x20] sm:$0xff] %v5000_v39  ;;  %v3922_v49 = vadd.f32 %v5000_v39, %v3921_v58  ;;  %v3960_v32 = vmul.f32 %v5000_v39, %v5000_v39  ;;  %v3990_v27 = vadd.f32 %v3989_v62, %v3959_v60  ;;  %v5002_v18 = vadd.f32 %v3747_v30, %v1944_v43 }
 0x1e9   : > { %3894 = vst [vmem:[%s6510_s29 + $0x38] sm:$0xff] %v5001_v13  ;;  %v3963_v59 = vmul.f32 %v5001_v13, %v5001_v13 }
 0x1ea   : > { %v3991_v55 = vadd.f32 %v3990_v27, %v3960_v32  ;;  %3892 = vst [vmem:[%s6510_s29 + $0x28] sm:$0xff] %v5002_v18  ;;  %v3923_v9 = vadd.f32 %v5002_v18, %v3922_v49  ;;  %v3961_v52 = vmul.f32 %v5002_v18, %v5002_v18 }
 0x1ec   : > { %v3924_v29 = vadd.f32 %v4999_v41, %v3923_v9  ;;  %v3992_v47 = vadd.f32 %v3991_v55, %v3961_v52  ;;  %v4957_v34 = vpop.f32.mrb[8].mxu0 }
 0x1ed   : > { %v5003_v22 = vadd.f32 %v4957_v34, %v4717_v50  ;;  %v3760_v23 = vpop.f32.mrb[9].mxu0 }
 0x1ee   : > { %v3993_v42 = vadd.f32 %v3992_v47, %v3962_v35  ;;  %v5004_v12 = vadd.f32 %v3760_v23, %v1957_v38  ;;  %v3925_v20 = vadd.f32 %v5001_v13, %v3924_v29  ;;  %v4958_v0 = vpop.f32.mrb[10].mxu0 }
 0x1ef   : > { %3897 = vst [vmem:[%s6510_s29 + $0x50] sm:$0xff] %v5003_v22  ;;  %v5005_v63 = vadd.f32 %v4958_v0, %v4718_v26  ;;  %v3763_v25 = vpop.f32.mrb[11].mxu0  ;;  %v3966_v36 = vmul.f32 %v5003_v22, %v5003_v22 }
 0x1f0   : > { %3895 = vst [vmem:[%s6510_s29 + $0x40] sm:$0xff] %v5004_v12  ;;  %v3926_v57 = vadd.f32 %v5004_v12, %v3925_v20  ;;  %v3964_v31 = vmul.f32 %v5004_v12, %v5004_v12  ;;  %v3994_v6 = vadd.f32 %v3993_v42, %v3963_v59  ;;  %v5006_v2 = vadd.f32 %v3763_v25, %v6495_v21 }
 0x1f1   : > { %3898 = vst [vmem:[%s6510_s29 + $0x58] sm:$0xff] %v5005_v63  ;;  %v3967_v38 = vmul.f32 %v5005_v63, %v5005_v63 }
 0x1f2   : > { %v3995_v48 = vadd.f32 %v3994_v6, %v3964_v31  ;;  %3896 = vst [vmem:[%s6510_s29 + $0x48] sm:$0xff] %v5006_v2  ;;  %v3927_v51 = vadd.f32 %v5006_v2, %v3926_v57  ;;  %v3965_v45 = vmul.f32 %v5006_v2, %v5006_v2 }
 0x1f4   : > { %v3928_v19 = vadd.f32 %v5003_v22, %v3927_v51  ;;  %v3996_v24 = vadd.f32 %v3995_v48, %v3965_v45  ;;  %v4961_v37 = vpop.f32.mrb[12].mxu0 }
 0x1f5   : > { %v5007_v43 = vadd.f32 %v4961_v37, %v6497_v28  ;;  %v3776_v50 = vpop.f32.mrb[13].mxu0 }
 0x1f6   : > { %v3997_v26 = vadd.f32 %v3996_v24, %v3966_v36  ;;  %v5008_v33 = vadd.f32 %v3776_v50, %v6499_v46  ;;  %v3929_v21 = vadd.f32 %v5005_v63, %v3928_v19  ;;  %v4962_v1 = vpop.f32.mrb[14].mxu0 }
 0x1f7   : > { %3901 = vst [vmem:[%s6510_s29 + $0x70] sm:$0xff] %v5007_v43  ;;  %v5009_v15 = vadd.f32 %v4962_v1, %v6501_v56  ;;  %v3779_v17 = vpop.f32.mrb[15].mxu0  ;;  %v3970_v61 = vmul.f32 %v5007_v43, %v5007_v43 }
 0x1f8   : > { %3899 = vst [vmem:[%s6510_s29 + $0x60] sm:$0xff] %v5008_v33  ;;  %v3930_v7 = vadd.f32 %v5008_v33, %v3929_v21  ;;  %v3968_v4 = vmul.f32 %v5008_v33, %v5008_v33  ;;  %v3998_v10 = vadd.f32 %v3997_v26, %v3967_v38  ;;  %v5010_v28 = vadd.f32 %v3779_v17, %v6503_v44 }
 0x1f9   : > { %v4773_v5 = vpop.f32.mrb[16].mxu1  ;;  %3902 = vst [vmem:[%s6510_s29 + $0x78] sm:$0xff] %v5009_v15  ;;  %v3971_v62 = vmul.f32 %v5009_v15, %v5009_v15 }
 0x1fa   : > { %v2263_v14 = vpop.f32.mrb[17].mxu1  ;;  %v3999_v16 = vadd.f32 %v3998_v10, %v3968_v4  ;;  %3900 = vst [vmem:[%s6510_s29 + $0x68] sm:$0xff] %v5010_v28  ;;  %v3931_v46 = vadd.f32 %v5010_v28, %v3930_v7  ;;  %v3969_v53 = vmul.f32 %v5010_v28, %v5010_v28 }
 0x1fb   : > { %v4774_v8 = vpop.f32.mrb[18].mxu1 }
 0x1fc   : > { %v2266_v3 = vpop.f32.mrb[19].mxu1  ;;  %v3932_v56 = vadd.f32 %v5007_v43, %v3931_v46  ;;  %v4000_v54 = vadd.f32 %v3999_v16, %v3969_v53  ;;  %v4965_v41 = vpop.f32.mrb[16].mxu0 }
 0x1fd   : > { %v5011_v40 = vadd.f32 %v4965_v41, %v4773_v5  ;;  %v3792_v60 = vpop.f32.mrb[17].mxu0 }
 0x1fe   : > { %v4001_v39 = vadd.f32 %v4000_v54, %v3970_v61  ;;  %v5012_v44 = vadd.f32 %v3792_v60, %v2263_v14  ;;  %v3933_v58 = vadd.f32 %v5009_v15, %v3932_v56  ;;  %v4966_v11 = vpop.f32.mrb[18].mxu0 }
 0x1ff   : > { %3905 = vst [vmem:[%s6510_s29 + $0x90] sm:$0xff] %v5011_v40  ;;  %v5013_v13 = vadd.f32 %v4966_v11, %v4774_v8  ;;  %v3795_v30 = vpop.f32.mrb[19].mxu0  ;;  %v3974_v22 = vmul.f32 %v5011_v40, %v5011_v40 }
 0x200   : > { %3903 = vst [vmem:[%s6510_s29 + $0x80] sm:$0xff] %v5012_v44  ;;  %v3934_v32 = vadd.f32 %v5012_v44, %v3933_v58  ;;  %v3972_v27 = vmul.f32 %v5012_v44, %v5012_v44  ;;  %v4002_v18 = vadd.f32 %v4001_v39, %v3971_v62  ;;  %v5014_v55 = vadd.f32 %v3795_v30, %v2266_v3 }
 0x201   : > { %v4777_v49 = vpop.f32.mrb[20].mxu1  ;;  %3906 = vst [vmem:[%s6510_s29 + $0x98] sm:$0xff] %v5013_v13  ;;  %v3975_v0 = vmul.f32 %v5013_v13, %v5013_v13 }
 0x202   : > { %v2279_v9 = vpop.f32.mrb[21].mxu1  ;;  %v4003_v35 = vadd.f32 %v4002_v18, %v3972_v27  ;;  %3904 = vst [vmem:[%s6510_s29 + $0x88] sm:$0xff] %v5014_v55  ;;  %v3935_v29 = vadd.f32 %v5014_v55, %v3934_v32  ;;  %v3973_v47 = vmul.f32 %v5014_v55, %v5014_v55 }
 0x203   : > { %v4778_v52 = vpop.f32.mrb[22].mxu1 }
 0x204   : > { %v2282_v34 = vpop.f32.mrb[23].mxu1  ;;  %v3936_v23 = vadd.f32 %v5011_v40, %v3935_v29  ;;  %v4004_v59 = vadd.f32 %v4003_v35, %v3973_v47  ;;  %v4969_v42 = vpop.f32.mrb[20].mxu0 }
 0x205   : > { %v5015_v12 = vadd.f32 %v4969_v42, %v4777_v49  ;;  %v3808_v20 = vpop.f32.mrb[21].mxu0 }
 0x206   : > { %v4005_v63 = vadd.f32 %v4004_v59, %v3974_v22  ;;  %v5016_v25 = vadd.f32 %v3808_v20, %v2279_v9  ;;  %v3937_v57 = vadd.f32 %v5013_v13, %v3936_v23  ;;  %v4970_v31 = vpop.f32.mrb[22].mxu0 }
 0x207   : > { %3909 = vst [vmem:[%s6510_s29 + $0xb0] sm:$0xff] %v5015_v12  ;;  %v5017_v6 = vadd.f32 %v4970_v31, %v4778_v52  ;;  %v3811_v2 = vpop.f32.mrb[23].mxu0  ;;  %v3978_v33 = vmul.f32 %v5015_v12, %v5015_v12 }
 0x208   : > { %3907 = vst [vmem:[%s6510_s29 + $0xa0] sm:$0xff] %v5016_v25  ;;  %v3938_v51 = vadd.f32 %v5016_v25, %v3937_v57  ;;  %v3976_v45 = vmul.f32 %v5016_v25, %v5016_v25  ;;  %v4006_v36 = vadd.f32 %v4005_v63, %v3975_v0  ;;  %v5018_v19 = vadd.f32 %v3811_v2, %v2282_v34 }
 0x209   : > { %v4781_v48 = vpop.f32.mrb[24].mxu1  ;;  %3910 = vst [vmem:[%s6510_s29 + $0xb8] sm:$0xff] %v5017_v6  ;;  %v3979_v7 = vmul.f32 %v5017_v6, %v5017_v6 }
 0x20a   : > { %v2295_v24 = vpop.f32.mrb[25].mxu1  ;;  %v4007_v43 = vadd.f32 %v4006_v36, %v3976_v45  ;;  %3908 = vst [vmem:[%s6510_s29 + $0xa8] sm:$0xff] %v5018_v19  ;;  %v3939_v50 = vadd.f32 %v5018_v19, %v3938_v51  ;;  %v3977_v38 = vmul.f32 %v5018_v19, %v5018_v19 }
 0x20b   : > { %v4782_v37 = vpop.f32.mrb[26].mxu1 }
 0x20c   : > { %v2298_v26 = vpop.f32.mrb[27].mxu1  ;;  %v3940_v21 = vadd.f32 %v5015_v12, %v3939_v50  ;;  %v4008_v1 = vadd.f32 %v4007_v43, %v3977_v38  ;;  %v4973_v15 = vpop.f32.mrb[24].mxu0 }
 0x20d   : > { %v5019_v17 = vadd.f32 %v4973_v15, %v4781_v48  ;;  %v3824_v5 = vpop.f32.mrb[25].mxu0 }
 0x20e   : > { %v4009_v4 = vadd.f32 %v4008_v1, %v3978_v33  ;;  %v5020_v10 = vadd.f32 %v3824_v5, %v2295_v24  ;;  %v3941_v28 = vadd.f32 %v5017_v6, %v3940_v21  ;;  %v4974_v14 = vpop.f32.mrb[26].mxu0 }
 0x20f   : > { %3913 = vst [vmem:[%s6510_s29 + $0xd0] sm:$0xff] %v5019_v17  ;;  %v5021_v8 = vadd.f32 %v4974_v14, %v4782_v37  ;;  %v3827_v16 = vpop.f32.mrb[27].mxu0  ;;  %v3982_v44 = vmul.f32 %v5019_v17, %v5019_v17 }
 0x210   : > { %3911 = vst [vmem:[%s6510_s29 + $0xc0] sm:$0xff] %v5020_v10  ;;  %v3942_v53 = vadd.f32 %v5020_v10, %v3941_v28  ;;  %v3980_v3 = vmul.f32 %v5020_v10, %v5020_v10  ;;  %v4010_v61 = vadd.f32 %v4009_v4, %v3979_v7  ;;  %v5022_v56 = vadd.f32 %v3827_v16, %v2298_v26 }
 0x211   : > { %v4785_v46 = vpop.f32.mrb[28].mxu1  ;;  %3914 = vst [vmem:[%s6510_s29 + $0xd8] sm:$0xff] %v5021_v8  ;;  %v3983_v32 = vmul.f32 %v5021_v8, %v5021_v8 }
 0x212   : > { %v2311_v54 = vpop.f32.mrb[29].mxu1  ;;  %v4011_v40 = vadd.f32 %v4010_v61, %v3980_v3  ;;  %3912 = vst [vmem:[%s6510_s29 + $0xc8] sm:$0xff] %v5022_v56  ;;  %v3943_v60 = vadd.f32 %v5022_v56, %v3942_v53  ;;  %v3981_v62 = vmul.f32 %v5022_v56, %v5022_v56 }
 0x213   : > { %v4786_v41 = vpop.f32.mrb[30].mxu1 }
 0x214   : > { %v2314_v39 = vpop.f32.mrb[31].mxu1  ;;  %v3944_v58 = vadd.f32 %v5019_v17, %v3943_v60  ;;  %v4012_v11 = vadd.f32 %v4011_v40, %v3981_v62  ;;  %v4977_v13 = vpop.f32.mrb[28].mxu0 }
 0x215   : > { %v5023_v30 = vadd.f32 %v4977_v13, %v4785_v46  ;;  %v3840_v49 = vpop.f32.mrb[29].mxu0 }
 0x216   : > { %v4013_v27 = vadd.f32 %v4012_v11, %v3982_v44  ;;  %v5024_v18 = vadd.f32 %v3840_v49, %v2311_v54  ;;  %v3945_v55 = vadd.f32 %v5021_v8, %v3944_v58  ;;  %v4978_v9 = vpop.f32.mrb[30].mxu0 }
 0x217   : > { %3917 = vst [vmem:[%s6510_s29 + $0xf0] sm:$0xff] %v5023_v30  ;;  %v5025_v52 = vadd.f32 %v4978_v9, %v4786_v41  ;;  %v3843_v35 = vpop.f32.mrb[31].mxu0  ;;  %v3986_v12 = vmul.f32 %v5023_v30, %v5023_v30 }
 0x218   : > { %3915 = vst [vmem:[%s6510_s29 + $0xe0] sm:$0xff] %v5024_v18  ;;  %v3946_v29 = vadd.f32 %v5024_v18, %v3945_v55  ;;  %v3984_v47 = vmul.f32 %v5024_v18, %v5024_v18  ;;  %v4014_v34 = vadd.f32 %v4013_v27, %v3983_v32  ;;  %v5026_v22 = vadd.f32 %v3843_v35, %v2314_v39 }
 0x219   : > { %3918 = vst [vmem:[%s6510_s29 + $0xf8] sm:$0xff] %v5025_v52  ;;  %v3987_v63 = vmul.f32 %v5025_v52, %v5025_v52 }
 0x21a   : > { %v4015_v23 = vadd.f32 %v4014_v34, %v3984_v47  ;;  %3916 = vst [vmem:[%s6510_s29 + $0xe8] sm:$0xff] %v5026_v22  ;;  %v3947_v59 = vadd.f32 %v5026_v22, %v3946_v29  ;;  %v3985_v42 = vmul.f32 %v5026_v22, %v5026_v22 }
 0x21c   : > { %v3948_v20 = vadd.f32 %v5023_v30, %v3947_v59  ;;  %v4016_v0 = vadd.f32 %v4015_v23, %v3985_v42 }
 0x21e   : > { %v3949_v25 = vadd.f32 %v5025_v52, %v3948_v20  ;;  %v4017_v57 = vadd.f32 %v4016_v0, %v3986_v12 }
 0x220   : > { %v3950_v31 = vrot.slane %v3949_v25, 4  ;;  %v4018_v6 = vadd.f32 %v4017_v57, %v3987_v63 }
 0x222   : > { %v3951_v2 = vadd.f32 %v3950_v31, %v3949_v25  ;;  %v4019_v48 = vrot.slane %v4018_v6, 4 }
 0x224   : > { %v3952_v51 = vrot.slane %v3951_v2, 2  ;;  %v4020_v45 = vadd.f32 %v4019_v48, %v4018_v6 }
 0x226   : > { %v3953_v36 = vadd.f32 %v3952_v51, %v3951_v2  ;;  %v4021_v19 = vrot.slane %v4020_v45, 2 }
 0x228   : > { %v3954_v24 = vrot.slane %v3953_v36, 1  ;;  %v4022_v37 = vadd.f32 %v4021_v19, %v4020_v45 }
 0x22a   : > { %v4023_v43 = vrot.slane %v4022_v37, 1  ;;  %v3955_v50 = vadd.f32 %v3954_v24, %v3953_v36 }
 0x22c   : > { %v4024_v38 = vadd.f32 %v4023_v43, %v4022_v37 }
 0x22e   : > { %v4026_v26 = vsel %vm404_vm0, %v3955_v50, %v4024_v38 }
 0x22f   : > { %v4028_v33 = vsel %vm4027_vm9, %v4026_v26, 0.0 }
 0x230   : > { %4029 = vst [vmem:[%s238_s21] sm:$0xff] %v4028_v33 }
 0x231 PF: > { %s16_s18 = sadd.s32 1, %s5349_s18  }
 0x232   : > { %p13_p5 = scmp.ge.s32.totalorder %s16_s18, 4  }
 0x234   :  { %15 = sbr.rel (!%p13_p5) target bundleno = 1 (0x1), region = 89 }

// kernel: basic_block_forward.3
= control target key start
LH: loop header
LB: loop body
LE: loop exit
PB: predicated region body
PF: predicated region fallthrough
CT: control target
= control target key end

     0   :  { %s6965_s12 = smov 0   ;;  %s8801_s0 = inlined_call_operand.vmem [shape: bf16[2,18,32,128], index: 0, kind: input, shape index: {}]   ;;  %s8802_s1 = inlined_call_operand.vmem [shape: bf16[9,128,128], index: 1, kind: input, shape index: {}]   ;;  %s8803_s2 = inlined_call_operand.vmem [shape: f32[512,128], index: 2, kind: output, shape index: {0}]   ;;  %s8804_s3 = inlined_call_operand.vmem [shape: f32[2,8,128], index: 3, kind: output, shape index: {1}]  }
   0x1 LB: > { %s6971_s13 = sadd.s32 4294967295, %s6943_s12   ;;  %p5227_p0 = scmp.ge.s32.totalorder %s6943_s12, 1  ;;  %s6943_s12 = sphi %s6965_s12, %s14_s12  }
   0x2   : > { %p140_p1 = scmp.lt.s32.totalorder %s6943_s12, 3 }
   0x4   : > { %p141_p2 = pnand %p5227_p0, %p140_p1 }
   0x6   : > { %144 = sbr.rel (%p141_p2) target bundleno = 606 (0x25e), region = 28 }
   0xd   : > { %v6747_v0 = vld [vmem:[%s8802_s1 + $0x40] sm:$0xff]   ;;  %p168_p3 = scmp.lt.s32.totalorder %s6971_s13, 1  ;;  %v6749_v2 = vld [vmem:[%s8802_s1 + $0x48] sm:$0xff]   ;;  %v6751_v4 = vld [vmem:[%s8802_s1 + $0x50] sm:$0xff]   ;;  %vm248_vm0 = vsmask.f32 3328 }
   0xe   : > { %v6748_v1 = vld [vmem:[%s8802_s1 + $0x100] sm:$0xff]   ;;  %6034 = vmatprep.subr.bf16.mxu1 %v6747_v0  ;;  %v6750_v3 = vld [vmem:[%s8802_s1 + $0x108] sm:$0xff]   ;;  %v6752_v5 = vld [vmem:[%s8802_s1 + $0x110] sm:$0xff]   ;;  %vm249_vm1 = vsmask.f32 7440  ;;  %vm1278_vm3 = vcmask 1042432  }
   0xf   : > { %6226 = vmatprep.subr.bf16.mxu0 %v6748_v1  ;;  %6035 = vmatpush3.bf16.msra.mxu1 %v6747_v0  ;;  %s6995_s26 = scalar_select %p168_p3, %s6971_s13, 1  ;;  %v6753_v6 = vld [vmem:[%s8802_s1 + $0x58] sm:$0xff]   ;;  %v6755_v8 = vld [vmem:[%s8802_s1 + $0x60] sm:$0xff]   ;;  %v6757_v10 = vld [vmem:[%s8802_s1 + $0x68] sm:$0xff]   ;;  %vm1279_vm4 = vcmask 1046532   ;;  %vm5131_vm6 = vcmask 1040384  }
  0x10   : > { %6227 = vmatpush3.bf16.msra.mxu0 %v6748_v1  ;;  %6036 = vmatprep.subr.bf16.mxu1 %v6749_v2  ;;  %v6754_v7 = vld [vmem:[%s8802_s1 + $0x118] sm:$0xff]   ;;  %v6756_v9 = vld [vmem:[%s8802_s1 + $0x120] sm:$0xff]   ;;  %v6758_v11 = vld [vmem:[%s8802_s1 + $0x128] sm:$0xff]   ;;  %vm5133_vm7 = vcmask 1041408  }
  0x11   : > { %6228 = vmatprep.subr.bf16.mxu0 %v6750_v3  ;;  %s6738_s4 = smul.u32 288, %s6995_s26  ;;  %v6759_v25 = vld [vmem:[%s8802_s1 + $0x70] sm:$0xff]   ;;  %v6761_v36 = vld [vmem:[%s8802_s1 + $0x78] sm:$0xff]   ;;  %vm7045_vm2 = vmor %vm248_vm0, %vm249_vm1 }
  0x12   : > { %v6760_v30 = vld [vmem:[%s8802_s1 + $0x130] sm:$0xff]   ;;  %v6762_v51 = vld [vmem:[%s8802_s1 + $0x138] sm:$0xff]   ;;  %vm7291_vm5 = vmor %vm1278_vm3, %vm1279_vm4 }
  0x13   : > { %6037 = vmatpush3.bf16.msra.mxu1 %v6749_v2  ;;  %s7013_s11 = scalar_lea.vmem %s8801_s0, %s6738_s4 }
  0x14   : > { %6229 = vmatpush3.bf16.msra.mxu0 %v6750_v3  ;;  %6038 = vmatprep.subr.bf16.mxu1 %v6751_v4  ;;  %v184_v12 = vld [vmem:[%s7013_s11] sm:$0xf]  ;;  %v185_v13 = vld [vmem:[%s7013_s11 + $0x4] sm:$0xf]  ;;  %v232_v14 = vld [vmem:[%s7013_s11 + $0x8] sm:$0x1] }
  0x15   : > { %6230 = vmatprep.subr.bf16.mxu0 %v6752_v5  ;;  %v252_v15 = vshrl.u32 %v184_v12, 16  ;;  %v255_v16 = vshll.u32 %v184_v12, 16  ;;  %v261_v17 = vshll.u32 %v185_v13, 16  ;;  %v265_v18 = vshrl.u32 %v185_v13, 16  ;;  %v5424_v20 = vld [vmem:[%s7013_s11 + $0x10] sm:$0xf] }
  0x16   : > { %v271_v19 = vshll.u32 %v232_v14, 16  ;;  %v7026_v23 = vld [vmem:[%s7013_s11 + $0x14] sm:$0xf]  ;;  %v7029_v24 = vld [vmem:[%s7013_s11 + $0x18] sm:$0x1]  ;;  %v2151_v29 = vshrl.u32 %v5424_v20, 16 }
  0x17   : > { %6039 = vmatpush3.bf16.msra.mxu1 %v6751_v4  ;;  %v254_v21 = vrot.slane %v252_v15, 4  ;;  %v257_v22 = vrot.slane %v255_v16, 5  ;;  %v263_v26 = vrot.slane %v261_v17, 5  ;;  %v267_v27 = vrot.slane %v265_v18, 4  ;;  %v186_v35 = vld [vmem:[%s7013_s11 + $0x10] sm:$0xf] }
  0x18   : > { %6231 = vmatpush3.bf16.msra.mxu0 %v6752_v5  ;;  %6040 = vmatprep.subr.bf16.mxu1 %v6753_v6  ;;  %v273_v28 = vrot.slane %v271_v19, 5  ;;  %v2154_v32 = vshll.u32 %v5424_v20, 16  ;;  %v2160_v33 = vshll.u32 %v7026_v23, 16  ;;  %v2164_v34 = vshrl.u32 %v7026_v23, 16  ;;  %v187_v42 = vld [vmem:[%s7013_s11 + $0x14] sm:$0xf] }
  0x19   : > { %6232 = vmatprep.subr.bf16.mxu0 %v6754_v7  ;;  %v258_v31 = vor.u32 %v257_v22, %v254_v21  ;;  %v268_v38 = vor.u32 %v267_v27, %v263_v26  ;;  %v2153_v39 = vrot.slane %v2151_v29, 4  ;;  %v2170_v40 = vshll.u32 %v7029_v24, 16  ;;  %v233_v55 = vld [vmem:[%s7013_s11 + $0x18] sm:$0x1]  ;;  %v5427_v57 = vld [vmem:[%s7013_s11 + $0x20] sm:$0xf] }
  0x1a   : > { %v2925_v41 = vrot.slane %v7029_v24, 5  ;;  %v2156_v44 = vrot.slane %v2154_v32, 5  ;;  %v2162_v45 = vrot.slane %v2160_v33, 5  ;;  %v2166_v46 = vrot.slane %v2164_v34, 4  ;;  %v7062_v62 = vld [vmem:[%s7013_s11 + $0x24] sm:$0xf] }
  0x1b   : > { %6041 = vmatpush3.bf16.msra.mxu1 %v6753_v6  ;;  %v259_v43 = vrot.slane %v258_v31, 4  ;;  %v269_v47 = vrot.slane %v268_v38, 4  ;;  %v2172_v48 = vrot.slane %v2170_v40, 5  ;;  %v276_v49 = vshrl.u32 %v186_v35, 16  ;;  %v6763_v3 = vld [vmem:[%s8802_s1] sm:$0xff]  }
  0x1c   : > { %6233 = vmatpush3.bf16.msra.mxu0 %v6754_v7  ;;  %6042 = vmatprep.subr.bf16.mxu1 %v6755_v8  ;;  %v279_v50 = vshll.u32 %v186_v35, 16  ;;  %v2157_v53 = vor.u32 %v2156_v44, %v2153_v39  ;;  %v2167_v54 = vor.u32 %v2166_v46, %v2162_v45  ;;  %v285_v56 = vshll.u32 %v187_v42, 16  ;;  %v7070_v4 = vld [vmem:[%s8802_s1 + $0x140] sm:$0xff]   ;;  %v234_v33 = vld [vmem:[%s7013_s11 + $0x28] sm:$0x1] }
  0x1d   : > { %6234 = vmatprep.subr.bf16.mxu0 %v6756_v9  ;;  %v264_v52 = vsel %vm7045_vm2, %v259_v43, %v263_v26  ;;  %v274_v58 = vsel %vm7045_vm2, %v269_v47, %v273_v28  ;;  %v278_v59 = vrot.slane %v276_v49, 4  ;;  %v289_v61 = vshrl.u32 %v187_v42, 16  ;;  %v188_v21 = vld [vmem:[%s7013_s11 + $0x20] sm:$0xf]  ;;  %v189_v28 = vld [vmem:[%s7013_s11 + $0x24] sm:$0xf] }
  0x1e   : > { %v281_v60 = vrot.slane %v279_v50, 5  ;;  %v5248_v63 = vcombine.low %v264_v52, %v274_v58  ;;  %v2158_v0 = vrot.slane %v2157_v53, 4  ;;  %v2168_v1 = vrot.slane %v2167_v54, 4  ;;  %v5430_v39 = vld [vmem:[%s7013_s11 + $0x30] sm:$0xf]  ;;  %v6766_v46 = vld [vmem:[%s8802_s1 + $0x8] sm:$0xff]  }
  0x1f   : > { %6043 = vmatpush3.bf16.msra.mxu1 %v6755_v8  ;;  %v287_v2 = vrot.slane %v285_v56, 5  ;;  %v291_v6 = vrot.slane %v289_v61, 4  ;;  %v295_v7 = vshll.u32 %v233_v55, 16  ;;  %v7073_v8 = vld [vmem:[%s7013_s11 + $0x28] sm:$0x1]  ;;  %v2178_v12 = vshll.u32 %v5427_v57, 16 }
  0x20   : > { %6235 = vmatpush3.bf16.msra.mxu0 %v6756_v9  ;;  %6044 = vmatprep.subr.bf16.mxu1 %v6757_v10  ;;  %v282_v5 = vor.u32 %v281_v60, %v278_v59  ;;  %v2163_v9 = vsel %vm7045_vm2, %v2158_v0, %v2162_v45  ;;  %v2184_v19 = vshll.u32 %v7062_v62, 16  ;;  %v2188_v20 = vshrl.u32 %v7062_v62, 16  ;;  %v7098_v45 = vld [vmem:[%s7013_s11 + $0x34] sm:$0xf]  ;;  %v190_v52 = vld [vmem:[%s7013_s11 + $0x30] sm:$0xf] }
  0x21   : > { %6236 = vmatprep.subr.bf16.mxu0 %v6758_v11  ;;  %6050 = vmatprep.mubr.bf16.mxu1 %v5248_v63  ;;  %v292_v15 = vor.u32 %v291_v6, %v287_v2  ;;  %v297_v16 = vrot.slane %v295_v7, 5  ;;  %v2180_v18 = vrot.slane %v2178_v12, 5  ;;  %v2194_v26 = vshll.u32 %v7073_v8, 16  ;;  %v6765_v63 = vld [vmem:[%s8802_s1 + $0x148] sm:$0xff]  }
  0x22   : > { %v283_v14 = vrot.slane %v282_v5, 4  ;;  %v2929_v27 = vrot.slane %v7062_v62, 5  ;;  %v2190_v31 = vrot.slane %v2188_v20, 4  ;;  %v2932_v32 = vrot.slane %v7073_v8, 5  ;;  %v191_v5 = vld [vmem:[%s7013_s11 + $0x34] sm:$0xf] }
  0x23   : > { %6045 = vmatpush3.bf16.msra.mxu1 %v6757_v10  ;;  %v2173_v10 = vsel %vm7045_vm2, %v2168_v1, %v2172_v48  ;;  %v2196_v35 = vrot.slane %v2194_v26, 5  ;;  %v300_v38 = vshrl.u32 %v188_v21, 16  ;;  %v303_v44 = vshll.u32 %v188_v21, 16 }
  0x24   : > { %6237 = vmatpush3.bf16.msra.mxu0 %v6758_v11  ;;  %6046 = vmatprep.subr.bf16.mxu1 %v6759_v25  ;;  %v2175_v11 = vshrl.u32 %v5427_v57, 16  ;;  %v5488_v13 = vcombine.low %v2163_v9, %v2173_v10  ;;  %v288_v22 = vsel %vm7045_vm2, %v283_v14, %v287_v2  ;;  %v309_v48 = vshll.u32 %v189_v28, 16 }
  0x25   : > { %6238 = vmatprep.subr.bf16.mxu0 %v6760_v30  ;;  %v302_v47 = vrot.slane %v300_v38, 4  ;;  %v313_v49 = vshrl.u32 %v189_v28, 16  ;;  %v319_v50 = vshll.u32 %v234_v33, 16  ;;  %v305_v55 = vrot.slane %v303_v44, 5  ;;  %v7129_v33 = vld [vmem:[%s7013_s11 + $0x44] sm:$0xf] }
  0x26   : > { %v2177_v17 = vrot.slane %v2175_v11, 4  ;;  %6242 = vmatprep.mubr.bf16.mxu0 %v5488_v13  ;;  %v2199_v56 = vshrl.u32 %v5430_v39, 16  ;;  %v311_v57 = vrot.slane %v309_v48, 5  ;;  %v2202_v60 = vshll.u32 %v5430_v39, 16  ;;  %v235_v11 = vld [vmem:[%s7013_s11 + $0x38] sm:$0x1] }
  0x27   : > { %6047 = vmatpush3.bf16.msra.mxu1 %v6759_v25  ;;  %v293_v25 = vrot.slane %v292_v15, 4  ;;  %v315_v58 = vrot.slane %v313_v49, 4  ;;  %v321_v59 = vrot.slane %v319_v50, 5  ;;  %v306_v0 = vor.u32 %v305_v55, %v302_v47  ;;  %v6768_v48 = vld [vmem:[%s8802_s1 + $0x158] sm:$0xff]  }
  0x28   : > { %6239 = vmatpush3.bf16.msra.mxu0 %v6760_v30  ;;  %6048 = vmatprep.subr.bf16.mxu1 %v6761_v36  ;;  %v2181_v29 = vor.u32 %v2180_v18, %v2177_v17  ;;  %v2186_v30 = vrot.slane %v2184_v19, 5  ;;  %v2201_v1 = vrot.slane %v2199_v56, 4  ;;  %v2208_v2 = vshll.u32 %v7098_v45, 16 }
  0x29   : > { %6240 = vmatprep.subr.bf16.mxu0 %v6762_v51  ;;  %v298_v34 = vsel %vm7045_vm2, %v293_v25, %v297_v16  ;;  %v316_v7 = vor.u32 %v315_v58, %v311_v57  ;;  %v2204_v9 = vrot.slane %v2202_v60, 5  ;;  %v2212_v10 = vshrl.u32 %v7098_v45, 16  ;;  %v5433_v16 = vld [vmem:[%s7013_s11 + $0x40] sm:$0xf] }
  0x2a   : > { %v5249_v40 = vcombine.low %v288_v22, %v298_v34  ;;  %v2182_v42 = vrot.slane %v2181_v29, 4  ;;  %v2191_v43 = vor.u32 %v2190_v31, %v2186_v30  ;;  %v307_v12 = vrot.slane %v306_v0, 4  ;;  %v6772_v34 = vld [vmem:[%s8802_s1 + $0x18] sm:$0xff]   ;;  %v6775_v60 = vld [vmem:[%s8802_s1 + $0x20] sm:$0xff]  }
  0x2b   : > { %6049 = vmatpush3.bf16.msra.mxu1 %v6761_v36  ;;  %v7094_v36 = vrot.slane %v2929_v27, 4  ;;  %v2210_v13 = vrot.slane %v2208_v2, 5  ;;  %v324_v15 = vshrl.u32 %v190_v52, 16  ;;  %v317_v17 = vrot.slane %v316_v7, 4  ;;  %v236_v2 = vld [vmem:[%s7013_s11 + $0x48] sm:$0x1] }
  0x2c   : > { %6241 = vmatpush3.bf16.msra.mxu0 %v6762_v51  ;;  %6082 = vmatprep.subr.bf16.mxu1 %v6763_v3  ;;  %v7104_v51 = vld [vmem:[%s7013_s11 + $0x38] sm:$0x1]  ;;  %v2187_v53 = vsel %vm7045_vm2, %v2182_v42, %v2186_v30  ;;  %v2192_v54 = vrot.slane %v2191_v43, 4  ;;  %v2205_v18 = vor.u32 %v2204_v9, %v2201_v1  ;;  %v2214_v19 = vrot.slane %v2212_v10, 4  ;;  %v5436_v9 = vld [vmem:[%s7013_s11 + $0x50] sm:$0xf] }
  0x2d   : > { %6274 = vmatprep.subr.bf16.mxu0 %v7070_v4  ;;  %v2218_v14 = vshll.u32 %v7104_v51, 16  ;;  %v327_v20 = vshll.u32 %v190_v52, 16  ;;  %v312_v21 = vsel %vm7045_vm2, %v307_v12, %v311_v57  ;;  %v326_v25 = vrot.slane %v324_v15, 4 }
  0x2e   : > { %6051 = vmatmul.mubr.bf16.vlgmr.msra.gmra.mrb[0].mxu1 %v5249_v40  ;;  %v2197_v61 = vsel %vm7045_vm2, %v2192_v54, %v2196_v35  ;;  %v333_v26 = vshll.u32 %v191_v5, 16  ;;  %v322_v28 = vsel %vm7045_vm2, %v317_v17, %v321_v59  ;;  %v2206_v29 = vrot.slane %v2205_v18, 4  ;;  %v192_v54 = vld [vmem:[%s7013_s11 + $0x40] sm:$0xf]  ;;  %v193_v59 = vld [vmem:[%s7013_s11 + $0x44] sm:$0xf] }
  0x2f   : > { %6083 = vmatpush3.bf16.msra.mxu1 %v6763_v3  ;;  %v6769_v3 = vld [vmem:[%s8802_s1 + $0x10] sm:$0xff]   ;;  %v5489_v6 = vcombine.low %v2187_v53, %v2197_v61  ;;  %v2220_v22 = vrot.slane %v2218_v14, 5  ;;  %v2215_v30 = vor.u32 %v2214_v19, %v2210_v13  ;;  %v329_v31 = vrot.slane %v327_v20, 5  ;;  %v6777_v14 = vld [vmem:[%s8802_s1 + $0x28] sm:$0xff]   ;;  %v6770_v20 = vld [vmem:[%s8802_s1 + $0x160] sm:$0xff]  }
  0x30   : > { %6084 = vmatprep.subr.bf16.mxu1 %v6766_v46  ;;  %v5250_v35 = vcombine.low %v312_v21, %v322_v28  ;;  %v335_v38 = vrot.slane %v333_v26, 5  ;;  %v337_v39 = vshrl.u32 %v191_v5, 16  ;;  %v343_v40 = vshll.u32 %v235_v11, 16  ;;  %v7163_v19 = vld [vmem:[%s7013_s11 + $0x54] sm:$0xf] }
  0x31   : > { %6243 = vmatmul.mubr.bf16.vlgmr.msra.gmra.mrb[0].mxu0 %v5489_v6  ;;  %v2211_v42 = vsel %vm7045_vm2, %v2206_v29, %v2210_v13  ;;  %v2216_v43 = vrot.slane %v2215_v30, 4  ;;  %v330_v44 = vor.u32 %v329_v31, %v326_v25  ;;  %v2223_v47 = vshrl.u32 %v5433_v16, 16  ;;  %v7171_v28 = vld [vmem:[%s7013_s11 + $0x58] sm:$0x1] }
  0x32   : > { %6275 = vmatpush3.bf16.msra.mxu0 %v7070_v4  ;;  %v6767_v4 = vld [vmem:[%s8802_s1 + $0x150] sm:$0xff]   ;;  %6054 = vmatprep.mubr.bf16.mxu1 %v5250_v35  ;;  %v339_v49 = vrot.slane %v337_v39, 4  ;;  %v345_v50 = vrot.slane %v343_v40, 5  ;;  %v2226_v52 = vshll.u32 %v5433_v16, 16  ;;  %v2232_v53 = vshll.u32 %v7129_v33, 16 }
  0x33   : > { %6085 = vmatpush3.bf16.msra.mxu1 %v6766_v46  ;;  %6276 = vmatprep.subr.bf16.mxu0 %v6765_v63  ;;  %v7140_v46 = vld [vmem:[%s7013_s11 + $0x48] sm:$0x1]  ;;  %v2221_v55 = vsel %vm7045_vm2, %v2216_v43, %v2220_v22  ;;  %v331_v56 = vrot.slane %v330_v44, 4  ;;  %v2225_v57 = vrot.slane %v2223_v47, 4  ;;  %v2236_v58 = vshrl.u32 %v7129_v33, 16  ;;  %v6779_v35 = vld [vmem:[%s8802_s1 + $0x30] sm:$0xff]  }
  0x34   : > { %6086 = vmatprep.subr.bf16.mxu1 %v6769_v3  ;;  %v5490_v61 = vcombine.low %v2211_v42, %v2221_v55  ;;  %v2228_v0 = vrot.slane %v2226_v52, 5  ;;  %v2234_v1 = vrot.slane %v2232_v53, 5  ;;  %v2242_v6 = vshll.u32 %v7140_v46, 16  ;;  %v195_v55 = vld [vmem:[%s7013_s11 + $0x54] sm:$0xf] }
  0x35   : > { %v336_v5 = vsel %vm7045_vm2, %v331_v56, %v335_v38  ;;  %v348_v7 = vshrl.u32 %v192_v54, 16  ;;  %v351_v12 = vshll.u32 %v192_v54, 16  ;;  %v357_v13 = vshll.u32 %v193_v59, 16 }
  0x36   : > { %6277 = vmatpush3.bf16.msra.mxu0 %v6765_v63  ;;  %v340_v63 = vor.u32 %v339_v49, %v335_v38  ;;  %6246 = vmatprep.mubr.bf16.mxu0 %v5490_v61  ;;  %v2229_v11 = vor.u32 %v2228_v0, %v2225_v57  ;;  %v2244_v16 = vrot.slane %v2242_v6, 5  ;;  %v361_v18 = vshrl.u32 %v193_v59, 16 }
  0x37   : > { %6087 = vmatpush3.bf16.msra.mxu1 %v6769_v3  ;;  %6278 = vmatprep.subr.bf16.mxu0 %v6767_v4  ;;  %v2238_v3 = vrot.slane %v2236_v58, 4  ;;  %v350_v17 = vrot.slane %v348_v7, 4  ;;  %v353_v25 = vrot.slane %v351_v12, 5  ;;  %v359_v26 = vrot.slane %v357_v13, 5 }
  0x38   : > { %6088 = vmatprep.subr.bf16.mxu1 %v6772_v34  ;;  %v341_v10 = vrot.slane %v340_v63, 4  ;;  %v2230_v22 = vrot.slane %v2229_v11, 4  ;;  %v363_v31 = vrot.slane %v361_v18, 4  ;;  %v2247_v40 = vshrl.u32 %v5436_v9, 16  ;;  %v237_v63 = vld [vmem:[%s7013_s11 + $0x58] sm:$0x1] }
  0x39   : > { %v2239_v15 = vor.u32 %v2238_v3, %v2234_v1  ;;  %v354_v39 = vor.u32 %v353_v25, %v350_v17  ;;  %v2250_v42 = vshll.u32 %v5436_v9, 16  ;;  %v2256_v49 = vshll.u32 %v7163_v19, 16  ;;  %v5439_v9 = vld [vmem:[%s7013_s11 + $0x60] sm:$0xf] }
  0x3a   : > { %6279 = vmatpush3.bf16.msra.mxu0 %v6767_v4  ;;  %v346_v21 = vsel %vm7045_vm2, %v341_v10, %v345_v50  ;;  %v367_v4 = vshll.u32 %v236_v2, 16  ;;  %v2235_v38 = vsel %vm7045_vm2, %v2230_v22, %v2234_v1  ;;  %v364_v44 = vor.u32 %v363_v31, %v359_v26  ;;  %v6781_v2 = vld [vmem:[%s8802_s1 + $0x38] sm:$0xff]   ;;  %v7204_v22 = vld [vmem:[%s7013_s11 + $0x68] sm:$0x1] }
  0x3b   : > { %6089 = vmatpush3.bf16.msra.mxu1 %v6772_v34  ;;  %6280 = vmatprep.subr.bf16.mxu0 %v6768_v48  ;;  %v5251_v29 = vcombine.low %v336_v5, %v346_v21  ;;  %v2240_v30 = vrot.slane %v2239_v15, 4  ;;  %v194_v34 = vld [vmem:[%s7013_s11 + $0x50] sm:$0xf]  ;;  %v355_v52 = vrot.slane %v354_v39, 4  ;;  %v2249_v53 = vrot.slane %v2247_v40, 4  ;;  %v6774_v31 = vld [vmem:[%s8802_s1 + $0x178] sm:$0xff]  }
  0x3c   : > { %6090 = vmatprep.subr.bf16.mxu1 %v6775_v60  ;;  %v369_v47 = vrot.slane %v367_v4, 5  ;;  %v2252_v54 = vrot.slane %v2250_v42, 5  ;;  %v365_v56 = vrot.slane %v364_v44, 4  ;;  %v2258_v57 = vrot.slane %v2256_v49, 5  ;;  %v6773_v15 = vld [vmem:[%s8802_s1 + $0x170] sm:$0xff]   ;;  %v7215_v4 = vld [vmem:[%s8802_s1 + $0x80] sm:$0xff]  }
  0x3d   : > { %6055 = vmatmul.mubr.bf16.gmra.mrb[4].mxu1 %v5251_v29  ;;  %v2245_v43 = vsel %vm7045_vm2, %v2240_v30, %v2244_v16  ;;  %v2260_v58 = vshrl.u32 %v7163_v19, 16  ;;  %v2266_v59 = vshll.u32 %v7171_v28, 16  ;;  %v372_v0 = vshrl.u32 %v194_v34, 16  ;;  %v196_v30 = vld [vmem:[%s7013_s11 + $0x60] sm:$0xf] }
  0x3e   : > { %6281 = vmatpush3.bf16.msra.mxu0 %v6768_v48  ;;  %v5491_v50 = vcombine.low %v2235_v38, %v2245_v43  ;;  %v6771_v48 = vld [vmem:[%s8802_s1 + $0x168] sm:$0xff]   ;;  %v2253_v61 = vor.u32 %v2252_v54, %v2249_v53  ;;  %v375_v1 = vshll.u32 %v194_v34, 16  ;;  %v370_v5 = vsel %vm7045_vm2, %v365_v56, %v369_v47  ;;  %v197_v53 = vld [vmem:[%s7013_s11 + $0x64] sm:$0xf] }
  0x3f   : > { %6091 = vmatpush3.bf16.msra.mxu1 %v6775_v60  ;;  %6282 = vmatprep.subr.bf16.mxu0 %v6770_v20  ;;  %v360_v60 = vsel %vm7045_vm2, %v355_v52, %v359_v26  ;;  %v2262_v3 = vrot.slane %v2260_v58, 4  ;;  %v2268_v6 = vrot.slane %v2266_v59, 5  ;;  %v381_v7 = vshll.u32 %v195_v55, 16  ;;  %v238_v54 = vld [vmem:[%s7013_s11 + $0x68] sm:$0x1] }
  0x40   : > { %6092 = vmatprep.subr.bf16.mxu1 %v6777_v14  ;;  %6247 = vmatmul.mubr.bf16.gmra.mrb[4].mxu0 %v5491_v50  ;;  %v5252_v10 = vcombine.low %v360_v60, %v370_v5  ;;  %v2254_v11 = vrot.slane %v2253_v61, 4  ;;  %v374_v12 = vrot.slane %v372_v0, 4  ;;  %v377_v13 = vrot.slane %v375_v1, 5  ;;  %v5442_v58 = vld [vmem:[%s7013_s11 + $0x70] sm:$0xf] }
  0x41   : > { %v2263_v16 = vor.u32 %v2262_v3, %v2258_v57  ;;  %v383_v17 = vrot.slane %v381_v7, 5  ;;  %v385_v18 = vshrl.u32 %v195_v55, 16  ;;  %v391_v21 = vshll.u32 %v237_v63, 16  ;;  %v7229_v0 = vld [vmem:[%s7013_s11 + $0x74] sm:$0xf] }
  0x42   : > { %6283 = vmatpush3.bf16.msra.mxu0 %v6770_v20  ;;  %6058 = vmatprep.mubr.bf16.mxu1 %v5252_v10  ;;  %v2259_v20 = vsel %vm7045_vm2, %v2254_v11, %v2258_v57  ;;  %v378_v25 = vor.u32 %v377_v13, %v374_v12  ;;  %v2271_v26 = vshrl.u32 %v5439_v9, 16  ;;  %v2274_v29 = vshll.u32 %v5439_v9, 16 }
  0x43   : > { %6093 = vmatpush3.bf16.msra.mxu1 %v6777_v14  ;;  %v7198_v14 = vld [vmem:[%s7013_s11 + $0x64] sm:$0xf]  ;;  %6284 = vmatprep.subr.bf16.mxu0 %v6771_v48  ;;  %v2264_v34 = vrot.slane %v2263_v16, 4  ;;  %v393_v38 = vrot.slane %v391_v21, 5  ;;  %v2290_v52 = vshll.u32 %v7204_v22, 16  ;;  %v396_v61 = vshrl.u32 %v196_v30, 16 }
  0x44   : > { %6094 = vmatprep.subr.bf16.mxu1 %v6779_v35  ;;  %v2280_v39 = vshll.u32 %v7198_v14, 16  ;;  %v379_v40 = vrot.slane %v378_v25, 4  ;;  %v2273_v42 = vrot.slane %v2271_v26, 4  ;;  %v2276_v43 = vrot.slane %v2274_v29, 5 }
  0x45   : > { %v2284_v44 = vshrl.u32 %v7198_v14, 16  ;;  %v2269_v47 = vsel %vm7045_vm2, %v2264_v34, %v2268_v6  ;;  %v2292_v60 = vrot.slane %v2290_v52, 5  ;;  %v399_v63 = vshll.u32 %v196_v30, 16  ;;  %v7234_v6 = vld [vmem:[%s8802_s1 + $0x180] sm:$0xff]  }
  0x46   : > { %6285 = vmatpush3.bf16.msra.mxu0 %v6771_v48  ;;  %v2282_v50 = vrot.slane %v2280_v39, 5  ;;  %v5492_v55 = vcombine.low %v2259_v20, %v2269_v47  ;;  %v384_v48 = vsel %vm7045_vm2, %v379_v40, %v383_v17  ;;  %v2277_v56 = vor.u32 %v2276_v43, %v2273_v42  ;;  %v7241_v20 = vld [vmem:[%s7013_s11 + $0x78] sm:$0x1]  ;;  %v199_v43 = vld [vmem:[%s7013_s11 + $0x74] sm:$0xf] }
  0x47   : > { %6095 = vmatpush3.bf16.msra.mxu1 %v6779_v35  ;;  %v387_v35 = vrot.slane %v385_v18, 4  ;;  %6286 = vmatprep.subr.bf16.mxu0 %v6773_v15  ;;  %v2286_v57 = vrot.slane %v2284_v44, 4  ;;  %v409_v3 = vshrl.u32 %v197_v53, 16  ;;  %v398_v9 = vrot.slane %v396_v61, 4  ;;  %v5445_v52 = vld [vmem:[%s7013_s11 + $0x80] sm:$0xf] }
  0x48   : > { %6096 = vmatprep.subr.bf16.mxu1 %v6781_v2  ;;  %6250 = vmatprep.mubr.bf16.mxu0 %v5492_v55  ;;  %v2278_v1 = vrot.slane %v2277_v56, 4  ;;  %v401_v10 = vrot.slane %v399_v63, 5  ;;  %v415_v11 = vshll.u32 %v238_v54, 16  ;;  %v2295_v25 = vshrl.u32 %v5442_v58, 16 }
  0x49   : > { %v388_v49 = vor.u32 %v387_v35, %v383_v17  ;;  %v2287_v5 = vor.u32 %v2286_v57, %v2282_v50  ;;  %v411_v18 = vrot.slane %v409_v3, 4  ;;  %v2298_v29 = vshll.u32 %v5442_v58, 16  ;;  %v198_v35 = vld [vmem:[%s7013_s11 + $0x70] sm:$0xf] }
  0x4a   : > { %6287 = vmatpush3.bf16.msra.mxu0 %v6773_v15  ;;  %v2283_v13 = vsel %vm7045_vm2, %v2278_v1, %v2282_v50  ;;  %v402_v17 = vor.u32 %v401_v10, %v398_v9  ;;  %v417_v21 = vrot.slane %v415_v11, 5  ;;  %v2304_v30 = vshll.u32 %v7229_v0, 16  ;;  %v239_v50 = vld [vmem:[%s7013_s11 + $0x78] sm:$0x1] }
  0x4b   : > { %6097 = vmatpush3.bf16.msra.mxu1 %v6781_v2  ;;  %v389_v59 = vrot.slane %v388_v49, 4  ;;  %v405_v2 = vshll.u32 %v197_v53, 16  ;;  %6288 = vmatprep.subr.bf16.mxu0 %v6774_v31  ;;  %v2288_v15 = vrot.slane %v2287_v5, 4  ;;  %v2308_v34 = vshrl.u32 %v7229_v0, 16 }
  0x4c   : > { %6130 = vmatprep.subr.bf16.mxu1 %v7215_v4  ;;  %v403_v39 = vrot.slane %v402_v17, 4  ;;  %v2297_v42 = vrot.slane %v2295_v25, 4  ;;  %v2306_v44 = vrot.slane %v2304_v30, 5  ;;  %v2314_v49 = vshll.u32 %v7241_v20, 16  ;;  %v7265_v17 = vld [vmem:[%s7013_s11 + $0x88] sm:$0x1] }
  0x4d   : > { %v394_v7 = vsel %vm7045_vm2, %v389_v59, %v393_v38  ;;  %v407_v16 = vrot.slane %v405_v2, 5  ;;  %v2293_v26 = vsel %vm7045_vm2, %v2288_v15, %v2292_v60  ;;  %v2310_v47 = vrot.slane %v2308_v34, 4  ;;  %v7256_v60 = vld [vmem:[%s7013_s11 + $0x84] sm:$0xf]  ;;  %v7269_v25 = vld [vmem:[%s7013_s11 + $0x80] sm:$0xf] }
  0x4e   : > { %v5253_v12 = vcombine.low %v384_v48, %v394_v7  ;;  %6289 = vmatpush3.bf16.msra.mxu0 %v6774_v31  ;;  %v5493_v38 = vcombine.low %v2283_v13, %v2293_v26  ;;  %v2300_v31 = vrot.slane %v2298_v29, 5  ;;  %v420_v55 = vshrl.u32 %v198_v35, 16 }
  0x4f   : > { %6322 = vmatprep.subr.bf16.mxu0 %v7234_v6  ;;  %v412_v40 = vor.u32 %v411_v18, %v407_v16  ;;  %v408_v53 = vsel %vm7045_vm2, %v403_v39, %v407_v16  ;;  %v423_v48 = vshll.u32 %v198_v35, 16  ;;  %v2311_v57 = vor.u32 %v2310_v47, %v2306_v44  ;;  %v7272_v35 = vld [vmem:[%s7013_s11 + $0x84] sm:$0xf] }
  0x50   : > { %6059 = vmatmul.mubr.bf16.gmra.mrb[8].mxu1 %v5253_v12  ;;  %6251 = vmatmul.mubr.bf16.gmra.mrb[8].mxu0 %v5493_v38  ;;  %v2301_v56 = vor.u32 %v2300_v31, %v2297_v42  ;;  %v2316_v58 = vrot.slane %v2314_v49, 5  ;;  %v429_v59 = vshll.u32 %v199_v43, 16  ;;  %v422_v63 = vrot.slane %v420_v55, 4 }
  0x51   : > { %v413_v54 = vrot.slane %v412_v40, 4  ;;  %v425_v1 = vrot.slane %v423_v48, 5  ;;  %v433_v5 = vshrl.u32 %v199_v43, 16  ;;  %v2312_v7 = vrot.slane %v2311_v57, 4  ;;  %v240_v43 = vld [vmem:[%s7013_s11 + $0x88] sm:$0x1] }
  0x52   : > { %v2302_v3 = vrot.slane %v2301_v56, 4  ;;  %v431_v9 = vrot.slane %v429_v59, 5  ;;  %v439_v12 = vshll.u32 %v239_v50, 16  ;;  %v2319_v13 = vshrl.u32 %v5445_v52, 16  ;;  %v5512_v50 = vld [vmem:[%s7013_s11 + $0x10] sm:$0xe] }
  0x53   : > { %v418_v61 = vsel %vm7045_vm2, %v413_v54, %v417_v21  ;;  %v426_v10 = vor.u32 %v425_v1, %v422_v63  ;;  %v435_v11 = vrot.slane %v433_v5, 4  ;;  %v2317_v16 = vsel %vm7045_vm2, %v2312_v7, %v2316_v58  ;;  %v7287_v5 = vld [vmem:[%s7013_s11 + $0x90] sm:$0xf] }
  0x54   : > { %v5254_v2 = vcombine.low %v408_v53, %v418_v61  ;;  %v2307_v15 = vsel %vm7045_vm2, %v2302_v3, %v2306_v44  ;;  %v2322_v18 = vshll.u32 %v5445_v52, 16  ;;  %v2328_v21 = vshll.u32 %v7256_v60, 16 }
  0x55   : > { %v5494_v26 = vcombine.low %v2307_v15, %v2317_v16  ;;  %v427_v29 = vrot.slane %v426_v10, 4  ;;  %v436_v30 = vor.u32 %v435_v11, %v431_v9  ;;  %v441_v34 = vrot.slane %v439_v12, 5 }
  0x56   : > { %6062 = vmatprep.mubr.bf16.mxu1 %v5254_v2  ;;  %v2321_v38 = vrot.slane %v2319_v13, 4  ;;  %v2324_v39 = vrot.slane %v2322_v18, 5  ;;  %v2330_v40 = vrot.slane %v2328_v21, 5  ;;  %v2332_v42 = vshrl.u32 %v7256_v60, 16  ;;  %v7299_v21 = vld [vmem:[%s7013_s11 + $0x94] sm:$0xf] }
  0x57   : > { %6254 = vmatprep.mubr.bf16.mxu0 %v5494_v26  ;;  %v432_v31 = vsel %vm7045_vm2, %v427_v29, %v431_v9  ;;  %v437_v44 = vrot.slane %v436_v30, 4  ;;  %v2338_v47 = vshll.u32 %v7265_v17, 16  ;;  %v444_v49 = vshrl.u32 %v7269_v25, 16  ;;  %v6865_v9 = vld [vmem:[%s7013_s11 + $0xf0] sm:$0xff]  }
  0x58   : > { %v2325_v52 = vor.u32 %v2324_v39, %v2321_v38  ;;  %v2334_v53 = vrot.slane %v2332_v42, 4  ;;  %v447_v54 = vshll.u32 %v7269_v25, 16  ;;  %v453_v55 = vshll.u32 %v7272_v35, 16 }
  0x59   : > { %v442_v48 = vsel %vm7045_vm2, %v437_v44, %v441_v34  ;;  %v2340_v56 = vrot.slane %v2338_v47, 5  ;;  %v446_v57 = vrot.slane %v444_v49, 4  ;;  %v457_v58 = vshrl.u32 %v7272_v35, 16  ;;  %v7310_v47 = vld [vmem:[%s7013_s11 + $0xa0] sm:$0xf] }
  0x5a   : > { %v5255_v59 = vcombine.low %v432_v31, %v442_v48  ;;  %v2326_v61 = vrot.slane %v2325_v52, 4  ;;  %v2335_v63 = vor.u32 %v2334_v53, %v2330_v40  ;;  %v449_v1 = vrot.slane %v447_v54, 5  ;;  %v7321_v54 = vld [vmem:[%s7013_s11 + $0xa4] sm:$0xf] }
  0x5b   : > { %v455_v2 = vrot.slane %v453_v55, 5  ;;  %v459_v3 = vrot.slane %v457_v58, 4  ;;  %v463_v7 = vshll.u32 %v240_v43, 16  ;;  %v5528_v10 = vrot.slane %v5512_v50, 9  ;;  %v242_v58 = vld [vmem:[%s7013_s11 + $0xa8] sm:$0x1] }
  0x5c   : > { %6063 = vmatmul.mubr.bf16.gmra.mrb[12].mxu1 %v5255_v59  ;;  %v2331_v11 = vsel %vm7045_vm2, %v2326_v61, %v2330_v40  ;;  %v2336_v12 = vrot.slane %v2335_v63, 4  ;;  %v450_v13 = vor.u32 %v449_v1, %v446_v57  ;;  %v2922_v15 = vrot.slane %v7026_v23, 5  ;;  %v241_v40 = vld [vmem:[%s7013_s11 + $0x98] sm:$0x1]  ;;  %v5513_v23 = vld [vmem:[%s7013_s11 + $0x20] sm:$0xe] }
  0x5d   : > { %v460_v16 = vor.u32 %v459_v3, %v455_v2  ;;  %v465_v18 = vrot.slane %v463_v7, 5  ;;  %v468_v26 = vshrl.u32 %v7287_v5, 16  ;;  %v471_v29 = vshll.u32 %v7287_v5, 16 }
  0x5e   : > { %v2341_v30 = vsel %vm7045_vm2, %v2336_v12, %v2340_v56  ;;  %v451_v34 = vrot.slane %v450_v13, 4  ;;  %v2923_v38 = vsel %vm7291_vm5, %v5528_v10, %v2922_v15  ;;  %v2924_v39 = vrot.slane %v2922_v15, 4  ;;  %v5514_v13 = vld [vmem:[%s7013_s11 + $0x30] sm:$0xe] }
  0x5f   : > { %v5495_v42 = vcombine.low %v2331_v11, %v2341_v30  ;;  %v461_v43 = vrot.slane %v460_v16, 4  ;;  %v470_v31 = vrot.slane %v468_v26, 4  ;;  %v473_v44 = vrot.slane %v471_v29, 5  ;;  %v7343_v16 = vld [vmem:[%s7013_s11 + $0xb0] sm:$0xf]  ;;  %v6778_v29 = vld [vmem:[%s8802_s1 + $0x188] sm:$0xff]  }
  0x60   : > { %v456_v49 = vsel %vm7045_vm2, %v451_v34, %v455_v2  ;;  %v2926_v50 = vsel %vm7291_vm5, %v2924_v39, %v2925_v41  ;;  %v477_v52 = vshll.u32 %v7299_v21, 16  ;;  %v481_v53 = vshrl.u32 %v7299_v21, 16 }
  0x61   : > { %6255 = vmatmul.mubr.bf16.gmra.mrb[12].mxu0 %v5495_v42  ;;  %v466_v55 = vsel %vm7045_vm2, %v461_v43, %v465_v18  ;;  %v5560_v48 = vcombine.low %v2923_v38, %v2926_v50  ;;  %v474_v56 = vor.u32 %v473_v44, %v470_v31  ;;  %v487_v57 = vshll.u32 %v241_v40, 16  ;;  %v7351_v40 = vld [vmem:[%s7013_s11 + $0xb4] sm:$0xf]  ;;  %v243_v31 = vld [vmem:[%s7013_s11 + $0xb8] sm:$0x1] }
  0x62   : > { %v5256_v59 = vcombine.low %v456_v49, %v466_v55  ;;  %v479_v24 = vrot.slane %v477_v52, 5  ;;  %v483_v61 = vrot.slane %v481_v53, 4  ;;  %v5529_v63 = vrot.slane %v5513_v23, 9 }
  0x63   : > { %6290 = vmatprep.mubr.bf16.mxu0 %v5560_v48  ;;  %v475_v41 = vrot.slane %v474_v56, 4  ;;  %v489_v1 = vrot.slane %v487_v57, 5  ;;  %v2933_v2 = vsel %vm7291_vm5, %v7094_v36, %v2932_v32  ;;  %v492_v3 = vshrl.u32 %v7310_v47, 16 }
  0x64   : > { %6066 = vmatprep.mubr.bf16.mxu1 %v5256_v59  ;;  %v484_v7 = vor.u32 %v483_v61, %v479_v24  ;;  %v2930_v10 = vsel %vm7291_vm5, %v5529_v63, %v2929_v27  ;;  %v495_v11 = vshll.u32 %v7310_v47, 16  ;;  %v501_v12 = vshll.u32 %v7321_v54, 16 }
  0x65   : > { %v480_v8 = vsel %vm7045_vm2, %v475_v41, %v479_v24  ;;  %v5561_v15 = vcombine.low %v2930_v10, %v2933_v2  ;;  %v494_v32 = vrot.slane %v492_v3, 4  ;;  %v505_v36 = vshrl.u32 %v7321_v54, 16  ;;  %v7372_v2 = vld [vmem:[%s7013_s11 + $0xc0] sm:$0xf]  ;;  %v7375_v3 = vld [vmem:[%s7013_s11 + $0xc4] sm:$0xf] }
  0x66   : > { %v485_v62 = vrot.slane %v484_v7, 4  ;;  %v497_v18 = vrot.slane %v495_v11, 5  ;;  %v503_v26 = vrot.slane %v501_v12, 5  ;;  %v511_v27 = vshll.u32 %v242_v58, 16 }
  0x67   : > { %v507_v30 = vrot.slane %v505_v36, 4  ;;  %v5530_v34 = vrot.slane %v5514_v13, 9  ;;  %v2936_v38 = vrot.slane %v7098_v45, 5  ;;  %v2939_v39 = vrot.slane %v7104_v51, 5  ;;  %v5515_v45 = vld [vmem:[%s7013_s11 + $0x40] sm:$0xe] }
  0x68   : > { %v490_v23 = vsel %vm7045_vm2, %v485_v62, %v489_v1  ;;  %v498_v42 = vor.u32 %v497_v18, %v494_v32  ;;  %v513_v43 = vrot.slane %v511_v27, 5  ;;  %v516_v44 = vshrl.u32 %v7343_v16, 16  ;;  %v244_v62 = vld [vmem:[%s7013_s11 + $0xc8] sm:$0x1] }
  0x69   : > { %v5257_v49 = vcombine.low %v480_v8, %v490_v23  ;;  %6291 = vmatmul.mubr.bf16.vlgmr.msra.gmra.mrb[0].mxu0 %v5561_v15  ;;  %v508_v50 = vor.u32 %v507_v30, %v503_v26  ;;  %v2937_v52 = vsel %vm7291_vm5, %v5530_v34, %v2936_v38  ;;  %v2938_v53 = vrot.slane %v2936_v38, 4  ;;  %v6782_v30 = vld [vmem:[%s8802_s1 + $0x198] sm:$0xff]   ;;  %v5516_v38 = vld [vmem:[%s7013_s11 + $0x50] sm:$0xe] }
  0x6a   : > { %6323 = vmatpush3.bf16.msra.mxu0 %v7234_v6  ;;  %v499_v51 = vrot.slane %v498_v42, 4  ;;  %v518_v55 = vrot.slane %v516_v44, 4  ;;  %v519_v48 = vshll.u32 %v7343_v16, 16  ;;  %v525_v56 = vshll.u32 %v7351_v40, 16  ;;  %v6780_v6 = vld [vmem:[%s8802_s1 + $0x190] sm:$0xff]  }
  0x6b   : > { %6067 = vmatmul.mubr.bf16.gmra.mrb[16].mxu1 %v5257_v49  ;;  %v509_v57 = vrot.slane %v508_v50, 4  ;;  %v2940_v58 = vsel %vm7291_vm5, %v2938_v53, %v2939_v39  ;;  %v529_v59 = vshrl.u32 %v7351_v40, 16  ;;  %v535_v24 = vshll.u32 %v243_v31, 16  ;;  %6324 = vmatprep.subr.bf16.mxu0 %v6778_v29  ;;  %v7393_v31 = vld [vmem:[%s7013_s11 + $0xd0] sm:$0xf] }
  0x6c   : > { %v504_v61 = vsel %vm7045_vm2, %v499_v51, %v503_v26  ;;  %v5562_v63 = vcombine.low %v2937_v52, %v2940_v58  ;;  %v521_v41 = vrot.slane %v519_v48, 5  ;;  %v527_v1 = vrot.slane %v525_v56, 5  ;;  %v7402_v48 = vld [vmem:[%s7013_s11 + $0xd4] sm:$0xf]  ;;  %v6786_v56 = vld [vmem:[%s8802_s1 + $0x1a0] sm:$0xff]  }
  0x6d   : > { %v514_v7 = vsel %vm7045_vm2, %v509_v57, %v513_v43  ;;  %v531_v10 = vrot.slane %v529_v59, 4  ;;  %v537_v11 = vrot.slane %v535_v24, 5  ;;  %v5531_v12 = vrot.slane %v5515_v45, 9 }
  0x6e   : > { %v5258_v13 = vcombine.low %v504_v61, %v514_v7  ;;  %6294 = vmatprep.mubr.bf16.mxu0 %v5562_v63  ;;  %v522_v8 = vor.u32 %v521_v41, %v518_v55  ;;  %v2943_v15 = vrot.slane %v7129_v33, 5  ;;  %v2946_v32 = vrot.slane %v7140_v46, 5  ;;  %6325 = vmatpush3.bf16.msra.mxu0 %v6778_v29  ;;  %v245_v61 = vld [vmem:[%s7013_s11 + $0xd8] sm:$0x1] }
  0x6f   : > { %v532_v36 = vor.u32 %v531_v10, %v527_v1  ;;  %v540_v18 = vshrl.u32 %v7372_v2, 16  ;;  %v543_v26 = vshll.u32 %v7372_v2, 16  ;;  %v549_v27 = vshll.u32 %v7375_v3, 16  ;;  %6326 = vmatprep.subr.bf16.mxu0 %v6780_v6 }
  0x70   : > { %6070 = vmatprep.mubr.bf16.mxu1 %v5258_v13  ;;  %v523_v34 = vrot.slane %v522_v8, 4  ;;  %v2944_v33 = vsel %vm7291_vm5, %v5531_v12, %v2943_v15  ;;  %v2945_v46 = vrot.slane %v2943_v15, 4  ;;  %v553_v29 = vshrl.u32 %v7375_v3, 16  ;;  %v5517_v15 = vld [vmem:[%s7013_s11 + $0x60] sm:$0xe] }
  0x71   : > { %v533_v39 = vrot.slane %v532_v36, 4  ;;  %v542_v23 = vrot.slane %v540_v18, 4  ;;  %v545_v42 = vrot.slane %v543_v26, 5  ;;  %v551_v43 = vrot.slane %v549_v27, 5  ;;  %v7427_v27 = vld [vmem:[%s7013_s11 + $0xe0] sm:$0xf] }
  0x72   : > { %v528_v44 = vsel %vm7045_vm2, %v523_v34, %v527_v1  ;;  %v2947_v49 = vsel %vm7291_vm5, %v2945_v46, %v2946_v32  ;;  %v555_v50 = vrot.slane %v553_v29, 4  ;;  %v559_v52 = vshll.u32 %v244_v62, 16  ;;  %6327 = vmatpush3.bf16.msra.mxu0 %v6780_v6  ;;  %v6790_v32 = vld [vmem:[%s8802_s1 + $0x1a8] sm:$0xff]   ;;  %v7430_v29 = vld [vmem:[%s7013_s11 + $0xe4] sm:$0xf] }
  0x73   : > { %v538_v53 = vsel %vm7045_vm2, %v533_v39, %v537_v11  ;;  %v5563_v45 = vcombine.low %v2944_v33, %v2947_v49  ;;  %v546_v51 = vor.u32 %v545_v42, %v542_v23  ;;  %v5532_v55 = vrot.slane %v5516_v38, 9  ;;  %6328 = vmatprep.subr.bf16.mxu0 %v6782_v30 }
  0x74   : > { %v5259_v57 = vcombine.low %v528_v44, %v538_v53  ;;  %v556_v58 = vor.u32 %v555_v50, %v551_v43  ;;  %v561_v59 = vrot.slane %v559_v52, 5  ;;  %v2950_v24 = vrot.slane %v7163_v19, 5  ;;  %v5518_v53 = vld [vmem:[%s7013_s11 + $0x70] sm:$0xe] }
  0x75   : > { %6295 = vmatmul.mubr.bf16.gmra.mrb[4].mxu0 %v5563_v45  ;;  %v547_v6 = vrot.slane %v546_v51, 4  ;;  %v2953_v63 = vrot.slane %v7171_v28, 5  ;;  %v564_v41 = vshrl.u32 %v7393_v31, 16  ;;  %v567_v1 = vshll.u32 %v7393_v31, 16  ;;  %v6794_v45 = vld [vmem:[%s8802_s1 + $0x1b0] sm:$0xff]  }
  0x76   : > { %6071 = vmatmul.mubr.bf16.gmra.mrb[20].mxu1 %v5259_v57  ;;  %v557_v7 = vrot.slane %v556_v58, 4  ;;  %v2951_v10 = vsel %vm7291_vm5, %v5532_v55, %v2950_v24  ;;  %v2952_v11 = vrot.slane %v2950_v24, 4  ;;  %v573_v12 = vshll.u32 %v7402_v48, 16  ;;  %6329 = vmatpush3.bf16.msra.mxu0 %v6782_v30 }
  0x77   : > { %v552_v19 = vsel %vm7045_vm2, %v547_v6, %v551_v43  ;;  %v566_v13 = vrot.slane %v564_v41, 4  ;;  %v569_v28 = vrot.slane %v567_v1, 5  ;;  %v577_v8 = vshrl.u32 %v7402_v48, 16  ;;  %6330 = vmatprep.subr.bf16.mxu0 %v6786_v56  ;;  %v246_v43 = vld [vmem:[%s7013_s11 + $0xe8] sm:$0x1] }
  0x78   : > { %v562_v36 = vsel %vm7045_vm2, %v557_v7, %v561_v59  ;;  %v2954_v62 = vsel %vm7291_vm5, %v2952_v11, %v2953_v63  ;;  %v575_v18 = vrot.slane %v573_v12, 5  ;;  %v583_v26 = vshll.u32 %v245_v61, 16  ;;  %v7450_v41 = vld [vmem:[%s7013_s11 + $0xf0] sm:$0xf]  ;;  %v7455_v12 = vld [vmem:[%s7013_s11 + $0xf4] sm:$0xf] }
  0x79   : > { %v5260_v30 = vcombine.low %v552_v19, %v562_v36  ;;  %v5564_v34 = vcombine.low %v2951_v10, %v2954_v62  ;;  %v570_v33 = vor.u32 %v569_v28, %v566_v13  ;;  %v579_v46 = vrot.slane %v577_v8, 4  ;;  %v247_v19 = vld [vmem:[%s7013_s11 + $0xf8] sm:$0x1] }
  0x7a   : > { %v585_v38 = vrot.slane %v583_v26, 5  ;;  %v5533_v39 = vrot.slane %v5517_v15, 9  ;;  %v2957_v23 = vrot.slane %v7198_v14, 5  ;;  %v2960_v42 = vrot.slane %v7204_v22, 5  ;;  %6331 = vmatpush3.bf16.msra.mxu0 %v6786_v56  ;;  %v6798_v13 = vld [vmem:[%s8802_s1 + $0x1b8] sm:$0xff]  }
  0x7b   : > { %6074 = vmatprep.mubr.bf16.mxu1 %v5260_v30  ;;  %6298 = vmatprep.mubr.bf16.mxu0 %v5564_v34  ;;  %v571_v44 = vrot.slane %v570_v33, 4  ;;  %v580_v49 = vor.u32 %v579_v46, %v575_v18  ;;  %v588_v50 = vshrl.u32 %v7427_v27, 16  ;;  %v591_v52 = vshll.u32 %v7427_v27, 16  ;;  %v5519_v30 = vld [vmem:[%s7013_s11 + $0x80] sm:$0xe] }
  0x7c   : > { %v2958_v14 = vsel %vm7291_vm5, %v5533_v39, %v2957_v23  ;;  %v2959_v22 = vrot.slane %v2957_v23, 4  ;;  %v597_v51 = vshll.u32 %v7430_v29, 16  ;;  %v601_v55 = vshrl.u32 %v7430_v29, 16  ;;  %6332 = vmatprep.subr.bf16.mxu0 %v6790_v32  ;;  %v5449_v39 = vld [vmem:[%s7013_s11 + $0x94] sm:$0xf] }
  0x7d   : > { %v576_v56 = vsel %vm7045_vm2, %v571_v44, %v575_v18  ;;  %v581_v57 = vrot.slane %v580_v49, 4  ;;  %v590_v58 = vrot.slane %v588_v50, 4  ;;  %v593_v59 = vrot.slane %v591_v52, 5  ;;  %v7477_v44 = vld [vmem:[%s8802_s1 + $0x1c0] sm:$0xff]  }
  0x7e   : > { %v2961_v24 = vsel %vm7291_vm5, %v2959_v22, %v2960_v42  ;;  %v599_v61 = vrot.slane %v597_v51, 5  ;;  %v603_v6 = vrot.slane %v601_v55, 4  ;;  %v607_v63 = vshll.u32 %v246_v43, 16  ;;  %6333 = vmatpush3.bf16.msra.mxu0 %v6790_v32  ;;  %v5520_v43 = vld [vmem:[%s7013_s11 + $0x90] sm:$0xe] }
  0x7f   : > { %v586_v1 = vsel %vm7045_vm2, %v581_v57, %v585_v38  ;;  %v5565_v7 = vcombine.low %v2958_v14, %v2961_v24  ;;  %v594_v10 = vor.u32 %v593_v59, %v590_v58  ;;  %v5534_v11 = vrot.slane %v5518_v53, 9  ;;  %6334 = vmatprep.subr.bf16.mxu0 %v6794_v45  ;;  %v5450_v55 = vld [vmem:[%s7013_s11 + $0x98] sm:$0x1]  ;;  %v5521_v24 = vld [vmem:[%s7013_s11 + $0xa0] sm:$0xe] }
  0x80   : > { %v5261_v28 = vcombine.low %v576_v56, %v586_v1  ;;  %v604_v8 = vor.u32 %v603_v6, %v599_v61  ;;  %v609_v15 = vrot.slane %v607_v63, 5  ;;  %v2964_v32 = vrot.slane %v7229_v0, 5 }
  0x81   : > { %6299 = vmatmul.mubr.bf16.gmra.mrb[8].mxu0 %v5565_v7  ;;  %v595_v36 = vrot.slane %v594_v10, 4  ;;  %v2967_v62 = vrot.slane %v7241_v20, 5  ;;  %v612_v18 = vshrl.u32 %v7450_v41, 16  ;;  %v615_v26 = vshll.u32 %v7450_v41, 16 }
  0x82   : > { %6075 = vmatmul.mubr.bf16.gmra.mrb[24].mxu1 %v5261_v28  ;;  %v605_v34 = vrot.slane %v604_v8, 4  ;;  %v2965_v33 = vsel %vm7291_vm5, %v5534_v11, %v2964_v32  ;;  %v2966_v46 = vrot.slane %v2964_v32, 4  ;;  %v621_v38 = vshll.u32 %v7455_v12, 16  ;;  %6335 = vmatpush3.bf16.msra.mxu0 %v6794_v45  ;;  %v7490_v11 = vld [vmem:[%s7013_s11 + $0xa4] sm:$0xf] }
  0x83   : > { %v600_v0 = vsel %vm7045_vm2, %v595_v36, %v599_v61  ;;  %v614_v20 = vrot.slane %v612_v18, 4  ;;  %v617_v23 = vrot.slane %v615_v26, 5  ;;  %v625_v42 = vshrl.u32 %v7455_v12, 16  ;;  %6336 = vmatprep.subr.bf16.mxu0 %v6798_v13  ;;  %v6867_v36 = vld [vmem:[%s7013_s11] sm:$0xf] }
  0x84   : > { %v610_v49 = vsel %vm7045_vm2, %v605_v34, %v609_v15  ;;  %v2968_v50 = vsel %vm7291_vm5, %v2966_v46, %v2967_v62  ;;  %v623_v52 = vrot.slane %v621_v38, 5  ;;  %v631_v53 = vshll.u32 %v247_v19, 16  ;;  %v5455_v15 = vld [vmem:[%s7013_s11 + $0xb4] sm:$0xf]  ;;  %v7505_v62 = vld [vmem:[%s7013_s11 + $0x4] sm:$0xf] }
  0x85   : > { %v5262_v45 = vcombine.low %v600_v0, %v610_v49  ;;  %v5566_v14 = vcombine.low %v2965_v33, %v2968_v50  ;;  %v618_v22 = vor.u32 %v617_v23, %v614_v20  ;;  %v627_v51 = vrot.slane %v625_v42, 4  ;;  %v5456_v26 = vld [vmem:[%s7013_s11 + $0xb8] sm:$0x1]  ;;  %v5459_v23 = vld [vmem:[%s7013_s11 + $0xc8] sm:$0x1] }
  0x86   : > { %v633_v56 = vrot.slane %v631_v53, 5  ;;  %v5535_v57 = vrot.slane %v5519_v30, 9  ;;  %v2971_v58 = vrot.slane %v7256_v60, 5  ;;  %v2974_v59 = vrot.slane %v7265_v17, 5  ;;  %6337 = vmatpush3.bf16.msra.mxu0 %v6798_v13  ;;  %v7493_v17 = vld [vmem:[%s7013_s11 + $0xa8] sm:$0x1] }
  0x87   : > { %6078 = vmatprep.mubr.bf16.mxu1 %v5262_v45  ;;  %6302 = vmatprep.mubr.bf16.mxu0 %v5566_v14  ;;  %v619_v61 = vrot.slane %v618_v22, 4  ;;  %v628_v6 = vor.u32 %v627_v51, %v623_v52  ;;  %v5536_v63 = vrot.slane %v5520_v43, 9  ;;  %v2978_v1 = vrot.slane %v5449_v39, 5  ;;  %v5522_v30 = vld [vmem:[%s7013_s11 + $0xb0] sm:$0xe] }
  0x88   : > { %v2972_v7 = vsel %vm7291_vm5, %v5535_v57, %v2971_v58  ;;  %v2973_v10 = vrot.slane %v2971_v58, 4  ;;  %v2981_v60 = vrot.slane %v5450_v55, 5  ;;  %6370 = vmatprep.subr.bf16.mxu0 %v7477_v44  ;;  %v5272_v18 = vcombine.low %v6867_v36, %v7505_v62  ;;  %v5458_v39 = vld [vmem:[%s7013_s11 + $0xc4] sm:$0xf]  ;;  %v5523_v42 = vld [vmem:[%s7013_s11 + $0xc0] sm:$0xe] }
  0x89   : > { %v624_v19 = vsel %vm7045_vm2, %v619_v61, %v623_v52  ;;  %v629_v13 = vrot.slane %v628_v6, 4  ;;  %v2979_v28 = vsel %vm7291_vm5, %v5536_v63, %v2978_v1  ;;  %v2980_v8 = vrot.slane %v2978_v1, 4  ;;  %v5524_v50 = vld [vmem:[%s7013_s11 + $0xd0] sm:$0xe]  ;;  %v5461_v14 = vld [vmem:[%s7013_s11 + $0xd4] sm:$0xf] }
  0x8a   : > { %v2975_v32 = vsel %vm7291_vm5, %v2973_v10, %v2974_v59  ;;  %v5537_v38 = vrot.slane %v5521_v24, 9  ;;  %v2985_v43 = vrot.slane %v7490_v11, 5  ;;  %v2988_v49 = vrot.slane %v7493_v17, 5  ;;  %v5462_v22 = vld [vmem:[%s7013_s11 + $0xd8] sm:$0x1] }
  0x8b   : > { %v634_v34 = vsel %vm7045_vm2, %v629_v13, %v633_v56  ;;  %v5567_v33 = vcombine.low %v2972_v7, %v2975_v32  ;;  %v2982_v46 = vsel %vm7291_vm5, %v2980_v8, %v2981_v60  ;;  %v5538_v52 = vrot.slane %v5522_v30, 9  ;;  %v5464_v59 = vld [vmem:[%s7013_s11 + $0xe4] sm:$0xf]  ;;  %v6869_v24 = vld [vmem:[%s7013_s11 + $0x10] sm:$0xf] }
  0x8c   : > { %v5263_v0 = vcombine.low %v624_v19, %v634_v34  ;;  %v5568_v20 = vcombine.low %v2979_v28, %v2982_v46  ;;  %v2992_v53 = vrot.slane %v5455_v15, 5  ;;  %v2995_v45 = vrot.slane %v5456_v26, 5  ;;  %v7529_v61 = vld [vmem:[%s7013_s11 + $0x14] sm:$0xf]  ;;  %v6789_v19 = vld [vmem:[%s8802_s1 + $0x88] sm:$0xff]  }
  0x8d   : > { %6303 = vmatmul.mubr.bf16.gmra.mrb[12].mxu0 %v5567_v33  ;;  %v2986_v51 = vsel %vm7291_vm5, %v5537_v38, %v2985_v43  ;;  %v2987_v55 = vrot.slane %v2985_v43, 4  ;;  %v2999_v58 = vrot.slane %v5458_v39, 5  ;;  %v5273_v6 = vcombine.low %v6869_v24, %v7529_v61  ;;  %v6871_v8 = vld [vmem:[%s7013_s11 + $0x20] sm:$0xf]  ;;  %v7541_v15 = vld [vmem:[%s7013_s11 + $0x24] sm:$0xf] }
  0x8e   : > { %6079 = vmatmul.mubr.bf16.gmra.mrb[28].mxu1 %v5263_v0  ;;  %6306 = vmatprep.mubr.bf16.mxu0 %v5568_v20  ;;  %v2993_v56 = vsel %vm7291_vm5, %v5538_v52, %v2992_v53  ;;  %v2994_v57 = vrot.slane %v2992_v53, 4  ;;  %v5539_v1 = vrot.slane %v5523_v42, 9  ;;  %v3002_v7 = vrot.slane %v5459_v23, 5  ;;  %v5465_v30 = vld [vmem:[%s7013_s11 + $0xe8] sm:$0x1] }
  0x8f   : > { %6098 = vmatprep.mubr.bf16.mxu1 %v5272_v18  ;;  %v2989_v63 = vsel %vm7291_vm5, %v2987_v55, %v2988_v49  ;;  %v3001_v13 = vrot.slane %v2999_v58, 4  ;;  %v5540_v28 = vrot.slane %v5524_v50, 9  ;;  %v5274_v32 = vcombine.low %v6871_v8, %v7541_v15  ;;  %v5525_v34 = vld [vmem:[%s7013_s11 + $0xe0] sm:$0xe]  ;;  %v5467_v33 = vld [vmem:[%s7013_s11 + $0xf4] sm:$0xf] }
  0x90   : > { %v5569_v10 = vcombine.low %v2986_v51, %v2989_v63  ;;  %v2996_v60 = vsel %vm7291_vm5, %v2994_v57, %v2995_v45  ;;  %v3006_v18 = vrot.slane %v5461_v14, 5  ;;  %v3009_v26 = vrot.slane %v5462_v22, 5  ;;  %v5468_v20 = vld [vmem:[%s7013_s11 + $0xf8] sm:$0x1]  ;;  %v5526_v23 = vld [vmem:[%s7013_s11 + $0xf0] sm:$0xe] }
  0x91   : > { %v5570_v36 = vcombine.low %v2993_v56, %v2996_v60  ;;  %v3013_v38 = vrot.slane %v5464_v59, 5  ;;  %v3000_v39 = vsel %vm7291_vm5, %v5539_v1, %v2999_v58  ;;  %v3003_v0 = vsel %vm7291_vm5, %v3001_v13, %v3002_v7  ;;  %v6793_v50 = vld [vmem:[%s8802_s1 + $0x90] sm:$0xff]   ;;  %v5470_v53 = vld [vmem:[%s7013_s11 + $0x104] sm:$0xf]  ;;  %v6875_v57 = vld [vmem:[%s7013_s11 + $0x40] sm:$0xf] }
  0x92   : > { %v3008_v46 = vrot.slane %v3006_v18, 4  ;;  %v3007_v42 = vsel %vm7291_vm5, %v5540_v28, %v3006_v18  ;;  %v3020_v49 = vrot.slane %v5467_v33, 5  ;;  %v5541_v52 = vrot.slane %v5525_v34, 9  ;;  %v6873_v22 = vld [vmem:[%s7013_s11 + $0x30] sm:$0xf]  ;;  %v6797_v1 = vld [vmem:[%s8802_s1 + $0x98] sm:$0xff]  }
  0x93   : > { %v5571_v45 = vcombine.low %v3000_v39, %v3003_v0  ;;  %v3015_v14 = vrot.slane %v3013_v38, 4  ;;  %v7564_v51 = vld [vmem:[%s7013_s11 + $0x34] sm:$0xf]  ;;  %v7569_v58 = vld [vmem:[%s7013_s11 + $0x44] sm:$0xf]  ;;  %v5542_v24 = vrot.slane %v5526_v23, 9 }
  0x94   : > { %v3010_v43 = vsel %vm7291_vm5, %v3008_v46, %v3009_v26  ;;  %v5275_v55 = vcombine.low %v6873_v22, %v7564_v51  ;;  %v5276_v59 = vcombine.low %v6875_v57, %v7569_v58  ;;  %v3023_v63 = vrot.slane %v5468_v20, 5  ;;  %v5527_v7 = vld [vmem:[%s7013_s11 + $0x100] sm:$0xe]  ;;  %v5471_v8 = vld [vmem:[%s7013_s11 + $0x108] sm:$0x1] }
  0x95   : > { %6307 = vmatmul.mubr.bf16.gmra.mrb[16].mxu0 %v5569_v10  ;;  %v5572_v56 = vcombine.low %v3007_v42, %v3010_v43  ;;  %v3027_v10 = vrot.slane %v5470_v53, 5  ;;  %v3014_v60 = vsel %vm7291_vm5, %v5541_v52, %v3013_v38  ;;  %v3021_v13 = vsel %vm7291_vm5, %v5542_v24, %v3020_v49  ;;  %v6877_v26 = vld [vmem:[%s7013_s11 + $0x50] sm:$0xf]  ;;  %v6879_v39 = vld [vmem:[%s7013_s11 + $0x60] sm:$0xf]  ;;  %v6808_v23 = vld [vmem:[%s8802_s1 + $0xa8] sm:$0xff]  }
  0x96   : > { %6099 = vmatmul.mubr.bf16.vlgmr.msra.gmra.mrb[0].mxu1 %v5273_v6  ;;  %6310 = vmatprep.mubr.bf16.mxu0 %v5570_v36  ;;  %v3022_v6 = vrot.slane %v3020_v49, 4  ;;  %v5543_v18 = vrot.slane %v5527_v7, 9  ;;  %v3030_v38 = vrot.slane %v5471_v8, 5  ;;  %v7595_v0 = vld [vmem:[%s7013_s11 + $0x64] sm:$0xf]  ;;  %v6814_v49 = vld [vmem:[%s8802_s1 + $0xb0] sm:$0xff]  }
  0x97   : > { %6131 = vmatpush3.bf16.msra.mxu1 %v7215_v4  ;;  %6102 = vmatprep.mubr.bf16.mxu1 %v5274_v32  ;;  %v3016_v4 = vrot.slane %v5465_v30, 5  ;;  %v6802_v32 = vld [vmem:[%s8802_s1 + $0xa0] sm:$0xff]   ;;  %v7590_v30 = vld [vmem:[%s7013_s11 + $0x54] sm:$0xf]  ;;  %v3029_v46 = vrot.slane %v3027_v10, 4  ;;  %v5278_v20 = vcombine.low %v6879_v39, %v7595_v0  ;;  %v2380_v52 = vshrl.u32 %v7490_v11, 16 }
  0x98   : > { %6132 = vmatprep.subr.bf16.mxu1 %v6789_v19  ;;  %v3024_v28 = vsel %vm7291_vm5, %v3022_v6, %v3023_v63  ;;  %v5277_v34 = vcombine.low %v6877_v26, %v7590_v30  ;;  %v3028_v42 = vsel %vm7291_vm5, %v5543_v18, %v3027_v10  ;;  %v6800_v22 = vld [vmem:[%s7013_s11 + $0x20] sm:$0xff]   ;;  %v6803_v6 = vld [vmem:[%s7013_s11 + $0x30] sm:$0xff]   ;;  %v1290_v7 = vrot.slane %v7529_v61, 5 }
  0x99   : > { %v5574_v33 = vcombine.low %v3021_v13, %v3024_v28  ;;  %v3031_v43 = vsel %vm7291_vm5, %v3029_v46, %v3030_v38  ;;  %v7623_v57 = vrot.slane %v2380_v52, 4  ;;  %v1230_v63 = vld [vmem:[%s7013_s11] sm:$0xe]  ;;  %v1231_v10 = vld [vmem:[%s7013_s11 + $0x10] sm:$0xe]  ;;  %v1297_v13 = vrot.slane %v7541_v15, 5 }
  0x9a   : > { %v5575_v53 = vcombine.low %v3028_v42, %v3031_v43  ;;  %v2386_v8 = vshll.u32 %v7493_v17, 16  ;;  %v1233_v61 = vld [vmem:[%s7013_s11 + $0x30] sm:$0xe]  ;;  %v6806_v18 = vld [vmem:[%s7013_s11 + $0x40] sm:$0xff]   ;;  %v5283_v15 = vcombine.low %v7343_v16, %v7351_v40  ;;  %v5284_v26 = vcombine.low %v7372_v2, %v7375_v3  ;;  %v6885_v38 = vld [vmem:[%s7013_s11 + $0x28] sm:$0x1] }
  0x9b   : > { %6133 = vmatpush3.bf16.msra.mxu1 %v6789_v19  ;;  %v3017_v19 = vsel %vm7291_vm5, %v3015_v14, %v3016_v4  ;;  %v7612_v14 = vld [vmem:[%s7013_s11 + $0x74] sm:$0xf]  ;;  %v5296_v17 = vrot.slane %v1230_v63, 9  ;;  %v1299_v46 = vrot.slane %v1297_v13, 4  ;;  %v1300_v39 = vrot.slane %v6885_v38, 5  ;;  %v6818_v3 = vld [vmem:[%s7013_s11 + $0x80] sm:$0xff]  }
  0x9c   : > { %6134 = vmatprep.subr.bf16.mxu1 %v6793_v50  ;;  %v5573_v36 = vcombine.low %v3014_v60, %v3017_v19  ;;  %v7638_v60 = vld [vmem:[%s8802_s1 + $0xc0] sm:$0xff]   ;;  %v6886_v43 = vld [vmem:[%s7013_s11 + $0x38] sm:$0x1]  ;;  %v6889_v38 = vld [vmem:[%s7013_s11 + $0x68] sm:$0x1]  ;;  %v1332_v16 = vrot.slane %v7612_v14, 5 }
  0x9d   : > { %6311 = vmatmul.mubr.bf16.gmra.mrb[20].mxu0 %v5571_v45  ;;  %v6881_v45 = vld [vmem:[%s7013_s11 + $0x70] sm:$0xf]  ;;  %v1232_v19 = vld [vmem:[%s7013_s11 + $0x20] sm:$0xe]  ;;  %v7761_v40 = vld [vmem:[%s7013_s11 + $0x84] sm:$0xf] }
  0x9e   : > { %6103 = vmatmul.mubr.bf16.gmra.mrb[4].mxu1 %v5275_v55  ;;  %6314 = vmatprep.mubr.bf16.mxu0 %v5572_v56  ;;  %v5279_v4 = vcombine.low %v6881_v45, %v7612_v14  ;;  %v5280_v55 = vcombine.low %v7269_v25, %v7272_v35  ;;  %v6820_v56 = vld [vmem:[%s8802_s1 + $0xb8] sm:$0xff]   ;;  %v6815_v2 = vld [vmem:[%s7013_s11 + $0x70] sm:$0xff]  }
  0x9f   : > { %6106 = vmatprep.mubr.bf16.mxu1 %v5276_v59  ;;  %6135 = vmatpush3.bf16.msra.mxu1 %v6793_v50  ;;  %v2376_v50 = vshll.u32 %v7490_v11, 16  ;;  %v7626_v59 = vld [vmem:[%s7013_s11 + $0x8] sm:$0x1]  ;;  %v6884_v25 = vld [vmem:[%s7013_s11 + $0x18] sm:$0x1] }
  0xa0   : > { %6136 = vmatprep.subr.bf16.mxu1 %v6797_v1  ;;  %v1286_v24 = vrot.slane %v7626_v59, 5  ;;  %v1293_v35 = vrot.slane %v6884_v25, 5 }
  0xa1   : > { %v7621_v11 = vrot.slane %v2376_v50, 5 }
  0xa3   : > { %6137 = vmatpush3.bf16.msra.mxu1 %v6797_v1  ;;  %v1283_v1 = vrot.slane %v7505_v62, 5  ;;  %v5281_v62 = vcombine.low %v7287_v5, %v7299_v21  ;;  %v5297_v21 = vrot.slane %v1231_v10, 9  ;;  %v5656_v10 = vld [vmem:[%s7013_s11 + $0x20] sm:$0xf] }
  0xa4   : > { %6138 = vmatprep.subr.bf16.mxu1 %v6802_v32 }
  0xa5   : > { %6315 = vmatmul.mubr.bf16.gmra.mrb[24].mxu0 %v5573_v36  ;;  %v5282_v36 = vcombine.low %v7310_v47, %v7321_v54  ;;  %v1285_v5 = vrot.slane %v1283_v1, 4  ;;  %v6810_v47 = vld [vmem:[%s8802_s1 + $0x1c8] sm:$0xff]   ;;  %v5298_v54 = vrot.slane %v1232_v19, 9  ;;  %v7681_v59 = vsel %vm7291_vm5, %v5296_v17, %v1283_v1  ;;  %v5657_v19 = vld [vmem:[%s7013_s11 + $0x24] sm:$0xf] }
  0xa6   : > { %6107 = vmatmul.mubr.bf16.gmra.mrb[8].mxu1 %v5277_v34  ;;  %6318 = vmatprep.mubr.bf16.mxu0 %v5574_v33  ;;  %v1311_v34 = vrot.slane %v7569_v58, 5  ;;  %v1292_v33 = vrot.slane %v1290_v7, 4  ;;  %v5299_v58 = vrot.slane %v1233_v61, 9  ;;  %v1325_v1 = vrot.slane %v7595_v0, 5  ;;  %v6812_v0 = vld [vmem:[%s7013_s11 + $0x60] sm:$0xff]  }
  0xa7   : > { %6110 = vmatprep.mubr.bf16.mxu1 %v5278_v20  ;;  %6139 = vmatpush3.bf16.msra.mxu1 %v6802_v32  ;;  %v1304_v32 = vrot.slane %v7564_v51, 5  ;;  %v1234_v51 = vld [vmem:[%s7013_s11 + $0x40] sm:$0xe]  ;;  %v5285_v20 = vcombine.low %v7393_v31, %v7402_v48  ;;  %v7689_v25 = vsel %vm7291_vm5, %v1285_v5, %v1286_v24  ;;  %v7697_v63 = vsel %vm7291_vm5, %v5298_v54, %v1297_v13  ;;  %v6821_v48 = vld [vmem:[%s7013_s11 + $0x90] sm:$0xff]  }
  0xa8   : > { %6140 = vmatprep.subr.bf16.mxu1 %v6808_v23  ;;  %v5300_v50 = vrot.slane %v1234_v51, 9  ;;  %v1313_v52 = vrot.slane %v1311_v34, 4  ;;  %v1236_v13 = vld [vmem:[%s7013_s11 + $0x60] sm:$0xe]  ;;  %v3790_v5 = vshrl.u32 %v5656_v10, 16  ;;  %v3803_v51 = vshrl.u32 %v5657_v19, 16 }
  0xa9   : > { %v1306_v42 = vrot.slane %v1304_v32, 4  ;;  %v7709_v24 = vsel %vm7291_vm5, %v5299_v58, %v1304_v32  ;;  %v6888_v32 = vld [vmem:[%s7013_s11 + $0x58] sm:$0x1]  ;;  %v5302_v54 = vrot.slane %v1236_v13, 9  ;;  %v5660_v13 = vld [vmem:[%s7013_s11 + $0x34] sm:$0xf] }
  0xaa   : > { %v7719_v61 = vsel %vm7291_vm5, %v5300_v50, %v1311_v34  ;;  %v1321_v17 = vrot.slane %v6888_v32, 5  ;;  %v5658_v50 = vld [vmem:[%s7013_s11 + $0x28] sm:$0x1]  ;;  %v1238_v32 = vld [vmem:[%s7013_s11 + $0x80] sm:$0xe] }
  0xab   : > { %6141 = vmatpush3.bf16.msra.mxu1 %v6808_v23  ;;  %v5286_v23 = vcombine.low %v7427_v27, %v7430_v29 }
  0xac   : > { %6142 = vmatprep.subr.bf16.mxu1 %v6814_v49 }
  0xad   : > { %6319 = vmatmul.mubr.bf16.gmra.mrb[28].mxu0 %v5575_v53  ;;  %v6887_v53 = vld [vmem:[%s7013_s11 + $0x48] sm:$0x1] }
  0xae   : > { %6111 = vmatmul.mubr.bf16.gmra.mrb[12].mxu1 %v5279_v4  ;;  %6338 = vmatprep.mubr.bf16.mxu0 %v6800_v22  ;;  %v1314_v45 = vrot.slane %v6887_v53, 5  ;;  %v1235_v4 = vld [vmem:[%s7013_s11 + $0x50] sm:$0xe]  ;;  %v1318_v22 = vrot.slane %v7590_v30, 5  ;;  %v7685_v30 = vsel %vm7291_vm5, %v5297_v21, %v1290_v7  ;;  %v3793_v21 = vshll.u32 %v5656_v10, 16  ;;  %v6826_v53 = vld [vmem:[%s8802_s1 + $0x1e0] sm:$0xff]  }
  0xaf   : > { %6114 = vmatprep.mubr.bf16.mxu1 %v5280_v55  ;;  %6143 = vmatpush3.bf16.msra.mxu1 %v6814_v49  ;;  %v1307_v49 = vrot.slane %v6886_v43, 5  ;;  %v7672_v55 = vrot.slane %v2386_v8, 5  ;;  %v6809_v7 = vld [vmem:[%s7013_s11 + $0x50] sm:$0xff]   ;;  %v7705_v8 = vsel %vm7291_vm5, %v1299_v46, %v1300_v39  ;;  %v1327_v46 = vrot.slane %v1325_v1, 4  ;;  %v5662_v43 = vld [vmem:[%s7013_s11 + $0x40] sm:$0xf] }
  0xb0   : > { %6144 = vmatprep.subr.bf16.mxu1 %v6820_v56  ;;  %v1328_v39 = vrot.slane %v6889_v38, 5  ;;  %v3792_v10 = vrot.slane %v3790_v5, 4 }
  0xb1   : > { %8823 = vst [vmem:[#allocation2_spill] sm:$0xff] %v7672_v55 }
  0xb3   : > { %6145 = vmatpush3.bf16.msra.mxu1 %v6820_v56  ;;  %v6816_v56 = vld [vmem:[%s8802_s1 + $0x1d0] sm:$0xff]  }
  0xb4   : > { %6178 = vmatprep.subr.bf16.mxu1 %v7638_v60 }
  0xb5   : > { %6339 = vmatmul.mubr.bf16.vlgmr.msra.gmra.mrb[0].mxu0 %v6803_v6  ;;  %v7693_v6 = vsel %vm7291_vm5, %v1292_v33, %v1293_v35  ;;  %v7713_v35 = vsel %vm7291_vm5, %v1306_v42, %v1307_v49  ;;  %v3799_v33 = vshll.u32 %v5657_v19, 16  ;;  %v3795_v19 = vrot.slane %v3793_v21, 5  ;;  %v1239_v21 = vld [vmem:[%s7013_s11 + $0x90] sm:$0xe] }
  0xb6   : > { %6115 = vmatmul.mubr.bf16.gmra.mrb[16].mxu1 %v5281_v62  ;;  %6371 = vmatpush3.bf16.msra.mxu0 %v7477_v44  ;;  %v5301_v62 = vrot.slane %v1235_v4, 9  ;;  %v5305_v58 = vrot.slane %v1239_v21, 9 }
  0xb7   : > { %6118 = vmatprep.mubr.bf16.mxu1 %v5282_v36  ;;  %6342 = vmatprep.mubr.bf16.mxu0 %v6806_v18  ;;  %v7723_v36 = vsel %vm7291_vm5, %v1313_v52, %v1314_v45  ;;  %v1320_v18 = vrot.slane %v1318_v22, 4  ;;  %v5659_v52 = vld [vmem:[%s7013_s11 + $0x30] sm:$0xf]  ;;  %v3827_v45 = vshrl.u32 %v5660_v13, 16 }
  0xb8   : > { %6372 = vmatprep.subr.bf16.mxu0 %v6810_v47  ;;  %v7740_v49 = vsel %vm7291_vm5, %v5301_v62, %v1318_v22  ;;  %v7757_v22 = vld [vmem:[%s7013_s11 + $0x70] sm:$0xe]  ;;  %v3805_v62 = vrot.slane %v3803_v51, 4  ;;  %v3814_v38 = vshrl.u32 %v5659_v52, 16  ;;  %v3817_v28 = vshll.u32 %v5659_v52, 16 }
  0xb9   : > { %v7754_v4 = vsel %vm7291_vm5, %v1320_v18, %v1321_v17  ;;  %v3809_v17 = vshll.u32 %v5658_v50, 16  ;;  %v5303_v5 = vrot.slane %v7757_v22, 9  ;;  %v6830_v50 = vld [vmem:[%s8802_s1 + $0x1e8] sm:$0xff]   ;;  %v1334_v52 = vrot.slane %v1332_v16, 4 }
  0xba   : > { %6373 = vmatpush3.bf16.msra.mxu0 %v6810_v47  ;;  %v6822_v47 = vld [vmem:[%s8802_s1 + $0x1d8] sm:$0xff]   ;;  %v3796_v22 = vor.u32 %v3795_v19, %v3792_v10  ;;  %v3816_v34 = vrot.slane %v3814_v38, 4  ;;  %v3819_v44 = vrot.slane %v3817_v28, 5  ;;  %v3829_v28 = vrot.slane %v3827_v45, 4 }
  0xbb   : > { %6374 = vmatprep.subr.bf16.mxu0 %v6816_v56  ;;  %v7795_v42 = vrot.slane %v3809_v17, 5  ;;  %v6894_v10 = vld [vmem:[%s7013_s11 + $0x98] sm:$0x1]  ;;  %v3838_v38 = vshrl.u32 %v5662_v43, 16  ;;  %v7820_v27 = vsel %vm7291_vm5, %v5303_v5, %v1332_v16 }
  0xbc   : > { %v1349_v19 = vrot.slane %v6894_v10, 5  ;;  %v3797_v21 = vrot.slane %v3796_v22, 4 }
  0xbd   : > { %6343 = vmatmul.mubr.bf16.gmra.mrb[4].mxu0 %v6809_v7  ;;  %v7767_v7 = vrot.slane %v3799_v33, 5  ;;  %v6892_v33 = vld [vmem:[%s7013_s11 + $0x94] sm:$0xf] }
  0xbe   : > { %6119 = vmatmul.mubr.bf16.gmra.mrb[20].mxu1 %v5283_v15  ;;  %6346 = vmatprep.mubr.bf16.mxu0 %v6812_v0  ;;  %v1339_v15 = vrot.slane %v7761_v40, 5  ;;  %v6891_v0 = vld [vmem:[%s7013_s11 + $0x78] sm:$0x1]  ;;  %v1346_v51 = vrot.slane %v6892_v33, 5 }
  0xbf   : > { %6122 = vmatprep.mubr.bf16.mxu1 %v5284_v26  ;;  %6375 = vmatpush3.bf16.msra.mxu0 %v6816_v56  ;;  %v1335_v18 = vrot.slane %v6891_v0, 5  ;;  %v7776_v26 = vsel %vm7291_vm5, %v5302_v54, %v1325_v1  ;;  %v7780_v56 = vsel %vm7291_vm5, %v1327_v46, %v1328_v39  ;;  %v6893_v1 = vld [vmem:[%s7013_s11 + $0x88] sm:$0x1]  ;;  %v3823_v0 = vshll.u32 %v5660_v13, 16  ;;  %v6838_v40 = vld [vmem:[%s8802_s1 + $0x1f8] sm:$0xff]  }
  0xc0   : > { %6376 = vmatprep.subr.bf16.mxu0 %v6822_v47  ;;  %v1342_v54 = vrot.slane %v6893_v1, 5  ;;  %v5304_v46 = vrot.slane %v1238_v32, 9  ;;  %v1341_v39 = vrot.slane %v1339_v15, 4  ;;  %v3806_v33 = vor.u32 %v3805_v62, %v7767_v7  ;;  %v5663_v1 = vld [vmem:[%s7013_s11 + $0x44] sm:$0xf] }
  0xc1   : > { %v1348_v32 = vrot.slane %v1346_v51, 4  ;;  %v5661_v62 = vld [vmem:[%s7013_s11 + $0x38] sm:$0x1]  ;;  %v7807_v17 = vrot.slane %v3823_v0, 5  ;;  %v3847_v13 = vshll.u32 %v5663_v1, 16  ;;  %v3851_v31 = vshrl.u32 %v5663_v1, 16 }
  0xc2   : > { %v3807_v10 = vrot.slane %v3806_v33, 4  ;;  %v7824_v29 = vsel %vm7291_vm5, %v1334_v52, %v1335_v18  ;;  %v7831_v45 = vsel %vm7291_vm5, %v5304_v46, %v1339_v15  ;;  %v7835_v14 = vsel %vm7291_vm5, %v1341_v39, %v1342_v54  ;;  %v1240_v18 = vld [vmem:[%s7013_s11 + $0xa0] sm:$0xe] }
  0xc3   : > { %6377 = vmatpush3.bf16.msra.mxu0 %v6822_v47  ;;  %v7839_v16 = vsel %vm7291_vm5, %v5305_v58, %v1346_v51  ;;  %v7849_v15 = vsel %vm7291_vm5, %v1348_v32, %v1349_v19  ;;  %v3830_v5 = vor.u32 %v3829_v28, %v7807_v17  ;;  %v3840_v52 = vrot.slane %v3838_v38, 4  ;;  %v5665_v58 = vld [vmem:[%s7013_s11 + $0x50] sm:$0xf]  ;;  %v5666_v51 = vld [vmem:[%s7013_s11 + $0x54] sm:$0xf] }
  0xc4   : > { %6378 = vmatprep.subr.bf16.mxu0 %v6826_v53  ;;  %v3802_v0 = vsel %vm7045_vm2, %v3797_v21, %v7767_v7  ;;  %v3812_v46 = vsel %vm7045_vm2, %v3807_v10, %v7795_v42  ;;  %v7860_v39 = vrot.slane %v3847_v13, 5  ;;  %v3853_v22 = vrot.slane %v3851_v31, 4  ;;  %v6896_v19 = vld [vmem:[%s7013_s11 + $0xa8] sm:$0x1]  ;;  %v7876_v21 = vld [vmem:[%s8802_s1 + $0x200] sm:$0xff]  }
  0xc5   : > { %6347 = vmatmul.mubr.bf16.gmra.mrb[8].mxu0 %v6815_v2  ;;  %v3841_v2 = vshll.u32 %v5662_v43, 16  ;;  %v3833_v43 = vshll.u32 %v5661_v62, 16  ;;  %v5306_v32 = vrot.slane %v1240_v18, 9  ;;  %v1241_v62 = vld [vmem:[%s7013_s11 + $0xb0] sm:$0xe]  ;;  %v3862_v28 = vshrl.u32 %v5665_v58, 16 }
  0xc6   : > { %6123 = vmatmul.mubr.bf16.gmra.mrb[24].mxu1 %v5285_v20  ;;  %6350 = vmatprep.mubr.bf16.mxu0 %v6818_v3  ;;  %v6834_v20 = vld [vmem:[%s8802_s1 + $0x1f0] sm:$0xff]   ;;  %v6895_v3 = vld [vmem:[%s7013_s11 + $0xa4] sm:$0xf]  ;;  %v3865_v7 = vshll.u32 %v5665_v58, 16  ;;  %v3871_v38 = vshll.u32 %v5666_v51, 16  ;;  %v8824_v42 = vcombine.low %v7450_v41, %v7455_v12  ;;  %v7871_v13 = vrot.slane %v3830_v5, 4 }
  0xc7   : > { %6126 = vmatprep.mubr.bf16.mxu1 %v5286_v23  ;;  %6379 = vmatpush3.bf16.msra.mxu0 %v6826_v53  ;;  %v3820_v23 = vor.u32 %v3819_v44, %v3816_v34  ;;  %v6823_v53 = vld [vmem:[%s7013_s11 + $0xa0] sm:$0xff]   ;;  %v1353_v44 = vrot.slane %v6895_v3, 5  ;;  %v5664_v34 = vld [vmem:[%s7013_s11 + $0x48] sm:$0x1]  ;;  %v3843_v54 = vrot.slane %v3841_v2, 5  ;;  %v7864_v1 = vrot.slane %v3833_v43, 5 }
  0xc8   : > { %6380 = vmatprep.subr.bf16.mxu0 %v6830_v50  ;;  %v3875_v2 = vshrl.u32 %v5666_v51, 16  ;;  %v6825_v43 = vld [vmem:[%s7013_s11 + $0xb0] sm:$0xff]   ;;  %v3854_v12 = vor.u32 %v3853_v22, %v7860_v39  ;;  %v5667_v5 = vld [vmem:[%s7013_s11 + $0x58] sm:$0x1]  ;;  %v3867_v58 = vrot.slane %v3865_v7, 5  ;;  %v7898_v51 = vrot.slane %v3871_v38, 5 }
  0xc9   : > { %v7862_v33 = vrot.slane %v3820_v23, 4  ;;  %v1355_v10 = vrot.slane %v1353_v44, 4  ;;  %v3844_v31 = vor.u32 %v3843_v54, %v3840_v52  ;;  %v8825_v23 = vcombine.low %v7681_v59, %v7689_v25  ;;  %v6897_v18 = vld [vmem:[%s7013_s11 + $0xb4] sm:$0xf]  ;;  %v5668_v52 = vld [vmem:[%s7013_s11 + $0x60] sm:$0xf] }
  0xca   : > { %v1360_v3 = vrot.slane %v6897_v18, 5  ;;  %v7889_v59 = vcombine.low %v3802_v0, %v3812_v46  ;;  %v3864_v54 = vrot.slane %v3862_v28, 4  ;;  %v3877_v22 = vrot.slane %v3875_v2, 4  ;;  %v6903_v41 = vld [vmem:[%s7013_s11 + $0xe4] sm:$0xf] }
  0xcb   : > { %6381 = vmatpush3.bf16.msra.mxu0 %v6830_v50  ;;  %v1356_v50 = vrot.slane %v6896_v19, 5  ;;  %v6827_v19 = vld [vmem:[%s7013_s11 + $0xc0] sm:$0xff]   ;;  %v3826_v0 = vsel %vm7045_vm2, %v7862_v33, %v7807_v17  ;;  %v3845_v46 = vrot.slane %v3844_v31, 4  ;;  %v3836_v28 = vsel %vm7045_vm2, %v7871_v13, %v7864_v1  ;;  %v5671_v17 = vld [vmem:[%s7013_s11 + $0x70] sm:$0xf]  ;;  %v6828_v31 = vld [vmem:[%s8802_s1 + $0xc8] sm:$0xff]  }
  0xcc   : > { %6382 = vmatprep.subr.bf16.mxu0 %v6834_v20  ;;  %v3855_v38 = vrot.slane %v3854_v12, 4  ;;  %v1362_v2 = vrot.slane %v1360_v3, 4  ;;  %v7920_v33 = vld [vmem:[%s7013_s11 + $0x74] sm:$0xf]  ;;  %v3881_v1 = vshll.u32 %v5667_v5, 16  ;;  %v3886_v13 = vshrl.u32 %v5668_v52, 16 }
  0xcd   : > { %6351 = vmatmul.mubr.bf16.gmra.mrb[12].mxu0 %v6821_v48  ;;  %v3857_v48 = vshll.u32 %v5664_v34, 16  ;;  %v7916_v7 = vsel %vm7291_vm5, %v1355_v10, %v1356_v50  ;;  %v3889_v50 = vshll.u32 %v5668_v52, 16  ;;  %v3868_v10 = vor.u32 %v3867_v58, %v3864_v54  ;;  %v6829_v54 = vld [vmem:[%s7013_s11 + $0xd0] sm:$0xff]   ;;  %v8019_v47 = vld [vmem:[%s7013_s11 + $0x88] sm:$0x1] }
  0xce   : > { %6127 = vmatmul.mubr.bf16.gmra.mrb[28].mxu1 %v8824_v42  ;;  %6354 = vmatprep.mubr.bf16.mxu0 %v6823_v53  ;;  %v5307_v53 = vrot.slane %v1241_v62, 9  ;;  %v6898_v42 = vld [vmem:[%s7013_s11 + $0xb8] sm:$0x1]  ;;  %v3919_v5 = vshll.u32 %v7920_v33, 16  ;;  %v8827_v52 = vcombine.low %v7697_v63, %v7705_v8  ;;  %v7956_v63 = vld [vmem:[%s7013_s11 + $0x68] sm:$0x1] }
  0xcf   : > { %6146 = vmatprep.mubr.bf16.mxu1 %v8825_v23  ;;  %6383 = vmatpush3.bf16.msra.mxu0 %v6834_v20  ;;  %v7895_v20 = vsel %vm7291_vm5, %v5306_v32, %v1353_v44  ;;  %v3859_v62 = vrot.slane %v3857_v48, 5  ;;  %v1363_v23 = vrot.slane %v6898_v42, 5  ;;  %v1242_v44 = vld [vmem:[%s7013_s11 + $0xc0] sm:$0xe]  ;;  %v7908_v32 = vld [vmem:[%s7013_s11 + $0x64] sm:$0xf]  ;;  %v3878_v48 = vor.u32 %v3877_v22, %v7898_v51 }
  0xd0   : > { %6384 = vmatprep.subr.bf16.mxu0 %v6838_v40  ;;  %v3895_v12 = vshll.u32 %v7908_v32, 16  ;;  %v3899_v18 = vshrl.u32 %v7908_v32, 16  ;;  %v8826_v42 = vcombine.low %v7685_v30, %v7693_v6  ;;  %v6832_v30 = vld [vmem:[%s8802_s1 + $0xd0] sm:$0xff]   ;;  %v3850_v6 = vsel %vm7045_vm2, %v3845_v46, %v7860_v39  ;;  %v6831_v8 = vld [vmem:[%s7013_s11 + $0xe0] sm:$0xff]   ;;  %v7963_v39 = vld [vmem:[%s7013_s11 + $0x78] sm:$0x1] }
  0xd1   : > { %v3860_v58 = vsel %vm7045_vm2, %v3855_v38, %v3859_v62  ;;  %v5308_v22 = vrot.slane %v1242_v44, 9  ;;  %v3891_v25 = vrot.slane %v3889_v50, 5  ;;  %8828 = vst [vmem:[#allocation3_spill] sm:$0xff] %v7963_v39  ;;  %v3869_v46 = vrot.slane %v3868_v10, 4  ;;  %8832 = vst [vmem:[#allocation5_spill] sm:$0xff] %v8019_v47 }
  0xd2   : > { %v3879_v62 = vrot.slane %v3878_v48, 4  ;;  %v7965_v38 = vrot.slane %v3895_v12, 5  ;;  %v7967_v34 = vrot.slane %v3919_v5, 5  ;;  %v7972_v50 = vcombine.low %v3826_v0, %v3836_v28  ;;  %v5674_v28 = vld [vmem:[%s7013_s11 + $0x80] sm:$0xf] }
  0xd3   : > { %6385 = vmatpush3.bf16.msra.mxu0 %v6838_v40  ;;  %v7928_v40 = vsel %vm7291_vm5, %v5307_v53, %v1360_v3  ;;  %v3910_v53 = vshrl.u32 %v5671_v17, 16  ;;  %v3913_v3 = vshll.u32 %v5671_v17, 16  ;;  %v6899_v17 = vld [vmem:[%s7013_s11 + $0xc4] sm:$0xf]  ;;  %v7976_v48 = vcombine.low %v3850_v6, %v3860_v58 }
  0xd4   : > { %6418 = vmatprep.subr.bf16.mxu0 %v7876_v21  ;;  %v3905_v0 = vshll.u32 %v7956_v63, 16  ;;  %v3874_v6 = vsel %vm7045_vm2, %v3869_v46, %v7898_v51  ;;  %v8831_v46 = vcombine.low %v7719_v61, %v7723_v36 }
  0xd5   : > { %6355 = vmatmul.mubr.bf16.gmra.mrb[16].mxu0 %v6825_v43  ;;  %v3923_v43 = vshrl.u32 %v7920_v33, 16  ;;  %v3912_v44 = vrot.slane %v3910_v53, 4  ;;  %v6900_v53 = vld [vmem:[%s7013_s11 + $0xc8] sm:$0x1] }
  0xd6   : > { %6147 = vmatmul.mubr.bf16.vlgmr.msra.gmra.mrb[0].mxu1 %v8826_v42  ;;  %6358 = vmatprep.mubr.bf16.mxu0 %v6827_v19  ;;  %v7959_v19 = vrot.slane %v3881_v1, 5  ;;  %v1367_v42 = vrot.slane %v6899_v17, 5  ;;  %v6901_v17 = vld [vmem:[%s7013_s11 + $0xd4] sm:$0xf]  ;;  %v3907_v36 = vrot.slane %v3905_v0, 5 }
  0xd7   : > { %6179 = vmatpush3.bf16.msra.mxu1 %v7638_v60  ;;  %6150 = vmatprep.mubr.bf16.mxu1 %v8827_v52  ;;  %v7953_v60 = vsel %vm7291_vm5, %v1362_v2, %v1363_v23  ;;  %v3888_v52 = vrot.slane %v3886_v13, 4  ;;  %v3901_v23 = vrot.slane %v3899_v18, 4  ;;  %v3915_v2 = vrot.slane %v3913_v3, 5  ;;  %v6836_v13 = vld [vmem:[%s8802_s1 + $0xd8] sm:$0xff]   ;;  %v1243_v18 = vld [vmem:[%s7013_s11 + $0xd0] sm:$0xe] }
  0xd8   : > { %6180 = vmatprep.subr.bf16.mxu1 %v6828_v31  ;;  %v3925_v1 = vrot.slane %v3923_v43, 4  ;;  %v1370_v3 = vrot.slane %v6900_v53, 5  ;;  %v7989_v43 = vld [vmem:[%s7013_s11 + $0x84] sm:$0xf]  ;;  %v1374_v12 = vrot.slane %v6901_v17, 5 }
  0xd9   : > { %v3892_v5 = vor.u32 %v3891_v25, %v3888_v52  ;;  %8829 = vst [vmem:[#allocation4_spill] sm:$0xff] %v7989_v43  ;;  %v3902_v58 = vor.u32 %v3901_v23, %v7965_v38  ;;  %v8830_v25 = vcombine.low %v7709_v24, %v7713_v35  ;;  %v1369_v52 = vrot.slane %v1367_v42, 4  ;;  %v6833_v23 = vld [vmem:[%s7013_s11 + $0xf0] sm:$0xff]   ;;  %v6839_v24 = vld [vmem:[%s8802_s1 + $0xe0] sm:$0xff]  }
  0xda   : > { %v3916_v53 = vor.u32 %v3915_v2, %v3912_v44  ;;  %v3926_v51 = vor.u32 %v3925_v1, %v7967_v34  ;;  %v3934_v35 = vshrl.u32 %v5674_v28, 16  ;;  %v5309_v44 = vrot.slane %v1243_v18, 9  ;;  %v6902_v2 = vld [vmem:[%s7013_s11 + $0xd8] sm:$0x1]  ;;  %v5677_v17 = vld [vmem:[%s7013_s11 + $0x90] sm:$0xf] }
  0xdb   : > { %6181 = vmatpush3.bf16.msra.mxu1 %v6828_v31  ;;  %v7983_v31 = vsel %vm7291_vm5, %v5308_v22, %v1367_v42  ;;  %v3929_v22 = vshll.u32 %v7963_v39, 16  ;;  %v3947_v42 = vshrl.u32 %v7989_v43, 16  ;;  %v3893_v61 = vrot.slane %v3892_v5, 4  ;;  %v8158_v39 = vld [vmem:[%s7013_s11 + $0xc8] sm:$0x1] }
  0xdc   : > { %6182 = vmatprep.subr.bf16.mxu1 %v6832_v30  ;;  %v1377_v1 = vrot.slane %v6902_v2, 5  ;;  %v3917_v5 = vrot.slane %v3916_v53, 4  ;;  %v3927_v18 = vrot.slane %v3926_v51, 4  ;;  %v3936_v0 = vrot.slane %v3934_v35, 4  ;;  %8845 = vst [vmem:[#allocation14_spill] sm:$0xff] %v8158_v39 }
  0xdd   : > { %6359 = vmatmul.mubr.bf16.gmra.mrb[20].mxu0 %v6829_v54  ;;  %v3884_v54 = vsel %vm7045_vm2, %v3879_v62, %v7959_v19  ;;  %v3943_v19 = vshll.u32 %v7989_v43, 16  ;;  %v6835_v62 = vld [vmem:[%s7013_s11 + $0x100] sm:$0xff]   ;;  %v3931_v10 = vrot.slane %v3929_v22, 5  ;;  %v8025_v43 = vsel %vm7291_vm5, %v1369_v52, %v1370_v3 }
  0xde   : > { %6151 = vmatmul.mubr.bf16.gmra.mrb[4].mxu1 %v8830_v25  ;;  %6362 = vmatprep.mubr.bf16.mxu0 %v6831_v8  ;;  %v3937_v8 = vshll.u32 %v5674_v28, 16  ;;  %v3903_v25 = vrot.slane %v3902_v58, 4  ;;  %v1381_v28 = vrot.slane %v6903_v41, 5  ;;  %v8021_v55 = vcombine.low %v3874_v6, %v3884_v54  ;;  %v6841_v41 = vld [vmem:[%s8802_s1 + $0xe8] sm:$0xff]  }
  0xdf   : > { %6154 = vmatprep.mubr.bf16.mxu1 %v8831_v46  ;;  %6183 = vmatpush3.bf16.msra.mxu1 %v6832_v30  ;;  %v1244_v30 = vld [vmem:[%s7013_s11 + $0xe0] sm:$0xe]  ;;  %v1376_v46 = vrot.slane %v1374_v12, 4  ;;  %v8027_v58 = vrot.slane %v3943_v19, 5  ;;  %v3949_v22 = vrot.slane %v3947_v42, 4  ;;  %v3898_v3 = vsel %vm7045_vm2, %v3893_v61, %v7965_v38 }
  0xe0   : > { %6184 = vmatprep.subr.bf16.mxu1 %v6836_v13  ;;  %v3939_v2 = vrot.slane %v3937_v8, 5  ;;  %v8037_v6 = vsel %vm7291_vm5, %v5309_v44, %v1374_v12  ;;  %v3958_v54 = vshrl.u32 %v5677_v17, 16  ;;  %v3961_v52 = vshll.u32 %v5677_v17, 16  ;;  %v6904_v38 = vld [vmem:[%s7013_s11 + $0xe8] sm:$0x1] }
  0xe1   : > { %v3908_v53 = vsel %vm7045_vm2, %v3903_v25, %v3907_v36  ;;  %v8046_v51 = vsel %vm7291_vm5, %v1376_v46, %v1377_v1  ;;  %v5310_v35 = vrot.slane %v1244_v30, 9  ;;  %v1384_v8 = vrot.slane %v6904_v38, 5  ;;  %v1245_v19 = vld [vmem:[%s7013_s11 + $0xf0] sm:$0xe]  ;;  %v8068_v30 = vld [vmem:[%s7013_s11 + $0x98] sm:$0x1] }
  0xe2   : > { %v8834_v12 = vcombine.low %v7740_v49, %v7754_v4  ;;  %v3922_v42 = vsel %vm7045_vm2, %v3917_v5, %v7967_v34  ;;  %v3932_v61 = vsel %vm7045_vm2, %v3927_v18, %v3931_v10  ;;  %v1383_v36 = vrot.slane %v1381_v28, 4  ;;  %v6837_v4 = vld [vmem:[%s7013_s11 + $0x110] sm:$0xff]   ;;  %8836 = vst [vmem:[#allocation7_spill] sm:$0xff] %v8068_v30 }
  0xe3   : > { %6185 = vmatpush3.bf16.msra.mxu1 %v6836_v13  ;;  %v8040_v13 = vld [vmem:[%s7013_s11 + $0x94] sm:$0xf]  ;;  %v3953_v44 = vshll.u32 %v8019_v47, 16  ;;  %v8835_v49 = vcombine.low %v7776_v26, %v7780_v56  ;;  %v3950_v1 = vor.u32 %v3949_v22, %v8027_v58  ;;  %v5311_v17 = vrot.slane %v1245_v19, 9  ;;  %v8085_v22 = vld [vmem:[%s7013_s11 + $0xa4] sm:$0xf] }
  0xe4   : > { %6186 = vmatprep.subr.bf16.mxu1 %v6839_v24  ;;  %8833 = vst [vmem:[#allocation6_spill] sm:$0xff] %v8040_v13  ;;  %v3967_v34 = vshll.u32 %v8040_v13, 16  ;;  %v3971_v10 = vshrl.u32 %v8040_v13, 16  ;;  %v6905_v25 = vld [vmem:[%s7013_s11 + $0xf4] sm:$0xf]  ;;  %v3960_v26 = vrot.slane %v3958_v54, 4  ;;  %v8076_v18 = vcombine.low %v3898_v3, %v3908_v53 }
  0xe5   : > { %6363 = vmatmul.mubr.bf16.gmra.mrb[24].mxu0 %v6833_v23  ;;  %v6843_v23 = vld [vmem:[%s8802_s1 + $0xf0] sm:$0xff]   ;;  %v1388_v46 = vrot.slane %v6905_v25, 5  ;;  %v3963_v56 = vrot.slane %v3961_v52, 5  ;;  %8837 = vst [vmem:[#allocation8_spill] sm:$0xff] %v8085_v22  ;;  %v8088_v19 = vcombine.low %v3922_v42, %v3932_v61  ;;  %v8092_v54 = vsel %vm7291_vm5, %v1383_v36, %v1384_v8  ;;  %v6906_v3 = vld [vmem:[%s7013_s11 + $0xf8] sm:$0x1] }
  0xe6   : > { %6155 = vmatmul.mubr.bf16.gmra.mrb[8].mxu1 %v8834_v12  ;;  %6366 = vmatprep.mubr.bf16.mxu0 %v6835_v62  ;;  %v3940_v62 = vor.u32 %v3939_v2, %v3936_v0  ;;  %v8082_v2 = vsel %vm7291_vm5, %v5310_v35, %v1381_v28  ;;  %v5683_v38 = vld [vmem:[%s7013_s11 + $0xb0] sm:$0xf]  ;;  %v8094_v52 = vrot.slane %v3953_v44, 5  ;;  %v1391_v53 = vrot.slane %v6906_v3, 5  ;;  %v6845_v12 = vld [vmem:[%s8802_s1 + $0xf8] sm:$0xff]  }
  0xe7   : > { %6158 = vmatprep.mubr.bf16.mxu1 %v8835_v49  ;;  %6187 = vmatpush3.bf16.msra.mxu1 %v6839_v24  ;;  %v5680_v24 = vld [vmem:[%s7013_s11 + $0xa0] sm:$0xf]  ;;  %v8101_v28 = vld [vmem:[%s7013_s11 + $0xb4] sm:$0xf]  ;;  %v8105_v42 = vrot.slane %v3950_v1, 4  ;;  %v8107_v61 = vrot.slane %v3967_v34, 5  ;;  %v8111_v36 = vsel %vm7291_vm5, %v5311_v17, %v1388_v46  ;;  %v3964_v49 = vor.u32 %v3963_v56, %v3960_v26 }
  0xe8   : > { %6188 = vmatprep.subr.bf16.mxu1 %v6841_v41  ;;  %8838 = vst [vmem:[#allocation9_spill] sm:$0xff] %v8101_v28  ;;  %v8103_v35 = vrot.slane %v3940_v62, 4  ;;  %v3973_v8 = vrot.slane %v3971_v10, 4  ;;  %v1390_v44 = vrot.slane %v1388_v46, 4  ;;  %v3977_v25 = vshll.u32 %v8068_v30, 16 }
  0xe9   : > { %v5686_v3 = vld [vmem:[%s7013_s11 + $0xc0] sm:$0xf]  ;;  %v3985_v0 = vshll.u32 %v5680_v24, 16  ;;  %v3991_v62 = vshll.u32 %v8085_v22, 16  ;;  %v3995_v1 = vshrl.u32 %v8085_v22, 16  ;;  %v8840_v10 = vcombine.low %v7820_v27, %v7824_v29 }
  0xea   : > { %v8118_v34 = vld [vmem:[%s7013_s11 + $0xc4] sm:$0xf]  ;;  %v4006_v17 = vshrl.u32 %v5683_v38, 16  ;;  %v4009_v46 = vshll.u32 %v5683_v38, 16  ;;  %v4019_v26 = vshrl.u32 %v8101_v28, 16  ;;  %v8841_v56 = vcombine.low %v7831_v45, %v7835_v14 }
  0xeb   : > { %6189 = vmatpush3.bf16.msra.mxu1 %v6841_v41  ;;  %v3982_v41 = vshrl.u32 %v5680_v24, 16  ;;  %8839 = vst [vmem:[#allocation10_spill] sm:$0xff] %v8118_v34  ;;  %v3974_v29 = vor.u32 %v3973_v8, %v8107_v61  ;;  %v4033_v24 = vshll.u32 %v5686_v3, 16  ;;  %v5689_v38 = vld [vmem:[%s7013_s11 + $0xd0] sm:$0xf]  ;;  %v8137_v5 = vrot.slane %v3977_v25, 5 }
  0xec   : > { %6190 = vmatprep.subr.bf16.mxu1 %v6843_v23  ;;  %v8140_v45 = vld [vmem:[%s7013_s11 + $0xa8] sm:$0x1]  ;;  %v4039_v14 = vshll.u32 %v8118_v34, 16  ;;  %v3987_v27 = vrot.slane %v3985_v0, 5  ;;  %v3997_v8 = vrot.slane %v3995_v1, 4  ;;  %v4008_v25 = vrot.slane %v4006_v17, 4 }
  0xed   : > { %6367 = vmatmul.mubr.bf16.gmra.mrb[28].mxu0 %v6837_v4  ;;  %v4015_v4 = vshll.u32 %v8101_v28, 16  ;;  %8842 = vst [vmem:[#allocation11_spill] sm:$0xff] %v8140_v45  ;;  %v8144_v28 = vrot.slane %v3991_v62, 5  ;;  %v8150_v22 = vld [vmem:[%s7013_s11 + $0xd4] sm:$0xf]  ;;  %v4011_v30 = vrot.slane %v4009_v46, 5  ;;  %v8167_v62 = vsel %vm7291_vm5, %v1390_v44, %v1391_v53 }
  0xee   : > { %6159 = vmatmul.mubr.bf16.gmra.mrb[12].mxu1 %v8840_v10  ;;  %6386 = vmatprep.mubr.bf16.mxu0 %v7889_v59  ;;  %v4030_v59 = vshrl.u32 %v5686_v3, 16  ;;  %v8135_v10 = vrot.slane %v3964_v49, 4  ;;  %v8147_v3 = vld [vmem:[%s7013_s11 + $0xb8] sm:$0x1]  ;;  %8844 = vst [vmem:[#allocation13_spill] sm:$0xff] %v8150_v22  ;;  %v6842_v49 = vld [vmem:[%s8802_s1 + $0x208] sm:$0xff]  }
  0xef   : > { %6162 = vmatprep.mubr.bf16.mxu1 %v8841_v56  ;;  %6191 = vmatpush3.bf16.msra.mxu1 %v6843_v23  ;;  %v4043_v23 = vshrl.u32 %v8118_v34, 16  ;;  %v3984_v56 = vrot.slane %v3982_v41, 4  ;;  %8843 = vst [vmem:[#allocation12_spill] sm:$0xff] %v8147_v3  ;;  %v8155_v13 = vrot.slane %v4015_v4, 5  ;;  %v4021_v47 = vrot.slane %v4019_v26, 4  ;;  %v8172_v17 = vld [vmem:[%s8802_s1 + $0x100] sm:$0xff]  }
  0xf0   : > { %6192 = vmatprep.subr.bf16.mxu1 %v6845_v12  ;;  %v5692_v41 = vld [vmem:[%s7013_s11 + $0xe0] sm:$0xf]  ;;  %v4032_v1 = vrot.slane %v4030_v59, 4  ;;  %v4035_v34 = vrot.slane %v4033_v24, 5  ;;  %8846 = vst [vmem:[#allocation15_spill] sm:$0xff] %v8172_v17  ;;  %v8175_v46 = vrot.slane %v4039_v14, 5  ;;  %v8847_v24 = vcombine.low %v7839_v16, %v7849_v15 }
  0xf1   : > { %v4045_v4 = vrot.slane %v4043_v23, 4  ;;  %v4054_v26 = vshrl.u32 %v5689_v38, 16  ;;  %v4057_v0 = vshll.u32 %v5689_v38, 16  ;;  %v8178_v53 = vrot.slane %v3974_v29, 4  ;;  %v8190_v29 = vld [vmem:[%s7013_s11 + $0xe4] sm:$0xf] }
  0xf2   : > { %v4063_v44 = vshll.u32 %v8150_v22, 16  ;;  %v4067_v59 = vshrl.u32 %v8150_v22, 16  ;;  %v3988_v14 = vor.u32 %v3987_v27, %v3984_v56  ;;  %v3998_v38 = vor.u32 %v3997_v8, %v8144_v28  ;;  %8848 = vst [vmem:[#allocation16_spill] sm:$0xff] %v8190_v29  ;;  %v6844_v16 = vld [vmem:[%s8802_s1 + $0x210] sm:$0xff]  }
  0xf3   : > { %6193 = vmatpush3.bf16.msra.mxu1 %v6845_v12  ;;  %v4001_v12 = vshll.u32 %v8140_v45, 16  ;;  %v4012_v23 = vor.u32 %v4011_v30, %v4008_v25  ;;  %v4022_v15 = vor.u32 %v4021_v47, %v8155_v13  ;;  %v4078_v27 = vshrl.u32 %v5692_v41, 16  ;;  %v8203_v25 = vld [vmem:[%s7013_s11 + $0xd8] sm:$0x1] }
  0xf4   : > { %6466 = vmatprep.subr.bf16.mxu1 %v8172_v17  ;;  %v8849_v17 = vcombine.low %v7895_v20, %v7916_v7  ;;  %v4081_v30 = vshll.u32 %v5692_v41, 16  ;;  %v4036_v56 = vor.u32 %v4035_v34, %v4032_v1  ;;  %v4046_v8 = vor.u32 %v4045_v4, %v8175_v46 }
  0xf5   : > { %6387 = vmatmul.mubr.bf16.vlgmr.msra.gmra.mrb[0].mxu0 %v7972_v50  ;;  %v4025_v50 = vshll.u32 %v8147_v3, 16  ;;  %v4056_v20 = vrot.slane %v4054_v26, 4  ;;  %v4059_v7 = vrot.slane %v4057_v0, 5  ;;  %v4091_v22 = vshrl.u32 %v8190_v29, 16  ;;  %v6846_v0 = vld [vmem:[%s8802_s1 + $0x218] sm:$0xff]  }
  0xf6   : > { %6163 = vmatmul.mubr.bf16.gmra.mrb[16].mxu1 %v8847_v24  ;;  %6419 = vmatpush3.bf16.msra.mxu0 %v7876_v21  ;;  %v4049_v21 = vshll.u32 %v8158_v39, 16  ;;  %v4087_v24 = vshll.u32 %v8190_v29, 16  ;;  %v3989_v47 = vrot.slane %v3988_v14, 4  ;;  %v3999_v39 = vrot.slane %v3998_v38, 4 }
  0xf7   : > { %6166 = vmatprep.mubr.bf16.mxu1 %v8849_v17  ;;  %6390 = vmatprep.mubr.bf16.mxu0 %v7976_v48  ;;  %v8205_v17 = vrot.slane %v4063_v44, 5  ;;  %v4069_v48 = vrot.slane %v4067_v59, 4  ;;  %v4003_v3 = vrot.slane %v4001_v12, 5  ;;  %v4027_v41 = vrot.slane %v4025_v50, 5 }
  0xf8   : > { %6420 = vmatprep.subr.bf16.mxu0 %v6842_v49  ;;  %v4013_v34 = vrot.slane %v4012_v23, 4  ;;  %v4023_v1 = vrot.slane %v4022_v15, 4  ;;  %v4080_v4 = vrot.slane %v4078_v27, 4  ;;  %v4083_v45 = vrot.slane %v4081_v30, 5  ;;  %v8271_v27 = vld [vmem:[%s7013_s11 + $0xf8] sm:$0x1] }
  0xf9   : > { %v4037_v26 = vrot.slane %v4036_v56, 4  ;;  %v4051_v44 = vrot.slane %v4049_v21, 5  ;;  %v4060_v59 = vor.u32 %v4059_v7, %v4056_v20  ;;  %v4073_v29 = vshll.u32 %v8203_v25, 16  ;;  %v8238_v21 = vld [vmem:[%s7013_s11 + $0xe8] sm:$0x1] }
  0xfa   : > { %6421 = vmatpush3.bf16.msra.mxu0 %v6842_v49  ;;  %v4047_v49 = vrot.slane %v4046_v8, 4  ;;  %v4070_v12 = vor.u32 %v4069_v48, %v8205_v17  ;;  %v8215_v14 = vrot.slane %v4087_v24, 5  ;;  %v4093_v38 = vrot.slane %v4091_v22, 4 }
  0xfb   : > { %6422 = vmatprep.subr.bf16.mxu0 %v6844_v16  ;;  %v8850_v23 = vor.u32 %v7623_v57, %v7621_v11  ;;  %v8851_v15 = vcombine.low %v7928_v40, %v7953_v60  ;;  %v3980_v22 = vsel %vm7045_vm2, %v8178_v53, %v8137_v5  ;;  %v3994_v57 = vsel %vm7045_vm2, %v3989_v47, %v8144_v28 }
  0xfc   : > { %v8852_v40 = vcombine.low %v7983_v31, %v8025_v43  ;;  %v4004_v60 = vsel %vm7045_vm2, %v3999_v39, %v4003_v3  ;;  %v4084_v5 = vor.u32 %v4083_v45, %v4080_v4  ;;  %v4028_v28 = vsel %vm7045_vm2, %v4023_v1, %v4027_v41  ;;  %v6849_v31 = vld [vmem:[%s8802_s1 + $0x220] sm:$0xff]  }
  0xfd   : > { %6391 = vmatmul.mubr.bf16.gmra.mrb[4].mxu0 %v8021_v55  ;;  %v8220_v50 = vrot.slane %v8850_v23, 4  ;;  %v3970_v55 = vsel %vm7045_vm2, %v8135_v10, %v8107_v61  ;;  %v5695_v61 = vld [vmem:[%s7013_s11 + $0xf0] sm:$0xf]  ;;  %v8250_v10 = vld [vmem:[%s7013_s11 + $0xf4] sm:$0xf]  ;;  %v4042_v39 = vsel %vm7045_vm2, %v4037_v26, %v8175_v46  ;;  %v8260_v43 = vrot.slane %v4060_v59, 4 }
  0xfe   : > { %6167 = vmatmul.mubr.bf16.gmra.mrb[20].mxu1 %v8851_v15  ;;  %6394 = vmatprep.mubr.bf16.mxu0 %v8076_v18  ;;  %v4018_v18 = vsel %vm7045_vm2, %v4013_v34, %v8155_v13  ;;  %v8262_v3 = vrot.slane %v4073_v29, 5  ;;  %v4052_v13 = vsel %vm7045_vm2, %v4047_v49, %v4051_v44  ;;  %v8266_v45 = vrot.slane %v4070_v12, 4  ;;  %v5748_v41 = vld [vmem:[%s7013_s11 + $0x60] sm:$0xe]  ;;  %v5749_v26 = vld [vmem:[%s7013_s11 + $0x70] sm:$0xe] }
  0xff   : > { %6170 = vmatprep.mubr.bf16.mxu1 %v8852_v40  ;;  %6423 = vmatpush3.bf16.msra.mxu0 %v6844_v16  ;;  %v4094_v53 = vor.u32 %v4093_v38, %v8215_v14  ;;  %v4097_v16 = vshll.u32 %v8238_v21, 16  ;;  %v8853_v46 = vsel %vm7045_vm2, %v8105_v42, %v8094_v52  ;;  %v8854_v29 = vsel %vm7045_vm2, %v8103_v35, %v8027_v58 }
 0x100   : > { %6424 = vmatprep.subr.bf16.mxu0 %v6846_v0  ;;  %v5726_v30 = vcombine.low %v8854_v29, %v8853_v46  ;;  %v4102_v56 = vshrl.u32 %v5695_v61, 16  ;;  %v4105_v8 = vshll.u32 %v5695_v61, 16  ;;  %v4111_v20 = vshll.u32 %v8250_v10, 16  ;;  %v8858_v29 = vld [vmem:[#allocation5_spill] sm:$0xff] }
 0x101   : > { %v5342_v7 = vcombine.low %v8082_v2, %v8092_v54  ;;  %v5343_v48 = vcombine.low %v8111_v36, %v8167_v62  ;;  %v5727_v24 = vcombine.low %v3970_v55, %v3980_v22  ;;  %v8288_v52 = vrot.slane %v4084_v5, 4  ;;  %v6852_v2 = vld [vmem:[%s8802_s1 + $0x228] sm:$0xff]   ;;  %v5698_v54 = vld [vmem:[%s7013_s11 + $0x100] sm:$0xf] }
 0x102   : > { %v5728_v42 = vcombine.low %v3994_v57, %v4004_v60  ;;  %v8290_v58 = vcombine.low %v4018_v18, %v4028_v28  ;;  %v8292_v35 = vcombine.low %v4042_v39, %v4052_v13  ;;  %v4066_v47 = vsel %vm7045_vm2, %v8260_v43, %v8205_v17  ;;  %v5751_v28 = vld [vmem:[%s7013_s11 + $0x90] sm:$0xe]  ;;  %v8856_v39 = vld [vmem:[#allocation3_spill] sm:$0xff] }
 0x103   : > { %6425 = vmatpush3.bf16.msra.mxu0 %v6846_v0  ;;  %v4076_v34 = vsel %vm7045_vm2, %v8266_v45, %v8262_v3  ;;  %v8308_v1 = vrot.slane %v4094_v53, 4  ;;  %v8310_v4 = vrot.slane %v4097_v16, 5  ;;  %v4115_v0 = vshrl.u32 %v8250_v10, 16  ;;  %v6847_v13 = vld [vmem:[%s7013_s11 + $0x10] sm:$0xff]  }
 0x104   : > { %6426 = vmatprep.subr.bf16.mxu0 %v6849_v31  ;;  %v8855_v44 = vcombine.low %v8037_v6, %v8046_v51  ;;  %v8317_v59 = vrot.slane %v4102_v56, 4  ;;  %v8321_v49 = vrot.slane %v4111_v20, 5  ;;  %v4121_v12 = vshll.u32 %v8271_v27, 16  ;;  %v6855_v6 = vld [vmem:[%s8802_s1 + $0x230] sm:$0xff]   ;;  %v8332_v51 = vld [vmem:[%s7013_s11 + $0x104] sm:$0xf] }
 0x105   : > { %6395 = vmatmul.mubr.bf16.gmra.mrb[8].mxu0 %v8088_v19  ;;  %v8319_v19 = vrot.slane %v4105_v8, 5  ;;  %v4090_v38 = vsel %vm7045_vm2, %v8288_v52, %v8215_v14  ;;  %v4126_v23 = vshrl.u32 %v5698_v54, 16  ;;  %v5764_v15 = vrot.slane %v5748_v41, 9  ;;  %v5750_v14 = vld [vmem:[%s7013_s11 + $0x80] sm:$0xe]  ;;  %v8857_v16 = vld [vmem:[#allocation4_spill] sm:$0xff] }
 0x106   : > { %6171 = vmatmul.mubr.bf16.gmra.mrb[24].mxu1 %v8855_v44  ;;  %6398 = vmatprep.mubr.bf16.mxu0 %v5726_v30  ;;  %v4589_v55 = vrot.slane %v7908_v32, 5  ;;  %v4129_v22 = vshll.u32 %v5698_v54, 16  ;;  %v4592_v57 = vrot.slane %v7956_v63, 5  ;;  %v5765_v40 = vrot.slane %v5749_v26, 9  ;;  %v6858_v56 = vld [vmem:[%s8802_s1 + $0x238] sm:$0xff]   ;;  %v8859_v52 = vld [vmem:[#allocation6_spill] sm:$0xff] }
 0x107   : > { %6174 = vmatprep.mubr.bf16.mxu1 %v5342_v7  ;;  %6427 = vmatpush3.bf16.msra.mxu0 %v6849_v31  ;;  %v4596_v60 = vrot.slane %v7920_v33, 5  ;;  %v4100_v18 = vsel %vm7045_vm2, %v8308_v1, %v8310_v4  ;;  %v8342_v5 = vrot.slane %v4115_v0, 4  ;;  %v4135_v31 = vshll.u32 %v8332_v51, 16  ;;  %v8860_v4 = vld [vmem:[#allocation7_spill] sm:$0xff] }
 0x108   : > { %6428 = vmatprep.subr.bf16.mxu0 %v6852_v2  ;;  %v8346_v61 = vsel %vm7291_vm5, %v5764_v15, %v4589_v55  ;;  %v4591_v32 = vrot.slane %v4589_v55, 4  ;;  %v4599_v3 = vrot.slane %v8856_v39, 5  ;;  %v5766_v53 = vrot.slane %v5750_v14, 9  ;;  %v8383_v26 = vld [vmem:[%s7013_s11 + $0x108] sm:$0x1]  ;;  %v6850_v39 = vld [vmem:[%s7013_s11 + $0x30] sm:$0xff]  }
 0x109   : > { %v8352_v63 = vsel %vm7291_vm5, %v5765_v40, %v4596_v60  ;;  %v4598_v33 = vrot.slane %v4596_v60, 4  ;;  %v4603_v46 = vrot.slane %v8857_v16, 5  ;;  %v4606_v30 = vrot.slane %v8858_v29, 5  ;;  %v6848_v40 = vld [vmem:[%s7013_s11 + $0x20] sm:$0xff]  }
 0x10a   : > { %v8358_v45 = vsel %vm7291_vm5, %v4591_v32, %v4592_v57  ;;  %v5767_v7 = vrot.slane %v5751_v28, 9  ;;  %v4613_v0 = vrot.slane %v8860_v4, 5  ;;  %v8385_v44 = vrot.slane %v4126_v23, 4  ;;  %v5752_v23 = vld [vmem:[%s7013_s11 + $0xa0] sm:$0xe]  ;;  %v8862_v28 = vld [vmem:[#allocation11_spill] sm:$0xff] }
 0x10b   : > { %6429 = vmatpush3.bf16.msra.mxu0 %v6852_v2  ;;  %v5796_v8 = vcombine.low %v8346_v61, %v8358_v45  ;;  %v8369_v20 = vsel %vm7291_vm5, %v4598_v33, %v4599_v3  ;;  %v4610_v2 = vrot.slane %v8859_v52, 5  ;;  %v8376_v41 = vsel %vm7291_vm5, %v5766_v53, %v4603_v46  ;;  %v8863_v53 = vld [vmem:[#allocation2_spill] sm:$0xff] }
 0x10c   : > { %6430 = vmatprep.subr.bf16.mxu0 %v6855_v6  ;;  %v5797_v54 = vcombine.low %v8352_v63, %v8369_v20  ;;  %v4605_v1 = vrot.slane %v4603_v46, 4  ;;  %v8398_v36 = vcombine.low %v4066_v47, %v4076_v34  ;;  %v4108_v62 = vor.u32 %v8319_v19, %v8317_v59  ;;  %v5451_v47 = vld [vmem:[%s7013_s11 + $0xa0] sm:$0xf]  ;;  %v6928_v63 = vld [vmem:[%s7013_s11 + $0xb8] sm:$0x1] }
 0x10d   : > { %6399 = vmatmul.mubr.bf16.gmra.mrb[12].mxu0 %v5727_v24  ;;  %v8387_v24 = vrot.slane %v4129_v22, 5  ;;  %v8391_v15 = vsel %vm7291_vm5, %v5767_v7, %v4610_v2  ;;  %v4612_v55 = vrot.slane %v4610_v2, 4  ;;  %v8408_v22 = vcombine.low %v4090_v38, %v4100_v18  ;;  %v8861_v18 = vld [vmem:[#allocation8_spill] sm:$0xff]  ;;  %v5457_v61 = vld [vmem:[%s7013_s11 + $0xc0] sm:$0xf] }
 0x10e   : > { %6175 = vmatmul.mubr.bf16.gmra.mrb[28].mxu1 %v5343_v48  ;;  %6402 = vmatprep.mubr.bf16.mxu0 %v5728_v42  ;;  %v4139_v48 = vshrl.u32 %v8332_v51, 16  ;;  %v8405_v42 = vsel %vm7291_vm5, %v4605_v1, %v4606_v30  ;;  %v8410_v57 = vrot.slane %v4121_v12, 5  ;;  %v4118_v34 = vor.u32 %v8342_v5, %v8321_v49  ;;  %v5701_v12 = vld [vmem:[%s7013_s11 + $0x110] sm:$0xf]  ;;  %v8864_v1 = vld [vmem:[#allocation9_spill] sm:$0xff]  ;;  %v6864_v45 = vld [vmem:[%s7013_s11 + $0xe0] sm:$0xff]  }
 0x10f   : > { %6194 = vmatprep.mubr.bf16.mxu1 %v6847_v13  ;;  %6431 = vmatpush3.bf16.msra.mxu0 %v6855_v6  ;;  %v5798_v17 = vcombine.low %v8376_v41, %v8405_v42  ;;  %v8416_v43 = vsel %vm7291_vm5, %v4612_v55, %v4613_v0  ;;  %v8421_v59 = vrot.slane %v4135_v31, 5  ;;  %v4145_v19 = vshll.u32 %v8383_v26, 16  ;;  %v5753_v6 = vld [vmem:[%s7013_s11 + $0xb0] sm:$0xe]  ;;  %v8435_v31 = vld [vmem:[%s7013_s11 + $0x114] sm:$0xf] }
 0x110   : > { %6432 = vmatprep.subr.bf16.mxu0 %v6858_v56  ;;  %v5799_v38 = vcombine.low %v8391_v15, %v8416_v43  ;;  %v4132_v60 = vor.u32 %v8387_v24, %v8385_v44  ;;  %v5768_v14 = vrot.slane %v5752_v23, 9  ;;  %v4617_v32 = vrot.slane %v8861_v18, 5  ;;  %v8865_v24 = vld [vmem:[#allocation12_spill] sm:$0xff] }
 0x111   : > { %v4620_v33 = vrot.slane %v8862_v28, 5  ;;  %v4141_v5 = vrot.slane %v4139_v48, 4  ;;  %v2367_v3 = vshrl.u32 %v5451_v47, 16  ;;  %v2370_v13 = vshll.u32 %v5451_v47, 16 }
 0x112   : > { %v2389_v16 = vsel %vm7045_vm2, %v8220_v50, %v8863_v53  ;;  %v4150_v46 = vshrl.u32 %v5701_v12, 16  ;;  %v8443_v29 = vsel %vm7291_vm5, %v5768_v14, %v4617_v32  ;;  %v4619_v30 = vrot.slane %v4617_v32, 4 }
 0x113   : > { %6433 = vmatpush3.bf16.msra.mxu0 %v6858_v56  ;;  %v5769_v7 = vrot.slane %v5753_v6, 9  ;;  %v4153_v52 = vshll.u32 %v5701_v12, 16  ;;  %v2369_v2 = vrot.slane %v2367_v3, 4  ;;  %v2372_v56 = vrot.slane %v2370_v13, 5  ;;  %v5754_v12 = vld [vmem:[%s7013_s11 + $0xc0] sm:$0xe] }
 0x114   : > { %v4624_v4 = vrot.slane %v8864_v1, 5  ;;  %v4159_v50 = vshll.u32 %v8435_v31, 16  ;;  %v4163_v0 = vshrl.u32 %v8435_v31, 16  ;;  %v8452_v44 = vsel %vm7291_vm5, %v4619_v30, %v4620_v33  ;;  %v6908_v6 = vld [vmem:[%s8802_s1 + $0x108] sm:$0xff]   ;;  %v6851_v3 = vld [vmem:[%s7013_s11 + $0x40] sm:$0xff]   ;;  %v6909_v1 = vld [vmem:[%s8802_s1 + $0x110] sm:$0xff]  }
 0x115   : > { %6403 = vmatmul.mubr.bf16.gmra.mrb[16].mxu0 %v8290_v58  ;;  %v4627_v55 = vrot.slane %v8865_v24, 5  ;;  %v8866_v58 = vld [vmem:[#allocation15_spill] sm:$0xff]  ;;  %v4142_v48 = vor.u32 %v4141_v5, %v8421_v59  ;;  %v2373_v23 = vor.u32 %v2372_v56, %v2369_v2  ;;  %v4119_v14 = vrot.slane %v4118_v34, 4  ;;  %v8473_v13 = vld [vmem:[%s7013_s11 + $0x118] sm:$0x1]  ;;  %v8867_v2 = vld [vmem:[#allocation10_spill] sm:$0xff] }
 0x116   : > { %6195 = vmatmul.mubr.bf16.vlgmr.msra.gmra.mrb[0].mxu1 %v6848_v40  ;;  %6406 = vmatprep.mubr.bf16.mxu0 %v8292_v35  ;;  %v5800_v35 = vcombine.low %v8443_v29, %v8452_v44  ;;  %v4626_v47 = vrot.slane %v4624_v4, 4  ;;  %v4109_v40 = vrot.slane %v4108_v62, 4  ;;  %v4147_v18 = vrot.slane %v4145_v19, 5  ;;  %v6853_v19 = vld [vmem:[%s7013_s11 + $0x50] sm:$0xff]  }
 0x117   : > { %6474 = vmatpush3.bf16.msra.mxu1 %v8866_v58  ;;  %6198 = vmatprep.mubr.bf16.mxu1 %v6850_v39  ;;  %v8465_v32 = vsel %vm7291_vm5, %v5769_v7, %v4624_v4  ;;  %v4152_v28 = vrot.slane %v4150_v46, 4  ;;  %v4155_v33 = vrot.slane %v4153_v52, 5  ;;  %v2374_v39 = vrot.slane %v2373_v23, 4 }
 0x118   : > { %6467 = vmatprep.subr.bf16.mxu1 %v6908_v6  ;;  %v8469_v5 = vsel %vm7291_vm5, %v4626_v47, %v4627_v55  ;;  %v8475_v53 = vrot.slane %v4159_v50, 5  ;;  %v4165_v30 = vrot.slane %v4163_v0, 4  ;;  %v5770_v34 = vrot.slane %v5754_v12, 9  ;;  %v6910_v47 = vld [vmem:[%s7013_s11 + $0x24] sm:$0xf] }
 0x119   : > { %v5801_v62 = vcombine.low %v8465_v32, %v8469_v5  ;;  %v4133_v7 = vrot.slane %v4132_v60, 4  ;;  %v4143_v46 = vrot.slane %v4142_v48, 4  ;;  %v2379_v52 = vsel %vm7045_vm2, %v2374_v39, %v7621_v11  ;;  %v8868_v11 = vld [vmem:[#allocation14_spill] sm:$0xff] }
 0x11a   : > { %v4631_v56 = vrot.slane %v8867_v2, 5  ;;  %v4114_v4 = vsel %vm7045_vm2, %v4109_v40, %v8321_v49  ;;  %v4124_v60 = vsel %vm7045_vm2, %v4119_v14, %v8410_v57  ;;  %v8493_v50 = vcombine.low %v2379_v52, %v2389_v16  ;;  %v5744_v57 = vld [vmem:[%s7013_s11 + $0x20] sm:$0xe]  ;;  %v5755_v16 = vld [vmem:[%s7013_s11 + $0xd0] sm:$0xe]  ;;  %v6911_v40 = vld [vmem:[%s8802_s1 + $0x118] sm:$0xff]  }
 0x11b   : > { %6475 = vmatpush3.bf16.msra.mxu1 %v6908_v6  ;;  %v4634_v0 = vrot.slane %v8868_v11, 5  ;;  %v4156_v24 = vor.u32 %v4155_v33, %v4152_v28  ;;  %v4169_v55 = vshll.u32 %v8473_v13, 16  ;;  %v4166_v49 = vor.u32 %v4165_v30, %v8475_v53  ;;  %v6854_v39 = vld [vmem:[%s7013_s11 + $0x60] sm:$0xff]   ;;  %v6912_v2 = vld [vmem:[%s7013_s11 + $0x28] sm:$0x1] }
 0x11c   : > { %6468 = vmatprep.subr.bf16.mxu1 %v6909_v1  ;;  %v8500_v58 = vsel %vm7291_vm5, %v5770_v34, %v4631_v56  ;;  %v4633_v48 = vrot.slane %v4631_v56, 4  ;;  %v4148_v23 = vsel %vm7045_vm2, %v4143_v46, %v4147_v18  ;;  %v4561_v12 = vrot.slane %v6910_v47, 5  ;;  %v8869_v34 = vld [vmem:[#allocation13_spill] sm:$0xff]  ;;  %v6856_v46 = vld [vmem:[%s7013_s11 + $0x70] sm:$0xff]   ;;  %v5756_v11 = vld [vmem:[%s7013_s11 + $0xe0] sm:$0xe] }
 0x11d   : > { %6407 = vmatmul.mubr.bf16.gmra.mrb[20].mxu0 %v8398_v36  ;;  %v4138_v36 = vsel %vm7045_vm2, %v4133_v7, %v8421_v59  ;;  %v5733_v6 = vcombine.low %v4114_v4, %v4124_v60  ;;  %v4157_v14 = vrot.slane %v4156_v24, 4  ;;  %v4171_v28 = vrot.slane %v4169_v55, 5  ;;  %v5745_v55 = vld [vmem:[%s7013_s11 + $0x30] sm:$0xe] }
 0x11e   : > { %6199 = vmatmul.mubr.bf16.gmra.mrb[4].mxu1 %v6851_v3  ;;  %6410 = vmatprep.mubr.bf16.mxu0 %v8408_v22  ;;  %v8514_v22 = vsel %vm7291_vm5, %v4633_v48, %v4634_v0  ;;  %v5760_v18 = vrot.slane %v5744_v57, 9  ;;  %v5771_v33 = vrot.slane %v5755_v16, 9  ;;  %v5734_v3 = vcombine.low %v4138_v36, %v4148_v23  ;;  %v6914_v48 = vld [vmem:[%s7013_s11 + $0x34] sm:$0xf]  ;;  %v6915_v36 = vld [vmem:[%s7013_s11 + $0x44] sm:$0xf] }
 0x11f   : > { %6202 = vmatprep.mubr.bf16.mxu1 %v6853_v19  ;;  %6476 = vmatpush3.bf16.msra.mxu1 %v6909_v1  ;;  %v5802_v59 = vcombine.low %v8500_v58, %v8514_v22  ;;  %v4167_v30 = vrot.slane %v4166_v49, 4  ;;  %v4638_v19 = vrot.slane %v8869_v34, 5  ;;  %v4641_v7 = vrot.slane %v8203_v25, 5  ;;  %v6913_v1 = vld [vmem:[%s8802_s1 + $0x120] sm:$0xff]  }
 0x120   : > { %6469 = vmatprep.subr.bf16.mxu1 %v6911_v40  ;;  %v4563_v52 = vrot.slane %v4561_v12, 4  ;;  %v4564_v56 = vrot.slane %v6912_v2, 5  ;;  %v4562_v25 = vsel %vm7291_vm5, %v5760_v18, %v4561_v12  ;;  %v4162_v0 = vsel %vm7045_vm2, %v4157_v14, %v8475_v53  ;;  %v5746_v12 = vld [vmem:[%s7013_s11 + $0x40] sm:$0xe] }
 0x121   : > { %v8531_v4 = vsel %vm7291_vm5, %v5771_v33, %v4638_v19  ;;  %v4640_v60 = vrot.slane %v4638_v19, 4  ;;  %v4172_v24 = vsel %vm7045_vm2, %v4167_v30, %v4171_v28  ;;  %v4568_v49 = vrot.slane %v6914_v48, 5  ;;  %v6917_v33 = vld [vmem:[%s7013_s11 + $0x38] sm:$0x1]  ;;  %v6857_v30 = vld [vmem:[%s7013_s11 + $0x80] sm:$0xff]  }
 0x122   : > { %v4565_v16 = vsel %vm7291_vm5, %v4563_v52, %v4564_v56  ;;  %v4575_v23 = vrot.slane %v6915_v36, 5  ;;  %v5772_v47 = vrot.slane %v5756_v11, 9  ;;  %v5735_v28 = vcombine.low %v4162_v0, %v4172_v24  ;;  %v6859_v52 = vld [vmem:[%s7013_s11 + $0x90] sm:$0xff]  }
 0x123   : > { %6477 = vmatpush3.bf16.msra.mxu1 %v6911_v40  ;;  %v8545_v57 = vsel %vm7291_vm5, %v4640_v60, %v4641_v7  ;;  %v8870_v40 = vld [vmem:[#allocation16_spill] sm:$0xff]  ;;  %v5761_v18 = vrot.slane %v5745_v55, 9  ;;  %v5792_v34 = vcombine.low %v4562_v25, %v4565_v16  ;;  %v4570_v19 = vrot.slane %v4568_v49, 4 }
 0x124   : > { %6470 = vmatprep.subr.bf16.mxu1 %v6913_v1  ;;  %v5803_v53 = vcombine.low %v8531_v4, %v8545_v57  ;;  %v4645_v14 = vrot.slane %v8870_v40, 5  ;;  %v5762_v2 = vrot.slane %v5746_v12, 9  ;;  %v4577_v56 = vrot.slane %v4575_v23, 4  ;;  %v5757_v11 = vld [vmem:[%s7013_s11 + $0xf0] sm:$0xe] }
 0x125   : > { %6411 = vmatmul.mubr.bf16.gmra.mrb[24].mxu0 %v5733_v6  ;;  %v6916_v6 = vld [vmem:[%s8802_s1 + $0x128] sm:$0xff]   ;;  %v5747_v0 = vld [vmem:[%s7013_s11 + $0x50] sm:$0xe]  ;;  %v6919_v24 = vld [vmem:[%s7013_s11 + $0x54] sm:$0xf]  ;;  %v4569_v48 = vsel %vm7291_vm5, %v5761_v18, %v4568_v49  ;;  %v4652_v12 = vrot.slane %v8250_v10, 5 }
 0x126   : > { %6203 = vmatmul.mubr.bf16.gmra.mrb[8].mxu1 %v6854_v39  ;;  %6414 = vmatprep.mubr.bf16.mxu0 %v5734_v3  ;;  %v4571_v39 = vrot.slane %v6917_v33, 5  ;;  %v4648_v3 = vrot.slane %v8238_v21, 5  ;;  %v8562_v7 = vsel %vm7291_vm5, %v5772_v47, %v4645_v14  ;;  %v4582_v55 = vrot.slane %v6919_v24, 5  ;;  %v6920_v21 = vld [vmem:[%s8802_s1 + $0x130] sm:$0xff]   ;;  %v6921_v18 = vld [vmem:[%s7013_s11 + $0x58] sm:$0x1] }
 0x127   : > { %6206 = vmatprep.mubr.bf16.mxu1 %v6856_v46  ;;  %6478 = vmatpush3.bf16.msra.mxu1 %v6913_v1  ;;  %v4647_v46 = vrot.slane %v4645_v14, 4  ;;  %v6918_v1 = vld [vmem:[%s7013_s11 + $0x48] sm:$0x1]  ;;  %v5773_v47 = vrot.slane %v5757_v11, 9  ;;  %v4576_v49 = vsel %vm7291_vm5, %v5762_v2, %v4575_v23  ;;  %v5763_v14 = vrot.slane %v5747_v0, 9  ;;  %v6922_v10 = vld [vmem:[%s8802_s1 + $0x138] sm:$0xff]  }
 0x128   : > { %6471 = vmatprep.subr.bf16.mxu1 %v6916_v6  ;;  %v4578_v60 = vrot.slane %v6918_v1, 5  ;;  %v4572_v36 = vsel %vm7291_vm5, %v4570_v19, %v4571_v39  ;;  %v4585_v33 = vrot.slane %v6921_v18, 5  ;;  %v4654_v39 = vrot.slane %v4652_v12, 4  ;;  %v5758_v23 = vld [vmem:[%s7013_s11 + $0x100] sm:$0xe] }
 0x129   : > { %v8574_v25 = vsel %vm7291_vm5, %v4647_v46, %v4648_v3  ;;  %v5793_v3 = vcombine.low %v4569_v48, %v4572_v36  ;;  %v5448_v19 = vld [vmem:[%s7013_s11 + $0x90] sm:$0xf]  ;;  %v4583_v1 = vsel %vm7291_vm5, %v5763_v14, %v4582_v55  ;;  %v4659_v11 = vrot.slane %v8332_v51, 5  ;;  %v6862_v18 = vld [vmem:[%s7013_s11 + $0xc0] sm:$0xff]  }
 0x12a   : > { %v5804_v16 = vcombine.low %v8562_v7, %v8574_v25  ;;  %v4579_v40 = vsel %vm7291_vm5, %v4577_v56, %v4578_v60  ;;  %v5774_v56 = vrot.slane %v5758_v23, 9  ;;  %v2343_v0 = vshrl.u32 %v5448_v19, 16  ;;  %v5759_v51 = vld [vmem:[%s7013_s11 + $0x110] sm:$0xe] }
 0x12b   : > { %6479 = vmatpush3.bf16.msra.mxu1 %v6916_v6  ;;  %v4655_v6 = vrot.slane %v8271_v27, 5  ;;  %v8594_v27 = vsel %vm7291_vm5, %v5773_v47, %v4652_v12  ;;  %v2346_v24 = vshll.u32 %v5448_v19, 16  ;;  %v4662_v36 = vrot.slane %v8383_v26, 5 }
 0x12c   : > { %6472 = vmatprep.subr.bf16.mxu1 %v6920_v21  ;;  %v4661_v12 = vrot.slane %v4659_v11, 4  ;;  %v4669_v23 = vrot.slane %v8473_v13, 5  ;;  %v2410_v20 = vshll.u32 %v6928_v63, 16 }
 0x12d   : > { %6415 = vmatmul.mubr.bf16.gmra.mrb[28].mxu0 %v5735_v28  ;;  %v4584_v28 = vrot.slane %v4582_v55, 4  ;;  %v8601_v46 = vsel %vm7291_vm5, %v4654_v39, %v4655_v6  ;;  %v8615_v55 = vsel %vm7291_vm5, %v5774_v56, %v4659_v11  ;;  %v2348_v26 = vrot.slane %v2346_v24, 5  ;;  %v6924_v56 = vld [vmem:[%s7013_s11 + $0x98] sm:$0x1] }
 0x12e   : > { %6207 = vmatmul.mubr.bf16.gmra.mrb[12].mxu1 %v6857_v30  ;;  %6434 = vmatprep.mubr.bf16.mxu0 %v5792_v34  ;;  %v6860_v30 = vld [vmem:[%s7013_s11 + $0xa0] sm:$0xff]   ;;  %v5794_v34 = vcombine.low %v4576_v49, %v4579_v40  ;;  %v5805_v2 = vcombine.low %v8594_v27, %v8601_v46  ;;  %v8620_v49 = vsel %vm7291_vm5, %v4661_v12, %v4662_v36  ;;  %v2345_v40 = vrot.slane %v2343_v0, 4  ;;  %v6925_v0 = vld [vmem:[%s7013_s11 + $0xb4] sm:$0xf] }
 0x12f   : > { %6210 = vmatprep.mubr.bf16.mxu1 %v6859_v52  ;;  %6480 = vmatpush3.bf16.msra.mxu1 %v6920_v21  ;;  %v6861_v52 = vld [vmem:[%s7013_s11 + $0xb0] sm:$0xff]   ;;  %v4586_v60 = vsel %vm7291_vm5, %v4584_v28, %v4585_v33  ;;  %v5806_v28 = vcombine.low %v8615_v55, %v8620_v49  ;;  %v4666_v39 = vrot.slane %v8435_v31, 5  ;;  %v2400_v24 = vshll.u32 %v6925_v0, 16 }
 0x130   : > { %6473 = vmatprep.subr.bf16.mxu1 %v6922_v10  ;;  %v6923_v21 = vld [vmem:[%s7013_s11 + $0x94] sm:$0xf]  ;;  %v5795_v6 = vcombine.low %v4583_v1, %v4586_v60  ;;  %v2362_v1 = vshll.u32 %v6924_v56, 16 }
 0x131   : > { %v2352_v48 = vshll.u32 %v6923_v21, 16  ;;  %v2356_v47 = vshrl.u32 %v6923_v21, 16  ;;  %v4668_v19 = vrot.slane %v4666_v39, 4  ;;  %v2404_v21 = vshrl.u32 %v6925_v0, 16 }
 0x133   : > { %6481 = vmatpush3.bf16.msra.mxu1 %v6922_v10  ;;  %v8622_v14 = vrot.slane %v2352_v48, 5  ;;  %v2358_v33 = vrot.slane %v2356_v47, 4  ;;  %v5775_v10 = vrot.slane %v5759_v51, 9  ;;  %v8642_v11 = vsel %vm7291_vm5, %v4668_v19, %v4669_v23  ;;  %v6927_v19 = vld [vmem:[%s7013_s11 + $0xd4] sm:$0xf] }
 0x134   : > { %v2452_v56 = vshrl.u32 %v6927_v19, 16 }
 0x135   : > { %6435 = vmatmul.mubr.bf16.vlgmr.msra.gmra.mrb[0].mxu0 %v5793_v3  ;;  %v6863_v3 = vld [vmem:[%s7013_s11 + $0xd0] sm:$0xff]   ;;  %v2359_v31 = vor.u32 %v2358_v33, %v8622_v14  ;;  %v2418_v33 = vshll.u32 %v5457_v61, 16 }
 0x136   : > { %6211 = vmatmul.mubr.bf16.gmra.mrb[16].mxu1 %v6860_v30  ;;  %6438 = vmatprep.mubr.bf16.mxu0 %v5794_v34  ;;  %v5454_v30 = vld [vmem:[%s7013_s11 + $0xb0] sm:$0xf]  ;;  %v8633_v34 = vsel %vm7291_vm5, %v5775_v10, %v4666_v39  ;;  %v6926_v10 = vld [vmem:[%s7013_s11 + $0xc4] sm:$0xf] }
 0x137   : > { %6214 = vmatprep.mubr.bf16.mxu1 %v6861_v52  ;;  %v2349_v52 = vor.u32 %v2348_v26, %v2345_v40  ;;  %v2391_v13 = vshrl.u32 %v5454_v30, 16  ;;  %v2394_v60 = vshll.u32 %v5454_v30, 16  ;;  %v5807_v48 = vcombine.low %v8633_v34, %v8642_v11 }
 0x138   : > { %v2360_v47 = vrot.slane %v2359_v31, 4  ;;  %v8651_v40 = vrot.slane %v2400_v24, 5  ;;  %v2406_v26 = vrot.slane %v2404_v21, 4  ;;  %v2424_v39 = vshll.u32 %v6926_v10, 16 }
 0x139   : > { %v2350_v36 = vrot.slane %v2349_v52, 4  ;;  %v2393_v12 = vrot.slane %v2391_v13, 4  ;;  %v2396_v51 = vrot.slane %v2394_v60, 5  ;;  %v2428_v23 = vshrl.u32 %v6926_v10, 16  ;;  %v6930_v10 = vld [vmem:[%s7013_s11 + $0xd8] sm:$0x1] }
 0x13a   : > { %v2448_v52 = vshll.u32 %v6927_v19, 16  ;;  %v2407_v13 = vor.u32 %v2406_v26, %v8651_v40  ;;  %v2420_v0 = vrot.slane %v2418_v33, 5  ;;  %v8668_v41 = vrot.slane %v2424_v39, 5  ;;  %v6931_v19 = vld [vmem:[%s7013_s11 + $0xe4] sm:$0xf] }
 0x13b   : > { %v2430_v42 = vrot.slane %v2428_v23, 4  ;;  %v2454_v21 = vrot.slane %v2452_v56, 4  ;;  %v2458_v39 = vshll.u32 %v6930_v10, 16  ;;  %v5466_v23 = vld [vmem:[%s7013_s11 + $0xf0] sm:$0xf]  ;;  %v2476_v15 = vshrl.u32 %v6931_v19, 16 }
 0x13c   : > { %v2490_v63 = vshll.u32 %v5466_v23, 16 }
 0x13d   : > { %6439 = vmatmul.mubr.bf16.gmra.mrb[4].mxu0 %v5795_v6  ;;  %v5460_v6 = vld [vmem:[%s7013_s11 + $0xd0] sm:$0xf]  ;;  %v2431_v26 = vor.u32 %v2430_v42, %v8668_v41 }
 0x13e   : > { %6215 = vmatmul.mubr.bf16.gmra.mrb[20].mxu1 %v6862_v18  ;;  %6442 = vmatprep.mubr.bf16.mxu0 %v5796_v8  ;;  %v2364_v8 = vrot.slane %v2362_v1, 5  ;;  %v2415_v18 = vshrl.u32 %v5457_v61, 16  ;;  %v2442_v30 = vshll.u32 %v5460_v6, 16  ;;  %v2355_v1 = vsel %vm7045_vm2, %v2350_v36, %v8622_v14  ;;  %v6866_v61 = vld [vmem:[%s7013_s11 + $0x100] sm:$0xff]  }
 0x13f   : > { %6218 = vmatprep.mubr.bf16.mxu1 %v6863_v3  ;;  %v2439_v3 = vshrl.u32 %v5460_v6, 16  ;;  %v8670_v14 = vrot.slane %v2448_v52, 5  ;;  %v2472_v52 = vshll.u32 %v6931_v19, 16 }
 0x140   : > { %v2365_v31 = vsel %vm7045_vm2, %v2360_v47, %v2364_v8  ;;  %v2417_v60 = vrot.slane %v2415_v18, 4  ;;  %v2444_v24 = vrot.slane %v2442_v30, 5  ;;  %v2412_v8 = vrot.slane %v2410_v20, 5  ;;  %v6932_v20 = vld [vmem:[%s7013_s11 + $0xf4] sm:$0xf] }
 0x141   : > { %v2408_v47 = vrot.slane %v2407_v13, 4  ;;  %v2455_v33 = vor.u32 %v2454_v21, %v8670_v14  ;;  %v2496_v29 = vshll.u32 %v6932_v20, 16  ;;  %v2500_v44 = vshrl.u32 %v6932_v20, 16 }
 0x143   : > { %v2456_v13 = vrot.slane %v2455_v33, 4 }
 0x145   : > { %6443 = vmatmul.mubr.bf16.gmra.mrb[8].mxu0 %v5797_v54  ;;  %v2397_v54 = vor.u32 %v2396_v51, %v2393_v12  ;;  %v2421_v12 = vor.u32 %v2420_v0, %v2417_v60  ;;  %v6929_v51 = vld [vmem:[%s7013_s11 + $0xc8] sm:$0x1]  ;;  %v2460_v60 = vrot.slane %v2458_v39, 5 }
 0x146   : > { %6219 = vmatmul.mubr.bf16.gmra.mrb[24].mxu1 %v6864_v45  ;;  %6446 = vmatprep.mubr.bf16.mxu0 %v5798_v17  ;;  %v2441_v17 = vrot.slane %v2439_v3, 4  ;;  %v5496_v45 = vcombine.low %v2355_v1, %v2365_v31  ;;  %v2434_v6 = vshll.u32 %v6929_v51, 16  ;;  %v2487_v31 = vshrl.u32 %v5466_v23, 16 }
 0x147   : > { %6222 = vmatprep.mubr.bf16.mxu1 %v6865_v9  ;;  %v2398_v36 = vrot.slane %v2397_v54, 4  ;;  %v5463_v9 = vld [vmem:[%s7013_s11 + $0xe0] sm:$0xf]  ;;  %v2422_v56 = vrot.slane %v2421_v12, 4  ;;  %v2461_v32 = vsel %vm7045_vm2, %v2456_v13, %v2460_v60 }
 0x148   : > { %v2445_v18 = vor.u32 %v2444_v24, %v2441_v17  ;;  %v2463_v3 = vshrl.u32 %v5463_v9, 16  ;;  %v2466_v30 = vshll.u32 %v5463_v9, 16  ;;  %v2436_v1 = vrot.slane %v2434_v6, 5 }
 0x149   : > { %v2403_v43 = vsel %vm7045_vm2, %v2398_v36, %v8651_v40  ;;  %v2474_v17 = vrot.slane %v2472_v52, 5  ;;  %v2478_v24 = vrot.slane %v2476_v15, 4  ;;  %v2489_v21 = vrot.slane %v2487_v31, 4  ;;  %v5469_v36 = vld [vmem:[%s7013_s11 + $0x100] sm:$0xf] }
 0x14a   : > { %v2446_v54 = vrot.slane %v2445_v18, 4  ;;  %v2465_v0 = vrot.slane %v2463_v3, 4  ;;  %v2468_v42 = vrot.slane %v2466_v30, 5  ;;  %v2511_v9 = vshrl.u32 %v5469_v36, 16  ;;  %v6934_v18 = vld [vmem:[%s7013_s11 + $0x104] sm:$0xf] }
 0x14b   : > { %v2520_v33 = vshll.u32 %v6934_v18, 16 }
 0x14c   : > { %v2451_v51 = vsel %vm7045_vm2, %v2446_v54, %v8670_v14  ;;  %v2469_v5 = vor.u32 %v2468_v42, %v2465_v0  ;;  %v2524_v14 = vshrl.u32 %v6934_v18, 16  ;;  %v2513_v19 = vrot.slane %v2511_v9, 4 }
 0x14d   : > { %6447 = vmatmul.mubr.bf16.gmra.mrb[12].mxu0 %v5799_v38  ;;  %v2413_v38 = vsel %vm7045_vm2, %v2408_v47, %v2412_v8  ;;  %v2502_v8 = vrot.slane %v2500_v44, 4  ;;  %v2427_v47 = vsel %vm7045_vm2, %v2422_v56, %v8668_v41  ;;  %v6933_v41 = vld [vmem:[%s7013_s11 + $0xe8] sm:$0x1]  ;;  %v5500_v58 = vcombine.low %v2451_v51, %v2461_v32 }
 0x14e   : > { %6223 = vmatmul.mubr.bf16.gmra.mrb[28].mxu1 %v6866_v61  ;;  %6450 = vmatprep.mubr.bf16.mxu0 %v5800_v35  ;;  %v2432_v35 = vrot.slane %v2431_v26, 4  ;;  %v5498_v40 = vcombine.low %v2403_v43, %v2413_v38  ;;  %v2492_v61 = vrot.slane %v2490_v63, 5  ;;  %v2482_v6 = vshll.u32 %v6933_v41, 16  ;;  %v6936_v44 = vld [vmem:[%s7013_s11 + $0x108] sm:$0x1] }
 0x14f   : > { %6258 = vmatprep.mubr.bf16.mxu1 %v5496_v45  ;;  %v2498_v45 = vrot.slane %v2496_v29, 5  ;;  %v2514_v26 = vshll.u32 %v5469_v36, 16  ;;  %v2470_v22 = vrot.slane %v2469_v5, 4  ;;  %v2522_v15 = vrot.slane %v2520_v33, 5 }
 0x150   : > { %v2437_v12 = vsel %vm7045_vm2, %v2432_v35, %v2436_v1  ;;  %v2493_v10 = vor.u32 %v2492_v61, %v2489_v21  ;;  %v2484_v30 = vrot.slane %v2482_v6, 5  ;;  %v2526_v43 = vrot.slane %v2524_v14, 4 }
 0x151   : > { %v2503_v39 = vor.u32 %v2502_v8, %v2498_v45  ;;  %v5499_v3 = vcombine.low %v2427_v47, %v2437_v12  ;;  %v2516_v52 = vrot.slane %v2514_v26, 5  ;;  %v2475_v31 = vsel %vm7045_vm2, %v2470_v22, %v2474_v17 }
 0x152   : > { %v2494_v38 = vrot.slane %v2493_v10, 4  ;;  %v2527_v29 = vor.u32 %v2526_v43, %v2522_v15  ;;  %v2530_v35 = vshll.u32 %v6936_v44, 16 }
 0x153   : > { %v2504_v56 = vrot.slane %v2503_v39, 4  ;;  %v2517_v20 = vor.u32 %v2516_v52, %v2513_v19 }
 0x154   : > { %v2499_v4 = vsel %vm7045_vm2, %v2494_v38, %v2498_v45  ;;  %v2532_v54 = vrot.slane %v2530_v35, 5 }
 0x155   : > { %6451 = vmatmul.mubr.bf16.gmra.mrb[16].mxu0 %v5801_v62  ;;  %v2479_v62 = vor.u32 %v2478_v24, %v2474_v17  ;;  %v2518_v25 = vrot.slane %v2517_v20, 4 }
 0x156   : > { %6259 = vmatmul.mubr.bf16.vlgmr.msra.gmra.mrb[16].mxu1 %v8493_v50  ;;  %6454 = vmatprep.mubr.bf16.mxu0 %v5802_v59  ;;  %v6935_v50 = vld [vmem:[%s7013_s11 + $0xf8] sm:$0x1]  ;;  %s5229_s11 = sshll.u32 %s6971_s13, 5  ;;  %s5231_s13 = sshll.u32 %s6995_s26, 3 }
 0x157   : > { %6262 = vmatprep.mubr.bf16.mxu1 %v5498_v40  ;;  %v2506_v23 = vshll.u32 %v6935_v50, 16  ;;  %v2480_v59 = vrot.slane %v2479_v62, 4  ;;  %v2523_v13 = vsel %vm7045_vm2, %v2518_v25, %v2522_v15  ;;  %p174_p4 = scmp.lt.s32.totalorder %s5229_s11, 63  ;;  %s182_s22 = scalar_lea.vmem %s8804_s3, %s5231_s13 }
 0x159   : > { %v2508_v1 = vrot.slane %v2506_v23, 5  ;;  %v2485_v63 = vsel %vm7045_vm2, %v2480_v59, %v2484_v30  ;;  %s8872_s11 = smov (!%p174_p4, %s5229_s11), 63 }
 0x15a   : > { %s5230_s16 = sshll.u32 %s8872_s11, 3 }
 0x15b   : > { %v2509_v57 = vsel %vm7045_vm2, %v2504_v56, %v2508_v1  ;;  %s8755_s19 = scalar_lea.vmem %s8803_s2, %s5230_s16 }
 0x15c   : > { %v5502_v7 = vcombine.low %v2499_v4, %v2509_v57 }
 0x15d   : > { %6455 = vmatmul.mubr.bf16.gmra.mrb[20].mxu0 %v5803_v53  ;;  %v5501_v53 = vcombine.low %v2475_v31, %v2485_v63 }
 0x15e   : > { %6263 = vmatmul.mubr.bf16.gmra.mrb[20].mxu1 %v5499_v3  ;;  %6458 = vmatprep.mubr.bf16.mxu0 %v5804_v16  ;;  %v2528_v16 = vrot.slane %v2527_v29, 4 }
 0x15f   : > { %6266 = vmatprep.mubr.bf16.mxu1 %v5500_v58 }
 0x160   : > { %v2533_v60 = vsel %vm7045_vm2, %v2528_v16, %v2532_v54 }
 0x161   : > { %v5503_v0 = vcombine.low %v2523_v13, %v2533_v60 }
 0x165   : > { %6459 = vmatmul.mubr.bf16.gmra.mrb[24].mxu0 %v5805_v2 }
 0x166   : > { %6267 = vmatmul.mubr.bf16.gmra.mrb[24].mxu1 %v5501_v53  ;;  %6462 = vmatprep.mubr.bf16.mxu0 %v5806_v28 }
 0x167   : > { %6270 = vmatprep.mubr.bf16.mxu1 %v5502_v7 }
 0x16d   : > { %6463 = vmatmul.mubr.bf16.gmra.mrb[28].mxu0 %v5807_v48 }
 0x16e   : > { %6271 = vmatmul.mubr.bf16.gmra.mrb[28].mxu1 %v5503_v0 }
 0x1e9   : > { %v6196_v27 = vpop.f32.mrb[0].mxu1 }
 0x1ea   : > { %v1943_v46 = vpop.f32.mrb[1].mxu1 }
 0x1eb   : > { %v6197_v2 = vpop.f32.mrb[2].mxu1 }
 0x1ec   : > { %v1946_v42 = vpop.f32.mrb[3].mxu1 }
 0x1f1   : > { %v6200_v55 = vpop.f32.mrb[4].mxu1 }
 0x1f2   : > { %v1959_v49 = vpop.f32.mrb[5].mxu1 }
 0x1f3   : > { %v6201_v28 = vpop.f32.mrb[6].mxu1 }
 0x1f4   : > { %v1962_v17 = vpop.f32.mrb[7].mxu1 }
 0x1f9   : > { %v6204_v24 = vpop.f32.mrb[8].mxu1 }
 0x1fa   : > { %v1975_v40 = vpop.f32.mrb[9].mxu1 }
 0x1fb   : > { %v6205_v21 = vpop.f32.mrb[10].mxu1 }
 0x1fc   : > { %v8742_v37 = vpop.f32.mrb[11].mxu1 }
 0x201   : > { %v8744_v61 = vpop.f32.mrb[12].mxu1 }
 0x202   : > { %v8746_v34 = vpop.f32.mrb[13].mxu1 }
 0x203   : > { %v8748_v11 = vpop.f32.mrb[14].mxu1 }
 0x204   : > { %v8750_v48 = vpop.f32.mrb[15].mxu1 }
 0x208   : > { %v6436_v45 = vpop.f32.mrb[0].mxu0 }
 0x209   : > { %v6482_v8 = vadd.f32 %v6436_v45, %v6196_v27  ;;  %v4834_v36 = vpop.f32.mrb[1].mxu0 }
 0x20a   : > { %v6483_v47 = vadd.f32 %v4834_v36, %v1943_v46  ;;  %v6437_v12 = vpop.f32.mrb[2].mxu0 }
 0x20b   : > { %4995 = vst [vmem:[%s8755_s19 + $0x10] sm:$0xff] %v6482_v8  ;;  %v6484_v51 = vadd.f32 %v6437_v12, %v6197_v2  ;;  %v4837_v32 = vpop.f32.mrb[3].mxu0  ;;  %v5064_v9 = vmul.f32 %v6482_v8, %v6482_v8 }
 0x20c   : > { %4993 = vst [vmem:[%s8755_s19] sm:$0xff] %v6483_v47  ;;  %v6485_v5 = vadd.f32 %v4837_v32, %v1946_v42  ;;  %v5062_v62 = vmul.f32 %v6483_v47, %v6483_v47 }
 0x20d   : > { %4996 = vst [vmem:[%s8755_s19 + $0x18] sm:$0xff] %v6484_v51  ;;  %v5065_v39 = vmul.f32 %v6484_v51, %v6484_v51 }
 0x20e   : > { %4994 = vst [vmem:[%s8755_s19 + $0x8] sm:$0xff] %v6485_v5  ;;  %v5025_v41 = vadd.f32 %v6485_v5, %v6483_v47  ;;  %v5063_v6 = vmul.f32 %v6485_v5, %v6485_v5 }
 0x210   : > { %v5026_v26 = vadd.f32 %v6482_v8, %v5025_v41  ;;  %v5094_v18 = vadd.f32 %v5063_v6, %v5062_v62  ;;  %v6440_v33 = vpop.f32.mrb[4].mxu0 }
 0x211   : > { %v6486_v14 = vadd.f32 %v6440_v33, %v6200_v55  ;;  %v4850_v10 = vpop.f32.mrb[5].mxu0 }
 0x212   : > { %v5095_v50 = vadd.f32 %v5094_v18, %v5064_v9  ;;  %v6487_v23 = vadd.f32 %v4850_v10, %v1959_v49  ;;  %v5027_v3 = vadd.f32 %v6484_v51, %v5026_v26  ;;  %v6441_v58 = vpop.f32.mrb[6].mxu0 }
 0x213   : > { %4999 = vst [vmem:[%s8755_s19 + $0x30] sm:$0xff] %v6486_v14  ;;  %v6488_v22 = vadd.f32 %v6441_v58, %v6201_v28  ;;  %v4853_v59 = vpop.f32.mrb[7].mxu0  ;;  %v5068_v1 = vmul.f32 %v6486_v14, %v6486_v14 }
 0x214   : > { %4997 = vst [vmem:[%s8755_s19 + $0x20] sm:$0xff] %v6487_v23  ;;  %v5028_v30 = vadd.f32 %v6487_v23, %v5027_v3  ;;  %v5066_v19 = vmul.f32 %v6487_v23, %v6487_v23  ;;  %v5096_v52 = vadd.f32 %v5095_v50, %v5065_v39  ;;  %v6489_v15 = vadd.f32 %v4853_v59, %v1962_v17 }
 0x215   : > { %5000 = vst [vmem:[%s8755_s19 + $0x38] sm:$0xff] %v6488_v22  ;;  %v5069_v35 = vmul.f32 %v6488_v22, %v6488_v22 }
 0x216   : > { %v5097_v43 = vadd.f32 %v5096_v52, %v5066_v19  ;;  %4998 = vst [vmem:[%s8755_s19 + $0x28] sm:$0xff] %v6489_v15  ;;  %v5029_v38 = vadd.f32 %v6489_v15, %v5028_v30  ;;  %v5067_v56 = vmul.f32 %v6489_v15, %v6489_v15 }
 0x218   : > { %v5030_v31 = vadd.f32 %v6486_v14, %v5029_v38  ;;  %v5098_v63 = vadd.f32 %v5097_v43, %v5067_v56  ;;  %v6444_v20 = vpop.f32.mrb[8].mxu0 }
 0x219   : > { %v6490_v29 = vadd.f32 %v6444_v20, %v6204_v24  ;;  %v4866_v44 = vpop.f32.mrb[9].mxu0 }
 0x21a   : > { %v5099_v4 = vadd.f32 %v5098_v63, %v5068_v1  ;;  %v6491_v57 = vadd.f32 %v4866_v44, %v1975_v40  ;;  %v5031_v53 = vadd.f32 %v6488_v22, %v5030_v31  ;;  %v6445_v7 = vpop.f32.mrb[10].mxu0 }
 0x21b   : > { %5003 = vst [vmem:[%s8755_s19 + $0x50] sm:$0xff] %v6490_v29  ;;  %v6492_v25 = vadd.f32 %v6445_v7, %v6205_v21  ;;  %v4869_v16 = vpop.f32.mrb[11].mxu0  ;;  %v5072_v42 = vmul.f32 %v6490_v29, %v6490_v29 }
 0x21c   : > { %5001 = vst [vmem:[%s8755_s19 + $0x40] sm:$0xff] %v6491_v57  ;;  %v5032_v54 = vadd.f32 %v6491_v57, %v5031_v53  ;;  %v5070_v13 = vmul.f32 %v6491_v57, %v6491_v57  ;;  %v5100_v60 = vadd.f32 %v5099_v4, %v5069_v35  ;;  %v6493_v0 = vadd.f32 %v4869_v16, %v8742_v37 }
 0x21d   : > { %5004 = vst [vmem:[%s8755_s19 + $0x58] sm:$0xff] %v6492_v25  ;;  %v5073_v40 = vmul.f32 %v6492_v25, %v6492_v25 }
 0x21e   : > { %v5101_v27 = vadd.f32 %v5100_v60, %v5070_v13  ;;  %5002 = vst [vmem:[%s8755_s19 + $0x48] sm:$0xff] %v6493_v0  ;;  %v5033_v46 = vadd.f32 %v6493_v0, %v5032_v54  ;;  %v5071_v2 = vmul.f32 %v6493_v0, %v6493_v0 }
 0x220   : > { %v5034_v55 = vadd.f32 %v6490_v29, %v5033_v46  ;;  %v5102_v49 = vadd.f32 %v5101_v27, %v5071_v2  ;;  %v6448_v28 = vpop.f32.mrb[12].mxu0 }
 0x221   : > { %v6494_v17 = vadd.f32 %v6448_v28, %v8744_v61  ;;  %v4882_v24 = vpop.f32.mrb[13].mxu0 }
 0x222   : > { %v5103_v21 = vadd.f32 %v5102_v49, %v5072_v42  ;;  %v6495_v37 = vadd.f32 %v4882_v24, %v8746_v34  ;;  %v5035_v45 = vadd.f32 %v6492_v25, %v5034_v55  ;;  %v6449_v8 = vpop.f32.mrb[14].mxu0 }
 0x223   : > { %5007 = vst [vmem:[%s8755_s19 + $0x70] sm:$0xff] %v6494_v17  ;;  %v6496_v36 = vadd.f32 %v6449_v8, %v8748_v11  ;;  %v4885_v47 = vpop.f32.mrb[15].mxu0  ;;  %v5076_v6 = vmul.f32 %v6494_v17, %v6494_v17 }
 0x224   : > { %5005 = vst [vmem:[%s8755_s19 + $0x60] sm:$0xff] %v6495_v37  ;;  %v5036_v12 = vadd.f32 %v6495_v37, %v5035_v45  ;;  %v5074_v51 = vmul.f32 %v6495_v37, %v6495_v37  ;;  %v5104_v32 = vadd.f32 %v5103_v21, %v5073_v40  ;;  %v6497_v5 = vadd.f32 %v4885_v47, %v8750_v48 }
 0x225   : > { %5008 = vst [vmem:[%s8755_s19 + $0x78] sm:$0xff] %v6496_v36  ;;  %v5077_v33 = vmul.f32 %v6496_v36, %v6496_v36 }
 0x226   : > { %v5105_v61 = vadd.f32 %v5104_v32, %v5074_v51  ;;  %5006 = vst [vmem:[%s8755_s19 + $0x68] sm:$0xff] %v6497_v5  ;;  %v5037_v62 = vadd.f32 %v6497_v5, %v5036_v12  ;;  %v5075_v41 = vmul.f32 %v6497_v5, %v6497_v5 }
 0x228   : > { %v5038_v34 = vadd.f32 %v6494_v17, %v5037_v62  ;;  %v5106_v9 = vadd.f32 %v5105_v61, %v5075_v41  ;;  %v6452_v26 = vpop.f32.mrb[16].mxu0 }
 0x229   : > { %v6260_v18 = vpop.f32.mrb[16].mxu1  ;;  %v4898_v11 = vpop.f32.mrb[17].mxu0 }
 0x22a   : > { %v5107_v14 = vadd.f32 %v5106_v9, %v5076_v6  ;;  %v6498_v10 = vadd.f32 %v6452_v26, %v6260_v18  ;;  %v2761_v39 = vpop.f32.mrb[17].mxu1  ;;  %v5039_v48 = vadd.f32 %v6496_v36, %v5038_v34  ;;  %v6453_v50 = vpop.f32.mrb[18].mxu0 }
 0x22b   : > { %v6499_v23 = vadd.f32 %v4898_v11, %v2761_v39  ;;  %v6261_v3 = vpop.f32.mrb[18].mxu1  ;;  %v4901_v58 = vpop.f32.mrb[19].mxu0 }
 0x22c   : > { %5011 = vst [vmem:[%s8755_s19 + $0x90] sm:$0xff] %v6498_v10  ;;  %v5108_v22 = vadd.f32 %v5107_v14, %v5077_v33  ;;  %v6500_v59 = vadd.f32 %v6453_v50, %v6261_v3  ;;  %v2764_v30 = vpop.f32.mrb[19].mxu1  ;;  %v5080_v31 = vmul.f32 %v6498_v10, %v6498_v10 }
 0x22d   : > { %5009 = vst [vmem:[%s8755_s19 + $0x80] sm:$0xff] %v6499_v23  ;;  %v5040_v19 = vadd.f32 %v6499_v23, %v5039_v48  ;;  %v5078_v52 = vmul.f32 %v6499_v23, %v6499_v23  ;;  %v6501_v15 = vadd.f32 %v4901_v58, %v2764_v30 }
 0x22e   : > { %5012 = vst [vmem:[%s8755_s19 + $0x98] sm:$0xff] %v6500_v59  ;;  %v5081_v53 = vmul.f32 %v6500_v59, %v6500_v59 }
 0x22f   : > { %v5109_v43 = vadd.f32 %v5108_v22, %v5078_v52  ;;  %5010 = vst [vmem:[%s8755_s19 + $0x88] sm:$0xff] %v6501_v15  ;;  %v5041_v38 = vadd.f32 %v6501_v15, %v5040_v19  ;;  %v5079_v56 = vmul.f32 %v6501_v15, %v6501_v15 }
 0x230   : > { %v6456_v1 = vpop.f32.mrb[20].mxu0 }
 0x231   : > { %v5042_v63 = vadd.f32 %v6498_v10, %v5041_v38  ;;  %v5110_v20 = vadd.f32 %v5109_v43, %v5079_v56  ;;  %v6264_v29 = vpop.f32.mrb[20].mxu1  ;;  %v4914_v44 = vpop.f32.mrb[21].mxu0 }
 0x232   : > { %v6502_v35 = vadd.f32 %v6456_v1, %v6264_v29  ;;  %v2777_v4 = vpop.f32.mrb[21].mxu1  ;;  %v6457_v57 = vpop.f32.mrb[22].mxu0 }
 0x233   : > { %v5111_v7 = vadd.f32 %v5110_v20, %v5080_v31  ;;  %v6503_v25 = vadd.f32 %v4914_v44, %v2777_v4  ;;  %v5043_v16 = vadd.f32 %v6500_v59, %v5042_v63  ;;  %v6265_v54 = vpop.f32.mrb[22].mxu1  ;;  %v4917_v13 = vpop.f32.mrb[23].mxu0 }
 0x234   : > { %5015 = vst [vmem:[%s8755_s19 + $0xb0] sm:$0xff] %v6502_v35  ;;  %v6504_v60 = vadd.f32 %v6457_v57, %v6265_v54  ;;  %v2780_v0 = vpop.f32.mrb[23].mxu1  ;;  %v5084_v24 = vmul.f32 %v6502_v35, %v6502_v35 }
 0x235   : > { %5013 = vst [vmem:[%s8755_s19 + $0xa0] sm:$0xff] %v6503_v25  ;;  %v5044_v27 = vadd.f32 %v6503_v25, %v5043_v16  ;;  %v5082_v46 = vmul.f32 %v6503_v25, %v6503_v25  ;;  %v5112_v2 = vadd.f32 %v5111_v7, %v5081_v53  ;;  %v6505_v42 = vadd.f32 %v4917_v13, %v2780_v0 }
 0x236   : > { %5016 = vst [vmem:[%s8755_s19 + $0xb8] sm:$0xff] %v6504_v60  ;;  %v5085_v12 = vmul.f32 %v6504_v60, %v6504_v60 }
 0x237   : > { %v5113_v55 = vadd.f32 %v5112_v2, %v5082_v46  ;;  %5014 = vst [vmem:[%s8755_s19 + $0xa8] sm:$0xff] %v6505_v42  ;;  %v5045_v49 = vadd.f32 %v6505_v42, %v5044_v27  ;;  %v5083_v28 = vmul.f32 %v6505_v42, %v6505_v42 }
 0x238   : > { %v6460_v17 = vpop.f32.mrb[24].mxu0 }
 0x239   : > { %v5046_v40 = vadd.f32 %v6502_v35, %v5045_v49  ;;  %v5114_v21 = vadd.f32 %v5113_v55, %v5083_v28  ;;  %v6268_v37 = vpop.f32.mrb[24].mxu1  ;;  %v4930_v45 = vpop.f32.mrb[25].mxu0 }
 0x23a   : > { %v6506_v8 = vadd.f32 %v6460_v17, %v6268_v37  ;;  %v2793_v36 = vpop.f32.mrb[25].mxu1  ;;  %v6461_v47 = vpop.f32.mrb[26].mxu0 }
 0x23b   : > { %v5115_v51 = vadd.f32 %v5114_v21, %v5084_v24  ;;  %v6507_v32 = vadd.f32 %v4930_v45, %v2793_v36  ;;  %v5047_v5 = vadd.f32 %v6504_v60, %v5046_v40  ;;  %v6269_v61 = vpop.f32.mrb[26].mxu1  ;;  %v4933_v62 = vpop.f32.mrb[27].mxu0 }
 0x23c   : > { %5019 = vst [vmem:[%s8755_s19 + $0xd0] sm:$0xff] %v6506_v8  ;;  %v6508_v41 = vadd.f32 %v6461_v47, %v6269_v61  ;;  %v2796_v6 = vpop.f32.mrb[27].mxu1  ;;  %v5088_v39 = vmul.f32 %v6506_v8, %v6506_v8 }
 0x23d   : > { %5017 = vst [vmem:[%s8755_s19 + $0xc0] sm:$0xff] %v6507_v32  ;;  %v5048_v34 = vadd.f32 %v6507_v32, %v5047_v5  ;;  %v5086_v9 = vmul.f32 %v6507_v32, %v6507_v32  ;;  %v5116_v26 = vadd.f32 %v5115_v51, %v5085_v12  ;;  %v6509_v18 = vadd.f32 %v4933_v62, %v2796_v6 }
 0x23e   : > { %5020 = vst [vmem:[%s8755_s19 + $0xd8] sm:$0xff] %v6508_v41  ;;  %v5089_v30 = vmul.f32 %v6508_v41, %v6508_v41 }
 0x23f   : > { %v5117_v11 = vadd.f32 %v5116_v26, %v5086_v9  ;;  %5018 = vst [vmem:[%s8755_s19 + $0xc8] sm:$0xff] %v6509_v18  ;;  %v5049_v33 = vadd.f32 %v6509_v18, %v5048_v34  ;;  %v5087_v14 = vmul.f32 %v6509_v18, %v6509_v18 }
 0x240   : > { %v6464_v10 = vpop.f32.mrb[28].mxu0 }
 0x241   : > { %v5050_v48 = vadd.f32 %v6506_v8, %v5049_v33  ;;  %v5118_v50 = vadd.f32 %v5117_v11, %v5087_v14  ;;  %v6272_v23 = vpop.f32.mrb[28].mxu1  ;;  %v4946_v3 = vpop.f32.mrb[29].mxu0 }
 0x242   : > { %v6510_v58 = vadd.f32 %v6464_v10, %v6272_v23  ;;  %v2809_v22 = vpop.f32.mrb[29].mxu1  ;;  %v6465_v59 = vpop.f32.mrb[30].mxu0 }
 0x243   : > { %v5119_v19 = vadd.f32 %v5118_v50, %v5088_v39  ;;  %v6511_v52 = vadd.f32 %v4946_v3, %v2809_v22  ;;  %v5051_v15 = vadd.f32 %v6508_v41, %v5050_v48  ;;  %v6273_v43 = vpop.f32.mrb[30].mxu1  ;;  %v4949_v38 = vpop.f32.mrb[31].mxu0 }
 0x244   : > { %5023 = vst [vmem:[%s8755_s19 + $0xf0] sm:$0xff] %v6510_v58  ;;  %v6512_v56 = vadd.f32 %v6465_v59, %v6273_v43  ;;  %v2812_v1 = vpop.f32.mrb[31].mxu1  ;;  %v5092_v57 = vmul.f32 %v6510_v58, %v6510_v58 }
 0x245   : > { %5021 = vst [vmem:[%s8755_s19 + $0xe0] sm:$0xff] %v6511_v52  ;;  %v5052_v31 = vadd.f32 %v6511_v52, %v5051_v15  ;;  %v5090_v63 = vmul.f32 %v6511_v52, %v6511_v52  ;;  %v5120_v20 = vadd.f32 %v5119_v19, %v5089_v30  ;;  %v6513_v29 = vadd.f32 %v4949_v38, %v2812_v1 }
 0x246   : > { %5024 = vst [vmem:[%s8755_s19 + $0xf8] sm:$0xff] %v6512_v56  ;;  %v5093_v25 = vmul.f32 %v6512_v56, %v6512_v56 }
 0x247   : > { %v5121_v44 = vadd.f32 %v5120_v20, %v5090_v63  ;;  %5022 = vst [vmem:[%s8755_s19 + $0xe8] sm:$0xff] %v6513_v29  ;;  %v5053_v35 = vadd.f32 %v6513_v29, %v5052_v31  ;;  %v5091_v4 = vmul.f32 %v6513_v29, %v6513_v29 }
 0x249   : > { %v5054_v53 = vadd.f32 %v6510_v58, %v5053_v35  ;;  %v5122_v7 = vadd.f32 %v5121_v44, %v5091_v4 }
 0x24b   : > { %v5055_v16 = vadd.f32 %v6512_v56, %v5054_v53  ;;  %v5123_v54 = vadd.f32 %v5122_v7, %v5092_v57 }
 0x24d   : > { %v5056_v13 = vrot.slane %v5055_v16, 4  ;;  %v5124_v60 = vadd.f32 %v5123_v54, %v5093_v25 }
 0x24f   : > { %v5057_v0 = vadd.f32 %v5056_v13, %v5055_v16  ;;  %v5125_v27 = vrot.slane %v5124_v60, 4 }
 0x251   : > { %v5058_v46 = vrot.slane %v5057_v0, 2  ;;  %v5126_v2 = vadd.f32 %v5125_v27, %v5124_v60 }
 0x253   : > { %v5059_v42 = vadd.f32 %v5058_v46, %v5057_v0  ;;  %v5127_v55 = vrot.slane %v5126_v2, 2 }
 0x255   : > { %v5060_v49 = vrot.slane %v5059_v42, 1  ;;  %v5128_v28 = vadd.f32 %v5127_v55, %v5126_v2 }
 0x257   : > { %v5129_v17 = vrot.slane %v5128_v28, 1  ;;  %v5061_v24 = vadd.f32 %v5060_v49, %v5059_v42 }
 0x259   : > { %v5130_v40 = vadd.f32 %v5129_v17, %v5128_v28 }
 0x25b   : > { %v5132_v21 = vsel %vm5131_vm6, %v5061_v24, %v5130_v40 }
 0x25c   : > { %v5134_v37 = vsel %vm5133_vm7, %v5132_v21, 0.0 }
 0x25d   : > { %5135 = vst [vmem:[%s182_s22] sm:$0xff] %v5134_v37 }
 0x25e PF: > { %s14_s12 = sadd.s32 1, %s6943_s12  }
 0x25f   : > { %p11_p5 = scmp.ge.s32.totalorder %s14_s12, 4  }
 0x261   :  { %13 = sbr.rel (!%p11_p5) target bundleno = 1 (0x1), region = 80 }

</bundles_post_ra>
